<compile_context>
chip_gen: v5e
topology: v5e:2x2
jax: 0.10.0
libtpu: 0.0.40
codegen_flags: <defaults>
</compile_context>

<pallas_src>
import functools

import jax
import jax.numpy as jnp
from jax.experimental import pallas as pl
from jax.experimental.pallas import tpu as pltpu

EPS = 1e-5   # torch BatchNorm default eps
LANE = 128   # TPU lane width


def resnet_block_kernel(x_ref, sc1_ref, sh1_ref, w1_ref, sc2_ref, sh2_ref,
                        w2_ref, ws_ref, b_ref, o_ref,
                        cat1_ref, cat2_ref, *, H, W):
    HW = H * W
    PHW = (H + 2) * W            # one zero halo row above/below, flattened on sublanes

    x = x_ref[0]                 # (HW, Cin_p) f32

    # Column masks realizing the zero W-padding for the rolled kx taps; built once on
    # the full padded extent and shared by both convs.
    col = jax.lax.broadcasted_iota(jnp.int32, (PHW, 1), 0) % W
    not_first = col != 0         # x == 0 is invalid after the "left"  (+1) roll
    not_last = col != (W - 1)    # x == W-1 is invalid after the "right" (-1) roll

    def fill_taps(cat_ref, h):
        """Pack the 3 kx taps of the H-padded image along lanes: [left | center | right].

        One roll + one select per kx direction for the whole conv (hoisted out of the
        ky loop); stored as bf16 so per-ky matmul operands need no further casts.
        """
        C = h.shape[-1]
        halo = jnp.zeros((W, C), jnp.float32)
        pad = jnp.concatenate([halo, h, halo], axis=0)             # (PHW, C) f32
        left = jnp.where(not_first, pltpu.roll(pad, 1, axis=0), 0.0)
        # shift = PHW-1 is congruent to -1 (single shift+select pass, not O(PHW) rolls)
        right = jnp.where(not_last, pltpu.roll(pad, PHW - 1, axis=0), 0.0)
        cat_ref[:, 0:C] = left.astype(jnp.bfloat16)
        cat_ref[:, C:2 * C] = pad.astype(jnp.bfloat16)
        cat_ref[:, 2 * C:3 * C] = right.astype(jnp.bfloat16)

    def conv3x3(cat_ref, w_ref, init):
        """3x3 conv as 3 matmuls with K = 3C; partials chained in registers, one store."""
        acc = init
        for ky in range(3):
            slab = cat_ref[ky * W:ky * W + HW, :]                  # (HW, 3C) bf16, aligned
            d = jnp.dot(slab, w_ref[ky], preferred_element_type=jnp.float32)
            acc = d if acc is None else acc + d
        return acc

    # ---- norm1 (eval-mode BN folded to per-channel affine) + swish (f32 VPU) ----
    h = x * sc1_ref[...] + sh1_ref[...]
    h = h * jax.nn.sigmoid(h)
    fill_taps(cat1_ref, h)

    # ---- conv1: 3x3, stride 1, pad 1 (its bias is folded into the BN2 shift) ----
    h1 = conv3x3(cat1_ref, w1_ref, None)

    # ---- norm2 + swish ----
    # TODO(synk): Dropout(p=0) is the identity; nonzero p would need pltpu.prng_* masking.
    h2 = h1 * sc2_ref[...] + sh2_ref[...]
    h2 = h2 * jax.nn.sigmoid(h2)
    fill_taps(cat2_ref, h2)

    # ---- conv2 accumulated on top of the 1x1 nin_shortcut (+ merged biases);
    #      the output tile is produced and stored exactly once.                ----
    shortcut = jnp.dot(x.astype(jnp.bfloat16), ws_ref[...],
                       preferred_element_type=jnp.float32) + b_ref[...]
    o_ref[0] = conv3x3(cat2_ref, w2_ref, shortcut)


def _fold_bn(gamma, beta, mean, var):
    scale = gamma / jnp.sqrt(var + EPS)
    shift = beta - mean * scale
    return scale.reshape(1, -1), shift.reshape(1, -1)


def _pad_axis(a, axis, target):
    amount = target - a.shape[axis]
    if amount == 0:
        return a
    widths = [(0, 0)] * a.ndim
    widths[axis] = (0, amount)
    return jnp.pad(a, widths)


def resnet_block_forward(x_nchw, p):
    """x_nchw: (B, Cin, H, W) float32 -> (B, Cout, H, W) float32."""
    B, Cin, H, W = x_nchw.shape
    Cout = p["w1"].shape[0]
    assert W % 8 == 0, "W must be a multiple of 8 (sublane alignment of tap slices)"
    HW = H * W

    # Lane-dense channel padding; padded weights/scales are zero so padded output
    # channels are exactly zero (no numerical effect on valid channels).
    Cin_p = -(-Cin // LANE) * LANE
    Cout_p = -(-Cout // LANE) * LANE

    # NCHW -> (B, H*W, Cin_p): channels on lanes, flattened spatial on sublanes.
    x = jnp.transpose(x_nchw, (0, 2, 3, 1)).reshape(B, HW, Cin).astype(jnp.float32)
    x = _pad_axis(x, 2, Cin_p)

    # Fold eval-mode BN running stats into per-channel affines; fold conv1's bias into
    # the BN2 shift; merge conv2's bias with the shortcut bias.
    sc1, sh1 = _fold_bn(p["g1"], p["be1"], p["m1"], p["v1"])
    sc2, sh2 = _fold_bn(p["g2"], p["be2"], p["m2"], p["v2"])
    sh2 = sh2 + p["b1"].reshape(1, -1) * sc2
    bias = (p["b2"] + p["bs"]).reshape(1, -1)
    sc1, sh1 = _pad_axis(sc1, 1, Cin_p), _pad_axis(sh1, 1, Cin_p)
    sc2, sh2 = _pad_axis(sc2, 1, Cout_p), _pad_axis(sh2, 1, Cout_p)
    bias = _pad_axis(bias, 1, Cout_p)

    # torch OIHW -> (3, 3*Cin_p, Cout_p): for each ky the K axis is [kx=0|kx=1|kx=2],
    # matching the [left|center|right] lane packing of the tap scratch; bf16 operands.
    def pack_w(w, cin_p, cout_p):
        w = jnp.transpose(w, (2, 3, 1, 0))                         # (ky, kx, Cin, Cout)
        w = _pad_axis(_pad_axis(w, 2, cin_p), 3, cout_p)
        return w.reshape(3, 3 * cin_p, cout_p).astype(jnp.bfloat16)

    w1 = pack_w(p["w1"], Cin_p, Cout_p)
    w2 = pack_w(p["w2"], Cout_p, Cout_p)
    ws = _pad_axis(_pad_axis(p["ws"][:, :, 0, 0].T, 0, Cin_p), 1, Cout_p).astype(jnp.bfloat16)

    kernel = functools.partial(resnet_block_kernel, H=H, W=W)
    grid_spec = pltpu.PrefetchScalarGridSpec(
        num_scalar_prefetch=0,
        grid=(B,),
        in_specs=[
            pl.BlockSpec((1, HW, Cin_p), lambda b: (b, 0, 0)),           # x
            pl.BlockSpec((1, Cin_p), lambda b: (0, 0)),                  # bn1 scale
            pl.BlockSpec((1, Cin_p), lambda b: (0, 0)),                  # bn1 shift
            pl.BlockSpec((3, 3 * Cin_p, Cout_p), lambda b: (0, 0, 0)),   # conv1 w (bf16, K=3C)
            pl.BlockSpec((1, Cout_p), lambda b: (0, 0)),                 # bn2 scale
            pl.BlockSpec((1, Cout_p), lambda b: (0, 0)),                 # bn2 shift (+ b1 folded)
            pl.BlockSpec((3, 3 * Cout_p, Cout_p), lambda b: (0, 0, 0)),  # conv2 w (bf16, K=3C)
            pl.BlockSpec((Cin_p, Cout_p), lambda b: (0, 0)),             # nin_shortcut w (bf16)
            pl.BlockSpec((1, Cout_p), lambda b: (0, 0)),                 # merged bias (b2 + bs)
        ],
        out_specs=pl.BlockSpec((1, HW, Cout_p), lambda b: (b, 0, 0)),
        scratch_shapes=[
            pltpu.VMEM(((H + 2) * W, 3 * Cin_p), jnp.bfloat16),          # conv1 tap buffer
            pltpu.VMEM(((H + 2) * W, 3 * Cout_p), jnp.bfloat16),         # conv2 tap buffer
        ],
    )
    out = pl.pallas_call(
        kernel,
        out_shape=jax.ShapeDtypeStruct((B, HW, Cout_p), jnp.float32),
        grid_spec=grid_spec,
        compiler_params=pltpu.CompilerParams(
            dimension_semantics=("parallel",),          # batch axis (megacore / v7x 2-TC)
            vmem_limit_bytes=64 * 1024 * 1024,
        ),
    )(x, sc1, sh1, w1, sc2, sh2, w2, ws, bias)
    out = jnp.transpose(out.reshape(B, H, W, Cout_p), (0, 3, 1, 2))      # back to NCHW
    return out[:, :Cout]                                                 # drop padded channels


def make_params(key, cin, cout):
    ks = jax.random.split(key, 14)
    return {
        "g1":  0.5 + jax.random.uniform(ks[0], (cin,), jnp.float32),
        "be1": jax.random.normal(ks[1], (cin,), jnp.float32) * 0.1,
        "m1":  jax.random.normal(ks[2], (cin,), jnp.float32) * 0.1,
        "v1":  0.5 + jax.random.uniform(ks[3], (cin,), jnp.float32),
        "w1":  jax.random.normal(ks[4], (cout, cin, 3, 3), jnp.float32) * 0.1,
        "b1":  jax.random.normal(ks[5], (cout,), jnp.float32) * 0.1,
        "g2":  0.5 + jax.random.uniform(ks[6], (cout,), jnp.float32),
        "be2": jax.random.normal(ks[7], (cout,), jnp.float32) * 0.1,
        "m2":  jax.random.normal(ks[8], (cout,), jnp.float32) * 0.1,
        "v2":  0.5 + jax.random.uniform(ks[9], (cout,), jnp.float32),
        "w2":  jax.random.normal(ks[10], (cout, cout, 3, 3), jnp.float32) * 0.1,
        "b2":  jax.random.normal(ks[11], (cout,), jnp.float32) * 0.1,
        "ws":  jax.random.normal(ks[12], (cout, cin, 1, 1), jnp.float32) * 0.1,
        "bs":  jax.random.normal(ks[13], (cout,), jnp.float32) * 0.1,
    }


def resnet_block_ref(x, p):
    """Pure-JAX NCHW f32 reference (mirrors the PyTorch forward, eval-mode BN)."""
    def bn(h, g, b, m, v):
        c = (1, -1, 1, 1)
        return (h - m.reshape(c)) / jnp.sqrt(v.reshape(c) + EPS) * g.reshape(c) + b.reshape(c)

    def conv(h, w, b, pad):
        o = jax.lax.conv_general_dilated(
            h, w, window_strides=(1, 1), padding=[(pad, pad), (pad, pad)],
            dimension_numbers=("NCHW", "OIHW", "NCHW"))
        return o + b.reshape(1, -1, 1, 1)

    h = bn(x, p["g1"], p["be1"], p["m1"], p["v1"])
    h = h * jax.nn.sigmoid(h)
    h = conv(h, p["w1"], p["b1"], 1)
    h = bn(h, p["g2"], p["be2"], p["m2"], p["v2"])
    h = h * jax.nn.sigmoid(h)
    h = conv(h, p["w2"], p["b2"], 1)
    xs = conv(x, p["ws"], p["bs"], 0)
    return xs + h


if __name__ == "__main__":
    key = jax.random.PRNGKey(0)
    kx, kp = jax.random.split(key)
    B, Cin, Cout, H, W = 2, 4, 8, 16, 16
    x = jax.random.normal(kx, (B, Cin, H, W), jnp.float32)
    params = make_params(kp, Cin, Cout)

    out = resnet_block_forward(x, params)
    out = jax.block_until_ready(out)
    assert out.shape == (B, Cout, H, W), out.shape

    ref = resnet_block_ref(x, params)
    max_err = float(jnp.max(jnp.abs(out - ref)))
    # bf16 MXU operands (f32 accumulation) vs. the f32 reference -> looser tolerance.
    assert max_err < 3e-2, f"max abs error vs reference: {max_err}"
    print("KERNEL_OK")
</pallas_src>

<mosaic_0001>
module attributes {stable_mosaic.version = 11 : i64} {
  func.func @resnet_block_kernel(%arg0: i32, %arg1: memref<1x256x128xf32, #tpu.memory_space<vmem>>, %arg2: memref<1x128xf32, #tpu.memory_space<vmem>>, %arg3: memref<1x128xf32, #tpu.memory_space<vmem>>, %arg4: memref<3x384x128xbf16, #tpu.memory_space<vmem>>, %arg5: memref<1x128xf32, #tpu.memory_space<vmem>>, %arg6: memref<1x128xf32, #tpu.memory_space<vmem>>, %arg7: memref<3x384x128xbf16, #tpu.memory_space<vmem>>, %arg8: memref<128x128xbf16, #tpu.memory_space<vmem>>, %arg9: memref<1x128xf32, #tpu.memory_space<vmem>>, %arg10: memref<1x256x128xf32, #tpu.memory_space<vmem>>, %arg11: memref<288x384xbf16, #tpu.memory_space<vmem>>, %arg12: memref<288x384xbf16, #tpu.memory_space<vmem>>) attributes {dimension_semantics = [#tpu.dimension_semantics<parallel>], iteration_bounds = array<i64: 2>, scalar_prefetch = 0 : i64, scratch_operands = 2 : i64, tpu.core_type = #tpu.core_type<tc>, window_params = [{transform_indices = @transform_0, window_bounds = array<i64: 1, 256, 128>}, {pipeline_mode = #tpu.pipeline_mode<synchronous>, transform_indices = @transform_1, window_bounds = array<i64: 1, 128>}, {pipeline_mode = #tpu.pipeline_mode<synchronous>, transform_indices = @transform_2, window_bounds = array<i64: 1, 128>}, {pipeline_mode = #tpu.pipeline_mode<synchronous>, transform_indices = @transform_3, window_bounds = array<i64: 3, 384, 128>}, {pipeline_mode = #tpu.pipeline_mode<synchronous>, transform_indices = @transform_4, window_bounds = array<i64: 1, 128>}, {pipeline_mode = #tpu.pipeline_mode<synchronous>, transform_indices = @transform_5, window_bounds = array<i64: 1, 128>}, {pipeline_mode = #tpu.pipeline_mode<synchronous>, transform_indices = @transform_6, window_bounds = array<i64: 3, 384, 128>}, {pipeline_mode = #tpu.pipeline_mode<synchronous>, transform_indices = @transform_7, window_bounds = array<i64: 128, 128>}, {pipeline_mode = #tpu.pipeline_mode<synchronous>, transform_indices = @transform_8, window_bounds = array<i64: 1, 128>}, {transform_indices = @transform_9, window_bounds = array<i64: 1, 256, 128>}]} {
    %c0 = arith.constant 0 : index
    %c0_0 = arith.constant 0 : index
    %c0_1 = arith.constant 0 : index
    %0 = vector.load %arg1[%c0, %c0_0, %c0_1] : memref<1x256x128xf32, #tpu.memory_space<vmem>>, vector<1x256x128xf32>
    %1 = vector.shape_cast %0 : vector<1x256x128xf32> to vector<256x128xf32>
    %2 = tpu.iota {dimensions = array<i32: 0>} : vector<288x1xi32>
    %c16_i32 = arith.constant 16 : i32
    %c0_i32 = arith.constant 0 : i32
    %3 = arith.cmpi eq, %c16_i32, %c0_i32 : i32
    %c1_i32 = arith.constant 1 : i32
    %4 = arith.select %3, %c1_i32, %c16_i32 : i32
    %5 = vector.broadcast %4 : i32 to vector<288x1xi32>
    %6 = arith.remsi %2, %5 : vector<288x1xi32>
    %c0_i32_2 = arith.constant 0 : i32
    %7 = vector.broadcast %c0_i32_2 : i32 to vector<288x1xi32>
    %8 = arith.cmpi ne, %6, %7 : vector<288x1xi32>
    %c0_i32_3 = arith.constant 0 : i32
    %9 = vector.broadcast %c0_i32_3 : i32 to vector<288x1xi32>
    %10 = arith.cmpi slt, %6, %9 : vector<288x1xi32>
    %c0_i32_4 = arith.constant 0 : i32
    %11 = arith.cmpi slt, %4, %c0_i32_4 : i32
    %12 = vector.broadcast %11 : i1 to vector<288x1xi1>
    %13 = vector.broadcast %12 : vector<288x1xi1> to vector<288x1xi1>
    %14 = arith.xori %10, %13 : vector<288x1xi1>
    %15 = arith.andi %14, %8 : vector<288x1xi1>
    %16 = vector.broadcast %4 : i32 to vector<288x1xi32>
    %17 = arith.addi %6, %16 : vector<288x1xi32>
    %18 = arith.select %15, %17, %6 : vector<288x1xi1>, vector<288x1xi32>
    %c0_i32_5 = arith.constant 0 : i32
    %19 = vector.broadcast %c0_i32_5 : i32 to vector<288x1xi32>
    %20 = arith.cmpi ne, %18, %19 : vector<288x1xi32>
    %c15_i32 = arith.constant 15 : i32
    %21 = vector.broadcast %c15_i32 : i32 to vector<288x1xi32>
    %22 = arith.cmpi ne, %18, %21 : vector<288x1xi32>
    %c0_6 = arith.constant 0 : index
    %c0_7 = arith.constant 0 : index
    %23 = vector.load %arg2[%c0_6, %c0_7] : memref<1x128xf32, #tpu.memory_space<vmem>>, vector<1x128xf32>
    %24 = vector.broadcast %23 : vector<1x128xf32> to vector<256x128xf32>
    %25 = arith.mulf %1, %24 : vector<256x128xf32>
    %c0_8 = arith.constant 0 : index
    %c0_9 = arith.constant 0 : index
    %26 = vector.load %arg3[%c0_8, %c0_9] : memref<1x128xf32, #tpu.memory_space<vmem>>, vector<1x128xf32>
    %27 = vector.broadcast %26 : vector<1x128xf32> to vector<256x128xf32>
    %28 = arith.addf %25, %27 : vector<256x128xf32>
    %29 = arith.negf %28 : vector<256x128xf32>
    %30 = math.exp %29 : vector<256x128xf32>
    %cst = arith.constant 1.000000e+00 : f32
    %31 = vector.broadcast %cst : f32 to vector<256x128xf32>
    %32 = arith.addf %31, %30 : vector<256x128xf32>
    %33 = arith.divf %31, %32 : vector<256x128xf32>
    %34 = arith.mulf %28, %33 : vector<256x128xf32>
    %cst_10 = arith.constant 0.000000e+00 : f32
    %35 = vector.broadcast %cst_10 : f32 to vector<16x128xf32>
    %36 = tpu.concatenate %35, %34, %35 in 0 : vector<16x128xf32>, vector<256x128xf32>, vector<16x128xf32> -> vector<288x128xf32>
    %c1_i32_11 = arith.constant 1 : i32
    %37 = tpu.dynamic_rotate %36 by %c1_i32_11 dim 0 : vector<288x128xf32>, i32 -> vector<288x128xf32>
    %cst_12 = arith.constant 0.000000e+00 : f32
    %38 = vector.shape_cast %20 : vector<288x1xi1> to vector<288x1xi1>
    %39 = vector.broadcast %38 : vector<288x1xi1> to vector<288x128xi1>
    %40 = vector.broadcast %cst_12 : f32 to vector<288x128xf32>
    %41 = arith.select %39, %37, %40 : vector<288x128xi1>, vector<288x128xf32>
    %c287_i32 = arith.constant 287 : i32
    %42 = tpu.dynamic_rotate %36 by %c287_i32 dim 0 : vector<288x128xf32>, i32 -> vector<288x128xf32>
    %cst_13 = arith.constant 0.000000e+00 : f32
    %43 = vector.shape_cast %22 : vector<288x1xi1> to vector<288x1xi1>
    %44 = vector.broadcast %43 : vector<288x1xi1> to vector<288x128xi1>
    %45 = vector.broadcast %cst_13 : f32 to vector<288x128xf32>
    %46 = arith.select %44, %42, %45 : vector<288x128xi1>, vector<288x128xf32>
    %47 = arith.truncf %41 : vector<288x128xf32> to vector<288x128xbf16>
    %c0_14 = arith.constant 0 : index
    %c0_15 = arith.constant 0 : index
    %48 = vector.load %arg11[%c0_14, %c0_15] : memref<288x384xbf16, #tpu.memory_space<vmem>>, vector<288x128xbf16>
    tpu.vector_store %arg11[%c0_14, %c0_15], %47 {strides = array<i32>} : memref<288x384xbf16, #tpu.memory_space<vmem>>, vector<288x128xbf16>,
    %49 = arith.truncf %36 : vector<288x128xf32> to vector<288x128xbf16>
    %c0_16 = arith.constant 0 : index
    %c128 = arith.constant 128 : index
    %50 = vector.load %arg11[%c0_16, %c128] : memref<288x384xbf16, #tpu.memory_space<vmem>>, vector<288x128xbf16>
    tpu.vector_store %arg11[%c0_16, %c128], %49 {strides = array<i32>} : memref<288x384xbf16, #tpu.memory_space<vmem>>, vector<288x128xbf16>,
    %51 = arith.truncf %46 : vector<288x128xf32> to vector<288x128xbf16>
    %c0_17 = arith.constant 0 : index
    %c256 = arith.constant 256 : index
    %52 = vector.load %arg11[%c0_17, %c256] : memref<288x384xbf16, #tpu.memory_space<vmem>>, vector<288x128xbf16>
    tpu.vector_store %arg11[%c0_17, %c256], %51 {strides = array<i32>} : memref<288x384xbf16, #tpu.memory_space<vmem>>, vector<288x128xbf16>,
    %c0_18 = arith.constant 0 : index
    %c0_19 = arith.constant 0 : index
    %53 = vector.load %arg11[%c0_18, %c0_19] : memref<288x384xbf16, #tpu.memory_space<vmem>>, vector<256x384xbf16>
    %c0_20 = arith.constant 0 : index
    %c0_21 = arith.constant 0 : index
    %c0_22 = arith.constant 0 : index
    %54 = vector.load %arg4[%c0_20, %c0_21, %c0_22] : memref<3x384x128xbf16, #tpu.memory_space<vmem>>, vector<1x384x128xbf16>
    %55 = vector.shape_cast %54 : vector<1x384x128xbf16> to vector<384x128xbf16>
    %cst_23 = arith.constant dense<0.000000e+00> : vector<256x128xf32>
    %56 = tpu.matmul %53, %55, %cst_23 {dimension_numbers = #tpu.dot_dimension_numbers<[1], [0], [0], [1], [0, 0, 1, 1], [], []>} : vector<256x384xbf16>, vector<384x128xbf16>, vector<256x128xf32> -> vector<256x128xf32>
    %c16 = arith.constant 16 : index
    %c0_24 = arith.constant 0 : index
    %57 = vector.load %arg11[%c16, %c0_24] : memref<288x384xbf16, #tpu.memory_space<vmem>>, vector<256x384xbf16>
    %c1 = arith.constant 1 : index
    %c0_25 = arith.constant 0 : index
    %c0_26 = arith.constant 0 : index
    %58 = vector.load %arg4[%c1, %c0_25, %c0_26] : memref<3x384x128xbf16, #tpu.memory_space<vmem>>, vector<1x384x128xbf16>
    %59 = vector.shape_cast %58 : vector<1x384x128xbf16> to vector<384x128xbf16>
    %cst_27 = arith.constant dense<0.000000e+00> : vector<256x128xf32>
    %60 = tpu.matmul %57, %59, %cst_27 {dimension_numbers = #tpu.dot_dimension_numbers<[1], [0], [0], [1], [0, 0, 1, 1], [], []>} : vector<256x384xbf16>, vector<384x128xbf16>, vector<256x128xf32> -> vector<256x128xf32>
    %61 = arith.addf %56, %60 : vector<256x128xf32>
    %c32 = arith.constant 32 : index
    %c0_28 = arith.constant 0 : index
    %62 = vector.load %arg11[%c32, %c0_28] : memref<288x384xbf16, #tpu.memory_space<vmem>>, vector<256x384xbf16>
    %c2 = arith.constant 2 : index
    %c0_29 = arith.constant 0 : index
    %c0_30 = arith.constant 0 : index
    %63 = vector.load %arg4[%c2, %c0_29, %c0_30] : memref<3x384x128xbf16, #tpu.memory_space<vmem>>, vector<1x384x128xbf16>
    %64 = vector.shape_cast %63 : vector<1x384x128xbf16> to vector<384x128xbf16>
    %cst_31 = arith.constant dense<0.000000e+00> : vector<256x128xf32>
    %65 = tpu.matmul %62, %64, %cst_31 {dimension_numbers = #tpu.dot_dimension_numbers<[1], [0], [0], [1], [0, 0, 1, 1], [], []>} : vector<256x384xbf16>, vector<384x128xbf16>, vector<256x128xf32> -> vector<256x128xf32>
    %66 = arith.addf %61, %65 : vector<256x128xf32>
    %c0_32 = arith.constant 0 : index
    %c0_33 = arith.constant 0 : index
    %67 = vector.load %arg5[%c0_32, %c0_33] : memref<1x128xf32, #tpu.memory_space<vmem>>, vector<1x128xf32>
    %68 = vector.broadcast %67 : vector<1x128xf32> to vector<256x128xf32>
    %69 = arith.mulf %66, %68 : vector<256x128xf32>
    %c0_34 = arith.constant 0 : index
    %c0_35 = arith.constant 0 : index
    %70 = vector.load %arg6[%c0_34, %c0_35] : memref<1x128xf32, #tpu.memory_space<vmem>>, vector<1x128xf32>
    %71 = vector.broadcast %70 : vector<1x128xf32> to vector<256x128xf32>
    %72 = arith.addf %69, %71 : vector<256x128xf32>
    %73 = arith.negf %72 : vector<256x128xf32>
    %74 = math.exp %73 : vector<256x128xf32>
    %cst_36 = arith.constant 1.000000e+00 : f32
    %75 = vector.broadcast %cst_36 : f32 to vector<256x128xf32>
    %76 = arith.addf %75, %74 : vector<256x128xf32>
    %77 = arith.divf %75, %76 : vector<256x128xf32>
    %78 = arith.mulf %72, %77 : vector<256x128xf32>
    %cst_37 = arith.constant 0.000000e+00 : f32
    %79 = vector.broadcast %cst_37 : f32 to vector<16x128xf32>
    %80 = tpu.concatenate %79, %78, %79 in 0 : vector<16x128xf32>, vector<256x128xf32>, vector<16x128xf32> -> vector<288x128xf32>
    %c1_i32_38 = arith.constant 1 : i32
    %81 = tpu.dynamic_rotate %80 by %c1_i32_38 dim 0 : vector<288x128xf32>, i32 -> vector<288x128xf32>
    %cst_39 = arith.constant 0.000000e+00 : f32
    %82 = vector.shape_cast %20 : vector<288x1xi1> to vector<288x1xi1>
    %83 = vector.broadcast %82 : vector<288x1xi1> to vector<288x128xi1>
    %84 = vector.broadcast %cst_39 : f32 to vector<288x128xf32>
    %85 = arith.select %83, %81, %84 : vector<288x128xi1>, vector<288x128xf32>
    %c287_i32_40 = arith.constant 287 : i32
    %86 = tpu.dynamic_rotate %80 by %c287_i32_40 dim 0 : vector<288x128xf32>, i32 -> vector<288x128xf32>
    %cst_41 = arith.constant 0.000000e+00 : f32
    %87 = vector.shape_cast %22 : vector<288x1xi1> to vector<288x1xi1>
    %88 = vector.broadcast %87 : vector<288x1xi1> to vector<288x128xi1>
    %89 = vector.broadcast %cst_41 : f32 to vector<288x128xf32>
    %90 = arith.select %88, %86, %89 : vector<288x128xi1>, vector<288x128xf32>
    %91 = arith.truncf %85 : vector<288x128xf32> to vector<288x128xbf16>
    %c0_42 = arith.constant 0 : index
    %c0_43 = arith.constant 0 : index
    %92 = vector.load %arg12[%c0_42, %c0_43] : memref<288x384xbf16, #tpu.memory_space<vmem>>, vector<288x128xbf16>
    tpu.vector_store %arg12[%c0_42, %c0_43], %91 {strides = array<i32>} : memref<288x384xbf16, #tpu.memory_space<vmem>>, vector<288x128xbf16>,
    %93 = arith.truncf %80 : vector<288x128xf32> to vector<288x128xbf16>
    %c0_44 = arith.constant 0 : index
    %c128_45 = arith.constant 128 : index
    %94 = vector.load %arg12[%c0_44, %c128_45] : memref<288x384xbf16, #tpu.memory_space<vmem>>, vector<288x128xbf16>
    tpu.vector_store %arg12[%c0_44, %c128_45], %93 {strides = array<i32>} : memref<288x384xbf16, #tpu.memory_space<vmem>>, vector<288x128xbf16>,
    %95 = arith.truncf %90 : vector<288x128xf32> to vector<288x128xbf16>
    %c0_46 = arith.constant 0 : index
    %c256_47 = arith.constant 256 : index
    %96 = vector.load %arg12[%c0_46, %c256_47] : memref<288x384xbf16, #tpu.memory_space<vmem>>, vector<288x128xbf16>
    tpu.vector_store %arg12[%c0_46, %c256_47], %95 {strides = array<i32>} : memref<288x384xbf16, #tpu.memory_space<vmem>>, vector<288x128xbf16>,
    %97 = arith.truncf %1 : vector<256x128xf32> to vector<256x128xbf16>
    %c0_48 = arith.constant 0 : index
    %c0_49 = arith.constant 0 : index
    %98 = vector.load %arg8[%c0_48, %c0_49] : memref<128x128xbf16, #tpu.memory_space<vmem>>, vector<128x128xbf16>
    %cst_50 = arith.constant dense<0.000000e+00> : vector<256x128xf32>
    %99 = tpu.matmul %97, %98, %cst_50 {dimension_numbers = #tpu.dot_dimension_numbers<[1], [0], [0], [1], [0, 0, 1, 1], [], []>} : vector<256x128xbf16>, vector<128x128xbf16>, vector<256x128xf32> -> vector<256x128xf32>
    %c0_51 = arith.constant 0 : index
    %c0_52 = arith.constant 0 : index
    %100 = vector.load %arg9[%c0_51, %c0_52] : memref<1x128xf32, #tpu.memory_space<vmem>>, vector<1x128xf32>
    %101 = vector.broadcast %100 : vector<1x128xf32> to vector<256x128xf32>
    %102 = arith.addf %99, %101 : vector<256x128xf32>
    %c0_53 = arith.constant 0 : index
    %c0_54 = arith.constant 0 : index
    %103 = vector.load %arg12[%c0_53, %c0_54] : memref<288x384xbf16, #tpu.memory_space<vmem>>, vector<256x384xbf16>
    %c0_55 = arith.constant 0 : index
    %c0_56 = arith.constant 0 : index
    %c0_57 = arith.constant 0 : index
    %104 = vector.load %arg7[%c0_55, %c0_56, %c0_57] : memref<3x384x128xbf16, #tpu.memory_space<vmem>>, vector<1x384x128xbf16>
    %105 = vector.shape_cast %104 : vector<1x384x128xbf16> to vector<384x128xbf16>
    %cst_58 = arith.constant dense<0.000000e+00> : vector<256x128xf32>
    %106 = tpu.matmul %103, %105, %cst_58 {dimension_numbers = #tpu.dot_dimension_numbers<[1], [0], [0], [1], [0, 0, 1, 1], [], []>} : vector<256x384xbf16>, vector<384x128xbf16>, vector<256x128xf32> -> vector<256x128xf32>
    %107 = arith.addf %102, %106 : vector<256x128xf32>
    %c16_59 = arith.constant 16 : index
    %c0_60 = arith.constant 0 : index
    %108 = vector.load %arg12[%c16_59, %c0_60] : memref<288x384xbf16, #tpu.memory_space<vmem>>, vector<256x384xbf16>
    %c1_61 = arith.constant 1 : index
    %c0_62 = arith.constant 0 : index
    %c0_63 = arith.constant 0 : index
    %109 = vector.load %arg7[%c1_61, %c0_62, %c0_63] : memref<3x384x128xbf16, #tpu.memory_space<vmem>>, vector<1x384x128xbf16>
    %110 = vector.shape_cast %109 : vector<1x384x128xbf16> to vector<384x128xbf16>
    %cst_64 = arith.constant dense<0.000000e+00> : vector<256x128xf32>
    %111 = tpu.matmul %108, %110, %cst_64 {dimension_numbers = #tpu.dot_dimension_numbers<[1], [0], [0], [1], [0, 0, 1, 1], [], []>} : vector<256x384xbf16>, vector<384x128xbf16>, vector<256x128xf32> -> vector<256x128xf32>
    %112 = arith.addf %107, %111 : vector<256x128xf32>
    %c32_65 = arith.constant 32 : index
    %c0_66 = arith.constant 0 : index
    %113 = vector.load %arg12[%c32_65, %c0_66] : memref<288x384xbf16, #tpu.memory_space<vmem>>, vector<256x384xbf16>
    %c2_67 = arith.constant 2 : index
    %c0_68 = arith.constant 0 : index
    %c0_69 = arith.constant 0 : index
    %114 = vector.load %arg7[%c2_67, %c0_68, %c0_69] : memref<3x384x128xbf16, #tpu.memory_space<vmem>>, vector<1x384x128xbf16>
    %115 = vector.shape_cast %114 : vector<1x384x128xbf16> to vector<384x128xbf16>
    %cst_70 = arith.constant dense<0.000000e+00> : vector<256x128xf32>
    %116 = tpu.matmul %113, %115, %cst_70 {dimension_numbers = #tpu.dot_dimension_numbers<[1], [0], [0], [1], [0, 0, 1, 1], [], []>} : vector<256x384xbf16>, vector<384x128xbf16>, vector<256x128xf32> -> vector<256x128xf32>
    %117 = arith.addf %112, %116 : vector<256x128xf32>
    %c0_71 = arith.constant 0 : index
    %c0_72 = arith.constant 0 : index
    %c0_73 = arith.constant 0 : index
    %118 = vector.load %arg10[%c0_71, %c0_72, %c0_73] : memref<1x256x128xf32, #tpu.memory_space<vmem>>, vector<1x256x128xf32>
    %119 = vector.shape_cast %118 : vector<1x256x128xf32> to vector<256x128xf32>
    %120 = vector.shape_cast %117 : vector<256x128xf32> to vector<1x256x128xf32>
    tpu.vector_store %arg10[%c0_71, %c0_72, %c0_73], %120 {strides = array<i32>} : memref<1x256x128xf32, #tpu.memory_space<vmem>>, vector<1x256x128xf32>,
    return
  }
  func.func @transform_0(%arg0: i32) -> (i32, i32, i32) {
    %c0_i32 = arith.constant 0 : i32
    %c0_i32_0 = arith.constant 0 : i32
    %c0_i32_1 = arith.constant 0 : i32
    return %arg0, %c0_i32, %c0_i32_0 : i32, i32, i32
  }
  func.func @transform_1(%arg0: i32) -> (i32, i32) {
    %c0_i32 = arith.constant 0 : i32
    %c0_i32_0 = arith.constant 0 : i32
    %c0_i32_1 = arith.constant 0 : i32
    return %c0_i32, %c0_i32_0 : i32, i32
  }
  func.func @transform_2(%arg0: i32) -> (i32, i32) {
    %c0_i32 = arith.constant 0 : i32
    %c0_i32_0 = arith.constant 0 : i32
    %c0_i32_1 = arith.constant 0 : i32
    return %c0_i32, %c0_i32_0 : i32, i32
  }
  func.func @transform_3(%arg0: i32) -> (i32, i32, i32) {
    %c0_i32 = arith.constant 0 : i32
    %c0_i32_0 = arith.constant 0 : i32
    %c0_i32_1 = arith.constant 0 : i32
    %c0_i32_2 = arith.constant 0 : i32
    return %c0_i32, %c0_i32_0, %c0_i32_1 : i32, i32, i32
  }
  func.func @transform_4(%arg0: i32) -> (i32, i32) {
    %c0_i32 = arith.constant 0 : i32
    %c0_i32_0 = arith.constant 0 : i32
    %c0_i32_1 = arith.constant 0 : i32
    return %c0_i32, %c0_i32_0 : i32, i32
  }
  func.func @transform_5(%arg0: i32) -> (i32, i32) {
    %c0_i32 = arith.constant 0 : i32
    %c0_i32_0 = arith.constant 0 : i32
    %c0_i32_1 = arith.constant 0 : i32
    return %c0_i32, %c0_i32_0 : i32, i32
  }
  func.func @transform_6(%arg0: i32) -> (i32, i32, i32) {
    %c0_i32 = arith.constant 0 : i32
    %c0_i32_0 = arith.constant 0 : i32
    %c0_i32_1 = arith.constant 0 : i32
    %c0_i32_2 = arith.constant 0 : i32
    return %c0_i32, %c0_i32_0, %c0_i32_1 : i32, i32, i32
  }
  func.func @transform_7(%arg0: i32) -> (i32, i32) {
    %c0_i32 = arith.constant 0 : i32
    %c0_i32_0 = arith.constant 0 : i32
    %c0_i32_1 = arith.constant 0 : i32
    return %c0_i32, %c0_i32_0 : i32, i32
  }
  func.func @transform_8(%arg0: i32) -> (i32, i32) {
    %c0_i32 = arith.constant 0 : i32
    %c0_i32_0 = arith.constant 0 : i32
    %c0_i32_1 = arith.constant 0 : i32
    return %c0_i32, %c0_i32_0 : i32, i32
  }
  func.func @transform_9(%arg0: i32) -> (i32, i32, i32) {
    %c0_i32 = arith.constant 0 : i32
    %c0_i32_0 = arith.constant 0 : i32
    %c0_i32_1 = arith.constant 0 : i32
    return %arg0, %c0_i32, %c0_i32_0 : i32, i32, i32
  }
}

</mosaic_0001>

<bundles_post_ra>
// kernel: tpu_custom_call.1
= control target key start
LH: loop header
LB: loop body
LE: loop exit
PB: predicated region body
PF: predicated region fallthrough
CT: control target
= control target key end

     0   :  { %s15701_s0 = inlined_call_operand.hbm [shape: f32[2,256,128], index: 0, kind: input, shape index: {}]   ;;  %s15702_s1 = inlined_call_operand.hbm [shape: f32[1,128], index: 1, kind: input, shape index: {}]   ;;  %s15703_s2 = inlined_call_operand.vmem [shape: f32[1,128], index: 2, kind: input, shape index: {}]   ;;  %s15704_s3 = inlined_call_operand.hbm [shape: bf16[3,384,128], index: 3, kind: input, shape index: {}]   ;;  %s15705_s4 = inlined_call_operand.vmem [shape: f32[1,128], index: 4, kind: input, shape index: {}]   ;;  %s15706_s5 = inlined_call_operand.vmem [shape: f32[1,128], index: 5, kind: input, shape index: {}]   ;;  %s15707_s6 = inlined_call_operand.hbm [shape: bf16[3,384,128], index: 6, kind: input, shape index: {}]   ;;  %s15708_s7 = inlined_call_operand.hbm [shape: bf16[128,128], index: 7, kind: input, shape index: {}]   ;;  %s15709_s8 = inlined_call_operand.vmem [shape: f32[1,128], index: 8, kind: input, shape index: {}]   ;;  %s15710_s9 = inlined_call_operand.hbm [shape: f32[2,256,128], index: 9, kind: output, shape index: {}]  }
   0x1   :  { %15820 = sst [smem:[#allocation84_spill]] %s15702_s1 }
   0x2   :  { %15821 = sst [smem:[#allocation85_spill]] %s15704_s3 }
   0x3   :  { %15822 = sst [smem:[#allocation86_spill]] %s15707_s6 }
   0x4   :  { %14 = vsyncpa [#allocation5], 0 }
   0x5   :  { %16 = vsyncpa [#allocation5 + $0x1], 0 }
   0x6   :  { %17 = vsyncpa [#allocation8], 0 }
   0x7   :  { %18 = vsyncpa [#allocation11], 0 }
   0x8   :  { %19 = vsyncpa [#allocation6], 0 }
   0x9   :  { %21 = vsyncpa [#allocation6 + $0x1], 0  ;;  %s10984_s30 = smov 0   ;;  %s10986_s10 = smov 0  }
   0xa   :  { %s10988_s11 = smov 0   ;;  %s10990_s12 = smov 0  }
   0xb LB: > { %s11005_s13 = sadd.s32 4294967295, %s10921_s12   ;;  %s8215_s14 = sadd.s32 4294967294, %s10921_s12   ;;  %s10921_s12 = sphi %s10990_s12, %s16549_s12   ;;  %s10917_s11 = sphi %s10988_s11, %s16548_s11   ;;  %s10913_s10 = sphi %s10986_s10, %s16547_s10   ;;  %s10909_s30 = sphi %s10984_s30, %s16546_s30  }
   0xc   : > { %p47_p0 = scmp.ne.s32.totalorder %s10913_s10, %s10909_s30  ;;  %p48_p1 = scmp.eq.s32.totalorder %s11005_s13, 0 }
   0xd   : > { %p239_p2 = scmp.eq.s32.totalorder %s11005_s13, 1  ;;  %p245_p3 = scmp.eq.s32.totalorder %s8215_s14, 1 }
   0xe   : > { %p11014_p4 = por %p48_p1, %p47_p0  ;;  %p8216_p5 = scmp.ge.s32.totalorder %s10921_s12, 1 }
   0xf   : > { %p11019_p6 = por %p245_p3, %p47_p0  ;;  %p252_p7 = scmp.lt.s32.totalorder %s10921_s12, 3 }
  0x10   : > { %s15825_s1 = sld [smem:[#allocation84_spill]]  ;;  %s10923_s21 = smov [#allocation7]  }
  0x11   : > { %p11027_p8 = pnand %p8216_p5, %p252_p7  ;;  %s266_s22 = sshll.u32 %s10923_s21, 4  ;;  %s267_s22 = int_to_ptr.vmem [resolvable:$true] %s266_s22 }
  0x12   : > { %s15828_s6 = sld [smem:[#allocation86_spill]]  ;;  %s10924_s27 = smov [#allocation10]  }
  0x13   : > { %p10322_p10 = pneg %p11027_p8  ;;  %s300_s28 = sshll.u32 %s10924_s27, 4  ;;  %s301_s28 = int_to_ptr.vmem [resolvable:$true] %s300_s28 }
  0x14   : > { %s15829_s3 = sld [smem:[#allocation85_spill]]  ;;  %s10925_s18 = smov 64  }
  0x15   : > { %p11036_p11 = pnand %p10322_p10, %p48_p1  ;;  %s10926_s21 = smov 4  }
  0x16   : > { %s264_s19 = sshll.u32 %s15825_s1, 4  ;;  %s10927_s25 = smov [#allocation9]   ;;  %s265_s19 = int_to_ptr.hbm [resolvable:$true] %s264_s19 }
  0x17   : > { %10325 = dma.hbm_to_vmem [thread:$0]  (!%p11036_p11), %s265_s19, 16, %s267_s22, [#allocation8]  }
  0x18   : > { %s298_s26 = sshll.u32 %s15828_s6, 4  ;;  %s312_s22 = sshll.u32 %s15708_s7, 4  ;;  %s299_s26 = int_to_ptr.hbm [resolvable:$true] %s298_s26  ;;  %s313_s22 = int_to_ptr.hbm [resolvable:$true] %s312_s22 }
  0x19   : > { %10331 = dma.hbm_to_vmem [thread:$0]  (!%p11036_p11), %s299_s26, 9216, %s301_s28, [#allocation11], %s10925_s18, %s10925_s18, %s10926_s21  }
  0x1a   : > { %s278_s17 = sshll.u32 %s15829_s3, 4  ;;  %s280_s27 = sshll.u32 %s10927_s25, 4  ;;  %s279_s17 = int_to_ptr.hbm [resolvable:$true] %s278_s17  ;;  %s281_s27 = int_to_ptr.vmem [resolvable:$true] %s280_s27 }
  0x1b   : > { %10328 = dma.hbm_to_vmem [thread:$0]  (!%p11036_p11), %s279_s17, 9216, %s281_s27, [#allocation8], %s10925_s18, %s10925_s18, %s10926_s21  }
  0x1c   : > { %s10928_s29 = smov [#allocation12]   ;;  %s11058_s26 = sadd.s32 1, %s10921_s12  }
  0x1d   : > { %s314_s14 = sshll.u32 %s10928_s29, 4  ;;  %s34_s28 = sadd.s32 1, %s10917_s11  ;;  %s315_s14 = int_to_ptr.vmem [resolvable:$true] %s314_s14 }
  0x1e   : > { %10334 = dma.hbm_to_vmem [thread:$0]  (!%p11036_p11), %s313_s22, 1024, %s315_s14, [#allocation11], %s10925_s18, %s10925_s18, %s10926_s21  }
  0x1f   : > { %s31_s24 = ssub.s32 %s10921_s12, %s11058_s26  ;;  %p41_p12 = scmp.ne.s32.totalorder %s10917_s11, %s10913_s10 }
  0x20   : > { %p32_p13 = scmp.eq.s32.totalorder %s31_s24, 0  ;;  %p42_p0 = scmp.eq.s32.totalorder %s10921_s12, 0 }
  0x21   : > { %p11068_p3 = por %p239_p2, %p41_p12  ;;  %p10347_p5 = scmp.lt.s32.totalorder %s10921_s12, 2 }
  0x22   : > { %s11074_s17 = scalar_select %p32_p13, %s10917_s11, %s34_s28  }
  0x23   : > { %p43_p7 = por %p42_p0, %p41_p12  ;;  %s331_s25 = sand.u32 1, %s10917_s11  }
  0x24   : > { %s8222_s23 = sshll.u32 %s331_s25, 8  ;;  %s9881_s18 = sshll.u32 %s10921_s12, 8 }
  0x25   : > { %s340_s27 = scalar_lea.hbm %s15701_s0, %s9881_s18  ;;  %s335_s29 = scalar_lea.vmem [#allocation4], %s8222_s23 }
  0x26   : > { %s343_s14 = sshll.u32 %s335_s29, 4  ;;  %s341_s24 = sshll.u32 %s340_s27, 4  ;;  %s344_s14 = int_to_ptr.vmem [resolvable:$true] %s343_s14  ;;  %s342_s24 = int_to_ptr.hbm [resolvable:$true] %s341_s24 }
  0x27   : > { %p11081_p2 = pnand %p10347_p5, %p43_p7  ;;  %s332_s28 = scalar_lea.sflag [#allocation5], %s331_s25 }
  0x28   : > { %s10817_s3 = sshra.s32 %s342_s24, 4  ;;  %s10824_s21 = scalar_lea.hbm %s15701_s0, 512  ;;  %s10818_s3 = int_to_ptr.hbm [resolvable:$true] %s10817_s3 }
  0x29   : > { %s10819_s6 = scalar_lea.hbm %s10818_s3, 256  ;;  %p10821_p11 = pneg %p11081_p2 }
  0x2a   : > { %p10820_p10 = scmp.ne.s32.totalorder %s10818_s3, %s10819_s6  ;;  %p10825_p0 = scmp.lt.s32.totalorder %s10818_s3, %s15701_s0 }
  0x2b   : > { %p10826_p5 = scmp.lt.s32.totalorder %s10824_s21, %s10819_s6 }
  0x2c   : > { %p10822_p12 = pnand %p10821_p11, %p10820_p10 }
  0x2d   : > { %p10827_p7 = por %p10826_p5, %p10825_p0 }
  0x2e   : > { %p10823_p13 = pneg %p10822_p12 }
  0x30   : > { %p10828_p9 = pnand %p10827_p7, %p10823_p13 }
  0x32   : > { %10831 = shalt.err (!%p10828_p9)
}
  0x33   : > { %s10929_s25 = smov 128   ;;  %s10930_s29 = smov 8  }
  0x34   : > { %10338 = dma.hbm_to_vmem [thread:$0]  (!%p11081_p2), %s342_s24, 4096, %s344_s14, %s332_s28, %s10929_s25, %s10929_s25, %s10930_s29  }
  0x35   : > { %355 = sbr.rel (%p11027_p8) target bundleno = 1746 (0x6d2), region = 56 }
  0x3a   : > { %s11098_s18 = sand.u32 1, %s10913_s10  }
  0x3b   : > { %s8226_s3 = sshll.u32 %s11098_s18, 8  ;;  %s358_s6 = scalar_lea.sflag [#allocation5], %s11098_s18 }
  0x3c   : > { %s11104_s23 = scalar_lea.vmem [#allocation4], %s8226_s3 }
  0x3d   : > { %10892 = dma.done.wait (%p11014_p4), %s358_s6, 4096  }
  0x3e   : > { %10894 = vsyncadd (%p11014_p4), %s358_s6, 4294963200 }
  0x3f   : > { %10896 = dma.done.wait (%p48_p1), [#allocation8], 9232  }
  0x40   : > { %10898 = vsyncadd (%p48_p1), [#allocation8], 4294958064 }
  0x41   : > { %10900 = dma.done.wait (%p48_p1), [#allocation11], 10240  }
  0x42   : > { %10902 = vsyncadd (%p48_p1), [#allocation11], 4294957056  ;;  %v11118_v0 = vld [vmem:[#allocation9 + $0x138] sm:$0xff]  ;;  %v11123_v3 = vld [vmem:[#allocation9 + $0x130] sm:$0xff]  ;;  %v449_v23 = vlaneseq  ;;  %s15559_s22 = scalar_lea.vmem [#allocation13], %s8226_s3  ;;  %s10277_s3 = sshll.u32 %s11005_s13, 8 }
  0x43   : > { %v9964_v1 = vld [vmem:[#allocation9 + $0xf8] sm:$0xff]  ;;  %2917 = vmatpush.bf16.msra.mxu1 %v11118_v0  ;;  %v9963_v4 = vld [vmem:[#allocation9 + $0xf0] sm:$0xff]  ;;  %v11129_v6 = vld [vmem:[#allocation9 + $0x128] sm:$0xff]  ;;  %s8100_s29 = scalar_lea.hbm %s15710_s9, %s10277_s3  ;;  %s8101_s6 = sshll.u32 %s15559_s22, 4  ;;  %s8102_s6 = int_to_ptr.vmem [resolvable:$true] %s8101_s6 }
  0x44   : > { %v11120_v2 = vld [vmem:[#allocation9 + $0x178] sm:$0xff]  ;;  %2828 = vmatpush.bf16.msra.mxu0 %v9964_v1  ;;  %10278 = vmatpush.bf16.msra.mxu3 %v9964_v1  ;;  %v11126_v5 = vld [vmem:[#allocation9 + $0x170] sm:$0xff]  ;;  %v9962_v7 = vld [vmem:[#allocation9 + $0xe8] sm:$0xff]  ;;  %v11189_v42 = vshrl.u32 %v449_v23, 7  ;;  %s8089_s13 = scalar_lea.sflag [#allocation6], %s11098_s18  ;;  %s10867_s24 = scalar_lea.hbm %s15710_s9, 512 }
  0x45   : > { %3006 = vmatpush.bf16.msra.mxu2 %v11120_v2  ;;  %v11132_v8 = vld [vmem:[#allocation9 + $0x168] sm:$0xff]  ;;  %v417_v9 = vld [vmem:[%s11104_s23] sm:$0xff]  ;;  %v440_v14 = vld [vmem:[%s11104_s23 + $0xb8] sm:$0xff] }
  0x46   : > { %v418_v10 = vld [vmem:[%s11104_s23 + $0x8] sm:$0xff]  ;;  %v11138_v12 = vld [vmem:[#allocation7] ss:$0 sm:$0xff]  ;;  %v419_v21 = vld [vmem:[%s11104_s23 + $0x10] sm:$0xff]  ;;  %15832 = vst [vmem:[#allocation18_spill] sm:$0xff] %v11189_v42  ;;  %v11211_v55 = vadd.s32 16, %v11189_v42 }
  0x47   : > { %2918 = vmatpush.bf16.msra.mxu1 %v11123_v3  ;;  %v11136_v11 = vld [vmem:[#allocation9 + $0x120] sm:$0xff]  ;;  %v11143_v13 = vld [vmem:[%s15703_s2] ss:$0 sm:$0xff]  ;;  %v994_v17 = vmul.f32 %v11138_v12, %v417_v9  ;;  %v995_v18 = vmul.f32 %v11138_v12, %v418_v10  ;;  %v1017_v20 = vmul.f32 %v11138_v12, %v440_v14  ;;  %v996_v29 = vmul.f32 %v11138_v12, %v419_v21  ;;  %v420_v37 = vld [vmem:[%s11104_s23 + $0x18] sm:$0xff] }
  0x48   : > { %2829 = vmatpush.bf16.msra.mxu0 %v9963_v4  ;;  %10279 = vmatpush.bf16.msra.mxu3 %v9963_v4  ;;  %v441_v15 = vld [vmem:[%s11104_s23 + $0xc0] sm:$0xff]  ;;  %v442_v19 = vld [vmem:[%s11104_s23 + $0xc8] sm:$0xff]  ;;  %v443_v38 = vld [vmem:[%s11104_s23 + $0xd0] sm:$0xff]  ;;  %v997_v45 = vmul.f32 %v11138_v12, %v420_v37  ;;  %v11214_v56 = vadd.s32 208, %v11189_v42  ;;  %v11217_v57 = vadd.s32 24, %v11189_v42 }
  0x49   : > { %3007 = vmatpush.bf16.msra.mxu2 %v11126_v5  ;;  %v9961_v16 = vld [vmem:[#allocation9 + $0xe0] sm:$0xff]  ;;  %v1018_v24 = vmul.f32 %v11138_v12, %v441_v15  ;;  %v1019_v25 = vmul.f32 %v11138_v12, %v442_v19  ;;  %v11159_v26 = vadd.f32 %v11143_v13, %v994_v17  ;;  %v11162_v27 = vadd.f32 %v11143_v13, %v995_v18  ;;  %v11168_v30 = vld [vmem:[#allocation9 + $0x118] sm:$0xff]  ;;  %v11197_v48 = vld [vmem:[#allocation9 + $0x110] sm:$0xff] }
  0x4a   : > { %v11154_v22 = vld [vmem:[#allocation9 + $0x160] sm:$0xff]  ;;  %v11165_v28 = vadd.f32 %v11143_v13, %v1017_v20  ;;  %v9960_v31 = vld [vmem:[#allocation9 + $0xd8] sm:$0xff]  ;;  %v11180_v36 = vadd.f32 %v11143_v13, %v996_v29  ;;  %v1020_v47 = vmul.f32 %v11138_v12, %v443_v38  ;;  %v9959_v49 = vld [vmem:[#allocation9 + $0xd0] sm:$0xff]  ;;  %v11203_v51 = vadd.f32 %v11143_v13, %v997_v45 }
  0x4b   : > { %2919 = vmatpush.bf16.msra.mxu1 %v11129_v6  ;;  %v11171_v32 = vadd.f32 %v11143_v13, %v1018_v24  ;;  %v11174_v33 = vadd.f32 %v11143_v13, %v1019_v25  ;;  %v8232_v34 = vmul.f32 -1.442695, %v11159_v26  ;;  %v8233_v35 = vmul.f32 -1.442695, %v11162_v27  ;;  %v11185_v39 = vld [vmem:[#allocation9 + $0x158] sm:$0xff]  ;;  %v11200_v50 = vld [vmem:[#allocation9 + $0x150] sm:$0xff] }
  0x4c   : > { %2830 = vmatpush.bf16.msra.mxu0 %v9962_v7  ;;  %10280 = vmatpush.bf16.msra.mxu3 %v9962_v7  ;;  %v8255_v40 = vmul.f32 -1.442695, %v11165_v28  ;;  %v8234_v44 = vmul.f32 -1.442695, %v11180_v36  ;;  %v444_v46 = vld [vmem:[%s11104_s23 + $0xd8] sm:$0xff]  ;;  %15833 = vst [vmem:[#allocation19_spill] sm:$0xff] %v11200_v50  ;;  %v11208_v54 = vadd.f32 %v11143_v13, %v1020_v47 }
  0x4d   : > { %3008 = vmatpush.bf16.msra.mxu2 %v11132_v8  ;;  %v8256_v41 = vmul.f32 -1.442695, %v11171_v32  ;;  %10401 = vpow2.f32 %v8232_v34  ;;  %v8257_v43 = vmul.f32 -1.442695, %v11174_v33  ;;  %v421_v52 = vld [vmem:[%s11104_s23 + $0x20] sm:$0xff]  ;;  %v1021_v53 = vmul.f32 %v11138_v12, %v444_v46  ;;  %v11220_v59 = vld [vmem:[#allocation9 + $0x108] sm:$0xff] }
  0x4e   : > { %10403 = vpow2.f32 %v8233_v35  ;;  %v9958_v60 = vld [vmem:[#allocation9 + $0xc8] sm:$0xff]  ;;  %v998_v61 = vmul.f32 %v11138_v12, %v421_v52  ;;  %v8235_v4 = vmul.f32 -1.442695, %v11203_v51  ;;  %v8258_v14 = vmul.f32 -1.442695, %v11208_v54  ;;  %v11240_v20 = vld [vmem:[#allocation9 + $0x100] sm:$0xff] }
  0x4f   : > { %2920 = vmatpush.bf16.msra.mxu1 %v11136_v11  ;;  %10405 = vpow2.f32 %v8255_v40  ;;  %v11224_v63 = vld [vmem:[#allocation9 + $0x148] sm:$0xff]  ;;  %v11232_v10 = vadd.f32 %v11143_v13, %v1021_v53  ;;  %v9957_v24 = vld [vmem:[#allocation9 + $0xc0] sm:$0xff] }
  0x50   : > { %2831 = vmatpush.bf16.msra.mxu0 %v9961_v16  ;;  %10281 = vmatpush.bf16.msra.mxu3 %v9961_v16  ;;  %10407 = vpow2.f32 %v8256_v41  ;;  %15834 = vst [vmem:[#allocation20_spill] sm:$0xff] %v11224_v63  ;;  %v504_v16 = vand.u32 15, %v11211_v55  ;;  %v11246_v25 = vadd.f32 %v11143_v13, %v998_v61  ;;  %v11250_v34 = vld [vmem:[#allocation9 + $0x140] sm:$0xff] }
  0x51   : > { %3009 = vmatpush.bf16.msra.mxu2 %v11154_v22  ;;  %10409 = vpow2.f32 %v8257_v43  ;;  %15835 = vst [vmem:[#allocation21_spill] sm:$0xff] %v11250_v34  ;;  %v11260_v41 = vmul.f32 -1.442695, %v11232_v10 }
  0x52   : > { %10411 = vpow2.f32 %v8234_v44  ;;  %vm11311_vm12 = vcmp.ne.s32.totalorder %v504_v16, 0 }
  0x53   : > { %2921 = vmatpush.bf16.msra.mxu1 %v11168_v30  ;;  %v10402_v58 = vpop.eup %10401 }
  0x54   : > { %2832 = vmatpush.bf16.msra.mxu0 %v9960_v31  ;;  %10282 = vmatpush.bf16.msra.mxu3 %v9960_v31  ;;  %v10404_v62 = vpop.eup %10403  ;;  %v11226_v1 = vadd.f32 1.0, %v10402_v58 }
  0x55   : > { %3010 = vmatpush.bf16.msra.mxu2 %v11185_v39  ;;  %v10406_v7 = vpop.eup %10405  ;;  %v11229_v9 = vadd.f32 1.0, %v10404_v62 }
  0x56   : > { %v10408_v15 = vpop.eup %10407  ;;  %10413 = vrcp.f32 %v11226_v1  ;;  %v1199_v21 = vand.u32 2147483647, %v11226_v1  ;;  %v1201_v23 = vand.u32 2147483648, %v11226_v1  ;;  %v11252_v35 = vadd.f32 1.0, %v10406_v7 }
  0x57   : > { %2922 = vmatpush.bf16.msra.mxu1 %v11197_v48  ;;  %v10410_v19 = vpop.eup %10409  ;;  %10415 = vrcp.f32 %v11229_v9  ;;  %v1214_v31 = vand.u32 2147483647, %v11229_v9  ;;  %v11254_v37 = vadd.f32 1.0, %v10408_v15  ;;  %v1216_v38 = vand.u32 2147483648, %v11229_v9 }
  0x58   : > { %2833 = vmatpush.bf16.msra.mxu0 %v9959_v49  ;;  %10283 = vmatpush.bf16.msra.mxu3 %v9959_v49  ;;  %v10412_v29 = vpop.eup %10411  ;;  %10417 = vpow2.f32 %v8235_v4  ;;  %v11257_v40 = vadd.f32 1.0, %v10410_v19  ;;  %vm1195_vm0 = vweird.f32 %v11226_v1  ;;  %vm1210_vm1 = vweird.f32 %v11229_v9 }
  0x59   : > { %3011 = vmatpush.bf16.msra.mxu2 %v11200_v50  ;;  %10419 = vpow2.f32 %v8258_v14  ;;  %v1546_v43 = vand.u32 2147483648, %v11252_v35  ;;  %vm11267_vm2 = vcmp.eq.f32.partialorder %v1199_v21, 8.507059e+37  ;;  %v11271_v45 = vor.u32 1.1754944e-38, %v1201_v23 }
  0x5a   : > { %10421 = vrcp.f32 %v11252_v35  ;;  %v1544_v46 = vand.u32 2147483647, %v11252_v35  ;;  %v11275_v47 = vadd.f32 1.0, %v10412_v29  ;;  %vm11277_vm3 = vcmp.eq.f32.partialorder %v1214_v31, 8.507059e+37 }
  0x5b   : > { %2923 = vmatpush.bf16.msra.mxu1 %v11220_v59  ;;  %10423 = vrcp.f32 %v11254_v37  ;;  %v1559_v53 = vand.u32 2147483647, %v11254_v37  ;;  %v1561_v58 = vand.u32 2147483648, %v11254_v37  ;;  %v1217_v62 = vor.u32 1.1754944e-38, %v1216_v38 }
  0x5c   : > { %2834 = vmatpush.bf16.msra.mxu0 %v9958_v60  ;;  %10284 = vmatpush.bf16.msra.mxu3 %v9958_v60  ;;  %v10414_v49 = vpop.eup %10413  ;;  %10425 = vrcp.f32 %v11257_v40  ;;  %vm1540_vm4 = vweird.f32 %v11252_v35  ;;  %vm1555_vm5 = vweird.f32 %v11254_v37  ;;  %v11290_v14 = vor.u32 1.1754944e-38, %v1546_v43 }
  0x5d   : > { %3012 = vmatpush.bf16.msra.mxu2 %v11224_v63  ;;  %v10416_v60 = vpop.eup %10415  ;;  %v1191_v61 = vmul.f32 %v10414_v49, %v11226_v1  ;;  %v1574_v15 = vand.u32 2147483647, %v11257_v40  ;;  %v1576_v19 = vand.u32 2147483648, %v11257_v40  ;;  %vm1196_vm6 = vweird.f32 %v10414_v49 }
  0x5e   : > { %v10418_v4 = vpop.eup %10417  ;;  %v1206_v7 = vmul.f32 %v10416_v60, %v11229_v9  ;;  %vm11296_vm7 = vcmp.eq.f32.partialorder %v1544_v46, 8.507059e+37  ;;  %10427 = vrcp.f32 %v11275_v47  ;;  %vm1211_vm9 = vweird.f32 %v10416_v60  ;;  %vm11326_vm14 = vmor %vm1195_vm0, %vm1196_vm6 }
  0x5f   : > { %2924 = vmatpush.bf16.msra.mxu1 %v11240_v20  ;;  %v11294_v21 = vpop.eup %10419  ;;  %v1192_v23 = vsub.f32 1.0, %v1191_v61  ;;  %vm11305_vm11 = vcmp.eq.f32.partialorder %v1559_v53, 8.507059e+37  ;;  %v1562_v38 = vor.u32 1.1754944e-38, %v1561_v58  ;;  %v15844_v61 = vmov 0  ;;  %vm11335_vm15 = vmor %vm1210_vm1, %vm1211_vm9 }
  0x60   : > { %2835 = vmatpush.bf16.msra.mxu0 %v9957_v24  ;;  %10285 = vmatpush.bf16.msra.mxu3 %v9957_v24  ;;  %v1207_v29 = vsub.f32 1.0, %v1206_v7  ;;  %v15845_v61 = vsel %vm11311_vm12, 4294967295, %v15844_v61  ;;  %vm11317_vm13 = vcmp.eq.f32.partialorder %v1574_v15, 8.507059e+37  ;;  %v1577_v17 = vor.u32 1.1754944e-38, %v1576_v19 }
  0x61   : > { %3013 = vmatpush.bf16.msra.mxu2 %v11250_v34  ;;  %v1193_v46 = vmul.f32 %v10414_v49, %v1192_v23  ;;  %15846 = vst [vmem:[#allocation22_spill] sm:$0xff] %v15845_v61  ;;  %vm1225_vm8 = vweird.f32 %v11275_v47  ;;  %vm15717_vm1 = vcmp.lt.s32.totalorder %v11189_v42, 7  ;;  %v15853_v50 = vand.u32 15, %v11214_v56 }
  0x62   : > { %v1208_v16 = vmul.f32 %v10416_v60, %v1207_v29 }
  0x63   : > { %v1194_v34 = vadd.f32 %v10414_v49, %v1193_v46  ;;  %vm11358_vm9 = vcmp.ne.s32.totalorder %v15853_v50, 0 }
  0x64   : > { %10286 = vmatpush.bf16.msrb.mxu3 %v11118_v0  ;;  %v11302_v0 = vpop.eup %10421  ;;  %v1209_v63 = vadd.f32 %v10416_v60, %v1208_v16 }
  0x65   : > { %v10424_v43 = vpop.eup %10423  ;;  %v1536_v18 = vmul.f32 %v11302_v0, %v11252_v35  ;;  %vm1541_vm0 = vweird.f32 %v11302_v0  ;;  %v1198_v9 = vsel %vm11326_vm14, %v10414_v49, %v1194_v34  ;;  %v15854_v34 = vmov 0 }
  0x66   : > { %v10426_v58 = vpop.eup %10425  ;;  %v1551_v23 = vmul.f32 %v10424_v43, %v11254_v37  ;;  %vm1556_vm6 = vweird.f32 %v10424_v43  ;;  %v1203_v16 = vsel %vm11267_vm2, %v11271_v45, %v1198_v9  ;;  %v15855_v34 = vsel %vm11358_vm9, 4294967295, %v15854_v34  ;;  %vm11366_vm14 = vmor %vm1540_vm4, %vm1541_vm0  ;;  %v9945_v45 = vld [vmem:[#allocation9 + $0x78] sm:$0xff] }
  0x67   : > { %v1537_v53 = vsub.f32 1.0, %v1536_v18  ;;  %v1566_v1 = vmul.f32 %v10426_v58, %v11257_v40  ;;  %vm1571_vm10 = vweird.f32 %v10426_v58  ;;  %v11342_v19 = vpop.eup %10427  ;;  %v11348_v18 = vadd.f32 1.0, %v10418_v4  ;;  %15856 = vst [vmem:[#allocation23_spill] sm:$0xff] %v15855_v34  ;;  %vm11381_vm2 = vmor %vm1555_vm5, %vm1556_vm6  ;;  %3344 = vmatpush.bf16.msrb.mxu0 %v9945_v45 }
  0x68   : > { %10287 = vmatpush.bf16.msrb.mxu3 %v11123_v3  ;;  %v1552_v29 = vsub.f32 1.0, %v1551_v23  ;;  %v1213_v23 = vsel %vm11335_vm15, %v10416_v60, %v1209_v63  ;;  %v1221_v44 = vmul.f32 %v11342_v19, %v11275_v47  ;;  %v11375_v50 = vmul.f32 %v1203_v16, %v11159_v26 }
  0x69   : > { %v1538_v46 = vmul.f32 %v11302_v0, %v1537_v53  ;;  %v1567_v15 = vsub.f32 1.0, %v1566_v1  ;;  %v1218_v56 = vsel %vm11277_vm3, %v1217_v62, %v1213_v23  ;;  %vm15861_vm3 = vweird.f32 %v11257_v40 }
  0x6a   : > { %v11386_v4 = vmul.f32 %v1218_v56, %v11162_v27  ;;  %vm11391_vm4 = vmor %vm15861_vm3, %vm1571_vm10  ;;  %v1222_v52 = vsub.f32 1.0, %v1221_v44  ;;  %vm1226_vm15 = vweird.f32 %v11342_v19  ;;  %v2123_v37 = vpack.c.bf16 %v11375_v50, %v11375_v50 }
  0x6b   : > { %v1539_v63 = vadd.f32 %v11302_v0, %v1538_v46  ;;  %v1568_v60 = vmul.f32 %v10426_v58, %v1567_v15  ;;  %v1702_v62 = vrot.slane %v11375_v50, 7  ;;  %vm15864_vm5 = vcmp.lt.s32.totalorder %v11189_v42, 1  ;;  %vm11445_vm10 = vmor %vm1225_vm8, %vm1226_vm15 }
  0x6c   : > { %10288 = vmatpush.bf16.msrb.mxu3 %v11129_v6  ;;  %v1553_v6 = vmul.f32 %v10424_v43, %v1552_v29  ;;  %v2124_v40 = vpack.c.bf16 %v11386_v4, %v11386_v4  ;;  %v1703_v15 = vrot.slane %v11386_v4, 7  ;;  %2157 = vst [vmem:[#allocation2 + $0x1c] sm:$0xf] %v2123_v37  ;;  %v1223_v23 = vmul.f32 %v11342_v19, %v1222_v52  ;;  %vm15879_vm3 = vmmov %vm15864_vm5 }
  0x6d   : > { %v1543_v27 = vsel %vm11366_vm14, %v11302_v0, %v1539_v63  ;;  %v1569_v55 = vadd.f32 %v10426_v58, %v1568_v60  ;;  %v1767_v29 = vsel %vm15864_vm5, 0.0, %v1702_v62  ;;  %v15714_v49 = vrot.slane %v11375_v50, 1 }
  0x6e   : > { %v1554_v53 = vadd.f32 %v10424_v43, %v1553_v6  ;;  %v1548_v3 = vsel %vm11296_vm7, %v11290_v14, %v1543_v27  ;;  %2158 = vst [vmem:[#allocation2 + $0x28] sm:$0xf] %v2124_v40  ;;  %vm15865_vm7 = vmmov %vm15864_vm5  ;;  %v1842_v24 = vsel %vm11311_vm12, %v1767_v29, 0.0  ;;  %10429 = vrcp.f32 %v11348_v18 }
  0x6f   : > { %v11418_v9 = vmul.f32 %v1548_v3, %v11165_v28  ;;  %v1766_v14 = vsel %vm15865_vm7, %v1702_v62, %v1703_v15  ;;  %v454_v6 = vadd.s32 32, %v11189_v42  ;;  %v1224_v45 = vadd.f32 %v11342_v19, %v1223_v23 }
  0x70   : > { %10289 = vmatpush.bf16.msrb.mxu3 %v11136_v11  ;;  %v1558_v1 = vsel %vm11381_vm2, %v10424_v43, %v1554_v53  ;;  %v1573_v11 = vsel %vm11391_vm4, %v10426_v58, %v1569_v55  ;;  %v2053_v58 = vpack.c.bf16 %v1766_v14, %v1766_v14  ;;  %v15870_v56 = vand.u32 2147483647, %v11275_v47 }
  0x71   : > { %v1563_v0 = vsel %vm11305_vm11, %v1562_v38, %v1558_v1  ;;  %v1578_v43 = vsel %vm11317_vm13, %v1577_v17, %v1573_v11  ;;  %v2052_v38 = vpack.c.bf16 %v1842_v24, %v1842_v24  ;;  %v15715_v46 = vrot.slane %v11418_v9, 7  ;;  %vm15869_vm11 = vmmov %vm15864_vm5 }
  0x72   : > { %v11429_v31 = vmul.f32 %v1563_v0, %v11171_v32  ;;  %v11432_v28 = vmul.f32 %v1578_v43, %v11174_v33  ;;  %v1877_v17 = vrot.slane %v11386_v4, 1  ;;  %2089 = vst [vmem:[#allocation2 + $0x24] sm:$0xf] %v2053_v58  ;;  %vm1230_vm8 = vcmp.eq.f32.partialorder %v15870_v56, 8.507059e+37  ;;  %vm15871_vm13 = vmmov %vm15864_vm5  ;;  %v422_v56 = vld [vmem:[%s11104_s23 + $0x28] sm:$0xff] }
  0x73   : > { %2088 = vst [vmem:[#allocation2 + $0x18] sm:$0xf] %v2052_v38  ;;  %v8236_v26 = vmul.f32 -1.442695, %v11246_v25  ;;  %v1228_v62 = vsel %vm11445_vm10, %v11342_v19, %v1224_v45  ;;  %v518_v40 = vand.u32 15, %v454_v6  ;;  %10431 = vpow2.f32 %v11260_v41 }
  0x74   : > { %10290 = vmatpush.bf16.msrb.mxu3 %v11168_v30  ;;  %v1726_v16 = vrot.slane %v11429_v31, 7  ;;  %v1727_v32 = vrot.slane %v11432_v28, 7  ;;  %v15868_v30 = vand.u32 2147483648, %v11275_v47  ;;  %v1940_v63 = vsel %vm15717_vm1, %v15714_v49, %v1877_v17  ;;  %v9885_v47 = vld [vmem:[#allocation2 + $0x1c] sm:$0xf]  ;;  %v10430_v29 = vpop.eup %10429 }
  0x75   : > { %v2193_v53 = vpack.c.bf16 %v1940_v63, %v1940_v63  ;;  %v8268_v27 = vld [vmem:[#allocation2 + $0x24] sm:$0xf0]  ;;  %v15872_v0 = vand.u32 15, %v11217_v57  ;;  %v15873_v19 = vmov 0  ;;  %vm1240_vm6 = vweird.f32 %v11348_v18 }
  0x76   : > { %v1232_v7 = vor.u32 1.1754944e-38, %v15868_v30  ;;  %v1743_v44 = vsel %vm15869_vm11, %v15715_v46, %v1726_v16  ;;  %v1742_v35 = vsel %vm15871_vm13, %v1726_v16, %v1727_v32  ;;  %v11476_v3 = vor.u32 %v9885_v47, %v8268_v27 }
  0x77   : > { %v1866_v60 = vsel %vm11358_vm9, %v1743_v44, 0.0  ;;  %v2077_v37 = vpack.c.bf16 %v1742_v35, %v1742_v35  ;;  %2229 = vst [vmem:[#allocation2 + $0x20] sm:$0xf] %v2193_v53  ;;  %vm11486_vm0 = vcmp.ne.s32.totalorder %v15872_v0, 15  ;;  %10433 = vpow2.f32 %v8236_v26 }
  0x78   : > { %10291 = vmatpush.bf16.msrb.mxu3 %v11197_v48  ;;  %v2076_v52 = vpack.c.bf16 %v1866_v60, %v1866_v60  ;;  %v1233_v55 = vsel %vm1230_vm8, %v1232_v7, %v1228_v62  ;;  %v11482_v48 = vadd.f32 1.0, %v11294_v21  ;;  %v15874_v19 = vsel %vm11486_vm0, 4294967295, %v15873_v19  ;;  %2925 = vmatmul.bf16.vlgmr.msra.gmra.mxu1 %v11476_v3 }
  0x79   : > { %v11479_v1 = vmul.f32 %v1233_v55, %v11180_v36  ;;  %2113 = vst [vmem:[#allocation2 + $0x144] sm:$0xf] %v2077_v37  ;;  %v1236_v21 = vmul.f32 %v10430_v29, %v11348_v18  ;;  %v1244_v11 = vand.u32 2147483647, %v11348_v18  ;;  %v9886_v14 = vld [vmem:[#allocation2 + $0x20] sm:$0xf0]  ;;  %vm1241_vm2 = vweird.f32 %v10430_v29  ;;  %v10432_v23 = vpop.eup %10431 }
  0x7a   : > { %2112 = vst [vmem:[#allocation2 + $0x138] sm:$0xf] %v2076_v52  ;;  %v8266_v36 = vld [vmem:[#allocation2 + $0x18] sm:$0xf]  ;;  %v1246_v24 = vand.u32 2147483648, %v11348_v18  ;;  %vm11499_vm14 = vcmp.ne.s32.totalorder %v518_v40, 0  ;;  %10435 = vrcp.f32 %v11482_v48  ;;  %vm11530_vm4 = vmor %vm1240_vm6, %vm1241_vm2  ;;  %v999_v55 = vmul.f32 %v11138_v12, %v422_v56 }
  0x7b   : > { %15875 = vst [vmem:[#allocation24_spill] sm:$0xff] %v15874_v19  ;;  %v1878_v41 = vrot.slane %v11479_v1, 1  ;;  %v2125_v57 = vpack.c.bf16 %v11479_v1, %v11479_v1  ;;  %v15876_v43 = vmov 0  ;;  %v11505_v38 = vor.u32 %v9886_v14, %v8266_v36 }
  0x7c   : > { %10292 = vmatpush.bf16.msrb.mxu3 %v11220_v59  ;;  %v15877_v43 = vsel %vm11499_vm14, 4294967295, %v15876_v43  ;;  %v1704_v59 = vrot.slane %v11479_v1, 7  ;;  %v1237_v16 = vsub.f32 1.0, %v1236_v21  ;;  %v478_v7 = vadd.s32 224, %v11189_v42 }
  0x7d   : > { %15878 = vst [vmem:[#allocation25_spill] sm:$0xff] %v15877_v43  ;;  %v1939_v58 = vsel %vm15717_vm1, %v1877_v17, %v1878_v41  ;;  %2836 = vmatmul.bf16.vlgmr.msra.gmra.mxu0 %v11505_v38  ;;  %v11524_v45 = vadd.f32 1.0, %v10432_v23  ;;  %v10434_v63 = vpop.eup %10433  ;;  %v1589_v60 = vand.u32 2147483647, %v11482_v48  ;;  %v11536_v53 = vadd.s32 40, %v11189_v42 }
  0x7e   : > { %2159 = vst [vmem:[#allocation2 + $0x34] sm:$0xf] %v2125_v57  ;;  %v2017_v33 = vsel %vm11486_vm0, %v1939_v58, 0.0  ;;  %v1765_v30 = vsel %vm15879_vm3, %v1703_v15, %v1704_v59  ;;  %v1238_v6 = vmul.f32 %v10430_v29, %v1237_v16  ;;  %vm1245_vm15 = vcmp.eq.f32.partialorder %v1244_v11, 8.507059e+37  ;;  %v445_v58 = vld [vmem:[%s11104_s23 + $0xe0] sm:$0xff] }
  0x7f   : > { %v2194_v17 = vpack.c.bf16 %v2017_v33, %v2017_v33  ;;  %v1844_v44 = vsel %vm11499_vm14, %v1765_v30, 0.0  ;;  %v1591_v52 = vand.u32 2147483648, %v11482_v48  ;;  %10437 = vrcp.f32 %v11524_v45  ;;  %v8274_v16 = vld [vmem:[#allocation2 + $0x20] sm:$0xf] }
  0x80   : > { %10293 = vmatpush.bf16.msrb.mxu3 %v11240_v20  ;;  %v1247_v20 = vor.u32 1.1754944e-38, %v1246_v24  ;;  %v2054_v15 = vpack.c.bf16 %v1844_v44, %v1844_v44  ;;  %v9922_v26 = vld [vmem:[#allocation2 + $0x140] sm:$0xf0]  ;;  %v1239_v47 = vadd.f32 %v10430_v29, %v1238_v6  ;;  %v10436_v18 = vpop.eup %10435  ;;  %v1604_v62 = vand.u32 2147483647, %v11524_v45 }
  0x81   : > { %v8410_v35 = vld [vmem:[#allocation2 + $0x138] sm:$0xf]  ;;  %2230 = vst [vmem:[#allocation2 + $0x2c] sm:$0xf] %v2194_v17  ;;  %v11543_v27 = vadd.f32 1.0, %v10434_v63  ;;  %v686_v0 = vand.u32 15, %v478_v7  ;;  %v1581_v36 = vmul.f32 %v10436_v18, %v11482_v48  ;;  %vm1585_vm5 = vweird.f32 %v11482_v48 }
  0x82   : > { %v11540_v37 = vor.u32 %v9922_v26, %v8410_v35  ;;  %2090 = vst [vmem:[#allocation2 + $0x30] sm:$0xf] %v2054_v15  ;;  %v1243_v40 = vsel %vm11530_vm4, %v10430_v29, %v1239_v47  ;;  %v1606_v21 = vand.u32 2147483648, %v11524_v45  ;;  %v525_v57 = vand.u32 15, %v11536_v53  ;;  %v447_v53 = vld [vmem:[%s11104_s23 + $0xf0] sm:$0xff] }
  0x83   : > { %v1248_v11 = vsel %vm1245_vm15, %v1247_v20, %v1243_v40  ;;  %10439 = vrcp.f32 %v11543_v27  ;;  %v1582_v24 = vsub.f32 1.0, %v1581_v36  ;;  %vm1586_vm7 = vweird.f32 %v10436_v18  ;;  %v446_v40 = vld [vmem:[%s11104_s23 + $0xe8] sm:$0xff] }
  0x84   : > { %15882 = vst [vmem:[#allocation26_spill] sm:$0xff] %v11540_v37  ;;  %2896 = vmatmul.bf16.vlgmr.msra.gmra.mxu3 %v11540_v37  ;;  %v11555_v14 = vmul.f32 %v1248_v11, %v11203_v51  ;;  %vm11557_vm10 = vcmp.eq.f32.partialorder %v1589_v60, 8.507059e+37  ;;  %v1592_v23 = vor.u32 1.1754944e-38, %v1591_v52  ;;  %vm1600_vm11 = vweird.f32 %v11524_v45  ;;  %vm11581_vm6 = vmor %vm1585_vm5, %vm1586_vm7 }
  0x85   : > { %10294 = vmatpush.bf16.msra.mxu3 %v11120_v2  ;;  %vm11564_vm8 = vcmp.eq.f32.partialorder %v1604_v62, 8.507059e+37  ;;  %v11569_v51 = vadd.f32 %v11143_v13, %v999_v55  ;;  %v10438_v30 = vpop.eup %10437  ;;  %vm11574_vm13 = vcmp.ne.s32.totalorder %v686_v0, 0  ;;  %v15887_v6 = vmov 0  ;;  %v9888_v29 = vld [vmem:[#allocation2 + $0x34] sm:$0xf] }
  0x86   : > { %v2126_v7 = vpack.c.bf16 %v11555_v14, %v11555_v14  ;;  %v1705_v17 = vrot.slane %v11555_v14, 7  ;;  %v15888_v6 = vsel %vm11574_vm13, 4294967295, %v15887_v6  ;;  %v1583_v2 = vmul.f32 %v10436_v18, %v1582_v24 }
  0x87   : > { %15889 = vst [vmem:[#allocation27_spill] sm:$0xff] %v15888_v6  ;;  %v1607_v44 = vor.u32 1.1754944e-38, %v1606_v21  ;;  %v1596_v35 = vmul.f32 %v10438_v30, %v11524_v45  ;;  %vm1255_vm2 = vweird.f32 %v11543_v27  ;;  %v1879_v4 = vrot.slane %v11555_v14, 1  ;;  %v423_v21 = vld [vmem:[%s11104_s23 + $0x30] sm:$0xff] }
  0x88   : > { %v9887_v56 = vld [vmem:[#allocation2 + $0x28] sm:$0xf0]  ;;  %v1022_v20 = vmul.f32 %v11138_v12, %v445_v58  ;;  %2160 = vst [vmem:[#allocation2 + $0x40] sm:$0xf] %v2126_v7  ;;  %v1764_v48 = vsel %vm15879_vm3, %v1704_v59, %v1705_v17  ;;  %v1584_v60 = vadd.f32 %v10436_v18, %v1583_v2  ;;  %v8237_v26 = vmul.f32 -1.442695, %v11569_v51 }
  0x89   : > { %v11589_v15 = vor.u32 %v9887_v56, %v8274_v16  ;;  %10295 = vmatpush.bf16.msra.mxu3 %v11126_v5  ;;  %v10440_v47 = vpop.eup %10439  ;;  %v2055_v52 = vpack.c.bf16 %v1764_v48, %v1764_v48  ;;  %v1597_v62 = vsub.f32 1.0, %v1596_v35  ;;  %vm1601_vm4 = vweird.f32 %v10438_v30 }
  0x8a   : > { %v1938_v55 = vsel %vm15717_vm1, %v1878_v41, %v1879_v4  ;;  %v1588_v59 = vsel %vm11581_vm6, %v10436_v18, %v1584_v60  ;;  %v1251_v0 = vmul.f32 %v10440_v47, %v11543_v27  ;;  %v1259_v5 = vand.u32 2147483647, %v11543_v27  ;;  %vm11617_vm15 = vmor %vm1600_vm11, %vm1601_vm4 }
  0x8b   : > { %3014 = vmatmul.bf16.vlgmr.msra.gmra.mxu2 %v11589_v15  ;;  %v2195_v36 = vpack.c.bf16 %v1938_v55, %v1938_v55  ;;  %2091 = vst [vmem:[#allocation2 + $0x3c] sm:$0xf] %v2055_v52  ;;  %v1593_v11 = vsel %vm11557_vm10, %v1592_v23, %v1588_v59  ;;  %v1598_v1 = vmul.f32 %v10438_v30, %v1597_v62  ;;  %v1261_v24 = vand.u32 2147483648, %v11543_v27  ;;  %v8278_v55 = vld [vmem:[#allocation2 + $0x30] sm:$0xf]  ;;  %vm15898_vm11 = vmmov %vm15879_vm3 }
  0x8c   : > { %10441 = vpow2.f32 %v8237_v26  ;;  %v11622_v18 = vmul.f32 %v1593_v11, %v11208_v54  ;;  %v1252_v58 = vsub.f32 1.0, %v1251_v0  ;;  %vm1256_vm5 = vweird.f32 %v10440_v47  ;;  %v424_v11 = vld [vmem:[%s11104_s23 + $0x38] sm:$0xff] }
  0x8d   : > { %2231 = vst [vmem:[#allocation2 + $0x38] sm:$0xf] %v2195_v36  ;;  %v1023_v16 = vmul.f32 %v11138_v12, %v446_v40  ;;  %10296 = vmatpush.bf16.msra.mxu3 %v11132_v8  ;;  %v1599_v23 = vadd.f32 %v10438_v30, %v1598_v1  ;;  %v456_v7 = vadd.s32 48, %v11189_v42  ;;  %v11628_v45 = vadd.f32 %v11143_v13, %v1022_v20  ;;  %vm11644_vm10 = vmor %vm1255_vm2, %vm1256_vm5 }
  0x8e   : > { %v1000_v2 = vmul.f32 %v11138_v12, %v423_v21  ;;  %v1728_v56 = vrot.slane %v11622_v18, 7  ;;  %v1253_v54 = vmul.f32 %v10440_v47, %v1252_v58  ;;  %vm11632_vm7 = vcmp.eq.f32.partialorder %v1259_v5, 8.507059e+37 }
  0x8f   : > { %v11637_v35 = vadd.f32 %v11143_v13, %v1023_v16  ;;  %v8280_v8 = vld [vmem:[#allocation2 + $0x3c] sm:$0xf0]  ;;  %v1603_v48 = vsel %vm11617_vm15, %v10438_v30, %v1599_v23  ;;  %v1262_v60 = vor.u32 1.1754944e-38, %v1261_v24  ;;  %v8260_v26 = vmul.f32 -1.442695, %v11628_v45 }
  0x90   : > { %v11650_v52 = vadd.f32 %v11143_v13, %v1000_v2  ;;  %v11652_v62 = vor.u32 %v9888_v29, %v8280_v8  ;;  %v1608_v30 = vsel %vm11564_vm8, %v1607_v44, %v1603_v48  ;;  %v1741_v27 = vsel %vm15898_vm11, %v1727_v32, %v1728_v56  ;;  %vm15899_vm8 = vmmov %vm15879_vm3 }
  0x91   : > { %v1254_v40 = vadd.f32 %v10440_v47, %v1253_v54  ;;  %10297 = vmatpush.bf16.msra.mxu3 %v11154_v22  ;;  %v11662_v0 = vmul.f32 %v1608_v30, %v11232_v10  ;;  %v1868_v5 = vsel %vm11574_vm13, %v1741_v27, 0.0  ;;  %10443 = vpow2.f32 %v8260_v26  ;;  %v15906_v26 = vld [vmem:[#allocation19_spill] sm:$0xff] }
  0x92   : > { %v10442_v59 = vpop.eup %10441  ;;  %v8261_v33 = vmul.f32 -1.442695, %v11637_v35  ;;  %2930 = vmatmul.bf16.gmra.mxu1 %v11652_v62  ;;  %v9889_v44 = vld [vmem:[#allocation2 + $0x38] sm:$0xf0]  ;;  %v2078_v36 = vpack.c.bf16 %v1868_v5, %v1868_v5  ;;  %v532_v22 = vand.u32 15, %v456_v7  ;;  %v11692_v16 = vadd.s32 56, %v11189_v42 }
  0x93   : > { %v1258_v32 = vsel %vm11644_vm10, %v10440_v47, %v1254_v40  ;;  %v11670_v21 = vadd.f32 1.0, %v10442_v59  ;;  %v11673_v1 = vor.u32 %v9889_v44, %v8278_v55  ;;  %v15716_v10 = vrot.slane %v11662_v0, 7 }
  0x94   : > { %v1263_v24 = vsel %vm11632_vm7, %v1262_v60, %v1258_v32  ;;  %10445 = vpow2.f32 %v8261_v33  ;;  %2114 = vst [vmem:[#allocation2 + $0x150] sm:$0xf] %v2078_v36  ;;  %v11683_v47 = vadd.s32 240, %v11189_v42  ;;  %v1001_v29 = vmul.f32 %v11138_v12, %v424_v11  ;;  %v448_v32 = vld [vmem:[%s11104_s23 + $0xf8] sm:$0xff] }
  0x95   : > { %v11679_v41 = vmul.f32 %v1263_v24, %v11246_v25  ;;  %10447 = vrcp.f32 %v11670_v21  ;;  %10298 = vmatpush.bf16.msra.mxu3 %v11185_v39  ;;  %2841 = vmatmul.bf16.gmra.mxu0 %v11673_v1  ;;  %v1740_v58 = vsel %vm15899_vm8, %v1728_v56, %v15716_v10  ;;  %v8238_v25 = vmul.f32 -1.442695, %v11650_v52 }
  0x96   : > { %v2079_v23 = vpack.c.bf16 %v1740_v58, %v1740_v58  ;;  %vm11698_vm6 = vcmp.ne.s32.totalorder %v525_v57, 15  ;;  %v15900_v7 = vmov 0  ;;  %vm11705_vm2 = vcmp.ne.s32.totalorder %v532_v22, 0  ;;  %v425_v58 = vld [vmem:[%s11104_s23 + $0x40] sm:$0xff] }
  0x97   : > { %v15901_v7 = vsel %vm11698_vm6, 4294967295, %v15900_v7  ;;  %v1880_v39 = vrot.slane %v11679_v41, 1  ;;  %v2127_v2 = vpack.c.bf16 %v11679_v41, %v11679_v41  ;;  %v10444_v56 = vpop.eup %10443  ;;  %v15903_v54 = vmov 0 }
  0x98   : > { %15902 = vst [vmem:[#allocation28_spill] sm:$0xff] %v15901_v7  ;;  %v15904_v54 = vsel %vm11705_vm2, 4294967295, %v15903_v54  ;;  %v1706_v63 = vrot.slane %v11679_v41, 7  ;;  %10449 = vpow2.f32 %v8238_v25  ;;  %v11711_v8 = vadd.f32 %v11143_v13, %v1001_v29  ;;  %v15909_v25 = vld [vmem:[#allocation20_spill] sm:$0xff] }
  0x99   : > { %15905 = vst [vmem:[#allocation29_spill] sm:$0xff] %v15904_v54  ;;  %v1937_v57 = vsel %vm15717_vm1, %v1879_v4, %v1880_v39  ;;  %v1274_v48 = vand.u32 2147483647, %v11670_v21  ;;  %v700_v20 = vand.u32 15, %v11683_v47  ;;  %v11722_v60 = vadd.f32 1.0, %v10444_v56  ;;  %10299 = vmatpush.bf16.msra.mxu3 %v15906_v26 }
  0x9a   : > { %2115 = vst [vmem:[#allocation2 + $0x15c] sm:$0xf] %v2079_v23  ;;  %v10446_v55 = vpop.eup %10445  ;;  %v2019_v30 = vsel %vm11698_vm6, %v1937_v57, 0.0  ;;  %v1763_v4 = vsel %vm15879_vm3, %v1705_v17, %v1706_v63  ;;  %v539_v27 = vand.u32 15, %v11692_v16  ;;  %v8239_v40 = vmul.f32 -1.442695, %v11711_v8 }
  0x9b   : > { %2161 = vst [vmem:[#allocation2 + $0x4c] sm:$0xf] %v2127_v2  ;;  %v10448_v59 = vpop.eup %10447  ;;  %v2196_v5 = vpack.c.bf16 %v2019_v30, %v2019_v30  ;;  %v1846_v33 = vsel %vm11705_vm2, %v1763_v4, 0.0  ;;  %v11737_v44 = vadd.f32 1.0, %v10446_v55  ;;  %10451 = vrcp.f32 %v11722_v60  ;;  %v8422_v23 = vld [vmem:[#allocation2 + $0x150] sm:$0xf] }
  0x9c   : > { %v1266_v36 = vmul.f32 %v10448_v59, %v11670_v21  ;;  %vm1270_vm4 = vweird.f32 %v11670_v21  ;;  %v1276_v14 = vand.u32 2147483648, %v11670_v21  ;;  %v2056_v17 = vpack.c.bf16 %v1846_v33, %v1846_v33 }
  0x9d   : > { %2232 = vst [vmem:[#allocation2 + $0x44] sm:$0xf] %v2196_v5  ;;  %vm11744_vm15 = vcmp.eq.f32.partialorder %v1274_v48, 8.507059e+37  ;;  %v1619_v11 = vand.u32 2147483647, %v11722_v60  ;;  %10453 = vrcp.f32 %v11737_v44  ;;  %v1024_v24 = vmul.f32 %v11138_v12, %v447_v53  ;;  %10300 = vmatpush.bf16.msra.mxu3 %v15909_v25 }
  0x9e   : > { %v10450_v29 = vpop.eup %10449  ;;  %v1267_v2 = vsub.f32 1.0, %v1266_v36  ;;  %vm1271_vm5 = vweird.f32 %v10448_v59  ;;  %2092 = vst [vmem:[#allocation2 + $0x48] sm:$0xf] %v2056_v17  ;;  %v1621_v56 = vand.u32 2147483648, %v11722_v60  ;;  %10455 = vpow2.f32 %v8239_v40 }
  0x9f   : > { %v1634_v57 = vand.u32 2147483647, %v11737_v44  ;;  %v1636_v48 = vand.u32 2147483648, %v11737_v44  ;;  %v11756_v26 = vadd.f32 1.0, %v10450_v29  ;;  %v1025_v55 = vmul.f32 %v11138_v12, %v448_v32  ;;  %vm11768_vm10 = vmor %vm1270_vm4, %vm1271_vm5 }
  0xa0   : > { %v1268_v30 = vmul.f32 %v10448_v59, %v1267_v2  ;;  %v1277_v4 = vor.u32 1.1754944e-38, %v1276_v14  ;;  %vm1615_vm7 = vweird.f32 %v11722_v60  ;;  %v11761_v5 = vmul.f32 %v11138_v12, %v425_v58  ;;  %v15915_v12 = vld [vmem:[#allocation21_spill] sm:$0xff] }
  0xa1   : > { %v9925_v53 = vld [vmem:[#allocation2 + $0x158] sm:$0xf0]  ;;  %v10452_v33 = vpop.eup %10451  ;;  %vm11772_vm11 = vcmp.eq.f32.partialorder %v1619_v11, 8.507059e+37  ;;  %vm1630_vm8 = vweird.f32 %v11737_v44  ;;  %10457 = vrcp.f32 %v11756_v26  ;;  %10301 = vmatpush.bf16.msra.mxu3 %v15915_v12  ;;  %v8286_v14 = vld [vmem:[#allocation2 + $0x38] sm:$0xf]  ;;  %v1622_v25 = vor.u32 1.1754944e-38, %v1621_v56 }
  0xa2   : > { %v11763_v36 = vor.u32 %v9925_v53, %v8422_v23  ;;  %v1269_v32 = vadd.f32 %v10448_v59, %v1268_v30  ;;  %v1611_v58 = vmul.f32 %v10452_v33, %v11722_v60  ;;  %v11781_v21 = vadd.f32 %v11143_v13, %v1024_v24  ;;  %v11928_v11 = vld [vmem:[%s15703_s2] ss:$0 sm:$0xff] }
  0xa3   : > { %v10454_v29 = vpop.eup %10453  ;;  %vm11784_vm3 = vcmp.eq.f32.partialorder %v1634_v57, 8.507059e+37  ;;  %v1637_v23 = vor.u32 1.1754944e-38, %v1636_v48  ;;  %v1289_v2 = vand.u32 2147483647, %v11756_v26  ;;  %v11790_v53 = vadd.f32 %v11143_v13, %v1025_v55  ;;  %v9944_v48 = vld [vmem:[#allocation9 + $0x70] sm:$0xff] }
  0xa4   : > { %15910 = vst [vmem:[#allocation19_spill] sm:$0xff] %v11763_v36  ;;  %2901 = vmatmul.bf16.gmra.mxu3 %v11763_v36  ;;  %v10456_v30 = vpop.eup %10455  ;;  %v9890_v12 = vld [vmem:[#allocation2 + $0x40] sm:$0xf0]  ;;  %v1273_v56 = vsel %vm11768_vm10, %v10448_v59, %v1269_v32  ;;  %v1612_v24 = vsub.f32 1.0, %v1611_v58  ;;  %vm1616_vm4 = vweird.f32 %v10452_v33  ;;  %v1626_v49 = vmul.f32 %v10454_v29, %v11737_v44  ;;  %3345 = vmatpush.bf16.msrb.mxu0 %v9944_v48 }
  0xa5   : > { %v11795_v46 = vor.u32 %v9890_v12, %v8286_v14  ;;  %v1278_v57 = vsel %vm11744_vm15, %v1277_v4, %v1273_v56  ;;  %v11800_v10 = vadd.f32 1.0, %v10456_v30  ;;  %vm11807_vm10 = vcmp.ne.s32.totalorder %v700_v20, 0  ;;  %vm11816_vm15 = vmor %vm1615_vm7, %vm1616_vm4 }
  0xa6   : > { %v11803_v13 = vmul.f32 %v1278_v57, %v11569_v51  ;;  %v15918_v59 = vmov 0  ;;  %v1613_v55 = vmul.f32 %v10452_v33, %v1612_v24  ;;  %v1627_v40 = vsub.f32 1.0, %v1626_v49 }
  0xa7   : > { %v15919_v59 = vsel %vm11807_vm10, 4294967295, %v15918_v59  ;;  %vm1631_vm1 = vweird.f32 %v10454_v29  ;;  %v11811_v14 = vpop.eup %10457  ;;  %3019 = vmatmul.bf16.gmra.mxu2 %v11795_v46  ;;  %vm11820_vm5 = vcmp.eq.f32.partialorder %v1289_v2, 8.507059e+37  ;;  %v1291_v47 = vand.u32 2147483648, %v11756_v26 }
  0xa8   : > { %15920 = vst [vmem:[#allocation20_spill] sm:$0xff] %v15919_v59  ;;  %10459 = vrcp.f32 %v11800_v10  ;;  %v11827_v49 = vadd.s32 64, %v11189_v42  ;;  %v2128_v20 = vpack.c.bf16 %v11803_v13, %v11803_v13  ;;  %v1707_v60 = vrot.slane %v11803_v13, 7  ;;  %vm11834_vm7 = vmor %vm1630_vm8, %vm1631_vm1 }
  0xa9   : > { %v1614_v4 = vadd.f32 %v10452_v33, %v1613_v55  ;;  %v1628_v32 = vmul.f32 %v10454_v29, %v1627_v40  ;;  %v1281_v2 = vmul.f32 %v11811_v14, %v11756_v26  ;;  %v1881_v30 = vrot.slane %v11803_v13, 1 }
  0xaa   : > { %v11842_v12 = vadd.s32 256, %v11189_v42  ;;  %v8262_v56 = vmul.f32 -1.442695, %v11781_v21  ;;  %2162 = vst [vmem:[#allocation2 + $0x58] sm:$0xf] %v2128_v20  ;;  %vm15927_vm1 = vcmp.lt.s32.totalorder %v11189_v42, 1  ;;  %vm1286_vm8 = vweird.f32 %v11811_v14 }
  0xab   : > { %v1762_v44 = vsel %vm15927_vm1, %v1706_v63, %v1707_v60  ;;  %v1618_v24 = vsel %vm11816_vm15, %v10452_v33, %v1614_v4  ;;  %v1629_v57 = vadd.f32 %v10454_v29, %v1628_v32  ;;  %v1282_v40 = vsub.f32 1.0, %v1281_v2 }
  0xac   : > { %v2057_v48 = vpack.c.bf16 %v1762_v44, %v1762_v44  ;;  %v1623_v55 = vsel %vm11772_vm11, %v1622_v25, %v1618_v24  ;;  %vm15928_vm4 = vcmp.lt.s32.totalorder %v11189_v42, 7  ;;  %v1304_v4 = vand.u32 2147483647, %v11800_v10 }
  0xad   : > { %v1936_v20 = vsel %vm15928_vm4, %v1880_v39, %v1881_v30  ;;  %v1633_v63 = vsel %vm11834_vm7, %v10454_v29, %v1629_v57  ;;  %v11865_v33 = vmul.f32 %v1623_v55, %v11628_v45  ;;  %vm11874_vm11 = vcmp.ne.s32.totalorder %v539_v27, 15 }
  0xae   : > { %v2197_v22 = vpack.c.bf16 %v1936_v20, %v1936_v20  ;;  %v11868_v32 = vpop.eup %10459  ;;  %2093 = vst [vmem:[#allocation2 + $0x54] sm:$0xf] %v2057_v48  ;;  %v1638_v17 = vsel %vm11784_vm3, %v1637_v23, %v1633_v63  ;;  %v15929_v41 = vmov 0  ;;  %v1283_v39 = vmul.f32 %v11811_v14, %v1282_v40  ;;  %v9891_v23 = vld [vmem:[#allocation2 + $0x4c] sm:$0xf] }
  0xaf   : > { %v15930_v41 = vsel %vm11874_vm11, 4294967295, %v15929_v41  ;;  %v1292_v25 = vor.u32 1.1754944e-38, %v1291_v47  ;;  %10461 = vpow2.f32 %v8262_v56  ;;  %v11880_v45 = vmul.f32 %v1638_v17, %v11637_v35  ;;  %v8290_v40 = vld [vmem:[#allocation2 + $0x48] sm:$0xf] }
  0xb0   : > { %15931 = vst [vmem:[#allocation21_spill] sm:$0xff] %v15930_v41  ;;  %v1730_v29 = vrot.slane %v11865_v33, 7  ;;  %vm15932_vm15 = vweird.f32 %v11756_v26  ;;  %v1296_v16 = vmul.f32 %v11868_v32, %v11800_v10  ;;  %v546_v27 = vand.u32 15, %v11827_v49  ;;  %v431_v41 = vld [vmem:[%s11104_s23 + $0x70] sm:$0xff] }
  0xb1   : > { %vm11887_vm3 = vmor %vm15932_vm15, %vm1286_vm8  ;;  %2233 = vst [vmem:[#allocation2 + $0x50] sm:$0xf] %v2197_v22  ;;  %v1284_v35 = vadd.f32 %v11811_v14, %v1283_v39  ;;  %vm1300_vm7 = vweird.f32 %v11800_v10  ;;  %v1306_v47 = vand.u32 2147483648, %v11800_v10  ;;  %v8263_v58 = vmul.f32 -1.442695, %v11790_v53 }
  0xb2   : > { %v15719_v26 = vrot.slane %v11880_v45, 7  ;;  %v15935_v2 = vrot.slane %v11662_v0, 7  ;;  %v1297_v44 = vsub.f32 1.0, %v1296_v16  ;;  %vm11903_vm8 = vcmp.eq.f32.partialorder %v1304_v4, 8.507059e+37  ;;  %v8292_v49 = vld [vmem:[#allocation2 + $0x54] sm:$0xf0]  ;;  %vm15938_vm15 = vmmov %vm15927_vm1 }
  0xb3   : > { %v1288_v48 = vsel %vm11887_vm3, %v11811_v14, %v1284_v35  ;;  %vm1301_vm4 = vweird.f32 %v11868_v32  ;;  %10463 = vpow2.f32 %v8263_v58  ;;  %v11913_v55 = vor.u32 %v9891_v23, %v8292_v49  ;;  %v427_v23 = vld [vmem:[%s11104_s23 + $0x50] sm:$0xff] }
  0xb4   : > { %v1739_v56 = vsel %vm15927_vm1, %v15935_v2, %v1730_v29  ;;  %v1738_v20 = vsel %vm15938_vm15, %v1730_v29, %v15719_v26  ;;  %v1293_v22 = vsel %vm11820_vm5, %v1292_v25, %v1288_v48  ;;  %v1298_v14 = vmul.f32 %v11868_v32, %v1297_v44  ;;  %v426_v29 = vld [vmem:[%s11104_s23 + $0x48] sm:$0xff]  ;;  %vm11941_vm5 = vmor %vm1300_vm7, %vm1301_vm4 }
  0xb5   : > { %v1870_v57 = vsel %vm11807_vm10, %v1739_v56, 0.0  ;;  %v10462_v4 = vpop.eup %10461  ;;  %v2081_v17 = vpack.c.bf16 %v1738_v20, %v1738_v20  ;;  %v11922_v39 = vmul.f32 %v1293_v22, %v11650_v52  ;;  %v11932_v16 = vadd.f32 %v11928_v11, %v11761_v5  ;;  %2935 = vmatmul.bf16.gmra.mxu1 %v11913_v55  ;;  %v9892_v51 = vld [vmem:[#allocation2 + $0x50] sm:$0xf0]  ;;  %vm15946_vm4 = vmmov %vm15927_vm1 }
  0xb6   : > { %v2080_v63 = vpack.c.bf16 %v1870_v57, %v1870_v57  ;;  %v1307_v25 = vor.u32 1.1754944e-38, %v1306_v47  ;;  %v11945_v35 = vadd.f32 1.0, %v10462_v4  ;;  %v11947_v58 = vor.u32 %v9892_v51, %v8290_v40  ;;  %v11959_v47 = vld [vmem:[#allocation7] ss:$0 sm:$0xff] }
  0xb7   : > { %2117 = vst [vmem:[#allocation2 + $0x174] sm:$0xf] %v2081_v17  ;;  %v1882_v5 = vrot.slane %v11922_v39, 1  ;;  %v1299_v2 = vadd.f32 %v11868_v32, %v1298_v14  ;;  %v2129_v56 = vpack.c.bf16 %v11922_v39, %v11922_v39  ;;  %vm11953_vm3 = vcmp.ne.s32.totalorder %v546_v27, 0 }
  0xb8   : > { %2116 = vst [vmem:[#allocation2 + $0x168] sm:$0xf] %v2080_v63  ;;  %v15941_v44 = vmov 0  ;;  %v1708_v10 = vrot.slane %v11922_v39, 7  ;;  %10465 = vrcp.f32 %v11945_v35  ;;  %v1003_v49 = vmul.f32 %v11959_v47, %v426_v29  ;;  %2846 = vmatmul.bf16.gmra.mxu0 %v11947_v58  ;;  %v428_v29 = vld [vmem:[%s11104_s23 + $0x58] sm:$0xff] }
  0xb9   : > { %v15942_v44 = vsel %vm11953_vm3, 4294967295, %v15941_v44  ;;  %v10464_v57 = vpop.eup %10463  ;;  %vm15944_vm7 = vcmp.lt.s32.totalorder %v11189_v42, 7  ;;  %v1303_v48 = vsel %vm11941_vm5, %v11868_v32, %v1299_v2  ;;  %2163 = vst [vmem:[#allocation2 + $0x64] sm:$0xf] %v2129_v56  ;;  %v8240_v40 = vmul.f32 -1.442695, %v11932_v16 }
  0xba   : > { %15943 = vst [vmem:[#allocation30_spill] sm:$0xff] %v15942_v44  ;;  %v1935_v27 = vsel %vm15944_vm7, %v1881_v30, %v1882_v5  ;;  %v1004_v20 = vmul.f32 %v11959_v47, %v427_v23  ;;  %v1308_v22 = vsel %vm11903_vm8, %v1307_v25, %v1303_v48  ;;  %v1761_v30 = vsel %vm15927_vm1, %v1707_v60, %v1708_v10  ;;  %vm15949_vm1 = vmmov %vm15944_vm7 }
  0xbb   : > { %v2021_v63 = vsel %vm11874_vm11, %v1935_v27, 0.0  ;;  %v11980_v4 = vadd.f32 1.0, %v10464_v57  ;;  %v11983_v32 = vmul.f32 %v1308_v22, %v11711_v8  ;;  %v1848_v39 = vsel %vm11953_vm3, %v1761_v30, 0.0 }
  0xbc   : > { %v2198_v17 = vpack.c.bf16 %v2021_v63, %v2021_v63  ;;  %v1649_v14 = vand.u32 2147483647, %v11945_v35  ;;  %v2058_v23 = vpack.c.bf16 %v1848_v39, %v1848_v39  ;;  %v714_v24 = vand.u32 15, %v11842_v12 }
  0xbd   : > { %v1651_v13 = vand.u32 2147483648, %v11945_v35  ;;  %10467 = vrcp.f32 %v11980_v4  ;;  %v2130_v51 = vpack.c.bf16 %v11983_v32, %v11983_v32  ;;  %v15718_v8 = vrot.slane %v11983_v32, 7 }
  0xbe   : > { %2234 = vst [vmem:[#allocation2 + $0x5c] sm:$0xf] %v2198_v17  ;;  %v11996_v52 = vadd.s32 72, %v11189_v42  ;;  %10469 = vpow2.f32 %v8240_v40  ;;  %v10466_v25 = vpop.eup %10465  ;;  %v9928_v2 = vld [vmem:[#allocation2 + $0x170] sm:$0xf0]  ;;  %vm1645_vm8 = vweird.f32 %v11945_v35  ;;  %v12000_v12 = vadd.f32 %v11928_v11, %v1003_v49  ;;  %v429_v49 = vld [vmem:[%s11104_s23 + $0x60] sm:$0xff] }
  0xbf   : > { %v8434_v60 = vld [vmem:[#allocation2 + $0x168] sm:$0xf]  ;;  %2094 = vst [vmem:[#allocation2 + $0x60] sm:$0xf] %v2058_v23  ;;  %v12003_v56 = vadd.f32 %v11928_v11, %v1004_v20  ;;  %v1005_v57 = vmul.f32 %v11959_v47, %v428_v29  ;;  %v1760_v48 = vsel %vm15946_vm4, %v1708_v10, %v15718_v8  ;;  %v1641_v40 = vmul.f32 %v10466_v25, %v11945_v35  ;;  %v8298_v23 = vld [vmem:[#allocation2 + $0x50] sm:$0xf] }
  0xc0   : > { %v12006_v27 = vor.u32 %v9928_v2, %v8434_v60  ;;  %2164 = vst [vmem:[#allocation2 + $0x70] sm:$0xf] %v2130_v51  ;;  %vm12013_vm15 = vcmp.eq.f32.partialorder %v1649_v14, 8.507059e+37  ;;  %v2059_v22 = vpack.c.bf16 %v1760_v48, %v1760_v48  ;;  %vm1646_vm5 = vweird.f32 %v10466_v25  ;;  %v9894_v48 = vld [vmem:[#allocation2 + $0x64] sm:$0xf] }
  0xc1   : > { %v1652_v20 = vor.u32 1.1754944e-38, %v1651_v13  ;;  %v15721_v30 = vrot.slane %v11983_v32, 1  ;;  %v1642_v17 = vsub.f32 1.0, %v1641_v40  ;;  %v8241_v39 = vmul.f32 -1.442695, %v12000_v12  ;;  %vm12037_vm4 = vmor %vm1645_vm8, %vm1646_vm5 }
  0xc2   : > { %15945 = vst [vmem:[#allocation31_spill] sm:$0xff] %v12006_v27  ;;  %2906 = vmatmul.bf16.gmra.mxu3 %v12006_v27  ;;  %v8242_v29 = vmul.f32 -1.442695, %v12003_v56  ;;  %v12023_v10 = vadd.f32 %v11928_v11, %v1005_v57  ;;  %v1666_v60 = vand.u32 2147483648, %v11980_v4  ;;  %v1006_v51 = vmul.f32 %v11959_v47, %v429_v49 }
  0xc3   : > { %v10468_v14 = vpop.eup %10467  ;;  %2095 = vst [vmem:[#allocation2 + $0x6c] sm:$0xf] %v2059_v22  ;;  %v1934_v13 = vsel %vm15949_vm1, %v1882_v5, %v15721_v30  ;;  %v1643_v40 = vmul.f32 %v10466_v25, %v1642_v17  ;;  %v1664_v8 = vand.u32 2147483647, %v11980_v4  ;;  %10471 = vpow2.f32 %v8241_v39 }
  0xc4   : > { %v10470_v2 = vpop.eup %10469  ;;  %v1656_v57 = vmul.f32 %v10468_v14, %v11980_v4  ;;  %v2199_v26 = vpack.c.bf16 %v1934_v13, %v1934_v13  ;;  %vm1661_vm7 = vweird.f32 %v10468_v14  ;;  %v8243_v49 = vmul.f32 -1.442695, %v12023_v10 }
  0xc5   : > { %v9893_v22 = vld [vmem:[#allocation2 + $0x58] sm:$0xf0]  ;;  %v12041_v5 = vadd.f32 1.0, %v10470_v2  ;;  %v1644_v30 = vadd.f32 %v10466_v25, %v1643_v40  ;;  %10473 = vpow2.f32 %v8242_v29  ;;  %vm12046_vm1 = vcmp.ne.s32.totalorder %v714_v24, 0 }
  0xc6   : > { %v12044_v17 = vor.u32 %v9893_v22, %v8298_v23  ;;  %v1657_v6 = vsub.f32 1.0, %v1656_v57  ;;  %2235 = vst [vmem:[#allocation2 + $0x68] sm:$0xf] %v2199_v26  ;;  %v15952_v34 = vmov 0  ;;  %v12052_v35 = vadd.f32 %v11928_v11, %v1006_v51  ;;  %v8302_v23 = vld [vmem:[#allocation2 + $0x60] sm:$0xf] }
  0xc7   : > { %v8304_v13 = vld [vmem:[#allocation2 + $0x6c] sm:$0xf0]  ;;  %v15953_v34 = vsel %vm12046_vm1, 4294967295, %v15952_v34  ;;  %10475 = vrcp.f32 %v12041_v5  ;;  %v1648_v2 = vsel %vm12037_vm4, %v10466_v25, %v1644_v30  ;;  %v1319_v29 = vand.u32 2147483647, %v12041_v5  ;;  %v430_v25 = vld [vmem:[%s11104_s23 + $0x68] sm:$0xff] }
  0xc8   : > { %15954 = vst [vmem:[#allocation32_spill] sm:$0xff] %v15953_v34  ;;  %3024 = vmatmul.bf16.gmra.mxu2 %v12044_v17  ;;  %v12055_v39 = vor.u32 %v9894_v48, %v8304_v13  ;;  %v1658_v26 = vmul.f32 %v10468_v14, %v1657_v6  ;;  %v1653_v24 = vsel %vm12013_vm15, %v1652_v20, %v1648_v2  ;;  %vm15956_vm8 = vweird.f32 %v11980_v4  ;;  %v9943_v4 = vld [vmem:[#allocation9 + $0x68] sm:$0xff] }
  0xc9   : > { %vm12065_vm5 = vmor %vm15956_vm8, %vm1661_vm7  ;;  %v1667_v40 = vor.u32 1.1754944e-38, %v1666_v60  ;;  %v553_v48 = vand.u32 15, %v11996_v52  ;;  %v1321_v57 = vand.u32 2147483648, %v12041_v5  ;;  %vm12072_vm4 = vcmp.eq.f32.partialorder %v1664_v8, 8.507059e+37  ;;  %v10472_v20 = vpop.eup %10471  ;;  %3346 = vmatpush.bf16.msrb.mxu0 %v9943_v4 }
  0xca   : > { %15955 = vst [vmem:[#allocation33_spill] sm:$0xff] %v12055_v39  ;;  %2940 = vmatmul.bf16.gmra.mxu1 %v12055_v39  ;;  %v9895_v6 = vld [vmem:[#allocation2 + $0x68] sm:$0xf0]  ;;  %v1659_v59 = vadd.f32 %v10468_v14, %v1658_v26  ;;  %v12077_v63 = vmul.f32 %v1653_v24, %v11781_v21  ;;  %10477 = vpow2.f32 %v8243_v49  ;;  %vm1315_vm15 = vweird.f32 %v12041_v5 }
  0xcb   : > { %v12079_v30 = vor.u32 %v9895_v6, %v8302_v23  ;;  %v460_v52 = vadd.s32 80, %v11189_v42  ;;  %v8244_v60 = vmul.f32 -1.442695, %v12052_v35  ;;  %v10474_v22 = vpop.eup %10473  ;;  %vm12087_vm7 = vcmp.eq.f32.partialorder %v1319_v29, 8.507059e+37 }
  0xcc   : > { %v1663_v8 = vsel %vm12065_vm5, %v10468_v14, %v1659_v59  ;;  %v1732_v13 = vrot.slane %v12077_v63, 7  ;;  %v12091_v49 = vadd.f32 1.0, %v10472_v20  ;;  %v1322_v26 = vor.u32 1.1754944e-38, %v1321_v57 }
  0xcd   : > { %15961 = vst [vmem:[#allocation34_spill] sm:$0xff] %v12079_v30  ;;  %v10476_v23 = vpop.eup %10475  ;;  %2851 = vmatmul.bf16.gmra.mxu0 %v12079_v30  ;;  %v1668_v2 = vsel %vm12072_vm4, %v1667_v40, %v1663_v8  ;;  %v12096_v24 = vadd.f32 1.0, %v10474_v22  ;;  %10479 = vpow2.f32 %v8244_v60  ;;  %v15965_v29 = vrot.slane %v11880_v45, 7 }
  0xce   : > { %v12099_v14 = vmul.f32 %v1668_v2, %v11790_v53  ;;  %vm15966_vm8 = vcmp.lt.s32.totalorder %v11189_v42, 1  ;;  %v1311_v6 = vmul.f32 %v10476_v23, %v12041_v5  ;;  %v12107_v59 = vadd.s32 88, %v11189_v42 }
  0xcf   : > { %v1737_v51 = vsel %vm15966_vm8, %v15965_v29, %v1732_v13  ;;  %vm1316_vm5 = vweird.f32 %v10476_v23  ;;  %10481 = vrcp.f32 %v12091_v49  ;;  %v560_v57 = vand.u32 15, %v460_v52  ;;  %vm15967_vm4 = vmmov %vm15966_vm8 }
  0xd0   : > { %15964 = vst [vmem:[#allocation35_spill] sm:$0xff] %v12099_v14  ;;  %v1872_v40 = vsel %vm12046_vm1, %v1737_v51, 0.0  ;;  %v10478_v53 = vpop.eup %10477  ;;  %v15732_v4 = vrot.slane %v12099_v14, 7  ;;  %v1312_v60 = vsub.f32 1.0, %v1311_v6  ;;  %v1334_v22 = vand.u32 2147483647, %v12091_v49  ;;  %vm12135_vm1 = vmor %vm1315_vm15, %vm1316_vm5 }
  0xd1   : > { %v2082_v20 = vpack.c.bf16 %v1872_v40, %v1872_v40  ;;  %v1336_v8 = vand.u32 2147483648, %v12091_v49  ;;  %v2147_v2 = vpack.c.bf16 %v11429_v31, %v11429_v31  ;;  %v2148_v29 = vpack.c.bf16 %v11432_v28, %v11432_v28 }
  0xd2   : > { %10483 = vrcp.f32 %v12096_v24  ;;  %v1736_v52 = vsel %vm15967_vm4, %v1732_v13, %v15732_v4  ;;  %vm12125_vm8 = vcmp.ne.s32.totalorder %v553_v48, 15  ;;  %v15968_v51 = vmov 0 }
  0xd3   : > { %2118 = vst [vmem:[#allocation2 + $0x180] sm:$0xf] %v2082_v20  ;;  %v15969_v51 = vsel %vm12125_vm8, 4294967295, %v15968_v51  ;;  %v1313_v6 = vmul.f32 %v10476_v23, %v1312_v60  ;;  %v567_v40 = vand.u32 15, %v12107_v59  ;;  %v1007_v34 = vmul.f32 %v11959_v47, %v430_v25  ;;  %v10480_v44 = vpop.eup %10479 }
  0xd4   : > { %15970 = vst [vmem:[#allocation36_spill] sm:$0xff] %v15969_v51  ;;  %v2083_v7 = vpack.c.bf16 %v1736_v52, %v1736_v52  ;;  %vm12139_vm4 = vcmp.ne.s32.totalorder %v560_v57, 0  ;;  %v15973_v48 = vmov 0  ;;  %v1349_v13 = vand.u32 2147483647, %v12096_v24 }
  0xd5   : > { %v15974_v48 = vsel %vm12139_vm4, 4294967295, %v15973_v48  ;;  %2181 = vst [vmem:[#allocation2 + $0x13c] sm:$0xf] %v2147_v2  ;;  %v12144_v59 = vadd.f32 1.0, %v10478_v53  ;;  %v1314_v25 = vadd.f32 %v10476_v23, %v1313_v6  ;;  %vm1330_vm10 = vweird.f32 %v12091_v49  ;;  %v10482_v60 = vpop.eup %10481 }
  0xd6   : > { %15975 = vst [vmem:[#allocation37_spill] sm:$0xff] %v15974_v48  ;;  %vm12147_vm13 = vcmp.eq.f32.partialorder %v1334_v22, 8.507059e+37  ;;  %v12151_v5 = vadd.f32 1.0, %v10480_v44  ;;  %v1337_v57 = vor.u32 1.1754944e-38, %v1336_v8  ;;  %v1351_v2 = vand.u32 2147483648, %v12096_v24 }
  0xd7   : > { %2182 = vst [vmem:[#allocation2 + $0x148] sm:$0xf] %v2148_v29  ;;  %10485 = vrcp.f32 %v12144_v59  ;;  %v1318_v53 = vsel %vm12135_vm1, %v10476_v23, %v1314_v25  ;;  %v1326_v22 = vmul.f32 %v10482_v60, %v12091_v49  ;;  %v12160_v52 = vadd.f32 %v11928_v11, %v1007_v34 }
  0xd8   : > { %2119 = vst [vmem:[#allocation2 + $0x18c] sm:$0xf] %v2083_v7  ;;  %v12163_v44 = vmul.f32 %v11959_v47, %v431_v41  ;;  %v10484_v29 = vpop.eup %10483  ;;  %v1323_v7 = vsel %vm12087_vm7, %v1322_v26, %v1318_v53  ;;  %vm1331_vm5 = vweird.f32 %v10482_v60  ;;  %vm12167_vm15 = vcmp.eq.f32.partialorder %v1349_v13, 8.507059e+37 }
  0xd9   : > { %v1366_v54 = vand.u32 2147483648, %v12144_v59  ;;  %v12173_v23 = vmul.f32 %v1323_v7, %v11932_v16  ;;  %v1327_v6 = vsub.f32 1.0, %v1326_v22  ;;  %v1341_v34 = vmul.f32 %v10484_v29, %v12096_v24  ;;  %vm12189_vm7 = vmor %vm1330_vm10, %vm1331_vm5 }
  0xda   : > { %10487 = vrcp.f32 %v12151_v5  ;;  %v1352_v41 = vor.u32 1.1754944e-38, %v1351_v2  ;;  %v1364_v21 = vand.u32 2147483647, %v12144_v59  ;;  %v462_v26 = vadd.s32 96, %v11189_v42  ;;  %v8446_v13 = vld [vmem:[#allocation2 + $0x180] sm:$0xf] }
  0xdb   : > { %v1884_v25 = vrot.slane %v12173_v23, 1  ;;  %v1328_v53 = vmul.f32 %v10482_v60, %v1327_v6  ;;  %v2131_v16 = vpack.c.bf16 %v12173_v23, %v12173_v23  ;;  %v1710_v22 = vrot.slane %v12173_v23, 7 }
  0xdc   : > { %v1342_v4 = vsub.f32 1.0, %v1341_v34  ;;  %v12193_v19 = vor.u32 1.1754944e-38, %v1366_v54  ;;  %v12196_v6 = vadd.s32 104, %v11189_v42  ;;  %v15982_v61 = vrot.slane %v11983_v32, 1 }
  0xdd   : > { %v12184_v7 = vpop.eup %10485  ;;  %vm15983_vm9 = vcmp.lt.s32.totalorder %v11189_v42, 7  ;;  %v1329_v27 = vadd.f32 %v10482_v60, %v1328_v53  ;;  %2165 = vst [vmem:[#allocation2 + $0x7c] sm:$0xf] %v2131_v16  ;;  %v15984_v49 = vrot.slane %v11983_v32, 7  ;;  %vm15985_vm10 = vcmp.lt.s32.totalorder %v11189_v42, 1 }
  0xde   : > { %v1933_v23 = vsel %vm15983_vm9, %v15982_v61, %v1884_v25  ;;  %v574_v34 = vand.u32 15, %v462_v26  ;;  %vm12210_vm5 = vcmp.ne.s32.totalorder %v567_v40, 15  ;;  %v15986_v30 = vmov 0 }
  0xdf   : > { %v9955_v43 = vld [vmem:[#allocation2 + $0x188] sm:$0xf0]  ;;  %v1759_v36 = vsel %vm15985_vm10, %v15984_v49, %v1710_v22  ;;  %v2023_v54 = vsel %vm12125_vm8, %v1933_v23, 0.0  ;;  %v15987_v30 = vsel %vm12210_vm5, 4294967295, %v15986_v30  ;;  %v1343_v61 = vmul.f32 %v10484_v29, %v1342_v4 }
  0xe0   : > { %v8447_v37 = vor.u32 %v9955_v43, %v8446_v13  ;;  %v1850_v39 = vsel %vm12139_vm4, %v1759_v36, 0.0  ;;  %15988 = vst [vmem:[#allocation38_spill] sm:$0xff] %v15987_v30  ;;  %vm12214_vm9 = vcmp.eq.f32.partialorder %v1364_v21, 8.507059e+37  ;;  %v12219_v32 = vpop.eup %10487  ;;  %v2200_v43 = vpack.c.bf16 %v2023_v54, %v2023_v54 }
  0xe1   : > { %v1333_v26 = vsel %vm12189_vm7, %v10482_v60, %v1329_v27  ;;  %v2060_v13 = vpack.c.bf16 %v1850_v39, %v1850_v39  ;;  %vm15991_vm10 = vweird.f32 %v10484_v29  ;;  %vm15992_vm8 = vweird.f32 %v12096_v24 }
  0xe2   : > { %vm12226_vm4 = vmor %vm15992_vm8, %vm15991_vm10  ;;  %v1356_v4 = vmul.f32 %v12184_v7, %v12144_v59  ;;  %2911 = vmatmul.bf16.gmra.mxu3 %v8447_v37  ;;  %v1338_v40 = vsel %vm12147_vm13, %v1337_v57, %v1333_v26  ;;  %v1344_v21 = vadd.f32 %v10484_v29, %v1343_v61  ;;  %v581_v16 = vand.u32 15, %v12196_v6  ;;  %2236 = vst [vmem:[#allocation2 + $0x74] sm:$0xf] %v2200_v43 }
  0xe3   : > { %v1381_v27 = vand.u32 2147483648, %v12151_v5  ;;  %v1679_v39 = vmul.f32 %v1338_v40, %v12000_v12  ;;  %v2149_v60 = vpack.c.bf16 %v11622_v18, %v11622_v18  ;;  %v2150_v2 = vpack.c.bf16 %v11662_v0, %v11662_v0  ;;  %2096 = vst [vmem:[#allocation2 + $0x78] sm:$0xf] %v2060_v13  ;;  %v8310_v13 = vld [vmem:[#allocation2 + $0x68] sm:$0xf] }
  0xe4   : > { %v1357_v24 = vsub.f32 1.0, %v1356_v4  ;;  %v1348_v37 = vsel %vm12226_vm4, %v10484_v29, %v1344_v21  ;;  %vm1361_vm13 = vweird.f32 %v12184_v7  ;;  %vm12244_vm8 = vcmp.ne.s32.totalorder %v574_v34, 0 }
  0xe5   : > { %v15995_v20 = vmov 0  ;;  %v1371_v12 = vmul.f32 %v12219_v32, %v12151_v5  ;;  %v2132_v57 = vpack.c.bf16 %v1679_v39, %v1679_v39  ;;  %v1711_v23 = vrot.slane %v1679_v39, 7  ;;  %2183 = vst [vmem:[#allocation2 + $0x154] sm:$0xf] %v2149_v60 }
  0xe6   : > { %v15996_v20 = vsel %vm12244_vm8, 4294967295, %v15995_v20  ;;  %v1353_v49 = vsel %vm12167_vm15, %v1352_v41, %v1348_v37  ;;  %v1885_v54 = vrot.slane %v1679_v39, 1  ;;  %v1358_v29 = vmul.f32 %v12184_v7, %v1357_v24  ;;  %2184 = vst [vmem:[#allocation2 + $0x160] sm:$0xf] %v2150_v2 }
  0xe7   : > { %15997 = vst [vmem:[#allocation39_spill] sm:$0xff] %v15996_v20  ;;  %v12253_v61 = vmul.f32 %v1353_v49, %v12003_v56  ;;  %v1372_v34 = vsub.f32 1.0, %v1371_v12  ;;  %vm1376_vm4 = vweird.f32 %v12219_v32  ;;  %vm15998_vm7 = vcmp.lt.s32.totalorder %v11189_v42, 1  ;;  %v8412_v49 = vld [vmem:[#allocation2 + $0x144] sm:$0xf0] }
  0xe8   : > { %2166 = vst [vmem:[#allocation2 + $0x88] sm:$0xf] %v2132_v57  ;;  %v1758_v43 = vsel %vm15998_vm7, %v1710_v22, %v1711_v23  ;;  %vm15999_vm10 = vcmp.lt.s32.totalorder %v11189_v42, 7  ;;  %vm16000_vm15 = vweird.f32 %v12144_v59  ;;  %v1379_v8 = vand.u32 2147483647, %v12151_v5 }
  0xe9   : > { %v1932_v26 = vsel %vm15999_vm10, %v1884_v25, %v1885_v54  ;;  %vm12265_vm1 = vmor %vm16000_vm15, %vm1361_vm13  ;;  %v8245_v41 = vmul.f32 -1.442695, %v12160_v52  ;;  %v2061_v36 = vpack.c.bf16 %v1758_v43, %v1758_v43  ;;  %v1886_v4 = vrot.slane %v12253_v61, 1  ;;  %v9921_v25 = vld [vmem:[#allocation2 + $0x13c] sm:$0xf] }
  0xea   : > { %v2201_v22 = vpack.c.bf16 %v1932_v26, %v1932_v26  ;;  %v1359_v40 = vadd.f32 %v12184_v7, %v1358_v29  ;;  %v2133_v21 = vpack.c.bf16 %v12253_v61, %v12253_v61  ;;  %v1712_v59 = vrot.slane %v12253_v61, 7  ;;  %v9896_v60 = vld [vmem:[#allocation2 + $0x70] sm:$0xf0]  ;;  %vm16003_vm13 = vmmov %vm15999_vm10  ;;  %v9897_v29 = vld [vmem:[#allocation2 + $0x7c] sm:$0xf] }
  0xeb   : > { %v1373_v39 = vmul.f32 %v12219_v32, %v1372_v34  ;;  %v1382_v24 = vor.u32 1.1754944e-38, %v1381_v27  ;;  %2097 = vst [vmem:[#allocation2 + $0x84] sm:$0xf] %v2061_v36  ;;  %v1931_v2 = vsel %vm16003_vm13, %v1885_v54, %v1886_v4  ;;  %vm12282_vm7 = vcmp.eq.f32.partialorder %v1379_v8, 8.507059e+37  ;;  %v9942_v26 = vld [vmem:[#allocation9 + $0x60] sm:$0xff]  ;;  %v432_v8 = vld [vmem:[%s11104_s23 + $0x78] sm:$0xff] }
  0xec   : > { %v1363_v37 = vsel %vm12265_vm1, %v12184_v7, %v1359_v40  ;;  %10489 = vpow2.f32 %v8245_v41  ;;  %v12286_v57 = vor.u32 %v9896_v60, %v8310_v13  ;;  %v2025_v27 = vsel %vm12210_vm5, %v1931_v2, 0.0  ;;  %2237 = vst [vmem:[#allocation2 + $0x80] sm:$0xf] %v2201_v22  ;;  %3347 = vmatpush.bf16.msrb.mxu0 %v9942_v26 }
  0xed   : > { %v1368_v54 = vsel %vm12214_vm9, %v12193_v19, %v1363_v37  ;;  %vm16006_vm10 = vcmp.lt.s32.totalorder %v11189_v42, 1  ;;  %vm16007_vm1 = vweird.f32 %v12151_v5  ;;  %v2202_v34 = vpack.c.bf16 %v2025_v27, %v2025_v27  ;;  %2167 = vst [vmem:[#allocation2 + $0x94] sm:$0xf] %v2133_v21  ;;  %v8314_v21 = vld [vmem:[#allocation2 + $0x78] sm:$0xf] }
  0xee   : > { %v1757_v7 = vsel %vm16006_vm10, %v1711_v23, %v1712_v59  ;;  %vm12299_vm15 = vmor %vm16007_vm1, %vm1376_vm4  ;;  %v1681_v43 = vmul.f32 %v1368_v54, %v12023_v10  ;;  %v1374_v19 = vadd.f32 %v12219_v32, %v1373_v39  ;;  %3029 = vmatmul.bf16.gmra.mxu2 %v12286_v57  ;;  %v464_v5 = vadd.s32 112, %v11189_v42 }
  0xef   : > { %v1852_v53 = vsel %vm12244_vm8, %v1757_v7, 0.0  ;;  %v12311_v56 = vadd.f32 %v11928_v11, %v12163_v44  ;;  %v8316_v41 = vld [vmem:[#allocation2 + $0x84] sm:$0xf0]  ;;  %v12314_v13 = vor.u32 %v9921_v25, %v8412_v49  ;;  %2238 = vst [vmem:[#allocation2 + $0x8c] sm:$0xf] %v2202_v34  ;;  %vm12323_vm9 = vcmp.ne.s32.totalorder %v581_v16, 15  ;;  %vm16014_vm4 = vmmov %vm16006_vm10 }
  0xf0   : > { %v2062_v23 = vpack.c.bf16 %v1852_v53, %v1852_v53  ;;  %v2134_v10 = vpack.c.bf16 %v1681_v43, %v1681_v43  ;;  %v1713_v36 = vrot.slane %v1681_v43, 7  ;;  %v1378_v22 = vsel %vm12299_vm15, %v12219_v32, %v1374_v19  ;;  %v433_v53 = vld [vmem:[%s11104_s23 + $0x80] sm:$0xff]  ;;  %v434_v19 = vld [vmem:[%s11104_s23 + $0x88] sm:$0xff]  ;;  %vm16019_vm1 = vmmov %vm16014_vm4 }
  0xf1   : > { %16010 = vst [vmem:[#allocation40_spill] sm:$0xff] %v12314_v13  ;;  %v12319_v40 = vor.u32 %v9897_v29, %v8316_v41  ;;  %v16011_v44 = vmov 0  ;;  %v1383_v25 = vsel %vm12282_vm7, %v1382_v24, %v1378_v22  ;;  %v1887_v39 = vrot.slane %v1681_v43, 1  ;;  %vm16015_vm7 = vmmov %vm16003_vm13 }
  0xf2   : > { %2098 = vst [vmem:[#allocation2 + $0x90] sm:$0xf] %v2062_v23  ;;  %v16012_v44 = vsel %vm12323_vm9, 4294967295, %v16011_v44  ;;  %v10490_v60 = vpop.eup %10489  ;;  %v1756_v32 = vsel %vm16014_vm4, %v1712_v59, %v1713_v36  ;;  %v12332_v2 = vmul.f32 %v1383_v25, %v12052_v35  ;;  %v588_v37 = vand.u32 15, %v464_v5  ;;  %v9898_v16 = vld [vmem:[#allocation2 + $0x80] sm:$0xf0]  ;;  %2985 = vmatmul.bf16.vlgmr.msrb.gmra.mxu3 %v12314_v13 }
  0xf3   : > { %16013 = vst [vmem:[#allocation41_spill] sm:$0xff] %v16012_v44  ;;  %v1009_v6 = vmul.f32 %v11959_v47, %v432_v8  ;;  %2945 = vmatmul.bf16.gmra.mxu1 %v12319_v40  ;;  %v2063_v49 = vpack.c.bf16 %v1756_v32, %v1756_v32  ;;  %v1930_v24 = vsel %vm16003_vm13, %v1886_v4, %v1887_v39  ;;  %v12338_v12 = vadd.f32 1.0, %v10490_v60  ;;  %v435_v5 = vld [vmem:[%s11104_s23 + $0x90] sm:$0xff]  ;;  %v8322_v8 = vld [vmem:[#allocation2 + $0x80] sm:$0xf] }
  0xf4   : > { %2168 = vst [vmem:[#allocation2 + $0xa0] sm:$0xf] %v2134_v10  ;;  %v8246_v27 = vmul.f32 -1.442695, %v12311_v56  ;;  %v12341_v59 = vor.u32 %v9898_v16, %v8314_v21  ;;  %v15744_v35 = vrot.slane %v12332_v2, 1  ;;  %v2203_v54 = vpack.c.bf16 %v1930_v24, %v1930_v24 }
  0xf5   : > { %v2135_v7 = vpack.c.bf16 %v12332_v2, %v12332_v2  ;;  %2099 = vst [vmem:[#allocation2 + $0x9c] sm:$0xf] %v2063_v49  ;;  %10491 = vrcp.f32 %v12338_v12  ;;  %v2151_v4 = vpack.c.bf16 %v11865_v33, %v11865_v33  ;;  %vm12355_vm10 = vcmp.ne.s32.totalorder %v588_v37, 0  ;;  %v9924_v49 = vld [vmem:[#allocation2 + $0x154] sm:$0xf] }
  0xf6   : > { %2856 = vmatmul.bf16.gmra.mxu0 %v12341_v59  ;;  %v1929_v61 = vsel %vm16015_vm7, %v1887_v39, %v15744_v35  ;;  %2239 = vst [vmem:[#allocation2 + $0x98] sm:$0xf] %v2203_v54  ;;  %v16016_v29 = vmov 0  ;;  %v15745_v34 = vrot.slane %v12332_v2, 7  ;;  %v2152_v43 = vpack.c.bf16 %v11880_v45, %v11880_v45  ;;  %v9899_v41 = vld [vmem:[#allocation2 + $0x88] sm:$0xf0] }
  0xf7   : > { %v16017_v29 = vsel %vm12355_vm10, 4294967295, %v16016_v29  ;;  %v2027_v23 = vsel %vm12323_vm9, %v1929_v61, 0.0  ;;  %2169 = vst [vmem:[#allocation2 + $0xac] sm:$0xf] %v2135_v7  ;;  %10493 = vpow2.f32 %v8246_v27  ;;  %v12367_v26 = vadd.f32 %v11928_v11, %v1009_v6  ;;  %v9900_v7 = vld [vmem:[#allocation2 + $0x94] sm:$0xf] }
  0xf8   : > { %16018 = vst [vmem:[#allocation42_spill] sm:$0xff] %v16017_v29  ;;  %v2204_v10 = vpack.c.bf16 %v2027_v23, %v2027_v23  ;;  %v1755_v22 = vsel %vm16019_vm1, %v1713_v36, %v15745_v34  ;;  %v1010_v25 = vmul.f32 %v11959_v47, %v433_v53  ;;  %v1011_v39 = vmul.f32 %v11959_v47, %v434_v19  ;;  %v8424_v36 = vld [vmem:[#allocation2 + $0x15c] sm:$0xf0] }
  0xf9   : > { %2185 = vst [vmem:[#allocation2 + $0x16c] sm:$0xf] %v2151_v4  ;;  %v1854_v21 = vsel %vm12355_vm10, %v1755_v22, 0.0  ;;  %v8247_v32 = vmul.f32 -1.442695, %v12367_v26  ;;  %v1012_v37 = vmul.f32 %v11959_v47, %v435_v5  ;;  %v12380_v16 = vor.u32 %v9899_v41, %v8322_v8 }
  0xfa   : > { %2186 = vst [vmem:[#allocation2 + $0x178] sm:$0xf] %v2152_v43  ;;  %v2064_v60 = vpack.c.bf16 %v1854_v21, %v1854_v21  ;;  %v1394_v24 = vand.u32 2147483647, %v12338_v12  ;;  %v12384_v27 = vadd.f32 %v11928_v11, %v1010_v25  ;;  %v12387_v54 = vadd.f32 %v11928_v11, %v1011_v39  ;;  %v8326_v19 = vld [vmem:[#allocation2 + $0x90] sm:$0xf] }
  0xfb   : > { %2240 = vst [vmem:[#allocation2 + $0xa4] sm:$0xf] %v2204_v10  ;;  %v10492_v6 = vpop.eup %10491  ;;  %v8328_v4 = vld [vmem:[#allocation2 + $0x9c] sm:$0xf0]  ;;  %10495 = vpow2.f32 %v8247_v32  ;;  %v12391_v43 = vadd.f32 %v11928_v11, %v1012_v37  ;;  %vm1390_vm15 = vweird.f32 %v12338_v12  ;;  %v1396_v23 = vand.u32 2147483648, %v12338_v12 }
  0xfc   : > { %v1386_v61 = vmul.f32 %v10492_v6, %v12338_v12  ;;  %2100 = vst [vmem:[#allocation2 + $0xa8] sm:$0xf] %v2064_v60  ;;  %v12396_v5 = vadd.s32 120, %v11189_v42  ;;  %v8248_v8 = vmul.f32 -1.442695, %v12384_v27  ;;  %vm1391_vm4 = vweird.f32 %v10492_v6 }
  0xfd   : > { %v10494_v53 = vpop.eup %10493  ;;  %v9901_v41 = vld [vmem:[#allocation2 + $0x98] sm:$0xf0]  ;;  %v8249_v21 = vmul.f32 -1.442695, %v12387_v54  ;;  %v12403_v25 = vor.u32 %v9900_v7, %v8328_v4  ;;  %vm12405_vm13 = vcmp.eq.f32.partialorder %v1394_v24, 8.507059e+37  ;;  %v12410_v32 = vor.u32 %v9924_v49, %v8424_v36  ;;  %vm12418_vm7 = vmor %vm1390_vm15, %vm1391_vm4 }
  0xfe   : > { %v1387_v10 = vsub.f32 1.0, %v1386_v61  ;;  %v12399_v22 = vadd.f32 1.0, %v10494_v53  ;;  %3034 = vmatmul.bf16.gmra.mxu2 %v12380_v16  ;;  %10497 = vpow2.f32 %v8248_v8  ;;  %v8250_v60 = vmul.f32 -1.442695, %v12391_v43  ;;  %v8334_v37 = vld [vmem:[#allocation2 + $0x98] sm:$0xf] }
  0xff   : > { %16020 = vst [vmem:[#allocation43_spill] sm:$0xff] %v12403_v25  ;;  %v12413_v34 = vor.u32 %v9901_v41, %v8326_v19  ;;  %v1397_v4 = vor.u32 1.1754944e-38, %v1396_v23  ;;  %v466_v44 = vadd.s32 128, %v11189_v42  ;;  %v12426_v19 = vadd.s32 136, %v11189_v42  ;;  %v9941_v41 = vld [vmem:[#allocation9 + $0x58] sm:$0xff] }
 0x100   : > { %16023 = vst [vmem:[#allocation44_spill] sm:$0xff] %v12410_v32  ;;  %v1388_v61 = vmul.f32 %v10492_v6, %v1387_v10  ;;  %v9927_v35 = vld [vmem:[#allocation2 + $0x16c] sm:$0xf]  ;;  %10499 = vrcp.f32 %v12399_v22  ;;  %v1409_v49 = vand.u32 2147483647, %v12399_v22  ;;  %v1411_v36 = vand.u32 2147483648, %v12399_v22  ;;  %3348 = vmatpush.bf16.msrb.mxu0 %v9941_v41 }
 0x101   : > { %v8436_v53 = vld [vmem:[#allocation2 + $0x174] sm:$0xf0]  ;;  %v10496_v8 = vpop.eup %10495  ;;  %10501 = vpow2.f32 %v8249_v21  ;;  %v595_v12 = vand.u32 15, %v12396_v5  ;;  %v16030_v48 = vrot.slane %v12332_v2, 7 }
 0x102   : > { %v9902_v7 = vld [vmem:[#allocation2 + $0xa0] sm:$0xf0]  ;;  %v1389_v10 = vadd.f32 %v10492_v6, %v1388_v61  ;;  %v12430_v29 = vadd.f32 1.0, %v10496_v8  ;;  %10503 = vpow2.f32 %v8250_v60  ;;  %v436_v23 = vld [vmem:[%s11104_s23 + $0x98] sm:$0xff]  ;;  %2990 = vmatmul.bf16.gmra.mxu3 %v12410_v32  ;;  %v12438_v20 = vor.u32 %v9927_v35, %v8436_v53 }
 0x103   : > { %2950 = vmatmul.bf16.gmra.mxu1 %v12403_v25  ;;  %v12434_v30 = vor.u32 %v9902_v7, %v8334_v37  ;;  %vm12443_vm15 = vcmp.eq.f32.partialorder %v1409_v49, 8.507059e+37  ;;  %v1412_v60 = vor.u32 1.1754944e-38, %v1411_v36  ;;  %v1013_v39 = vmul.f32 %v11959_v47, %v436_v23  ;;  %v437_v36 = vld [vmem:[%s11104_s23 + $0xa0] sm:$0xff] }
 0x104   : > { %v1393_v61 = vsel %vm12418_vm7, %v10492_v6, %v1389_v10  ;;  %16027 = vst [vmem:[#allocation46_spill] sm:$0xff] %v12438_v20  ;;  %v10498_v21 = vpop.eup %10497  ;;  %10505 = vrcp.f32 %v12430_v29  ;;  %v602_v6 = vand.u32 15, %v466_v44  ;;  %v1424_v24 = vand.u32 2147483647, %v12430_v29 }
 0x105   : > { %16026 = vst [vmem:[#allocation45_spill] sm:$0xff] %v12434_v30  ;;  %v1398_v5 = vsel %vm12405_vm13, %v1397_v4, %v1393_v61  ;;  %v1426_v4 = vand.u32 2147483648, %v12430_v29  ;;  %v2153_v49 = vpack.c.bf16 %v12077_v63, %v12077_v63  ;;  %v12466_v53 = vadd.f32 1.0, %v10498_v21  ;;  %vm16031_vm13 = vmmov %vm16019_vm1 }
 0x106   : > { %v10500_v37 = vpop.eup %10499  ;;  %2861 = vmatmul.bf16.gmra.mxu0 %v12413_v34  ;;  %v12450_v35 = vmul.f32 %v1398_v5, %v12160_v52  ;;  %v2154_v5 = vpack.c.bf16 %v12099_v14, %v12099_v14  ;;  %vm16033_vm7 = vcmp.lt.s32.totalorder %v11189_v42, 7  ;;  %v12484_v21 = vmul.f32 %v11959_v47, %v437_v36 }
 0x107   : > { %v1401_v7 = vmul.f32 %v10500_v37, %v12399_v22  ;;  %v10502_v10 = vpop.eup %10501  ;;  %2187 = vst [vmem:[#allocation2 + $0x184] sm:$0xf] %v2153_v49  ;;  %vm12488_vm4 = vcmp.ne.s32.totalorder %v595_v12, 15  ;;  %v16037_v25 = vmov 0  ;;  %10507 = vrcp.f32 %v12466_v53 }
 0x108   : > { %v2136_v52 = vpack.c.bf16 %v12450_v35, %v12450_v35  ;;  %v15754_v44 = vrot.slane %v12450_v35, 7  ;;  %v15759_v41 = vrot.slane %v12450_v35, 1  ;;  %v10504_v23 = vpop.eup %10503  ;;  %v12468_v51 = vadd.f32 1.0, %v10502_v10  ;;  %2188 = vst [vmem:[#allocation2 + $0x190] sm:$0xf] %v2154_v5 }
 0x109   : > { %v1402_v61 = vsub.f32 1.0, %v1401_v7  ;;  %v16032_v7 = vrot.slane %v12332_v2, 1  ;;  %vm16041_vm1 = vweird.f32 %v12399_v22  ;;  %vm12506_vm10 = vcmp.eq.f32.partialorder %v1424_v24, 8.507059e+37 }
 0x10a   : > { %2170 = vst [vmem:[#allocation2 + $0xb8] sm:$0xf] %v2136_v52  ;;  %v1754_v32 = vsel %vm16031_vm13, %v16030_v48, %v15754_v44  ;;  %v12486_v49 = vpop.eup %10505  ;;  %v16034_v52 = vmov 0  ;;  %vm12492_vm13 = vcmp.ne.s32.totalorder %v602_v6, 0  ;;  %v12511_v12 = vadd.f32 1.0, %v10504_v23 }
 0x10b   : > { %v1928_v13 = vsel %vm16033_vm7, %v16032_v7, %v15759_v41  ;;  %v2065_v10 = vpack.c.bf16 %v1754_v32, %v1754_v32  ;;  %v16035_v52 = vsel %vm12488_vm4, 4294967295, %v16034_v52  ;;  %v1403_v48 = vmul.f32 %v10500_v37, %v1402_v61  ;;  %v9903_v23 = vld [vmem:[#allocation2 + $0xac] sm:$0xf] }
 0x10c   : > { %16036 = vst [vmem:[#allocation47_spill] sm:$0xff] %v16035_v52  ;;  %v2205_v44 = vpack.c.bf16 %v1928_v13, %v1928_v13  ;;  %v16038_v25 = vsel %vm12492_vm13, 4294967295, %v16037_v25  ;;  %vm16040_vm7 = vweird.f32 %v10500_v37  ;;  %v1416_v2 = vmul.f32 %v12486_v49, %v12430_v29 }
 0x10d   : > { %16039 = vst [vmem:[#allocation48_spill] sm:$0xff] %v16038_v25  ;;  %vm12500_vm9 = vmor %vm16041_vm1, %vm16040_vm7  ;;  %v1439_v13 = vand.u32 2147483647, %v12466_v53  ;;  %v1404_v6 = vadd.f32 %v10500_v37, %v1403_v48  ;;  %v1427_v36 = vor.u32 1.1754944e-38, %v1426_v4  ;;  %v1441_v22 = vand.u32 2147483648, %v12466_v53 }
 0x10e   : > { %2101 = vst [vmem:[#allocation2 + $0xb4] sm:$0xf] %v2065_v10  ;;  %10509 = vrcp.f32 %v12468_v51  ;;  %v1417_v61 = vsub.f32 1.0, %v1416_v2  ;;  %vm1421_vm1 = vweird.f32 %v12486_v49  ;;  %v12518_v24 = vadd.f32 %v11928_v11, %v1013_v39  ;;  %3039 = vmatmul.bf16.gmra.mxu2 %v12434_v30 }
 0x10f   : > { %2241 = vst [vmem:[#allocation2 + $0xb0] sm:$0xf] %v2205_v44  ;;  %v1408_v5 = vsel %vm12500_vm9, %v10500_v37, %v1404_v6  ;;  %v1454_v4 = vand.u32 2147483647, %v12468_v51  ;;  %v1456_v44 = vand.u32 2147483648, %v12468_v51  ;;  %vm12529_vm7 = vcmp.eq.f32.partialorder %v1439_v13, 8.507059e+37  ;;  %v12536_v37 = vpop.eup %10507 }
 0x110   : > { %v1413_v7 = vsel %vm12443_vm15, %v1412_v60, %v1408_v5  ;;  %v1418_v10 = vmul.f32 %v12486_v49, %v1417_v61  ;;  %v12533_v39 = vor.u32 1.1754944e-38, %v1441_v22  ;;  %10511 = vrcp.f32 %v12511_v12  ;;  %v8338_v22 = vld [vmem:[#allocation2 + $0xa8] sm:$0xf]  ;;  %v12597_v32 = vld [vmem:[#allocation2 + $0x18c] sm:$0xf0] }
 0x111   : > { %v8340_v48 = vld [vmem:[#allocation2 + $0xb4] sm:$0xf0]  ;;  %v1684_v47 = vmul.f32 %v1413_v7, %v12311_v56  ;;  %vm16048_vm9 = vweird.f32 %v12430_v29  ;;  %v12547_v60 = vor.u32 1.1754944e-38, %v1456_v44  ;;  %v12550_v2 = vadd.s32 144, %v11189_v42 }
 0x112   : > { %vm12543_vm15 = vmor %vm16048_vm9, %vm1421_vm1  ;;  %v12553_v6 = vor.u32 %v9903_v23, %v8340_v48  ;;  %v1419_v56 = vadd.f32 %v12486_v49, %v1418_v10  ;;  %v1431_v61 = vmul.f32 %v12536_v37, %v12466_v53  ;;  %v12559_v29 = vadd.s32 152, %v11189_v42  ;;  %2995 = vmatmul.bf16.gmra.mxu3 %v12438_v20 }
 0x113   : > { %v1890_v44 = vrot.slane %v1684_v47, 1  ;;  %v2137_v7 = vpack.c.bf16 %v1684_v47, %v1684_v47  ;;  %v1716_v41 = vrot.slane %v1684_v47, 7  ;;  %vm12564_vm9 = vcmp.eq.f32.partialorder %v1454_v4, 8.507059e+37 }
 0x114   : > { %16051 = vst [vmem:[#allocation49_spill] sm:$0xff] %v12553_v6  ;;  %v12561_v5 = vpop.eup %10509  ;;  %2955 = vmatmul.bf16.gmra.mxu1 %v12553_v6  ;;  %v1423_v10 = vsel %vm12543_vm15, %v12486_v49, %v1419_v56  ;;  %v1432_v48 = vsub.f32 1.0, %v1431_v61  ;;  %v16055_v4 = vrot.slane %v12450_v35, 1  ;;  %vm16056_vm1 = vcmp.lt.s32.totalorder %v11189_v42, 7 }
 0x115   : > { %v9904_v23 = vld [vmem:[#allocation2 + $0xb0] sm:$0xf0]  ;;  %v1446_v30 = vmul.f32 %v12561_v5, %v12468_v51  ;;  %v1428_v20 = vsel %vm12506_vm10, %v1427_v36, %v1423_v10  ;;  %2171 = vst [vmem:[#allocation2 + $0xc4] sm:$0xf] %v2137_v7  ;;  %v16057_v8 = vrot.slane %v12450_v35, 7  ;;  %vm16058_vm15 = vcmp.lt.s32.totalorder %v11189_v42, 1  ;;  %v2926_v10 = vpop.f32.mrf.mxu1 }
 0x116   : > { %v12576_v47 = vor.u32 %v9904_v23, %v8338_v22  ;;  %v1927_v6 = vsel %vm16056_vm1, %v16055_v4, %v1890_v44  ;;  %v12588_v56 = vpop.eup %10511  ;;  %v1685_v61 = vmul.f32 %v1428_v20, %v12367_v26  ;;  %v12595_v4 = vld [vmem:[#allocation2 + $0x184] sm:$0xf]  ;;  %v16059_v36 = vand.u32 15, %v12426_v19 }
 0x117   : > { %v1753_v49 = vsel %vm16058_vm15, %v16057_v8, %v1716_v41  ;;  %v2029_v22 = vsel %vm12488_vm4, %v1927_v6, 0.0  ;;  %v16060_v35 = vmov 0  ;;  %v1433_v7 = vmul.f32 %v12536_v37, %v1432_v48  ;;  %v2837_v8 = vpop.f32.mrf.mxu0 }
 0x118   : > { %16054 = vst [vmem:[#allocation50_spill] sm:$0xff] %v12576_v47  ;;  %v1856_v23 = vsel %vm12492_vm13, %v1753_v49, 0.0  ;;  %vm12601_vm10 = vcmp.ne.s32.totalorder %v16059_v36, 15  ;;  %2866 = vmatmul.bf16.gmra.mxu0 %v12576_v47  ;;  %v2206_v20 = vpack.c.bf16 %v2029_v22, %v2029_v22  ;;  %vm16063_vm15 = vweird.f32 %v12536_v37 }
 0x119   : > { %v16061_v35 = vsel %vm12601_vm10, 4294967295, %v16060_v35  ;;  %v2066_v26 = vpack.c.bf16 %v1856_v23, %v1856_v23  ;;  %vm16064_vm5 = vweird.f32 %v12466_v53  ;;  %v1447_v6 = vsub.f32 1.0, %v1446_v30 }
 0x11a   : > { %16062 = vst [vmem:[#allocation51_spill] sm:$0xff] %v16061_v35  ;;  %vm12612_vm4 = vmor %vm16064_vm5, %vm16063_vm15  ;;  %v12616_v49 = vadd.f32 %v2926_v10, %v2837_v8  ;;  %v2138_v48 = vpack.c.bf16 %v1685_v61, %v1685_v61  ;;  %v1717_v36 = vrot.slane %v1685_v61, 7  ;;  %v1434_v52 = vadd.f32 %v12536_v37, %v1433_v7 }
 0x11b   : > { %v1891_v25 = vrot.slane %v1685_v61, 1  ;;  %2242 = vst [vmem:[#allocation2 + $0xbc] sm:$0xf] %v2206_v20  ;;  %v8451_v22 = vor.u32 %v12595_v4, %v12597_v32  ;;  %v1448_v23 = vmul.f32 %v12561_v5, %v1447_v6  ;;  %v616_v53 = vand.u32 15, %v12550_v2  ;;  %vm16068_vm15 = vmmov %vm16056_vm1 }
 0x11c   : > { %v1461_v47 = vmul.f32 %v12588_v56, %v12511_v12  ;;  %2172 = vst [vmem:[#allocation2 + $0xd0] sm:$0xf] %v2138_v48  ;;  %vm16067_vm5 = vcmp.lt.s32.totalorder %v11189_v42, 1  ;;  %v1438_v7 = vsel %vm12612_vm4, %v12536_v37, %v1434_v52  ;;  %vm16069_vm1 = vweird.f32 %v12561_v5 }
 0x11d   : > { %v1752_v30 = vsel %vm16067_vm5, %v1716_v41, %v1717_v36  ;;  %v1926_v61 = vsel %vm16068_vm15, %v1890_v44, %v1891_v25  ;;  %vm16070_vm13 = vweird.f32 %v12468_v51  ;;  %v623_v4 = vand.u32 15, %v12559_v29  ;;  %2102 = vst [vmem:[#allocation2 + $0xc0] sm:$0xf] %v2066_v26  ;;  %v8346_v26 = vld [vmem:[#allocation2 + $0xb0] sm:$0xf] }
 0x11e   : > { %vm12636_vm8 = vmor %vm16070_vm13, %vm16069_vm1  ;;  %v2067_v32 = vpack.c.bf16 %v1752_v30, %v1752_v30  ;;  %v1443_v41 = vsel %vm12529_vm7, %v12533_v39, %v1438_v7  ;;  %v2207_v52 = vpack.c.bf16 %v1926_v61, %v1926_v61  ;;  %v1449_v37 = vadd.f32 %v12561_v5, %v1448_v23 }
 0x11f   : > { %v1686_v44 = vmul.f32 %v1443_v41, %v12384_v27  ;;  %vm12646_vm4 = vcmp.ne.s32.totalorder %v616_v53, 0  ;;  %v16073_v10 = vmov 0  ;;  %v1462_v51 = vsub.f32 1.0, %v1461_v47  ;;  %vm16080_vm1 = vmmov %vm16067_vm5 }
 0x120   : > { %v16074_v10 = vsel %vm12646_vm4, 4294967295, %v16073_v10  ;;  %vm1466_vm13 = vweird.f32 %v12588_v56  ;;  %2103 = vst [vmem:[#allocation2 + $0xcc] sm:$0xf] %v2067_v32  ;;  %v1453_v8 = vsel %vm12636_vm8, %v12561_v5, %v1449_v37  ;;  %v16076_v11 = vand.u32 2147483647, %v12511_v12  ;;  %vm16079_vm8 = vmmov %vm16068_vm15 }
 0x121   : > { %16075 = vst [vmem:[#allocation52_spill] sm:$0xff] %v16074_v10  ;;  %v1471_v27 = vand.u32 2147483648, %v12511_v12  ;;  %v477_v20 = vadd.s32 216, %v11189_v42  ;;  %v1892_v19 = vrot.slane %v1686_v44, 1  ;;  %v1458_v47 = vsel %vm12564_vm9, %v12547_v60, %v1453_v8  ;;  %v9906_v5 = vld [vmem:[#allocation2 + $0xc4] sm:$0xf]  ;;  %vm16085_vm15 = vmmov %vm16080_vm1 }
 0x122   : > { %vm12656_vm7 = vcmp.eq.f32.partialorder %v16076_v11, 8.507059e+37  ;;  %2243 = vst [vmem:[#allocation2 + $0xc8] sm:$0xf] %v2207_v52  ;;  %v2139_v6 = vpack.c.bf16 %v1686_v44, %v1686_v44  ;;  %v1718_v48 = vrot.slane %v1686_v44, 7  ;;  %v12666_v23 = vmul.f32 %v1458_v47, %v12387_v54  ;;  %v9905_v61 = vld [vmem:[#allocation2 + $0xb8] sm:$0xf0]  ;;  %3000 = vmatmul.bf16.gmra.mxu3 %v8451_v22 }
 0x123   : > { %v1463_v53 = vmul.f32 %v12588_v56, %v1462_v51  ;;  %v1472_v30 = vor.u32 1.1754944e-38, %v1471_v27  ;;  %v679_v7 = vand.u32 15, %v477_v20  ;;  %v1925_v2 = vsel %vm16079_vm8, %v1891_v25, %v1892_v19  ;;  %v8352_v54 = vld [vmem:[#allocation2 + $0xcc] sm:$0xf0]  ;;  %v9937_v47 = vld [vmem:[#allocation9 + $0x38] sm:$0xff] }
 0x124   : > { %2173 = vst [vmem:[#allocation2 + $0xdc] sm:$0xf] %v2139_v6  ;;  %v1751_v32 = vsel %vm16080_vm1, %v1717_v36, %v1718_v48  ;;  %v15769_v60 = vrot.slane %v11429_v31, 1  ;;  %v1901_v13 = vrot.slane %v11432_v28, 1  ;;  %v12675_v41 = vor.u32 %v9905_v61, %v8346_v26  ;;  %v8350_v36 = vld [vmem:[#allocation2 + $0xc0] sm:$0xf]  ;;  %vm16089_vm1 = vmmov %vm16079_vm8  ;;  %3255 = vmatpush.bf16.msrb.mxu3 %v9937_v47 }
 0x125   : > { %v2031_v52 = vsel %vm12601_vm10, %v1925_v2, 0.0  ;;  %v2140_v37 = vpack.c.bf16 %v12666_v23, %v12666_v23  ;;  %v1719_v44 = vrot.slane %v12666_v23, 7  ;;  %vm16081_vm9 = vweird.f32 %v12511_v12  ;;  %v9940_v61 = vld [vmem:[#allocation9 + $0x50] sm:$0xff] }
 0x126   : > { %vm12686_vm5 = vmor %vm16081_vm9, %vm1466_vm13  ;;  %v12690_v28 = vor.u32 %v9906_v5, %v8352_v54  ;;  %v2208_v51 = vpack.c.bf16 %v2031_v52, %v2031_v52  ;;  %v1858_v8 = vsel %vm12646_vm4, %v1751_v32, 0.0  ;;  %v1464_v11 = vadd.f32 %v12588_v56, %v1463_v53  ;;  %3044 = vmatmul.bf16.gmra.mxu2 %v12675_v41  ;;  %3349 = vmatpush.bf16.msrb.mxu0 %v9940_v61 }
 0x127   : > { %2174 = vst [vmem:[#allocation2 + $0xe8] sm:$0xf] %v2140_v37  ;;  %v1750_v12 = vsel %vm16085_vm15, %v1718_v48, %v1719_v44  ;;  %v2068_v27 = vpack.c.bf16 %v1858_v8, %v1858_v8  ;;  %v1893_v20 = vrot.slane %v12666_v23, 1  ;;  %vm12701_vm13 = vcmp.ne.s32.totalorder %v679_v7, 15  ;;  %v9907_v6 = vld [vmem:[#allocation2 + $0xc8] sm:$0xf0]  ;;  %vm16090_vm9 = vmmov %vm16089_vm1 }
 0x128   : > { %16084 = vst [vmem:[#allocation53_spill] sm:$0xff] %v12690_v28  ;;  %v16086_v26 = vmov 0  ;;  %2960 = vmatmul.bf16.gmra.mxu1 %v12690_v28  ;;  %v2069_v5 = vpack.c.bf16 %v1750_v12, %v1750_v12  ;;  %v1468_v53 = vsel %vm12686_vm5, %v12588_v56, %v1464_v11  ;;  %v15772_v48 = vrot.slane %v11622_v18, 1  ;;  %v438_v12 = vld [vmem:[%s11104_s23 + $0xa8] sm:$0xff]  ;;  %vm16096_vm5 = vmmov %vm16089_vm1 }
 0x129   : > { %v16087_v26 = vsel %vm12701_vm13, 4294967295, %v16086_v26  ;;  %2244 = vst [vmem:[#allocation2 + $0xd4] sm:$0xf] %v2208_v51  ;;  %v12710_v2 = vor.u32 %v9907_v6, %v8350_v36  ;;  %v1473_v7 = vsel %vm12656_vm7, %v1472_v30, %v1468_v53  ;;  %v1924_v32 = vsel %vm16079_vm8, %v1892_v19, %v1893_v20  ;;  %v12727_v30 = vpop.f32.mrf.mxu1  ;;  %v3015_v19 = vpop.f32.mrf.mxu2  ;;  %v9936_v36 = vld [vmem:[#allocation9 + $0x30] sm:$0xff] }
 0x12a   : > { %16088 = vst [vmem:[#allocation54_spill] sm:$0xff] %v16087_v26  ;;  %v1916_v22 = vsel %vm16089_vm1, %v15769_v60, %v1901_v13  ;;  %v12721_v56 = vmul.f32 %v1473_v7, %v12391_v43  ;;  %v2209_v54 = vpack.c.bf16 %v1924_v32, %v1924_v32  ;;  %v1915_v52 = vsel %vm16090_vm9, %v1901_v13, %v15772_v48  ;;  %v12741_v13 = vpop.f32.mrf.mxu0  ;;  %v8358_v7 = vld [vmem:[#allocation2 + $0xc8] sm:$0xf]  ;;  %vm16106_vm9 = vmmov %vm16096_vm5 }
 0x12b   : > { %2104 = vst [vmem:[#allocation2 + $0xd8] sm:$0xf] %v2068_v27  ;;  %v2217_v39 = vpack.c.bf16 %v1916_v22, %v1916_v22  ;;  %2871 = vmatmul.bf16.gmra.mxu0 %v12710_v2  ;;  %vm12732_vm7 = vcmp.ne.s32.totalorder %v623_v4, 15  ;;  %v16092_v37 = vmov 0  ;;  %v2041_v43 = vsel %vm12701_vm13, %v1915_v52, 0.0  ;;  %3256 = vmatpush.bf16.msrb.mxu3 %v9936_v36 }
 0x12c   : > { %2105 = vst [vmem:[#allocation2 + $0xe4] sm:$0xf] %v2069_v5  ;;  %v16093_v37 = vsel %vm12732_vm7, 4294967295, %v16092_v37  ;;  %v12739_v25 = vadd.f32 %v3015_v19, %v12616_v49  ;;  %v8251_v51 = vmul.f32 -1.442695, %v12518_v24  ;;  %v15770_v8 = vrot.slane %v12721_v56, 1  ;;  %v12760_v5 = vpop.f32.mrf.mxu3 }
 0x12d   : > { %16091 = vst [vmem:[#allocation55_spill] sm:$0xff] %v12727_v30  ;;  %v2218_v29 = vpack.c.bf16 %v2041_v43, %v2041_v43  ;;  %v2141_v4 = vpack.c.bf16 %v12721_v56, %v12721_v56  ;;  %v470_v11 = vadd.s32 160, %v11189_v42  ;;  %v15771_v49 = vrot.slane %v12721_v56, 7  ;;  %v10659_v27 = vld [vmem:[%s15703_s2] ss:$0 sm:$0xff]  ;;  %v439_v43 = vld [vmem:[%s11104_s23 + $0xb0] sm:$0xff] }
 0x12e   : > { %16094 = vst [vmem:[#allocation56_spill] sm:$0xff] %v16093_v37  ;;  %10513 = vpow2.f32 %v8251_v51  ;;  %v12754_v47 = vadd.f32 %v10659_v27, %v12484_v21  ;;  %v1923_v6 = vsel %vm16096_vm5, %v1893_v20, %v15770_v8  ;;  %v479_v61 = vadd.s32 232, %v11189_v42  ;;  %v10660_v20 = vld [vmem:[#allocation7] ss:$0 sm:$0xff]  ;;  %v9909_v36 = vld [vmem:[#allocation2 + $0xdc] sm:$0xf] }
 0x12f   : > { %16095 = vst [vmem:[#allocation57_spill] sm:$0xff] %v12741_v13  ;;  %v630_v53 = vand.u32 15, %v470_v11  ;;  %v2033_v32 = vsel %vm12732_vm7, %v1923_v6, 0.0  ;;  %v1749_v21 = vsel %vm16085_vm15, %v1719_v44, %v15771_v49  ;;  %v1015_v22 = vmul.f32 %v10660_v20, %v438_v12  ;;  %v8364_v51 = vld [vmem:[#allocation2 + $0xe4] sm:$0xf0] }
 0x130   : > { %2245 = vst [vmem:[#allocation2 + $0xe0] sm:$0xf] %v2209_v54  ;;  %v9908_v54 = vld [vmem:[#allocation2 + $0xd0] sm:$0xf0]  ;;  %v2210_v52 = vpack.c.bf16 %v2033_v32, %v2033_v32  ;;  %v8252_v19 = vmul.f32 -1.442695, %v12754_v47  ;;  %v1016_v8 = vmul.f32 %v10660_v20, %v439_v43  ;;  %v12785_v49 = vor.u32 %v9909_v36, %v8364_v51 }
 0x131   : > { %2253 = vst [vmem:[#allocation2 + $0x140] sm:$0xf] %v2217_v39  ;;  %vm12771_vm8 = vcmp.ne.s32.totalorder %v630_v53, 0  ;;  %v16097_v39 = vmov 0  ;;  %v693_v23 = vand.u32 15, %v479_v61  ;;  %v1903_v44 = vrot.slane %v11662_v0, 1 }
 0x132   : > { %2254 = vst [vmem:[#allocation2 + $0x14c] sm:$0xf] %v2218_v29  ;;  %v16098_v39 = vsel %vm12771_vm8, 4294967295, %v16097_v39  ;;  %v1860_v29 = vsel %vm12771_vm8, %v1749_v21, 0.0  ;;  %10515 = vpow2.f32 %v8252_v19  ;;  %v12780_v12 = vor.u32 %v9908_v54, %v8358_v7  ;;  %v8362_v6 = vld [vmem:[#allocation2 + $0xd8] sm:$0xf]  ;;  %v2931_v21 = vpop.f32.mrf.mxu1  ;;  %v2842_v20 = vpop.f32.mrf.mxu0 }
 0x133   : > { %2175 = vst [vmem:[#allocation2 + $0xf4] sm:$0xf] %v2141_v4  ;;  %v2070_v4 = vpack.c.bf16 %v1860_v29, %v1860_v29  ;;  %v9910_v53 = vld [vmem:[#allocation2 + $0xe0] sm:$0xf0]  ;;  %v15773_v32 = vrot.slane %v11865_v33, 1  ;;  %v12783_v60 = vadd.f32 %v10659_v27, %v1015_v22  ;;  %vm12789_vm1 = vcmp.ne.s32.totalorder %v693_v23, 15  ;;  %v12797_v22 = vpop.f32.mrf.mxu2 }
 0x134   : > { %16099 = vst [vmem:[#allocation58_spill] sm:$0xff] %v16098_v39  ;;  %v10514_v11 = vpop.eup %10513  ;;  %v16105_v0 = vrot.slane %v11622_v18, 1  ;;  %v12804_v51 = vadd.f32 %v10659_v27, %v1016_v8  ;;  %v12810_v18 = vor.u32 %v9910_v53, %v8362_v6  ;;  %v2932_v23 = vadd.f32 %v2931_v21, %v2842_v20  ;;  %v12816_v8 = vpop.f32.mrf.mxu3 }
 0x135   : > { %2246 = vst [vmem:[#allocation2 + $0xec] sm:$0xf] %v2210_v52  ;;  %v12787_v61 = vadd.f32 1.0, %v10514_v11  ;;  %v16102_v52 = vmov 0  ;;  %v1913_v19 = vsel %vm16096_vm5, %v1903_v44, %v15773_v32  ;;  %v8253_v36 = vmul.f32 -1.442695, %v12783_v60 }
 0x136   : > { %16100 = vst [vmem:[#allocation59_spill] sm:$0xff] %v12780_v12  ;;  %v16103_v52 = vsel %vm12789_vm1, 4294967295, %v16102_v52  ;;  %v1914_v7 = vsel %vm16106_vm9, %v16105_v0, %v1903_v44  ;;  %3049 = vmatmul.bf16.gmra.mxu2 %v12780_v12  ;;  %v8254_v27 = vmul.f32 -1.442695, %v12804_v51  ;;  %v12821_v6 = vadd.s32 168, %v11189_v42  ;;  %v9935_v32 = vld [vmem:[#allocation9 + $0x28] sm:$0xff] }
 0x137   : > { %16101 = vst [vmem:[#allocation60_spill] sm:$0xff] %v12785_v49  ;;  %v2219_v43 = vpack.c.bf16 %v1914_v7, %v1914_v7  ;;  %10517 = vrcp.f32 %v12787_v61  ;;  %v1484_v11 = vand.u32 2147483647, %v12787_v61  ;;  %v1486_v21 = vand.u32 2147483648, %v12787_v61  ;;  %3257 = vmatpush.bf16.msrb.mxu3 %v9935_v32 }
 0x138   : > { %v8418_v48 = vld [vmem:[#allocation2 + $0x140] sm:$0xf]  ;;  %2106 = vst [vmem:[#allocation2 + $0xf0] sm:$0xf] %v2070_v4  ;;  %v2043_v4 = vsel %vm12789_vm1, %v1913_v19, 0.0  ;;  %10519 = vpow2.f32 %v8253_v36  ;;  %v10516_v44 = vpop.eup %10515  ;;  %2965 = vmatmul.bf16.gmra.mxu1 %v12785_v49  ;;  %v472_v37 = vadd.s32 176, %v11189_v42  ;;  %vm16118_vm13 = vweird.f32 %v12787_v61 }
 0x139   : > { %16104 = vst [vmem:[#allocation61_spill] sm:$0xff] %v16103_v52  ;;  %v9923_v54 = vld [vmem:[#allocation2 + $0x148] sm:$0xf0]  ;;  %v12823_v53 = vadd.f32 1.0, %v10516_v44  ;;  %10521 = vpow2.f32 %v8254_v27  ;;  %v8370_v19 = vld [vmem:[#allocation2 + $0xe0] sm:$0xf] }
 0x13a   : > { %16107 = vst [vmem:[#allocation62_spill] sm:$0xff] %v12797_v22  ;;  %v12806_v29 = vor.u32 %v9923_v54, %v8418_v48  ;;  %v2220_v48 = vpack.c.bf16 %v2043_v4, %v2043_v4  ;;  %v481_v54 = vadd.s32 248, %v11189_v42  ;;  %vm12832_vm9 = vcmp.eq.f32.partialorder %v1484_v11, 8.507059e+37  ;;  %v12838_v52 = vpop.f32.mrf.mxu1  ;;  %v12843_v10 = vpop.f32.mrf.mxu0  ;;  %v9939_v11 = vld [vmem:[#allocation9 + $0x48] sm:$0xff] }
 0x13b   : > { %16109 = vst [vmem:[#allocation64_spill] sm:$0xff] %v12810_v18  ;;  %2876 = vmatmul.bf16.gmra.mxu0 %v12810_v18  ;;  %10523 = vrcp.f32 %v12823_v53  ;;  %v1499_v7 = vand.u32 2147483647, %v12823_v53  ;;  %v637_v44 = vand.u32 15, %v12821_v6  ;;  %v1501_v27 = vand.u32 2147483648, %v12823_v53  ;;  %v3020_v35 = vpop.f32.mrf.mxu2 }
 0x13c   : > { %16108 = vst [vmem:[#allocation63_spill] sm:$0xff] %v12806_v29  ;;  %3074 = vmatmul.bf16.vlgmr.msra.gmra.mxu3 %v12806_v29  ;;  %v12846_v29 = vadd.s32 184, %v11189_v42  ;;  %v707_v6 = vand.u32 15, %v481_v54  ;;  %3350 = vmatpush.bf16.msrb.mxu0 %v9939_v11  ;;  %v16122_v13 = vmov 0  ;;  %v16140_v11 = vrot.slane %v12721_v56, 7 }
 0x13d   : > { %2255 = vst [vmem:[#allocation2 + $0x158] sm:$0xf] %v2219_v43  ;;  %v10518_v0 = vpop.eup %10517  ;;  %v9911_v43 = vld [vmem:[#allocation2 + $0xe8] sm:$0xf0]  ;;  %vm12848_vm15 = vcmp.eq.f32.partialorder %v1499_v7, 8.507059e+37  ;;  %vm12897_vm10 = vcmp.ne.s32.totalorder %v637_v44, 15 }
 0x13e   : > { %2256 = vst [vmem:[#allocation2 + $0x164] sm:$0xf] %v2220_v48  ;;  %v10520_v20 = vpop.eup %10519  ;;  %v1476_v36 = vmul.f32 %v10518_v0, %v12787_v61  ;;  %v1487_v48 = vor.u32 1.1754944e-38, %v1486_v21  ;;  %v12857_v28 = vor.u32 %v9911_v43, %v8370_v19  ;;  %vm16117_vm1 = vweird.f32 %v10518_v0  ;;  %v12869_v19 = vpop.f32.mrf.mxu3 }
 0x13f   : > { %16112 = vst [vmem:[#allocation65_spill] sm:$0xff] %v12838_v52  ;;  %v12840_v26 = vadd.f32 1.0, %v10520_v20  ;;  %v10522_v21 = vpop.eup %10521  ;;  %v12852_v20 = vadd.f32 %v3020_v35, %v2932_v23  ;;  %v9934_v52 = vld [vmem:[#allocation9 + $0x20] sm:$0xff]  ;;  %vm12864_vm7 = vmor %vm16118_vm13, %vm16117_vm1  ;;  %v1502_v23 = vor.u32 1.1754944e-38, %v1501_v27  ;;  %v644_v43 = vand.u32 15, %v472_v37 }
 0x140   : > { %v1477_v39 = vsub.f32 1.0, %v1476_v36  ;;  %16113 = vst [vmem:[#allocation66_spill] sm:$0xff] %v12843_v10  ;;  %v1905_v36 = vrot.slane %v11880_v45, 1  ;;  %3258 = vmatpush.bf16.msrb.mxu3 %v9934_v52  ;;  %vm12877_vm13 = vcmp.ne.s32.totalorder %v707_v6, 15  ;;  %v16125_v27 = vrot.slane %v12077_v63, 1  ;;  %vm16126_vm1 = vmmov %vm16096_vm5 }
 0x141   : > { %16116 = vst [vmem:[#allocation67_spill] sm:$0xff] %v12852_v20  ;;  %10525 = vrcp.f32 %v12840_v26  ;;  %v10524_v18 = vpop.eup %10523  ;;  %v1514_v32 = vand.u32 2147483647, %v12840_v26  ;;  %v12873_v20 = vadd.f32 1.0, %v10522_v21  ;;  %v16123_v13 = vsel %vm12877_vm13, 4294967295, %v16122_v13  ;;  %v9953_v21 = vld [vmem:[#allocation9 + $0xb8] sm:$0xff] }
 0x142   : > { %v1478_v22 = vmul.f32 %v10518_v0, %v1477_v39  ;;  %v1491_v45 = vmul.f32 %v10524_v18, %v12823_v53  ;;  %v1516_v39 = vand.u32 2147483648, %v12840_v26  ;;  %16124 = vst [vmem:[#allocation69_spill] sm:$0xff] %v16123_v13  ;;  %v1911_v12 = vsel %vm16126_vm1, %v1905_v36, %v16125_v27  ;;  %3433 = vmatpush.bf16.msrb.mxu1 %v9953_v21 }
 0x143   : > { %vm12888_vm8 = vcmp.eq.f32.partialorder %v1514_v32, 8.507059e+37  ;;  %10527 = vrcp.f32 %v12873_v20  ;;  %v16132_v32 = vmov 0  ;;  %v16135_v35 = vrot.slane %v11865_v33, 1 }
 0x144   : > { %v8430_v7 = vld [vmem:[#allocation2 + $0x158] sm:$0xf]  ;;  %v1479_v10 = vadd.f32 %v10518_v0, %v1478_v22  ;;  %v1492_v30 = vsub.f32 1.0, %v1491_v45  ;;  %vm16137_vm5 = vweird.f32 %v12823_v53  ;;  %vm1525_vm11 = vweird.f32 %v12873_v20 }
 0x145   : > { %v9926_v54 = vld [vmem:[#allocation2 + $0x160] sm:$0xf0]  ;;  %v1912_v45 = vsel %vm16126_vm1, %v16135_v35, %v1905_v36  ;;  %v2045_v33 = vsel %vm12877_vm13, %v1911_v12, 0.0  ;;  %v1529_v53 = vand.u32 2147483647, %v12873_v20  ;;  %v475_v13 = vadd.s32 200, %v11189_v42 }
 0x146   : > { %v12875_v61 = vor.u32 %v9926_v54, %v8430_v7  ;;  %v1483_v37 = vsel %vm12864_vm7, %v10518_v0, %v1479_v10  ;;  %v16129_v7 = vmov 0  ;;  %v1493_v54 = vmul.f32 %v10524_v18, %v1492_v30  ;;  %v2936_v10 = vpop.f32.mrf.mxu1  ;;  %3054 = vmatmul.bf16.gmra.mxu2 %v12857_v28 }
 0x147   : > { %v12893_v52 = vpop.eup %10525  ;;  %v1488_v6 = vsel %vm12832_vm9, %v1487_v48, %v1483_v37  ;;  %v16130_v7 = vsel %vm12897_vm10, 4294967295, %v16129_v7  ;;  %v1517_v0 = vor.u32 1.1754944e-38, %v1516_v39  ;;  %vm12901_vm7 = vcmp.ne.s32.totalorder %v644_v43, 0  ;;  %v2847_v48 = vpop.f32.mrf.mxu0 }
 0x148   : > { %16121 = vst [vmem:[#allocation68_spill] sm:$0xff] %v12875_v61  ;;  %v16133_v32 = vsel %vm12901_vm7, 4294967295, %v16132_v32  ;;  %v1689_v4 = vmul.f32 %v1488_v6, %v12518_v24  ;;  %vm16136_vm9 = vweird.f32 %v10524_v18  ;;  %v1506_v44 = vmul.f32 %v12893_v52, %v12840_v26 }
 0x149   : > { %16131 = vst [vmem:[#allocation70_spill] sm:$0xff] %v16130_v7  ;;  %vm12914_vm4 = vmor %vm16137_vm5, %vm16136_vm9  ;;  %v1494_v36 = vadd.f32 %v10524_v18, %v1493_v54  ;;  %vm1511_vm1 = vweird.f32 %v12893_v52  ;;  %v12925_v24 = vadd.f32 %v2936_v10, %v2847_v48  ;;  %v1531_v6 = vand.u32 2147483648, %v12873_v20  ;;  %v12931_v54 = vpop.eup %10527 }
 0x14a   : > { %16134 = vst [vmem:[#allocation71_spill] sm:$0xff] %v16133_v32  ;;  %v2142_v39 = vpack.c.bf16 %v1689_v4, %v1689_v4  ;;  %v1721_v43 = vrot.slane %v1689_v4, 7  ;;  %v1895_v27 = vrot.slane %v1689_v4, 1  ;;  %v1507_v37 = vsub.f32 1.0, %v1506_v44 }
 0x14b   : > { %v1498_v21 = vsel %vm12914_vm4, %v10524_v18, %v1494_v36  ;;  %v2221_v35 = vpack.c.bf16 %v1912_v45, %v1912_v45  ;;  %v2222_v12 = vpack.c.bf16 %v2045_v33, %v2045_v33  ;;  %vm16141_vm5 = vcmp.lt.s32.totalorder %v11189_v42, 1  ;;  %v12947_v36 = vpop.f32.mrf.mxu3 }
 0x14c   : > { %3079 = vmatmul.bf16.gmra.mxu3 %v12875_v61  ;;  %2176 = vst [vmem:[#allocation2 + $0x100] sm:$0xf] %v2142_v39  ;;  %v1748_v10 = vsel %vm16141_vm5, %v16140_v11, %v1721_v43  ;;  %v1503_v48 = vsel %vm12848_vm15, %v1502_v23, %v1498_v21  ;;  %v16142_v4 = vrot.slane %v12721_v56, 1  ;;  %vm16143_vm9 = vcmp.lt.s32.totalorder %v11189_v42, 7  ;;  %v12949_v39 = vpop.f32.mrf.mxu2  ;;  %v9952_v11 = vld [vmem:[#allocation9 + $0xb0] sm:$0xff] }
 0x14d   : > { %v1508_v30 = vmul.f32 %v12893_v52, %v1507_v37  ;;  %v2071_v45 = vpack.c.bf16 %v1748_v10, %v1748_v10  ;;  %v12945_v44 = vmul.f32 %v1503_v48, %v12754_v47  ;;  %vm16144_vm4 = vweird.f32 %v12840_v26  ;;  %2257 = vst [vmem:[#allocation2 + $0x170] sm:$0xf] %v2221_v35  ;;  %v9933_v48 = vld [vmem:[#allocation9 + $0x18] sm:$0xff]  ;;  %3434 = vmatpush.bf16.msrb.mxu1 %v9952_v11  ;;  %v10051_v61 = vld [vmem:[#allocation9 + $0x230] sm:$0xff] }
 0x14e   : > { %v1922_v18 = vsel %vm16143_vm9, %v16142_v4, %v1895_v27  ;;  %vm12955_vm15 = vmor %vm16144_vm4, %vm1511_vm1  ;;  %v1521_v49 = vmul.f32 %v12931_v54, %v12873_v20  ;;  %vm1526_vm5 = vweird.f32 %v12931_v54  ;;  %vm12963_vm9 = vcmp.eq.f32.partialorder %v1529_v53, 8.507059e+37  ;;  %2258 = vst [vmem:[#allocation2 + $0x17c] sm:$0xf] %v2222_v12  ;;  %v12972_v4 = vpop.f32.mrf.mxu1  ;;  %3259 = vmatpush.bf16.msrb.mxu3 %v9933_v48 }
 0x14f   : > { %v2211_v33 = vpack.c.bf16 %v1922_v18, %v1922_v18  ;;  %v1509_v47 = vadd.f32 %v12893_v52, %v1508_v30  ;;  %v474_v26 = vadd.s32 192, %v11189_v42  ;;  %2107 = vst [vmem:[#allocation2 + $0xfc] sm:$0xf] %v2071_v45  ;;  %v1896_v37 = vrot.slane %v12945_v44, 1  ;;  %v12977_v12 = vpop.f32.mrf.mxu0  ;;  %v9951_v18 = vld [vmem:[#allocation9 + $0xa8] sm:$0xff] }
 0x150   : > { %v2143_v21 = vpack.c.bf16 %v12945_v44, %v12945_v44  ;;  %v1722_v35 = vrot.slane %v12945_v44, 7  ;;  %v1522_v10 = vsub.f32 1.0, %v1521_v49  ;;  %v2146_v30 = vpack.c.bf16 %v11418_v9, %v11418_v9  ;;  %v9912_v44 = vld [vmem:[#allocation2 + $0xf4] sm:$0xf] }
 0x151   : > { %2247 = vst [vmem:[#allocation2 + $0xf8] sm:$0xf] %v2211_v33  ;;  %v1513_v53 = vsel %vm12955_vm15, %v12893_v52, %v1509_v47  ;;  %v658_v45 = vand.u32 15, %v474_v26  ;;  %vm16149_vm1 = vcmp.lt.s32.totalorder %v11189_v42, 7  ;;  %vm16150_vm4 = vcmp.lt.s32.totalorder %v11189_v42, 1  ;;  %3435 = vmatpush.bf16.msrb.mxu1 %v9951_v18 }
 0x152   : > { %v1921_v49 = vsel %vm16149_vm1, %v1895_v27, %v1896_v37  ;;  %v1518_v33 = vsel %vm12888_vm8, %v1517_v0, %v1513_v53  ;;  %2177 = vst [vmem:[#allocation2 + $0x10c] sm:$0xf] %v2143_v21  ;;  %v1747_v52 = vsel %vm16150_vm4, %v1721_v43, %v1722_v35  ;;  %v16151_v56 = vand.u32 15, %v12846_v29  ;;  %vm13006_vm8 = vmor %vm1525_vm11, %vm1526_vm5  ;;  %v9932_v43 = vld [vmem:[#allocation9 + $0x10] sm:$0xff] }
 0x153   : > { %v16152_v47 = vmov 0  ;;  %v1523_v11 = vmul.f32 %v12931_v54, %v1522_v10  ;;  %v2035_v26 = vsel %vm12897_vm10, %v1921_v49, 0.0  ;;  %v12998_v27 = vmul.f32 %v1518_v33, %v12783_v60  ;;  %2180 = vst [vmem:[#allocation2 + $0x130] sm:$0xf] %v2146_v30  ;;  %v8376_v21 = vld [vmem:[#allocation2 + $0xfc] sm:$0xf0]  ;;  %vm16160_vm11 = vmmov %vm16150_vm4  ;;  %3260 = vmatpush.bf16.msrb.mxu3 %v9932_v43 }
 0x154   : > { %vm12990_vm15 = vcmp.ne.s32.totalorder %v16151_v56, 15  ;;  %v1862_v22 = vsel %vm12901_vm7, %v1747_v52, 0.0  ;;  %v1532_v0 = vor.u32 1.1754944e-38, %v1531_v6  ;;  %v8374_v10 = vld [vmem:[#allocation2 + $0xf0] sm:$0xf]  ;;  %v2212_v53 = vpack.c.bf16 %v2035_v26, %v2035_v26  ;;  %v9950_v56 = vld [vmem:[#allocation9 + $0xa0] sm:$0xff] }
 0x155   : > { %v16153_v47 = vsel %vm12990_vm15, 4294967295, %v16152_v47  ;;  %v2072_v60 = vpack.c.bf16 %v1862_v22, %v1862_v22  ;;  %v1524_v49 = vadd.f32 %v12931_v54, %v1523_v11  ;;  %vm13011_vm1 = vcmp.ne.s32.totalorder %v658_v45, 0  ;;  %v8442_v30 = vld [vmem:[#allocation2 + $0x170] sm:$0xf]  ;;  %v9929_v11 = vld [vmem:[#allocation2 + $0x178] sm:$0xf0]  ;;  %3436 = vmatpush.bf16.msrb.mxu1 %v9950_v56 }
 0x156   : > { %16154 = vst [vmem:[#allocation72_spill] sm:$0xff] %v16153_v47  ;;  %v16157_v33 = vmov 0  ;;  %v13015_v52 = vor.u32 %v9912_v44, %v8376_v21  ;;  %v2144_v20 = vpack.c.bf16 %v12998_v27, %v12998_v27  ;;  %v1723_v6 = vrot.slane %v12998_v27, 7  ;;  %v9913_v22 = vld [vmem:[#allocation2 + $0xf8] sm:$0xf0]  ;;  %v2941_v23 = vpop.f32.mrf.mxu1 }
 0x157   : > { %v16158_v33 = vsel %vm13011_vm1, 4294967295, %v16157_v33  ;;  %v1897_v48 = vrot.slane %v12998_v27, 1  ;;  %2248 = vst [vmem:[#allocation2 + $0x104] sm:$0xf] %v2212_v53  ;;  %v1528_v45 = vsel %vm13006_vm8, %v12931_v54, %v1524_v49  ;;  %v665_v26 = vand.u32 15, %v475_v13  ;;  %v13035_v49 = vpop.f32.mrf.mxu3 }
 0x158   : > { %16159 = vst [vmem:[#allocation73_spill] sm:$0xff] %v16158_v33  ;;  %v1899_v44 = vrot.slane %v11418_v9, 1  ;;  %2970 = vmatmul.bf16.gmra.mxu1 %v13015_v52  ;;  %v1746_v21 = vsel %vm16160_vm11, %v1722_v35, %v1723_v6  ;;  %v1533_v18 = vsel %vm12963_vm9, %v1532_v0, %v1528_v45  ;;  %vm16161_vm5 = vcmp.lt.s32.totalorder %v11189_v42, 7  ;;  %v2852_v0 = vpop.f32.mrf.mxu0 }
 0x159   : > { %2178 = vst [vmem:[#allocation2 + $0x118] sm:$0xf] %v2144_v20  ;;  %v1920_v27 = vsel %vm16161_vm5, %v1896_v37, %v1897_v48  ;;  %v13032_v29 = vor.u32 %v9913_v22, %v8374_v10  ;;  %v2073_v54 = vpack.c.bf16 %v1746_v21, %v1746_v21  ;;  %v1692_v13 = vmul.f32 %v1533_v18, %v12804_v51  ;;  %v3025_v20 = vpop.f32.mrf.mxu2  ;;  %v9949_v37 = vld [vmem:[#allocation9 + $0x98] sm:$0xff]  ;;  %vm16167_vm4 = vmmov %vm16161_vm5 }
 0x15a   : > { %2108 = vst [vmem:[#allocation2 + $0x108] sm:$0xf] %v2072_v60  ;;  %v2213_v53 = vpack.c.bf16 %v1920_v27, %v1920_v27  ;;  %v13037_v7 = vor.u32 %v9929_v11, %v8442_v30  ;;  %v13040_v35 = vadd.f32 %v3025_v20, %v12925_v24  ;;  %vm13042_vm9 = vcmp.ne.s32.totalorder %v665_v26, 15  ;;  %v8382_v60 = vld [vmem:[#allocation2 + $0xf8] sm:$0xf]  ;;  %vm16168_vm8 = vmmov %vm16167_vm4  ;;  %3437 = vmatpush.bf16.msrb.mxu1 %v9949_v37 }
 0x15b   : > { %v16163_v43 = vmov 0  ;;  %v16166_v10 = vrot.slane %v11429_v31, 1  ;;  %2881 = vmatmul.bf16.gmra.mxu0 %v13032_v29  ;;  %2109 = vst [vmem:[#allocation2 + $0x114] sm:$0xf] %v2073_v54  ;;  %v1898_v30 = vrot.slane %v1692_v13, 1  ;;  %v2145_v24 = vpack.c.bf16 %v1692_v13, %v1692_v13  ;;  %vm16170_vm5 = vmmov %vm16160_vm11 }
 0x15c   : > { %16162 = vst [vmem:[#allocation74_spill] sm:$0xff] %v13037_v7  ;;  %v16164_v43 = vsel %vm13042_vm9, 4294967295, %v16163_v43  ;;  %v13051_v45 = vadd.f32 %v2941_v23, %v2852_v0  ;;  %v1724_v56 = vrot.slane %v1692_v13, 7  ;;  %3084 = vmatmul.bf16.gmra.mxu3 %v13037_v7  ;;  %v483_v31 = vadd.s32 264, %v11189_v42  ;;  %v10034_v7 = vld [vmem:[#allocation9 + $0x1a8] sm:$0xff] }
 0x15d   : > { %16165 = vst [vmem:[#allocation75_spill] sm:$0xff] %v16164_v43  ;;  %v1917_v51 = vsel %vm16167_vm4, %v1899_v44, %v16166_v10  ;;  %v1907_v26 = vrot.slane %v12099_v14, 1  ;;  %v451_v22 = vadd.s32 8, %v11189_v42  ;;  %v1919_v21 = vsel %vm16168_vm8, %v1897_v48, %v1898_v30  ;;  %vm16171_vm8 = vmmov %vm16167_vm4  ;;  %v10043_v14 = vld [vmem:[#allocation9 + $0x1f0] sm:$0xff] }
 0x15e   : > { %2249 = vst [vmem:[#allocation2 + $0x110] sm:$0xf] %v2213_v53  ;;  %v2039_v11 = vsel %vm13042_vm9, %v1917_v51, 0.0  ;;  %v16169_v18 = vrot.slane %v11418_v9, 7  ;;  %v1745_v54 = vsel %vm16170_vm5, %v1723_v6, %v1724_v56  ;;  %v1918_v13 = vsel %vm16167_vm4, %v1898_v30, %v1899_v44  ;;  %v9914_v53 = vld [vmem:[#allocation2 + $0x100] sm:$0xf0] }
 0x15f   : > { %2179 = vst [vmem:[#allocation2 + $0x124] sm:$0xf] %v2145_v24  ;;  %v2037_v20 = vsel %vm12990_vm15, %v1919_v21, 0.0  ;;  %v1864_v48 = vsel %vm13011_vm1, %v1745_v54, 0.0  ;;  %v13073_v0 = vor.u32 %v9914_v53, %v8382_v60  ;;  %v9915_v9 = vld [vmem:[#allocation2 + $0x10c] sm:$0xf]  ;;  %v2215_v24 = vpack.c.bf16 %v1918_v13, %v1918_v13 }
 0x160   : > { %v1744_v27 = vsel %vm16160_vm11, %v1724_v56, %v16169_v18  ;;  %v2214_v10 = vpack.c.bf16 %v2037_v20, %v2037_v20  ;;  %v2074_v51 = vpack.c.bf16 %v1864_v48, %v1864_v48  ;;  %v8388_v18 = vld [vmem:[#allocation2 + $0x114] sm:$0xf0]  ;;  %v2216_v6 = vpack.c.bf16 %v2039_v11, %v2039_v11  ;;  %vm16173_vm11 = vmmov %vm16167_vm4  ;;  %v9931_v30 = vld [vmem:[#allocation9 + $0x8] sm:$0xff] }
 0x161   : > { %v2075_v23 = vpack.c.bf16 %v1744_v27, %v1744_v27  ;;  %v721_v56 = vand.u32 15, %v483_v31  ;;  %v1909_v44 = vsel %vm16171_vm8, %v1907_v26, 0.0  ;;  %3059 = vmatmul.bf16.gmra.mxu2 %v13073_v0  ;;  %v16172_v37 = vrot.slane %v12077_v63, 1  ;;  %v9938_v21 = vld [vmem:[#allocation9 + $0x40] sm:$0xff]  ;;  %v9948_v27 = vld [vmem:[#allocation9 + $0x90] sm:$0xff]  ;;  %v10036_v31 = vld [vmem:[#allocation9 + $0x1b8] sm:$0xff]  ;;  %3261 = vmatpush.bf16.msrb.mxu3 %v9931_v30 }
 0x162   : > { %2250 = vst [vmem:[#allocation2 + $0x11c] sm:$0xf] %v2214_v10  ;;  %v497_v54 = vand.u32 15, %v451_v22  ;;  %v16174_v13 = vmov 0  ;;  %v16177_v53 = vrot.slane %v11375_v50, 1  ;;  %3351 = vmatpush.bf16.msrb.mxu0 %v9938_v21  ;;  %v13092_v22 = vor.u32 %v9915_v9, %v8388_v18  ;;  %3438 = vmatpush.bf16.msrb.mxu1 %v9948_v27  ;;  %v9930_v50 = vld [vmem:[#allocation9] sm:$0xff] }
 0x163   : > { %2111 = vst [vmem:[#allocation2 + $0x12c] sm:$0xf] %v2075_v23  ;;  %v1910_v60 = vsel %vm16173_vm11, %v16172_v37, %v1907_v26  ;;  %vm13082_vm5 = vcmp.ne.s32.totalorder %v721_v56, 15  ;;  %v8386_v63 = vld [vmem:[#allocation2 + $0x108] sm:$0xf]  ;;  %v13094_v23 = vpop.f32.mrf.mxu3  ;;  %4035 = vmatpush.bf16.msrb.mxu2 %v10036_v31  ;;  %v16178_v56 = vmov 0  ;;  %v13108_v31 = vpop.f32.mrf.mxu1 }
 0x164   : > { %2110 = vst [vmem:[#allocation2 + $0x120] sm:$0xf] %v2074_v51  ;;  %v16175_v13 = vsel %vm13082_vm5, 4294967295, %v16174_v13  ;;  %v2223_v11 = vpack.c.bf16 %v1910_v60, %v1910_v60  ;;  %v1941_v20 = vsel %vm16167_vm4, 0.0, %v16177_v53  ;;  %v2047_v26 = vsel %vm13082_vm5, %v1909_v44, 0.0  ;;  %v9947_v51 = vld [vmem:[#allocation9 + $0x88] sm:$0xff] }
 0x165   : > { %16176 = vst [vmem:[#allocation76_spill] sm:$0xff] %v16175_v13  ;;  %v9916_v48 = vld [vmem:[#allocation2 + $0x110] sm:$0xf0]  ;;  %v2224_v10 = vpack.c.bf16 %v2047_v26, %v2047_v26  ;;  %vm13096_vm8 = vcmp.ne.s32.totalorder %v497_v54, 15  ;;  %3262 = vmatpush.bf16.msrb.mxu3 %v9930_v50  ;;  %v10931_v44 = vmov 0.0|0.0   ;;  %v10044_v30 = vld [vmem:[#allocation9 + $0x1f8] sm:$0xff]  ;;  %v13114_v26 = vpop.f32.mrf.mxu0 }
 0x166   : > { %2251 = vst [vmem:[#allocation2 + $0x128] sm:$0xf] %v2215_v24  ;;  %v16179_v56 = vsel %vm13096_vm8, 4294967295, %v16178_v56  ;;  %v2015_v24 = vsel %vm13096_vm8, %v1941_v20, 0.0  ;;  %v13102_v9 = vor.u32 %v9916_v48, %v8386_v63  ;;  %3439 = vmatpush.bf16.msrb.mxu1 %v9947_v51  ;;  %v8394_v37 = vld [vmem:[#allocation2 + $0x110] sm:$0xf]  ;;  %v13112_v63 = vpop.f32.mrf.mxu2 }
 0x167   : > { %2252 = vst [vmem:[#allocation2 + $0x134] sm:$0xf] %v2216_v6  ;;  %v2192_v18 = vpack.c.bf16 %v2015_v24, %v2015_v24  ;;  %v9946_v6 = vld [vmem:[#allocation9 + $0x80] sm:$0xff]  ;;  %v10052_v21 = vld [vmem:[#allocation9 + $0x238] sm:$0xff]  ;;  %v10035_v50 = vld [vmem:[#allocation9 + $0x1b0] sm:$0xff] }
 0x168   : > { %2259 = vst [vmem:[#allocation2 + $0x188] sm:$0xf] %v2223_v11  ;;  %2975 = vmatmul.bf16.gmra.mxu1 %v13092_v22  ;;  %4213 = vmatpush.bf16.msra.mxu0 %v10052_v21  ;;  %v9918_v48 = vld [vmem:[#allocation2 + $0x124] sm:$0xf] }
 0x169   : > { %16180 = vst [vmem:[#allocation77_spill] sm:$0xff] %v16179_v56  ;;  %v9917_v60 = vld [vmem:[#allocation2 + $0x118] sm:$0xf0]  ;;  %4124 = vmatpush.bf16.msra.mxu3 %v10044_v30  ;;  %4036 = vmatpush.bf16.msrb.mxu2 %v10035_v50 }
 0x16a   : > { %2260 = vst [vmem:[#allocation2 + $0x194] sm:$0xf] %v2224_v10  ;;  %v13106_v54 = vor.u32 %v9917_v60, %v8394_v37  ;;  %3440 = vmatpush.bf16.msrb.mxu1 %v9946_v6  ;;  %v8400_v10 = vld [vmem:[#allocation2 + $0x12c] sm:$0xf0] }
 0x16b   : > { %2227 = vst [vmem:[#allocation2 + $0x8] sm:$0xf] %v10931_v44  ;;  %2886 = vmatmul.bf16.gmra.mxu0 %v13102_v9  ;;  %v13110_v20 = vpop.f32.mrf.mxu3  ;;  %v13117_v51 = vor.u32 %v9918_v48, %v8400_v10  ;;  %v8398_v24 = vld [vmem:[#allocation2 + $0x120] sm:$0xf] }
 0x16c   : > { %2086 = vst [vmem:[#allocation2] sm:$0xf] %v10931_v44  ;;  %4214 = vmatpush.bf16.msra.mxu0 %v10051_v61 }
 0x16d   : > { %2228 = vst [vmem:[#allocation2 + $0x14] sm:$0xf] %v2192_v18  ;;  %v9919_v18 = vld [vmem:[#allocation2 + $0x128] sm:$0xf0]  ;;  %4125 = vmatpush.bf16.msra.mxu3 %v10043_v14  ;;  %4037 = vmatpush.bf16.msrb.mxu2 %v10034_v7 }
 0x16e   : > { %2087 = vst [vmem:[#allocation2 + $0xc] sm:$0xf] %v10931_v44  ;;  %v13121_v37 = vor.u32 %v9919_v18, %v8398_v24 }
 0x16f   : > { %2121 = vst [vmem:[#allocation2 + $0x1a4] sm:$0xf] %v10931_v44  ;;  %v8454_v27 = vld [vmem:[#allocation2 + $0x188] sm:$0xf] }
 0x170   : > { %2155 = vst [vmem:[#allocation2 + $0x4] sm:$0xf] %v10931_v44  ;;  %v2946_v60 = vpop.f32.mrf.mxu1 }
 0x171   : > { %v9956_v11 = vld [vmem:[#allocation2 + $0x190] sm:$0xf0]  ;;  %2156 = vst [vmem:[#allocation2 + $0x10] sm:$0xf] %v10931_v44  ;;  %3064 = vmatmul.bf16.gmra.mxu2 %v13106_v54  ;;  %v3030_v30 = vpop.f32.mrf.mxu2 }
 0x172   : > { %v8455_v53 = vor.u32 %v9956_v11, %v8454_v27  ;;  %2189 = vst [vmem:[#allocation2 + $0x19c] sm:$0xf] %v10931_v44  ;;  %v8406_v11 = vld [vmem:[#allocation2 + $0x128] sm:$0xf]  ;;  %v13125_v48 = vadd.f32 %v3030_v30, %v13051_v45 }
 0x173   : > { %2190 = vst [vmem:[#allocation2 + $0x1a8] sm:$0xf] %v10931_v44  ;;  %v13119_v6 = vpop.f32.mrf.mxu3  ;;  %v8554_v21 = vld [vmem:[#allocation2] sm:$0xf]  ;;  %v2857_v10 = vpop.f32.mrf.mxu0  ;;  %v8562_v45 = vld [vmem:[#allocation2 + $0x8] sm:$0xf] }
 0x174   : > { %3089 = vmatmul.bf16.gmra.mxu3 %v8455_v53  ;;  %2261 = vst [vmem:[#allocation2 + $0x1a0] sm:$0xf] %v10931_v44  ;;  %v9920_v53 = vld [vmem:[#allocation2 + $0x130] sm:$0xf0]  ;;  %v2947_v50 = vadd.f32 %v2946_v60, %v2857_v10 }
 0x175   : > { %2262 = vst [vmem:[#allocation2 + $0x1ac] sm:$0xf] %v10931_v44  ;;  %v9883_v27 = vld [vmem:[#allocation2 + $0x8] sm:$0xf0]  ;;  %v13128_v18 = vor.u32 %v9920_v53, %v8406_v11  ;;  %v9884_v30 = vld [vmem:[#allocation2 + $0x10] sm:$0xf0] }
 0x176   : > { %5275 = vst [vmem:[#allocation3] sm:$0xf] %v10931_v44  ;;  %v8555_v24 = vor.u32 %v9883_v27, %v8554_v21  ;;  %v8563_v32 = vor.u32 %v9884_v30, %v8562_v45 }
 0x177   : > { %5276 = vst [vmem:[#allocation3 + $0xc] sm:$0xf] %v10931_v44  ;;  %v9882_v56 = vld [vmem:[#allocation2 + $0x4] sm:$0xf] }
 0x178   : > { %5310 = vst [vmem:[#allocation3 + $0x1a4] sm:$0xf] %v10931_v44  ;;  %2980 = vmatmul.bf16.gmra.mxu1 %v13117_v51  ;;  %v13132_v43 = vpop.f32.mrf.mxu1 }
 0x179   : > { %5343 = vst [vmem:[#allocation3 + $0x4] sm:$0xf] %v10931_v44  ;;  %v13135_v47 = vpop.f32.mrf.mxu2 }
 0x17a   : > { %5344 = vst [vmem:[#allocation3 + $0x10] sm:$0xf] %v10931_v44 }
 0x17b   : > { %5377 = vst [vmem:[#allocation3 + $0x19c] sm:$0xf] %v10931_v44  ;;  %2891 = vmatmul.bf16.gmra.mxu0 %v13121_v37  ;;  %v13130_v13 = vpop.f32.mrf.mxu3  ;;  %v13137_v33 = vpop.f32.mrf.mxu0 }
 0x17c   : > { %5378 = vst [vmem:[#allocation3 + $0x1a8] sm:$0xf] %v10931_v44 }
 0x17d   : > { %5412 = vst [vmem:[#allocation3 + $0x8] sm:$0xf] %v10931_v44 }
 0x17e   : > { %5446 = vst [vmem:[#allocation3 + $0x1a0] sm:$0xf] %v10931_v44 }
 0x17f   : > { %5447 = vst [vmem:[#allocation3 + $0x1ac] sm:$0xf] %v10931_v44  ;;  %v8556_v44 = vld [vmem:[#allocation2 + $0xc] sm:$0xf0] }
 0x180   : > { %v8559_v21 = vor.u32 %v9882_v56, %v8556_v44  ;;  %v2951_v27 = vpop.f32.mrf.mxu1 }
 0x181   : > { %3069 = vmatmul.bf16.gmra.mxu2 %v13128_v18  ;;  %v3035_v11 = vpop.f32.mrf.mxu2 }
 0x182   : > { %v13141_v53 = vadd.f32 %v3035_v11, %v2947_v50 }
 0x183   : > { %v13139_v60 = vpop.f32.mrf.mxu3  ;;  %v2862_v10 = vpop.f32.mrf.mxu0 }
 0x184   : > { %3263 = vmatmul.bf16.vlgmr.msrb.gmra.mxu3 %v8555_v24  ;;  %v2952_v24 = vadd.f32 %v2951_v27, %v2862_v10 }
 0x188   : > { %3441 = vmatmul.bf16.vlgmr.msrb.gmra.mxu1 %v8563_v32  ;;  %v13145_v45 = vpop.f32.mrf.mxu1 }
 0x189   : > { %16181 = vst [vmem:[#allocation78_spill] sm:$0xff] %v13145_v45  ;;  %v13148_v56 = vpop.f32.mrf.mxu2 }
 0x18b   : > { %3352 = vmatmul.bf16.vlgmr.msrb.gmra.mxu0 %v8559_v21  ;;  %v13143_v42 = vpop.f32.mrf.mxu3  ;;  %v13150_v32 = vpop.f32.mrf.mxu0 }
 0x191   : > { %v2956_v30 = vpop.f32.mrf.mxu1  ;;  %v3040_v14 = vpop.f32.mrf.mxu2 }
 0x192   : > { %v13155_v44 = vadd.f32 %v3040_v14, %v2952_v24 }
 0x193   : > { %v13152_v50 = vpop.f32.mrf.mxu3 }
 0x194   : > { %3268 = vmatmul.bf16.gmra.mxu3 %v11505_v38 }
 0x195   : > { %v2867_v21 = vpop.f32.mrf.mxu0 }
 0x196   : > { %v2957_v27 = vadd.f32 %v2956_v30, %v2867_v21  ;;  %v10042_v30 = vld [vmem:[#allocation9 + $0x1e8] sm:$0xff] }
 0x197   : > { %4126 = vmatpush.bf16.msra.mxu3 %v10042_v30 }
 0x198   : > { %3446 = vmatmul.bf16.gmra.mxu1 %v11589_v15  ;;  %v10033_v15 = vld [vmem:[#allocation9 + $0x1a0] sm:$0xff] }
 0x199   : > { %v13161_v38 = vpop.f32.mrf.mxu1  ;;  %v13163_v61 = vpop.f32.mrf.mxu2  ;;  %4038 = vmatpush.bf16.msrb.mxu2 %v10033_v15 }
 0x19a   : > { %16182 = vst [vmem:[#allocation79_spill] sm:$0xff] %v13161_v38 }
 0x19b   : > { %3357 = vmatmul.bf16.gmra.mxu0 %v11476_v3  ;;  %v13158_v11 = vpop.f32.mrf.mxu3  ;;  %16183 = vst [vmem:[#allocation80_spill] sm:$0xff] %v13163_v61 }
 0x19d   : > { %v13165_v7 = vpop.f32.mrf.mxu0 }
 0x19e   : > { %16184 = vst [vmem:[#allocation81_spill] sm:$0xff] %v13165_v7  ;;  %v10050_v7 = vld [vmem:[#allocation9 + $0x228] sm:$0xff] }
 0x19f   : > { %4215 = vmatpush.bf16.msra.mxu0 %v10050_v7 }
 0x1a3   : > { %v2998_v10 = vpop.f32.mrf.mxu3 }
 0x1a4   : > { %3273 = vmatmul.bf16.gmra.mxu3 %v11673_v1  ;;  %v13168_v45 = vadd.f32 %v2998_v10, %v13094_v23 }
 0x1a5   : > { %v2961_v3 = vpop.f32.mrf.mxu1 }
 0x1a8   : > { %3451 = vmatmul.bf16.gmra.mxu1 %v11795_v46  ;;  %v2872_v24 = vpop.f32.mrf.mxu0 }
 0x1a9   : > { %v2962_v1 = vadd.f32 %v2961_v3, %v2872_v24  ;;  %v3045_v14 = vpop.f32.mrf.mxu2 }
 0x1aa   : > { %v13172_v21 = vadd.f32 %v3045_v14, %v2957_v27  ;;  %v16186_v14 = vld [vmem:[#allocation34_spill] sm:$0xff] }
 0x1ab   : > { %3362 = vmatmul.bf16.gmra.mxu0 %v11652_v62  ;;  %v3001_v38 = vpop.f32.mrf.mxu3 }
 0x1ac   : > { %v13175_v61 = vadd.f32 %v3001_v38, %v13110_v20 }
 0x1ad   : > { %v13178_v46 = vpop.f32.mrf.mxu1 }
 0x1ae   : > { %16185 = vst [vmem:[#allocation82_spill] sm:$0xff] %v13178_v46 }
 0x1b0   : > { %v13180_v23 = vpop.f32.mrf.mxu0 }
 0x1b1   : > { %v13182_v62 = vpop.f32.mrf.mxu2 }
 0x1b3   : > { %v3003_v10 = vpop.f32.mrf.mxu3 }
 0x1b4   : > { %3278 = vmatmul.bf16.gmra.mxu3 %v11947_v58  ;;  %v13185_v15 = vadd.f32 %v3003_v10, %v13119_v6  ;;  %v2987_v58 = vadd.f32 %v13130_v13, %v12760_v5  ;;  %v2989_v6 = vadd.f32 %v13139_v60, %v12816_v8  ;;  %v16187_v5 = vld [vmem:[#allocation33_spill] sm:$0xff] }
 0x1b5   : > { %v2966_v27 = vpop.f32.mrf.mxu1 }
 0x1b8   : > { %3456 = vmatmul.bf16.gmra.mxu1 %v12044_v17  ;;  %v2877_v20 = vpop.f32.mrf.mxu0 }
 0x1b9   : > { %v2967_v38 = vadd.f32 %v2966_v27, %v2877_v20  ;;  %v3050_v7 = vpop.f32.mrf.mxu2  ;;  %v10041_v20 = vld [vmem:[#allocation9 + $0x1e0] sm:$0xff] }
 0x1ba   : > { %v13191_v3 = vadd.f32 %v3050_v7, %v2962_v1  ;;  %v2992_v1 = vadd.f32 %v13143_v42, %v12869_v19  ;;  %4127 = vmatpush.bf16.msra.mxu3 %v10041_v20 }
 0x1bb   : > { %3367 = vmatmul.bf16.gmra.mxu0 %v11913_v55  ;;  %v10032_v55 = vld [vmem:[#allocation9 + $0x198] sm:$0xff] }
 0x1bc   : > { %4039 = vmatpush.bf16.msrb.mxu2 %v10032_v55 }
 0x1bd   : > { %v13204_v13 = vpop.f32.mrf.mxu1 }
 0x1bf   : > { %v3075_v24 = vpop.f32.mrf.mxu3 }
 0x1c0   : > { %v13193_v30 = vadd.f32 %v3075_v24, %v2987_v58  ;;  %v13210_v8 = vpop.f32.mrf.mxu0 }
 0x1c1   : > { %v13198_v17 = vpop.f32.mrf.mxu2 }
 0x1c4   : > { %3283 = vmatmul.bf16.gmra.mxu3 %v16186_v14  ;;  %v10049_v14 = vld [vmem:[#allocation9 + $0x220] sm:$0xff] }
 0x1c5   : > { %4216 = vmatpush.bf16.msra.mxu0 %v10049_v14 }
 0x1c7   : > { %v3077_v10 = vpop.f32.mrf.mxu3 }
 0x1c8   : > { %v13200_v46 = vadd.f32 %v3077_v10, %v2989_v6  ;;  %3461 = vmatmul.bf16.gmra.mxu1 %v12286_v57  ;;  %v2994_v57 = vadd.f32 %v13152_v50, %v12947_v36 }
 0x1c9   : > { %v3055_v27 = vpop.f32.mrf.mxu2 }
 0x1ca   : > { %v13208_v58 = vadd.f32 %v3055_v27, %v2967_v38 }
 0x1cb   : > { %3372 = vmatmul.bf16.gmra.mxu0 %v16187_v5  ;;  %v10031_v5 = vld [vmem:[#allocation9 + $0x190] sm:$0xff] }
 0x1cc   : > { %4040 = vmatpush.bf16.msrb.mxu2 %v10031_v5  ;;  %v16194_v5 = vld [vmem:[#allocation50_spill] sm:$0xff] }
 0x1cf   : > { %v3080_v60 = vpop.f32.mrf.mxu3 }
 0x1d0   : > { %v13212_v7 = vadd.f32 %v3080_v60, %v2992_v1 }
 0x1d1   : > { %v13220_v38 = vpop.f32.mrf.mxu2 }
 0x1d2   : > { %16188 = vst [vmem:[#allocation34_spill] sm:$0xff] %v13212_v7 }
 0x1d4   : > { %3288 = vmatmul.bf16.gmra.mxu3 %v12341_v59  ;;  %v2997_v59 = vadd.f32 %v13158_v11, %v13035_v49  ;;  %v16193_v11 = vld [vmem:[#allocation43_spill] sm:$0xff] }
 0x1d5   : > { %v2971_v24 = vpop.f32.mrf.mxu1 }
 0x1d7   : > { %v3082_v6 = vpop.f32.mrf.mxu3 }
 0x1d8   : > { %v13217_v55 = vadd.f32 %v3082_v6, %v2994_v57  ;;  %3466 = vmatmul.bf16.gmra.mxu1 %v12380_v16  ;;  %v2882_v42 = vpop.f32.mrf.mxu0 }
 0x1d9   : > { %v2972_v19 = vadd.f32 %v2971_v24, %v2882_v42  ;;  %v10040_v42 = vld [vmem:[#allocation9 + $0x1d8] sm:$0xff] }
 0x1da   : > { %16189 = vst [vmem:[#allocation33_spill] sm:$0xff] %v13217_v55  ;;  %4128 = vmatpush.bf16.msra.mxu3 %v10040_v42 }
 0x1db   : > { %3377 = vmatmul.bf16.gmra.mxu0 %v12319_v40  ;;  %v16191_v40 = vld [vmem:[#allocation45_spill] sm:$0xff] }
 0x1dd   : > { %v2973_v10 = vpop.f32.mrf.mxu1 }
 0x1df   : > { %v3085_v36 = vpop.f32.mrf.mxu3 }
 0x1e0   : > { %v2884_v50 = vpop.f32.mrf.mxu0  ;;  %v13226_v1 = vadd.f32 %v3085_v36, %v2997_v59  ;;  %v10048_v59 = vld [vmem:[#allocation9 + $0x218] sm:$0xff] }
 0x1e1   : > { %v13228_v27 = vadd.f32 %v2973_v10, %v2884_v50  ;;  %v10030_v10 = vld [vmem:[#allocation9 + $0x188] sm:$0xff]  ;;  %4217 = vmatpush.bf16.msra.mxu0 %v10048_v59 }
 0x1e2   : > { %16190 = vst [vmem:[#allocation83_spill] sm:$0xff] %v13226_v1  ;;  %4041 = vmatpush.bf16.msrb.mxu2 %v10030_v10 }
 0x1e4   : > { %3293 = vmatmul.bf16.gmra.mxu3 %v12413_v34  ;;  %v3060_v16 = vpop.f32.mrf.mxu2 }
 0x1e5   : > { %v13230_v20 = vadd.f32 %v3060_v16, %v2972_v19  ;;  %v2976_v60 = vpop.f32.mrf.mxu1 }
 0x1e7   : > { %v3087_v57 = vpop.f32.mrf.mxu3 }
 0x1e8   : > { %3471 = vmatmul.bf16.gmra.mxu1 %v16191_v40  ;;  %v2887_v24 = vpop.f32.mrf.mxu0  ;;  %v13234_v14 = vadd.f32 %v3087_v57, %v13168_v45 }
 0x1e9   : > { %v2977_v49 = vadd.f32 %v2976_v60, %v2887_v24 }
 0x1ea   : > { %16192 = vst [vmem:[#allocation45_spill] sm:$0xff] %v13234_v14  ;;  %v16201_v14 = vld [vmem:[#allocation62_spill] sm:$0xff] }
 0x1eb   : > { %3382 = vmatmul.bf16.gmra.mxu0 %v16193_v11  ;;  %v16196_v11 = vld [vmem:[#allocation49_spill] sm:$0xff] }
 0x1ec   : > { %v13237_v6 = vpop.f32.mrf.mxu2 }
 0x1ed   : > { %v2978_v34 = vpop.f32.mrf.mxu1 }
 0x1f0   : > { %v2889_v19 = vpop.f32.mrf.mxu0 }
 0x1f1   : > { %v13240_v36 = vadd.f32 %v2978_v34, %v2889_v19 }
 0x1f4   : > { %3298 = vmatmul.bf16.gmra.mxu3 %v16194_v5  ;;  %v3065_v45 = vpop.f32.mrf.mxu2 }
 0x1f5   : > { %v13245_v60 = vadd.f32 %v3065_v45, %v2977_v49  ;;  %v2981_v57 = vpop.f32.mrf.mxu1 }
 0x1f7   : > { %v3090_v50 = vpop.f32.mrf.mxu3 }
 0x1f8   : > { %v13243_v16 = vadd.f32 %v3090_v50, %v13175_v61  ;;  %3476 = vmatmul.bf16.gmra.mxu1 %v12675_v41  ;;  %v2892_v40 = vpop.f32.mrf.mxu0 }
 0x1f9   : > { %v2982_v24 = vadd.f32 %v2981_v57, %v2892_v40  ;;  %v10029_v57 = vld [vmem:[#allocation9 + $0x180] sm:$0xff]  ;;  %v16198_v40 = vld [vmem:[#allocation59_spill] sm:$0xff] }
 0x1fa   : > { %16195 = vst [vmem:[#allocation43_spill] sm:$0xff] %v13243_v16  ;;  %4042 = vmatpush.bf16.msrb.mxu2 %v10029_v57  ;;  %v16203_v57 = vld [vmem:[#allocation64_spill] sm:$0xff] }
 0x1fb   : > { %3387 = vmatmul.bf16.gmra.mxu0 %v16196_v11 }
 0x1fc   : > { %v13249_v10 = vpop.f32.mrf.mxu2 }
 0x1fd   : > { %v2983_v19 = vpop.f32.mrf.mxu1 }
 0x1ff   : > { %v3092_v42 = vpop.f32.mrf.mxu3 }
 0x200   : > { %v13252_v34 = vadd.f32 %v3092_v42, %v13185_v15  ;;  %v2894_v5 = vpop.f32.mrf.mxu0  ;;  %v16199_v15 = vld [vmem:[#allocation57_spill] sm:$0xff]  ;;  %v16200_v42 = vld [vmem:[#allocation55_spill] sm:$0xff] }
 0x201   : > { %v13255_v61 = vadd.f32 %v2983_v19, %v2894_v5  ;;  %v16202_v19 = vld [vmem:[#allocation53_spill] sm:$0xff] }
 0x202   : > { %16197 = vst [vmem:[#allocation50_spill] sm:$0xff] %v13252_v34  ;;  %v2929_v34 = vadd.f32 %v16200_v42, %v16199_v15  ;;  %v8662_v15 = vld [vmem:[#allocation2 + $0x30] sm:$0xf] }
 0x204   : > { %3303 = vmatmul.bf16.gmra.mxu3 %v12710_v2  ;;  %v3070_v59 = vpop.f32.mrf.mxu2  ;;  %v3018_v2 = vadd.f32 %v16201_v14, %v2929_v34 }
 0x205   : > { %v13258_v50 = vadd.f32 %v3070_v59, %v2982_v24  ;;  %v3442_v45 = vpop.f32.mrf.mxu1 }
 0x207   : > { %v3264_v49 = vpop.f32.mrf.mxu3 }
 0x208   : > { %v3265_v41 = vadd.f32 %v3264_v49, %v12739_v25  ;;  %3481 = vmatmul.bf16.gmra.mxu1 %v16198_v40  ;;  %v3353_v11 = vpop.f32.mrf.mxu0  ;;  %v10039_v25 = vld [vmem:[#allocation9 + $0x1d0] sm:$0xff] }
 0x209   : > { %4129 = vmatpush.bf16.msra.mxu3 %v10039_v25  ;;  %v10047_v40 = vld [vmem:[#allocation9 + $0x210] sm:$0xff] }
 0x20a   : > { %v3354_v16 = vadd.f32 %v3353_v11, %v3265_v41  ;;  %4218 = vmatpush.bf16.msra.mxu0 %v10047_v40  ;;  %v16204_v11 = vld [vmem:[#allocation67_spill] sm:$0xff] }
 0x20b   : > { %3392 = vmatmul.bf16.gmra.mxu0 %v16202_v19 }
 0x20c   : > { %v13265_v5 = vadd.f32 %v3442_v45, %v3354_v16  ;;  %v9982_v16 = vld [vmem:[#allocation2 + $0x38] sm:$0xf0] }
 0x20d   : > { %v3444_v24 = vpop.f32.mrf.mxu1  ;;  %v8663_v45 = vor.u32 %v9982_v16, %v8662_v15 }
 0x20f   : > { %v3266_v1 = vpop.f32.mrf.mxu3  ;;  %4043 = vmatmul.bf16.vlgmr.msrb.gmra.mxu2 %v8663_v45 }
 0x210   : > { %v3267_v49 = vadd.f32 %v3266_v1, %v3018_v2  ;;  %v3355_v59 = vpop.f32.mrf.mxu0  ;;  %v16205_v1 = vld [vmem:[#allocation66_spill] sm:$0xff]  ;;  %v16206_v2 = vld [vmem:[#allocation65_spill] sm:$0xff] }
 0x211   : > { %v2934_v19 = vadd.f32 %v16206_v2, %v16205_v1 }
 0x212   : > { %v3356_v55 = vadd.f32 %v3355_v59, %v3267_v49  ;;  %v16207_v59 = vld [vmem:[#allocation60_spill] sm:$0xff] }
 0x213   : > { %v3023_v49 = vadd.f32 %v12949_v39, %v2934_v19  ;;  %v2939_v19 = vadd.f32 %v12972_v4, %v12977_v12 }
 0x214   : > { %3308 = vmatmul.bf16.gmra.mxu3 %v16203_v57  ;;  %v13268_v7 = vadd.f32 %v3444_v24, %v3356_v55 }
 0x215   : > { %v3447_v34 = vpop.f32.mrf.mxu1 }
 0x217   : > { %v3269_v41 = vpop.f32.mrf.mxu3 }
 0x218   : > { %v3270_v14 = vadd.f32 %v3269_v41, %v16204_v11  ;;  %3486 = vmatmul.bf16.gmra.mxu1 %v12857_v28  ;;  %v3358_v42 = vpop.f32.mrf.mxu0  ;;  %v10116_v41 = vld [vmem:[#allocation10 + $0x38] sm:$0xff] }
 0x219   : > { %6133 = vmatpush.bf16.msra.mxu2 %v10116_v41  ;;  %v10060_v28 = vld [vmem:[#allocation12 + $0x38] sm:$0xff] }
 0x21a   : > { %v3359_v25 = vadd.f32 %v3358_v42, %v3270_v14  ;;  %5532 = vmatpush.bf16.msra.mxu1 %v10060_v28  ;;  %v8674_v42 = vld [vmem:[#allocation2 + $0x48] sm:$0xf]  ;;  %v9988_v28 = vld [vmem:[#allocation2 + $0x68] sm:$0xf0] }
 0x21b   : > { %3397 = vmatmul.bf16.gmra.mxu0 %v16207_v59 }
 0x21c   : > { %v13276_v55 = vadd.f32 %v3447_v34, %v3359_v25  ;;  %v9985_v34 = vld [vmem:[#allocation2 + $0x50] sm:$0xf0]  ;;  %v3028_v25 = vadd.f32 %v13112_v63, %v2939_v19 }
 0x21d   : > { %v3449_v57 = vpop.f32.mrf.mxu1  ;;  %v8675_v1 = vor.u32 %v9985_v34, %v8674_v42 }
 0x21f   : > { %v3271_v24 = vpop.f32.mrf.mxu3  ;;  %4048 = vmatmul.bf16.gmra.mxu2 %v8675_v1 }
 0x220   : > { %v3272_v40 = vadd.f32 %v3271_v24, %v3023_v49  ;;  %v3360_v11 = vpop.f32.mrf.mxu0 }
 0x222   : > { %v3361_v15 = vadd.f32 %v3360_v11, %v3272_v40 }
 0x224   : > { %3313 = vmatmul.bf16.gmra.mxu3 %v13032_v29  ;;  %v13279_v16 = vadd.f32 %v3449_v57, %v3361_v15 }
 0x225   : > { %v3452_v45 = vpop.f32.mrf.mxu1 }
 0x227   : > { %v3274_v14 = vpop.f32.mrf.mxu3 }
 0x228   : > { %v3275_v39 = vadd.f32 %v3274_v14, %v13040_v35  ;;  %3491 = vmatmul.bf16.gmra.mxu1 %v13073_v0  ;;  %v3363_v2 = vpop.f32.mrf.mxu0  ;;  %v10038_v35 = vld [vmem:[#allocation9 + $0x1c8] sm:$0xff] }
 0x229   : > { %4130 = vmatpush.bf16.msra.mxu3 %v10038_v35  ;;  %v10046_v0 = vld [vmem:[#allocation9 + $0x208] sm:$0xff] }
 0x22a   : > { %v3364_v29 = vadd.f32 %v3363_v2, %v3275_v39  ;;  %4219 = vmatpush.bf16.msra.mxu0 %v10046_v0  ;;  %v2944_v39 = vadd.f32 %v13108_v31, %v13114_v26  ;;  %v10115_v2 = vld [vmem:[#allocation10 + $0x30] sm:$0xff] }
 0x22b   : > { %3402 = vmatmul.bf16.gmra.mxu0 %v13015_v52  ;;  %v8686_v52 = vld [vmem:[#allocation2 + $0x60] sm:$0xf]  ;;  %6134 = vmatpush.bf16.msra.mxu2 %v10115_v2 }
 0x22c   : > { %v13287_v49 = vadd.f32 %v3452_v45, %v3364_v29  ;;  %v8687_v15 = vor.u32 %v9988_v28, %v8686_v52  ;;  %v3033_v45 = vadd.f32 %v13135_v47, %v2944_v39  ;;  %v16208_v52 = vld [vmem:[#allocation26_spill] sm:$0xff]  ;;  %v8710_v39 = vld [vmem:[#allocation2 + $0x90] sm:$0xf] }
 0x22d   : > { %v3454_v24 = vpop.f32.mrf.mxu1  ;;  %v10045_v28 = vld [vmem:[#allocation9 + $0x200] sm:$0xff] }
 0x22e   : > { %4220 = vmatpush.bf16.msra.mxu0 %v10045_v28  ;;  %v16210_v2 = vld [vmem:[#allocation78_spill] sm:$0xff] }
 0x22f   : > { %v3276_v59 = vpop.f32.mrf.mxu3  ;;  %4053 = vmatmul.bf16.gmra.mxu2 %v8687_v15 }
 0x230   : > { %v3277_v57 = vadd.f32 %v3276_v59, %v3028_v25  ;;  %v3365_v40 = vpop.f32.mrf.mxu0  ;;  %v9991_v59 = vld [vmem:[#allocation2 + $0x80] sm:$0xf0] }
 0x232   : > { %v3366_v41 = vadd.f32 %v3365_v40, %v3277_v57  ;;  %v2949_v57 = vadd.f32 %v13132_v43, %v13137_v33 }
 0x234   : > { %3318 = vmatmul.bf16.gmra.mxu3 %v13102_v9  ;;  %v13290_v11 = vadd.f32 %v3454_v24, %v3366_v41  ;;  %v3038_v40 = vadd.f32 %v13148_v56, %v2949_v57 }
 0x235   : > { %v3457_v63 = vpop.f32.mrf.mxu1 }
 0x237   : > { %v3279_v4 = vpop.f32.mrf.mxu3 }
 0x238   : > { %v3280_v12 = vadd.f32 %v3279_v4, %v13125_v48  ;;  %3496 = vmatmul.bf16.gmra.mxu1 %v13106_v54  ;;  %v3368_v14 = vpop.f32.mrf.mxu0  ;;  %v10059_v54 = vld [vmem:[#allocation12 + $0x30] sm:$0xff] }
 0x239   : > { %5533 = vmatpush.bf16.msra.mxu1 %v10059_v54 }
 0x23a   : > { %v3369_v9 = vadd.f32 %v3368_v14, %v3280_v12  ;;  %v10057_v14 = vld [vmem:[#allocation12 + $0x20] sm:$0xff] }
 0x23b   : > { %3407 = vmatmul.bf16.gmra.mxu0 %v13092_v22  ;;  %v8698_v22 = vld [vmem:[#allocation2 + $0x78] sm:$0xf] }
 0x23c   : > { %v13298_v42 = vadd.f32 %v3457_v63, %v3369_v9  ;;  %v8699_v35 = vor.u32 %v9991_v59, %v8698_v22  ;;  %v9994_v9 = vld [vmem:[#allocation2 + $0x98] sm:$0xf0] }
 0x23d   : > { %v3459_v48 = vpop.f32.mrf.mxu1 }
 0x23f   : > { %v3281_v34 = vpop.f32.mrf.mxu3  ;;  %4058 = vmatmul.bf16.gmra.mxu2 %v8699_v35  ;;  %v10055_v35 = vld [vmem:[#allocation12 + $0x10] sm:$0xff] }
 0x240   : > { %v3282_v1 = vadd.f32 %v3281_v34, %v3033_v45  ;;  %v3370_v19 = vpop.f32.mrf.mxu0  ;;  %v8711_v45 = vor.u32 %v9994_v9, %v8710_v39  ;;  %v16209_v34 = vld [vmem:[#allocation63_spill] sm:$0xff] }
 0x242   : > { %v3371_v29 = vadd.f32 %v3370_v19, %v3282_v1  ;;  %v10056_v1 = vld [vmem:[#allocation12 + $0x18] sm:$0xff]  ;;  %v2954_v19 = vadd.f32 %v16210_v2, %v13150_v32 }
 0x244   : > { %3323 = vmatmul.bf16.gmra.mxu3 %v13121_v37  ;;  %v13301_v25 = vadd.f32 %v3459_v48, %v3371_v29  ;;  %v16211_v29 = vld [vmem:[#allocation80_spill] sm:$0xff] }
 0x245   : > { %v3462_v26 = vpop.f32.mrf.mxu1 }
 0x247   : > { %v3284_v31 = vpop.f32.mrf.mxu3 }
 0x248   : > { %v3285_v47 = vadd.f32 %v3284_v31, %v13141_v53  ;;  %3501 = vmatmul.bf16.gmra.mxu1 %v13128_v18  ;;  %v3373_v24 = vpop.f32.mrf.mxu0  ;;  %v10037_v53 = vld [vmem:[#allocation9 + $0x1c0] sm:$0xff]  ;;  %v10058_v18 = vld [vmem:[#allocation12 + $0x28] sm:$0xff]  ;;  %v3043_v31 = vadd.f32 %v16211_v29, %v2954_v19 }
 0x249   : > { %4131 = vmatpush.bf16.msra.mxu3 %v10037_v53  ;;  %5534 = vmatpush.bf16.msra.mxu1 %v10058_v18  ;;  %v9997_v18 = vld [vmem:[#allocation2 + $0xb0] sm:$0xf0]  ;;  %v16218_v19 = vld [vmem:[#allocation31_spill] sm:$0xff] }
 0x24a   : > { %v3374_v37 = vadd.f32 %v3373_v24, %v3285_v47  ;;  %v16212_v47 = vld [vmem:[#allocation40_spill] sm:$0xff]  ;;  %v10114_v24 = vld [vmem:[#allocation10 + $0x28] sm:$0xff] }
 0x24b   : > { %3412 = vmatmul.bf16.gmra.mxu0 %v13117_v51  ;;  %6135 = vmatpush.bf16.msra.mxu2 %v10114_v24 }
 0x24c   : > { %v13309_v0 = vadd.f32 %v3462_v26, %v3374_v37  ;;  %v16213_v37 = vld [vmem:[#allocation19_spill] sm:$0xff] }
 0x24d   : > { %v3464_v4 = vpop.f32.mrf.mxu1  ;;  %5535 = vmatpush.bf16.msra.mxu1 %v10057_v14 }
 0x24f   : > { %v3286_v41 = vpop.f32.mrf.mxu3  ;;  %4063 = vmatmul.bf16.gmra.mxu2 %v8711_v45  ;;  %v16217_v45 = vld [vmem:[#allocation44_spill] sm:$0xff] }
 0x250   : > { %v3287_v12 = vadd.f32 %v3286_v41, %v3038_v40  ;;  %v3375_v63 = vpop.f32.mrf.mxu0  ;;  %v10054_v40 = vld [vmem:[#allocation12 + $0x8] sm:$0xff] }
 0x251   : > { %5536 = vmatpush.bf16.msra.mxu1 %v10056_v1 }
 0x252   : > { %v3376_v15 = vadd.f32 %v3375_v63, %v3287_v12  ;;  %v10053_v63 = vld [vmem:[#allocation12] sm:$0xff] }
 0x254   : > { %3328 = vmatmul.bf16.gmra.mxu3 %v16208_v52  ;;  %v13312_v33 = vadd.f32 %v3464_v4, %v3376_v15  ;;  %v8722_v52 = vld [vmem:[#allocation2 + $0xa8] sm:$0xf]  ;;  %v16214_v15 = vld [vmem:[#allocation68_spill] sm:$0xff] }
 0x255   : > { %v3467_v56 = vpop.f32.mrf.mxu1  ;;  %5537 = vmatpush.bf16.msra.mxu1 %v10055_v35  ;;  %v8723_v28 = vor.u32 %v9997_v18, %v8722_v52  ;;  %v16219_v35 = vld [vmem:[#allocation74_spill] sm:$0xff] }
 0x257   : > { %v3289_v43 = vpop.f32.mrf.mxu3 }
 0x258   : > { %v3290_v51 = vadd.f32 %v3289_v43, %v13155_v44  ;;  %3506 = vmatmul.bf16.gmra.mxu1 %v16209_v34  ;;  %v3378_v48 = vpop.f32.mrf.mxu0 }
 0x259   : > { %5538 = vmatpush.bf16.msra.mxu1 %v10054_v40 }
 0x25a   : > { %v3379_v54 = vadd.f32 %v3378_v48, %v3290_v51  ;;  %v16215_v51 = vld [vmem:[#allocation81_spill] sm:$0xff] }
 0x25b   : > { %3417 = vmatmul.bf16.gmra.mxu0 %v16212_v47 }
 0x25c   : > { %v13320_v44 = vadd.f32 %v3467_v56, %v3379_v54  ;;  %v16216_v56 = vld [vmem:[#allocation79_spill] sm:$0xff] }
 0x25d   : > { %v3469_v22 = vpop.f32.mrf.mxu1  ;;  %5539 = vmatpush.bf16.msra.mxu1 %v10053_v63  ;;  %v2959_v14 = vadd.f32 %v16216_v56, %v16215_v51 }
 0x25f   : > { %v3291_v26 = vpop.f32.mrf.mxu3  ;;  %4068 = vmatmul.bf16.gmra.mxu2 %v8723_v28  ;;  %v3048_v9 = vadd.f32 %v13182_v62, %v2959_v14  ;;  %v10661_v14 = vld [vmem:[%s11104_s23] sm:$0xff] }
 0x260   : > { %v3292_v59 = vadd.f32 %v3291_v26, %v3043_v31  ;;  %v3380_v57 = vpop.f32.mrf.mxu0 }
 0x262   : > { %v3381_v32 = vadd.f32 %v3380_v57, %v3292_v59  ;;  %v10000_v59 = vld [vmem:[#allocation2 + $0xc8] sm:$0xf0]  ;;  %v16220_v57 = vld [vmem:[#allocation82_spill] sm:$0xff] }
 0x264   : > { %3333 = vmatmul.bf16.gmra.mxu3 %v16213_v37  ;;  %v13323_v41 = vadd.f32 %v3469_v22, %v3381_v32  ;;  %v8734_v22 = vld [vmem:[#allocation2 + $0xc0] sm:$0xf]  ;;  %v2964_v37 = vadd.f32 %v16220_v57, %v13180_v23  ;;  %v9981_v32 = vld [vmem:[#allocation2 + $0x34] sm:$0xf] }
 0x265   : > { %v3472_v12 = vpop.f32.mrf.mxu1  ;;  %v8735_v62 = vor.u32 %v10000_v59, %v8734_v22  ;;  %v9984_v22 = vld [vmem:[#allocation2 + $0x4c] sm:$0xf]  ;;  %v8676_v59 = vld [vmem:[#allocation2 + $0x54] sm:$0xf0] }
 0x267   : > { %v3294_v53 = vpop.f32.mrf.mxu3 }
 0x268   : > { %v3295_v4 = vadd.f32 %v3294_v53, %v13172_v21  ;;  %3511 = vmatmul.bf16.gmra.mxu1 %v16214_v15  ;;  %v3383_v43 = vpop.f32.mrf.mxu0  ;;  %v8664_v53 = vld [vmem:[#allocation2 + $0x3c] sm:$0xf0] }
 0x269   : > { %v8667_v52 = vor.u32 %v9981_v32, %v8664_v53  ;;  %v10113_v15 = vld [vmem:[#allocation10 + $0x20] sm:$0xff]  ;;  %v13354_v53 = vpop.f32.mrf.mxu2 }
 0x26a   : > { %v3384_v39 = vadd.f32 %v3383_v43, %v3295_v4  ;;  %v3053_v4 = vadd.f32 %v13198_v17, %v2964_v37  ;;  %6136 = vmatpush.bf16.msra.mxu2 %v10113_v15  ;;  %v8670_v17 = vld [vmem:[#allocation2 + $0x38] sm:$0xf]  ;;  %v8758_v15 = vld [vmem:[#allocation2 + $0xf0] sm:$0xf] }
 0x26b   : > { %3422 = vmatmul.bf16.gmra.mxu0 %v16217_v45  ;;  %v9983_v45 = vld [vmem:[#allocation2 + $0x40] sm:$0xf0] }
 0x26c   : > { %v13331_v34 = vadd.f32 %v3472_v12, %v3384_v39  ;;  %v16221_v12 = vld [vmem:[#allocation46_spill] sm:$0xff] }
 0x26d   : > { %v3474_v48 = vpop.f32.mrf.mxu1  ;;  %v10662_v39 = vld [vmem:[%s11104_s23 + $0x8] sm:$0xff] }
 0x26f   : > { %v3296_v21 = vpop.f32.mrf.mxu3  ;;  %4073 = vmatmul.bf16.gmra.mxu2 %v8735_v62 }
 0x270   : > { %v3297_v1 = vadd.f32 %v3296_v21, %v3048_v9  ;;  %v3385_v2 = vpop.f32.mrf.mxu0  ;;  %v5448_v9 = vpack.c.bf16 %v10662_v39, %v10661_v14 }
 0x272   : > { %v3386_v54 = vadd.f32 %v3385_v2, %v3297_v1  ;;  %v8746_v1 = vld [vmem:[#allocation2 + $0xd8] sm:$0xf]  ;;  %v10003_v2 = vld [vmem:[#allocation2 + $0xe0] sm:$0xf0] }
 0x274   : > { %3338 = vmatmul.bf16.gmra.mxu3 %v16218_v19  ;;  %v13334_v29 = vadd.f32 %v3474_v48, %v3386_v54  ;;  %v8747_v19 = vor.u32 %v10003_v2, %v8746_v1  ;;  %v8671_v54 = vor.u32 %v9983_v45, %v8670_v17  ;;  %v8688_v17 = vld [vmem:[#allocation2 + $0x6c] sm:$0xf0]  ;;  %v3063_v45 = vadd.f32 %v13237_v6, %v13228_v27  ;;  %v10665_v6 = vld [vmem:[%s11104_s23 + $0x20] sm:$0xff] }
 0x275   : > { %v3477_v26 = vpop.f32.mrf.mxu1 }
 0x277   : > { %v3299_v31 = vpop.f32.mrf.mxu3 }
 0x278   : > { %v3300_v47 = vadd.f32 %v3299_v31, %v13191_v3  ;;  %3516 = vmatmul.bf16.gmra.mxu1 %v16219_v35  ;;  %v3388_v24 = vpop.f32.mrf.mxu0 }
 0x27a   : > { %v3389_v40 = vadd.f32 %v3388_v24, %v3300_v47  ;;  %v2969_v47 = vadd.f32 %v13204_v13, %v13210_v8  ;;  %v8679_v24 = vor.u32 %v9984_v22, %v8676_v59  ;;  %v10666_v59 = vld [vmem:[%s11104_s23 + $0x28] sm:$0xff] }
 0x27b   : > { %3427 = vmatmul.bf16.gmra.mxu0 %v16221_v12  ;;  %v10664_v12 = vld [vmem:[%s11104_s23 + $0x18] sm:$0xff] }
 0x27c   : > { %v13342_v3 = vadd.f32 %v3477_v26, %v3389_v40  ;;  %v3058_v62 = vadd.f32 %v13220_v38, %v2969_v47  ;;  %v9986_v38 = vld [vmem:[#allocation2 + $0x58] sm:$0xf0] }
 0x27d   : > { %v3479_v18 = vpop.f32.mrf.mxu1 }
 0x27f   : > { %v3301_v63 = vpop.f32.mrf.mxu3  ;;  %4078 = vmatmul.bf16.gmra.mxu2 %v8747_v19 }
 0x280   : > { %v3302_v28 = vadd.f32 %v3301_v63, %v3053_v4  ;;  %v3390_v43 = vpop.f32.mrf.mxu0  ;;  %v10663_v4 = vld [vmem:[%s11104_s23 + $0x10] sm:$0xff] }
 0x281   : > { %v5449_v63 = vpack.c.bf16 %v10664_v12, %v10663_v4 }
 0x282   : > { %v3391_v23 = vadd.f32 %v3390_v43, %v3302_v28  ;;  %v10006_v43 = vld [vmem:[#allocation2 + $0xf8] sm:$0xf0] }
 0x284   : > { %4132 = vmatmul.bf16.vlgmr.msra.gmra.mxu3 %v8667_v52  ;;  %v13344_v51 = vadd.f32 %v3479_v18, %v3391_v23  ;;  %v8682_v52 = vld [vmem:[#allocation2 + $0x50] sm:$0xf]  ;;  %v8759_v23 = vor.u32 %v10006_v43, %v8758_v15 }
 0x285   : > { %v3482_v48 = vpop.f32.mrf.mxu1 }
 0x287   : > { %v3304_v56 = vpop.f32.mrf.mxu3 }
 0x288   : > { %v3305_v21 = vadd.f32 %v3304_v56, %v13208_v58  ;;  %5540 = vmatmul.bf16.vlgmr.msra.gmra.mxu1 %v5448_v9  ;;  %v3393_v31 = vpop.f32.mrf.mxu0  ;;  %v8683_v56 = vor.u32 %v9986_v38, %v8682_v52  ;;  %v9987_v9 = vld [vmem:[#allocation2 + $0x64] sm:$0xf]  ;;  %v9990_v52 = vld [vmem:[#allocation2 + $0x7c] sm:$0xf]  ;;  %v8700_v38 = vld [vmem:[#allocation2 + $0x84] sm:$0xf0] }
 0x289   : > { %v8691_v2 = vor.u32 %v9987_v9, %v8688_v17 }
 0x28a   : > { %v3394_v26 = vadd.f32 %v3393_v31, %v3305_v21 }
 0x28b   : > { %4221 = vmatmul.bf16.vlgmr.msra.gmra.mxu0 %v8671_v54  ;;  %v10112_v54 = vld [vmem:[#allocation10 + $0x18] sm:$0xff] }
 0x28c   : > { %v13352_v58 = vadd.f32 %v3482_v48, %v3394_v26  ;;  %6137 = vmatpush.bf16.msra.mxu2 %v10112_v54 }
 0x28d   : > { %v3484_v57 = vpop.f32.mrf.mxu1 }
 0x28f   : > { %v3306_v35 = vpop.f32.mrf.mxu3  ;;  %4083 = vmatmul.bf16.gmra.mxu2 %v8759_v23  ;;  %v8703_v23 = vor.u32 %v9990_v52, %v8700_v38 }
 0x290   : > { %v3307_v37 = vadd.f32 %v3306_v35, %v3058_v62  ;;  %v3395_v40 = vpop.f32.mrf.mxu0  ;;  %v5450_v62 = vpack.c.bf16 %v10666_v59, %v10665_v6  ;;  %v8694_v35 = vld [vmem:[#allocation2 + $0x68] sm:$0xf] }
 0x292   : > { %v3396_v32 = vadd.f32 %v3395_v40, %v3307_v37  ;;  %v13365_v48 = vpop.f32.mrf.mxu2  ;;  %v8770_v40 = vld [vmem:[#allocation2 + $0x108] sm:$0xf] }
 0x294   : > { %4137 = vmatmul.bf16.gmra.mxu3 %v8679_v24  ;;  %v13356_v13 = vadd.f32 %v3484_v57, %v3396_v32  ;;  %v9989_v24 = vld [vmem:[#allocation2 + $0x70] sm:$0xf0] }
 0x295   : > { %v3487_v28 = vpop.f32.mrf.mxu1  ;;  %v10009_v32 = vld [vmem:[#allocation2 + $0x110] sm:$0xf0]  ;;  %v8695_v4 = vor.u32 %v9989_v24, %v8694_v35  ;;  %v8712_v24 = vld [vmem:[#allocation2 + $0x9c] sm:$0xf0] }
 0x296   : > { %v9993_v35 = vld [vmem:[#allocation2 + $0x94] sm:$0xf] }
 0x297   : > { %v3309_v8 = vpop.f32.mrf.mxu3 }
 0x298   : > { %v3310_v18 = vadd.f32 %v3309_v8, %v13230_v20  ;;  %5545 = vmatmul.bf16.gmra.mxu1 %v5449_v63  ;;  %v3398_v14 = vpop.f32.mrf.mxu0  ;;  %v8771_v8 = vor.u32 %v10009_v32, %v8770_v40 }
 0x29a   : > { %v3399_v39 = vadd.f32 %v3398_v14, %v3310_v18  ;;  %v13369_v27 = vpop.f32.mrf.mxu2  ;;  %v3068_v18 = vadd.f32 %v13249_v10, %v13240_v36  ;;  %v8706_v10 = vld [vmem:[#allocation2 + $0x80] sm:$0xf] }
 0x29b   : > { %4226 = vmatmul.bf16.gmra.mxu0 %v8683_v56 }
 0x29c   : > { %v13363_v21 = vadd.f32 %v3487_v28, %v3399_v39 }
 0x29d   : > { %v3489_v19 = vpop.f32.mrf.mxu1 }
 0x29f   : > { %v3311_v20 = vpop.f32.mrf.mxu3  ;;  %4088 = vmatmul.bf16.gmra.mxu2 %v8771_v8  ;;  %v8715_v8 = vor.u32 %v9993_v35, %v8712_v24 }
 0x2a0   : > { %v3312_v1 = vadd.f32 %v3311_v20, %v3063_v45  ;;  %v3400_v31 = vpop.f32.mrf.mxu0  ;;  %v10667_v20 = vld [vmem:[%s11104_s23 + $0x30] sm:$0xff] }
 0x2a2   : > { %v3401_v47 = vadd.f32 %v3400_v31, %v3312_v1  ;;  %v13378_v15 = vpop.f32.mrf.mxu2  ;;  %v10668_v1 = vld [vmem:[%s11104_s23 + $0x38] sm:$0xff]  ;;  %v8782_v31 = vld [vmem:[#allocation2 + $0x120] sm:$0xf] }
 0x2a3   : > { %v5451_v36 = vpack.c.bf16 %v10668_v1, %v10667_v20  ;;  %v10015_v20 = vld [vmem:[#allocation2 + $0x140] sm:$0xf0] }
 0x2a4   : > { %4142 = vmatmul.bf16.gmra.mxu3 %v8691_v2  ;;  %v13367_v26 = vadd.f32 %v3489_v19, %v3401_v47  ;;  %v9992_v2 = vld [vmem:[#allocation2 + $0x88] sm:$0xf0] }
 0x2a5   : > { %v3492_v37 = vpop.f32.mrf.mxu1  ;;  %v10012_v47 = vld [vmem:[#allocation2 + $0x128] sm:$0xf0]  ;;  %v8707_v6 = vor.u32 %v9992_v2, %v8706_v10 }
 0x2a7   : > { %v3314_v22 = vpop.f32.mrf.mxu3 }
 0x2a8   : > { %v3315_v57 = vadd.f32 %v3314_v22, %v13245_v60  ;;  %5550 = vmatmul.bf16.gmra.mxu1 %v5450_v62  ;;  %v3403_v12 = vpop.f32.mrf.mxu0  ;;  %v8783_v22 = vor.u32 %v10012_v47, %v8782_v31 }
 0x2aa   : > { %v3404_v63 = vadd.f32 %v3403_v12, %v3315_v57  ;;  %v13382_v45 = vpop.f32.mrf.mxu2  ;;  %v3073_v57 = vadd.f32 %v13354_v53, %v13255_v61  ;;  %v10111_v12 = vld [vmem:[#allocation10 + $0x10] sm:$0xff]  ;;  %v10669_v53 = vld [vmem:[%s11104_s23 + $0x40] sm:$0xff] }
 0x2ab   : > { %4231 = vmatmul.bf16.gmra.mxu0 %v8695_v4  ;;  %6138 = vmatpush.bf16.msra.mxu2 %v10111_v12  ;;  %v8730_v12 = vld [vmem:[#allocation2 + $0xb0] sm:$0xf] }
 0x2ac   : > { %v13376_v28 = vadd.f32 %v3492_v37, %v3404_v63 }
 0x2ad   : > { %v3494_v56 = vpop.f32.mrf.mxu1 }
 0x2af   : > { %v3316_v60 = vpop.f32.mrf.mxu3  ;;  %4093 = vmatmul.bf16.gmra.mxu2 %v8783_v22 }
 0x2b0   : > { %v3317_v43 = vadd.f32 %v3316_v60, %v3068_v18  ;;  %v3405_v14 = vpop.f32.mrf.mxu0  ;;  %v10670_v60 = vld [vmem:[%s11104_s23 + $0x48] sm:$0xff] }
 0x2b2   : > { %v3406_v39 = vadd.f32 %v3405_v14, %v3317_v43  ;;  %v13391_v40 = vpop.f32.mrf.mxu2  ;;  %v5452_v43 = vpack.c.bf16 %v10670_v60, %v10669_v53  ;;  %v8806_v60 = vld [vmem:[#allocation2 + $0x150] sm:$0xf] }
 0x2b4   : > { %4147 = vmatmul.bf16.gmra.mxu3 %v8703_v23  ;;  %v13380_v9 = vadd.f32 %v3494_v56, %v3406_v39  ;;  %v8718_v23 = vld [vmem:[#allocation2 + $0x98] sm:$0xf]  ;;  %v9995_v56 = vld [vmem:[#allocation2 + $0xa0] sm:$0xf0] }
 0x2b5   : > { %v3497_v54 = vpop.f32.mrf.mxu1 }
 0x2b7   : > { %v3319_v17 = vpop.f32.mrf.mxu3 }
 0x2b8   : > { %v3320_v19 = vadd.f32 %v3319_v17, %v13258_v50  ;;  %5555 = vmatmul.bf16.gmra.mxu1 %v5451_v36  ;;  %v3408_v59 = vpop.f32.mrf.mxu0  ;;  %v8794_v17 = vld [vmem:[#allocation2 + $0x138] sm:$0xf]  ;;  %v8719_v36 = vor.u32 %v9995_v56, %v8718_v23 }
 0x2b9   : > { %v8795_v1 = vor.u32 %v10015_v20, %v8794_v17  ;;  %v8736_v17 = vld [vmem:[#allocation2 + $0xcc] sm:$0xf0] }
 0x2ba   : > { %v3409_v62 = vadd.f32 %v3408_v59, %v3320_v19  ;;  %v13395_v61 = vpop.f32.mrf.mxu2  ;;  %v9996_v19 = vld [vmem:[#allocation2 + $0xac] sm:$0xf] }
 0x2bb   : > { %4236 = vmatmul.bf16.gmra.mxu0 %v8707_v6 }
 0x2bc   : > { %v13389_v37 = vadd.f32 %v3497_v54, %v3409_v62  ;;  %v8724_v54 = vld [vmem:[#allocation2 + $0xb4] sm:$0xf0] }
 0x2bd   : > { %v3499_v4 = vpop.f32.mrf.mxu1  ;;  %v8727_v6 = vor.u32 %v9996_v19, %v8724_v54 }
 0x2bf   : > { %v3321_v50 = vpop.f32.mrf.mxu3  ;;  %4098 = vmatmul.bf16.gmra.mxu2 %v8795_v1 }
 0x2c0   : > { %v3322_v32 = vadd.f32 %v3321_v50, %v3073_v57  ;;  %v3410_v63 = vpop.f32.mrf.mxu0 }
 0x2c2   : > { %v3411_v52 = vadd.f32 %v3410_v63, %v3322_v32  ;;  %v13402_v22 = vpop.f32.mrf.mxu2  ;;  %v10671_v32 = vld [vmem:[%s11104_s23 + $0x50] sm:$0xff]  ;;  %v9998_v63 = vld [vmem:[#allocation2 + $0xb8] sm:$0xf0] }
 0x2c3   : > { %v8731_v23 = vor.u32 %v9998_v63, %v8730_v12  ;;  %v10001_v12 = vld [vmem:[#allocation2 + $0xd0] sm:$0xf0]  ;;  %v16229_v63 = vld [vmem:[#allocation83_spill] sm:$0xff] }
 0x2c4   : > { %4152 = vmatmul.bf16.gmra.mxu3 %v8715_v8  ;;  %v13393_v38 = vadd.f32 %v3499_v4, %v3411_v52  ;;  %v10672_v8 = vld [vmem:[%s11104_s23 + $0x58] sm:$0xff]  ;;  %v16225_v52 = vld [vmem:[#allocation34_spill] sm:$0xff] }
 0x2c5   : > { %v3502_v39 = vpop.f32.mrf.mxu1  ;;  %v5453_v4 = vpack.c.bf16 %v10672_v8, %v10671_v32  ;;  %v10674_v32 = vld [vmem:[%s11104_s23 + $0x68] sm:$0xff] }
 0x2c6   : > { %16222 = vst [vmem:[#allocation49_spill] sm:$0xff] %v13393_v38 }
 0x2c7   : > { %v3324_v18 = vpop.f32.mrf.mxu3 }
 0x2c8   : > { %v3325_v14 = vadd.f32 %v3324_v18, %v13193_v30  ;;  %5560 = vmatmul.bf16.gmra.mxu1 %v5452_v43  ;;  %v3413_v10 = vpop.f32.mrf.mxu0 }
 0x2ca   : > { %v3414_v2 = vadd.f32 %v3413_v10, %v3325_v14  ;;  %v13407_v50 = vpop.f32.mrf.mxu2  ;;  %v16227_v10 = vld [vmem:[#allocation33_spill] sm:$0xff] }
 0x2cb   : > { %4241 = vmatmul.bf16.gmra.mxu0 %v8719_v36 }
 0x2cc   : > { %v13400_v31 = vadd.f32 %v3502_v39, %v3414_v2  ;;  %v9999_v39 = vld [vmem:[#allocation2 + $0xc4] sm:$0xf] }
 0x2cd   : > { %v3504_v59 = vpop.f32.mrf.mxu1  ;;  %v8739_v19 = vor.u32 %v9999_v39, %v8736_v17  ;;  %v8748_v39 = vld [vmem:[#allocation2 + $0xe4] sm:$0xf0] }
 0x2ce   : > { %16223 = vst [vmem:[#allocation59_spill] sm:$0xff] %v13400_v31 }
 0x2cf   : > { %v3326_v47 = vpop.f32.mrf.mxu3 }
 0x2d0   : > { %v3327_v30 = vadd.f32 %v3326_v47, %v13200_v46  ;;  %v3415_v62 = vpop.f32.mrf.mxu0  ;;  %v10018_v46 = vld [vmem:[#allocation2 + $0x158] sm:$0xf0]  ;;  %v10110_v47 = vld [vmem:[#allocation10 + $0x8] sm:$0xff] }
 0x2d1   : > { %v8807_v43 = vor.u32 %v10018_v46, %v8806_v60  ;;  %6139 = vmatpush.bf16.msra.mxu2 %v10110_v47  ;;  %v10021_v60 = vld [vmem:[#allocation2 + $0x170] sm:$0xf0] }
 0x2d2   : > { %v3416_v35 = vadd.f32 %v3415_v62, %v3327_v30  ;;  %v13414_v36 = vpop.f32.mrf.mxu2 }
 0x2d3   : > { %4103 = vmatmul.bf16.gmra.mxu2 %v8807_v43 }
 0x2d4   : > { %4157 = vmatmul.bf16.gmra.mxu3 %v8727_v6  ;;  %v13405_v24 = vadd.f32 %v3504_v59, %v3416_v35 }
 0x2d5   : > { %v3507_v53 = vpop.f32.mrf.mxu1 }
 0x2d6   : > { %16224 = vst [vmem:[#allocation57_spill] sm:$0xff] %v13405_v24 }
 0x2d7   : > { %v3329_v57 = vpop.f32.mrf.mxu3 }
 0x2d8   : > { %v3330_v18 = vadd.f32 %v3329_v57, %v16225_v52  ;;  %5565 = vmatmul.bf16.gmra.mxu1 %v5453_v4  ;;  %v3418_v56 = vpop.f32.mrf.mxu0  ;;  %v10673_v57 = vld [vmem:[%s11104_s23 + $0x60] sm:$0xff]  ;;  %v8742_v4 = vld [vmem:[#allocation2 + $0xc8] sm:$0xf] }
 0x2d9   : > { %v5454_v8 = vpack.c.bf16 %v10674_v32, %v10673_v57  ;;  %v8743_v46 = vor.u32 %v10001_v12, %v8742_v4  ;;  %v10675_v32 = vld [vmem:[%s11104_s23 + $0x70] sm:$0xff]  ;;  %v8754_v12 = vld [vmem:[#allocation2 + $0xe0] sm:$0xf] }
 0x2da   : > { %v3419_v14 = vadd.f32 %v3418_v56, %v3330_v18  ;;  %v13419_v35 = vpop.f32.mrf.mxu2 }
 0x2db   : > { %4246 = vmatmul.bf16.gmra.mxu0 %v8731_v23 }
 0x2dc   : > { %v13412_v20 = vadd.f32 %v3507_v53, %v3419_v14  ;;  %v8818_v53 = vld [vmem:[#allocation2 + $0x168] sm:$0xf]  ;;  %v10002_v14 = vld [vmem:[#allocation2 + $0xdc] sm:$0xf] }
 0x2dd   : > { %v3509_v54 = vpop.f32.mrf.mxu1  ;;  %v8819_v43 = vor.u32 %v10021_v60, %v8818_v53 }
 0x2de   : > { %16226 = vst [vmem:[#allocation55_spill] sm:$0xff] %v13412_v20 }
 0x2df   : > { %v3331_v1 = vpop.f32.mrf.mxu3 }
 0x2e0   : > { %v3332_v2 = vadd.f32 %v3331_v1, %v16227_v10  ;;  %v3420_v30 = vpop.f32.mrf.mxu0  ;;  %v16231_v10 = vld [vmem:[#allocation45_spill] sm:$0xff] }
 0x2e2   : > { %v3421_v6 = vadd.f32 %v3420_v30, %v3332_v2  ;;  %v13427_v47 = vpop.f32.mrf.mxu2 }
 0x2e3   : > { %4108 = vmatmul.bf16.gmra.mxu2 %v8819_v43 }
 0x2e4   : > { %4162 = vmatmul.bf16.gmra.mxu3 %v8739_v19  ;;  %v13417_v59 = vadd.f32 %v3509_v54, %v3421_v6  ;;  %v8751_v19 = vor.u32 %v10002_v14, %v8748_v39  ;;  %v8760_v14 = vld [vmem:[#allocation2 + $0xfc] sm:$0xf0] }
 0x2e5   : > { %v3512_v18 = vpop.f32.mrf.mxu1  ;;  %v8830_v39 = vld [vmem:[#allocation2 + $0x180] sm:$0xf] }
 0x2e6   : > { %16228 = vst [vmem:[#allocation62_spill] sm:$0xff] %v13417_v59 }
 0x2e7   : > { %v3334_v62 = vpop.f32.mrf.mxu3 }
 0x2e8   : > { %v3335_v52 = vadd.f32 %v3334_v62, %v16229_v63  ;;  %5570 = vmatmul.bf16.gmra.mxu1 %v5454_v8  ;;  %v3423_v23 = vpop.f32.mrf.mxu0  ;;  %v10676_v8 = vld [vmem:[%s11104_s23 + $0x78] sm:$0xff]  ;;  %v10004_v63 = vld [vmem:[#allocation2 + $0xe8] sm:$0xf0] }
 0x2e9   : > { %v5455_v4 = vpack.c.bf16 %v10676_v8, %v10675_v32  ;;  %v8755_v60 = vor.u32 %v10004_v63, %v8754_v12  ;;  %v16237_v63 = vmov 0 }
 0x2ea   : > { %v3424_v56 = vadd.f32 %v3423_v23, %v3335_v52  ;;  %v16233_v52 = vld [vmem:[#allocation43_spill] sm:$0xff]  ;;  %v10005_v23 = vld [vmem:[#allocation2 + $0xf4] sm:$0xf] }
 0x2eb   : > { %4251 = vmatmul.bf16.gmra.mxu0 %v8743_v46  ;;  %v13434_v46 = vpop.f32.mrf.mxu2  ;;  %v8763_v32 = vor.u32 %v10005_v23, %v8760_v14 }
 0x2ec   : > { %v13424_v17 = vadd.f32 %v3512_v18, %v3424_v56 }
 0x2ed   : > { %v3514_v54 = vpop.f32.mrf.mxu1 }
 0x2ee   : > { %16230 = vst [vmem:[#allocation53_spill] sm:$0xff] %v13424_v17 }
 0x2ef   : > { %v3336_v1 = vpop.f32.mrf.mxu3 }
 0x2f0   : > { %v3337_v2 = vadd.f32 %v3336_v1, %v16231_v10  ;;  %v3425_v30 = vpop.f32.mrf.mxu0  ;;  %v10024_v1 = vld [vmem:[#allocation2 + $0x188] sm:$0xf0] }
 0x2f1   : > { %v8831_v10 = vor.u32 %v10024_v1, %v8830_v39  ;;  %v10677_v1 = vld [vmem:[%s11104_s23 + $0x80] sm:$0xff] }
 0x2f2   : > { %v3426_v6 = vadd.f32 %v3425_v30, %v3337_v2  ;;  %v16234_v2 = vld [vmem:[#allocation18_spill] sm:$0xff] }
 0x2f3   : > { %4113 = vmatmul.bf16.gmra.mxu2 %v8831_v10  ;;  %v13440_v12 = vpop.f32.mrf.mxu2  ;;  %vm16242_vm4 = vcmp.lt.s32.totalorder %v16234_v2, 1  ;;  %v10678_v10 = vld [vmem:[%s11104_s23 + $0x88] sm:$0xff] }
 0x2f4   : > { %4167 = vmatmul.bf16.gmra.mxu3 %v8751_v19  ;;  %v13429_v62 = vadd.f32 %v3514_v54, %v3426_v6  ;;  %v484_v19 = vadd.s32 272, %v16234_v2  ;;  %v16236_v6 = vld [vmem:[#allocation50_spill] sm:$0xff] }
 0x2f5   : > { %v3517_v53 = vpop.f32.mrf.mxu1 }
 0x2f6   : > { %16232 = vst [vmem:[#allocation64_spill] sm:$0xff] %v13429_v62  ;;  %v728_v8 = vand.u32 15, %v484_v19  ;;  %v5456_v19 = vpack.c.bf16 %v10678_v10, %v10677_v1 }
 0x2f7   : > { %v3339_v57 = vpop.f32.mrf.mxu3 }
 0x2f8   : > { %v3340_v18 = vadd.f32 %v3339_v57, %v16233_v52  ;;  %5575 = vmatmul.bf16.gmra.mxu1 %v5455_v4  ;;  %v3428_v43 = vpop.f32.mrf.mxu0  ;;  %vm13442_vm11 = vcmp.ne.s32.totalorder %v728_v8, 0  ;;  %v16240_v52 = vld [vmem:[#allocation35_spill] sm:$0xff] }
 0x2f9   : > { %v16238_v63 = vsel %vm13442_vm11, 4294967295, %v16237_v63 }
 0x2fa   : > { %v3429_v56 = vadd.f32 %v3428_v43, %v3340_v18  ;;  %16239 = vst [vmem:[#allocation66_spill] sm:$0xff] %v16238_v63  ;;  %v16241_v18 = vrot.slane %v16240_v52, 7 }
 0x2fb   : > { %4256 = vmatmul.bf16.gmra.mxu0 %v8755_v60 }
 0x2fc   : > { %v13437_v54 = vadd.f32 %v3517_v53, %v3429_v56  ;;  %v1735_v53 = vsel %vm16242_vm4, %v16241_v18, 0.0 }
 0x2fd   : > { %v3519_v4 = vpop.f32.mrf.mxu1  ;;  %v1874_v43 = vsel %vm13442_vm11, %v1735_v53, 0.0 }
 0x2fe   : > { %16235 = vst [vmem:[#allocation67_spill] sm:$0xff] %v13437_v54  ;;  %v2084_v56 = vpack.c.bf16 %v1874_v43, %v1874_v43  ;;  %v8772_v43 = vld [vmem:[#allocation2 + $0x114] sm:$0xf0] }
 0x2ff   : > { %v3341_v30 = vpop.f32.mrf.mxu3 }
 0x300   : > { %v3342_v57 = vadd.f32 %v3341_v30, %v16236_v6  ;;  %v3430_v60 = vpop.f32.mrf.mxu0  ;;  %2120 = vst [vmem:[#allocation2 + $0x198] sm:$0xf] %v2084_v56  ;;  %v8766_v30 = vld [vmem:[#allocation2 + $0xf8] sm:$0xf]  ;;  %v10007_v6 = vld [vmem:[#allocation2 + $0x100] sm:$0xf0] }
 0x301   : > { %v8767_v18 = vor.u32 %v10007_v6, %v8766_v30 }
 0x302   : > { %v3431_v23 = vadd.f32 %v3430_v60, %v3342_v57  ;;  %v13464_v57 = vld [vmem:[%s15705_s4] ss:$0 sm:$0xff]  ;;  %v10008_v60 = vld [vmem:[#allocation2 + $0x10c] sm:$0xf] }
 0x304   : > { %4172 = vmatmul.bf16.gmra.mxu3 %v8763_v32  ;;  %v13452_v14 = vadd.f32 %v3519_v4, %v3431_v23  ;;  %v13459_v32 = vpop.f32.mrf.mxu2  ;;  %v10027_v23 = vld [vmem:[#allocation2 + $0x1a0] sm:$0xf0] }
 0x305   : > { %v13456_v8 = vpop.f32.mrf.mxu1 }
 0x306   : > { %16243 = vst [vmem:[#allocation65_spill] sm:$0xff] %v13452_v14 }
 0x307   : > { %v4133_v39 = vpop.f32.mrf.mxu3  ;;  %16244 = vst [vmem:[#allocation60_spill] sm:$0xff] %v13456_v8  ;;  %v8842_v56 = vld [vmem:[#allocation2 + $0x198] sm:$0xf] }
 0x308   : > { %v4134_v52 = vadd.f32 %v4133_v39, %v13365_v48  ;;  %5580 = vmatmul.bf16.gmra.mxu1 %v5456_v19  ;;  %v4222_v53 = vpop.f32.mrf.mxu0  ;;  %v13470_v48 = vld [vmem:[%s15706_s5] ss:$0 sm:$0xff]  ;;  %v8843_v10 = vor.u32 %v10027_v23, %v8842_v56  ;;  %v8775_v19 = vor.u32 %v10008_v60, %v8772_v43  ;;  %v10679_v23 = vld [vmem:[%s11104_s23 + $0x90] sm:$0xff]  ;;  %v10680_v56 = vld [vmem:[%s11104_s23 + $0x98] sm:$0xff] }
 0x30a   : > { %v4223_v4 = vadd.f32 %v4222_v53, %v4134_v52  ;;  %4118 = vmatmul.bf16.gmra.mxu2 %v8843_v10 }
 0x30b   : > { %4261 = vmatmul.bf16.gmra.mxu0 %v8767_v18 }
 0x30c   : > { %v4302_v1 = vadd.f32 %v4223_v4, %v13265_v5  ;;  %v13479_v5 = vpop.f32.mrf.mxu2 }
 0x30d   : > { %v13472_v30 = vpop.f32.mrf.mxu1 }
 0x30e   : > { %16245 = vst [vmem:[#allocation26_spill] sm:$0xff] %v13472_v30  ;;  %v4338_v6 = vmul.f32 %v13464_v57, %v4302_v1  ;;  %v5457_v1 = vpack.c.bf16 %v10680_v56, %v10679_v23  ;;  %v8778_v30 = vld [vmem:[#allocation2 + $0x110] sm:$0xf] }
 0x30f   : > { %v4135_v39 = vpop.f32.mrf.mxu3 }
 0x310   : > { %v4136_v52 = vadd.f32 %v4135_v39, %v13369_v27  ;;  %v13477_v18 = vadd.f32 %v13470_v48, %v4338_v6  ;;  %v4224_v53 = vpop.f32.mrf.mxu0  ;;  %v10010_v27 = vld [vmem:[#allocation2 + $0x118] sm:$0xf0] }
 0x311   : > { %v8779_v63 = vor.u32 %v10010_v27, %v8778_v30 }
 0x312   : > { %v8948_v4 = vmul.f32 -1.442695, %v13477_v18  ;;  %v4225_v8 = vadd.f32 %v4224_v53, %v4136_v52  ;;  %v10109_v52 = vld [vmem:[#allocation10] sm:$0xff] }
 0x313   : > { %6140 = vmatpush.bf16.msra.mxu2 %v10109_v52 }
 0x314   : > { %4177 = vmatmul.bf16.gmra.mxu3 %v8775_v19  ;;  %10529 = vpow2.f32 %v8948_v4  ;;  %v4303_v60 = vadd.f32 %v4225_v8, %v13268_v7  ;;  %v13492_v53 = vpop.f32.mrf.mxu2  ;;  %v10011_v8 = vld [vmem:[#allocation2 + $0x124] sm:$0xf]  ;;  %v8784_v4 = vld [vmem:[#allocation2 + $0x12c] sm:$0xf0] }
 0x315   : > { %v13485_v39 = vpop.f32.mrf.mxu1  ;;  %v8787_v27 = vor.u32 %v10011_v8, %v8784_v4 }
 0x316   : > { %16246 = vst [vmem:[#allocation63_spill] sm:$0xff] %v13485_v39  ;;  %v4339_v10 = vmul.f32 %v13464_v57, %v4303_v60  ;;  %v9014_v39 = vld [vmem:[#allocation3] sm:$0xf]  ;;  %v10062_v60 = vld [vmem:[#allocation3 + $0x8] sm:$0xf0] }
 0x317   : > { %v4138_v43 = vpop.f32.mrf.mxu3 }
 0x318   : > { %v4139_v6 = vadd.f32 %v4138_v43, %v13378_v15  ;;  %v13490_v19 = vadd.f32 %v13470_v48, %v4339_v10  ;;  %5585 = vmatmul.bf16.gmra.mxu1 %v5457_v1  ;;  %v4227_v7 = vpop.f32.mrf.mxu0  ;;  %v9015_v15 = vor.u32 %v10062_v60, %v9014_v39  ;;  %v10682_v60 = vld [vmem:[%s11104_s23 + $0xa8] sm:$0xff] }
 0x31a   : > { %v10530_v23 = vpop.eup %10529  ;;  %v8949_v56 = vmul.f32 -1.442695, %v13490_v19  ;;  %v4228_v14 = vadd.f32 %v4227_v7, %v4139_v6  ;;  %6141 = vmatmul.bf16.vlgmr.msra.gmra.mxu2 %v9015_v15 }
 0x31b   : > { %v4502_v54 = vadd.f32 1.0, %v10530_v23  ;;  %4266 = vmatmul.bf16.gmra.mxu0 %v8779_v63 }
 0x31c   : > { %10531 = vpow2.f32 %v8949_v56  ;;  %v4304_v30 = vadd.f32 %v4228_v14, %v13276_v55  ;;  %v13503_v39 = vpop.f32.mrf.mxu2  ;;  %v10681_v56 = vld [vmem:[%s11104_s23 + $0xa0] sm:$0xff] }
 0x31d   : > { %10533 = vrcp.f32 %v4502_v54  ;;  %v13496_v1 = vpop.f32.mrf.mxu1  ;;  %v5458_v15 = vpack.c.bf16 %v10682_v60, %v10681_v56  ;;  %v10014_v56 = vld [vmem:[#allocation2 + $0x13c] sm:$0xf]  ;;  %v8796_v60 = vld [vmem:[#allocation2 + $0x144] sm:$0xf0]  ;;  %vm4539_vm5 = vweird.f32 %v4502_v54 }
 0x31e   : > { %16247 = vst [vmem:[#allocation78_spill] sm:$0xff] %v13496_v1  ;;  %v4340_v10 = vmul.f32 %v13464_v57, %v4304_v30  ;;  %v8790_v30 = vld [vmem:[#allocation2 + $0x128] sm:$0xf]  ;;  %v4545_v1 = vand.u32 2147483648, %v4502_v54 }
 0x31f   : > { %v4140_v43 = vpop.f32.mrf.mxu3 }
 0x320   : > { %v4141_v62 = vadd.f32 %v4140_v43, %v13382_v45  ;;  %v13501_v6 = vadd.f32 %v13470_v48, %v4340_v10  ;;  %v4229_v63 = vpop.f32.mrf.mxu0  ;;  %v10013_v43 = vld [vmem:[#allocation2 + $0x130] sm:$0xf0] }
 0x322   : > { %v10532_v55 = vpop.eup %10531  ;;  %v8950_v14 = vmul.f32 -1.442695, %v13501_v6  ;;  %v4230_v52 = vadd.f32 %v4229_v63, %v4141_v62 }
 0x323   : > { %v10534_v7 = vpop.eup %10533  ;;  %v13506_v8 = vadd.f32 1.0, %v10532_v55  ;;  %v4543_v55 = vand.u32 2147483647, %v4502_v54 }
 0x324   : > { %4182 = vmatmul.bf16.gmra.mxu3 %v8787_v27  ;;  %v4535_v4 = vmul.f32 %v10534_v7, %v4502_v54  ;;  %10535 = vpow2.f32 %v8950_v14  ;;  %v4305_v45 = vadd.f32 %v4230_v52, %v13279_v16  ;;  %vm4540_vm4 = vweird.f32 %v10534_v7  ;;  %v13519_v59 = vpop.f32.mrf.mxu2 }
 0x325   : > { %10537 = vrcp.f32 %v13506_v8  ;;  %v13512_v10 = vpop.f32.mrf.mxu1  ;;  %v8791_v52 = vor.u32 %v10013_v43, %v8790_v30  ;;  %vm4541_vm11 = vmor %vm4539_vm5, %vm4540_vm4  ;;  %vm4544_vm13 = vcmp.eq.f32.partialorder %v4543_v55, 8.507059e+37  ;;  %v8799_v43 = vor.u32 %v10014_v56, %v8796_v60 }
 0x326   : > { %v4536_v27 = vsub.f32 1.0, %v4535_v4  ;;  %16248 = vst [vmem:[#allocation80_spill] sm:$0xff] %v13512_v10  ;;  %v4341_v62 = vmul.f32 %v13464_v57, %v4305_v45  ;;  %v4560_v54 = vand.u32 2147483648, %v13506_v8  ;;  %vm16252_vm4 = vcmp.lt.s32.totalorder %v16234_v2, 1 }
 0x327   : > { %v4143_v23 = vpop.f32.mrf.mxu3  ;;  %vm16253_vm5 = vcmp.lt.s32.totalorder %v16234_v2, 7  ;;  %vm16257_vm9 = vweird.f32 %v13506_v8 }
 0x328   : > { %v4144_v63 = vadd.f32 %v4143_v23, %v13391_v40  ;;  %v4537_v14 = vmul.f32 %v10534_v7, %v4536_v27  ;;  %v13517_v16 = vadd.f32 %v13470_v48, %v4341_v62  ;;  %5590 = vmatmul.bf16.gmra.mxu1 %v5458_v15  ;;  %v4232_v17 = vpop.f32.mrf.mxu0  ;;  %v4546_v27 = vor.u32 1.1754944e-38, %v4545_v1 }
 0x32a   : > { %v10536_v4 = vpop.eup %10535  ;;  %v4538_v10 = vadd.f32 %v10534_v7, %v4537_v14  ;;  %v8951_v45 = vmul.f32 -1.442695, %v13517_v16  ;;  %v4233_v40 = vadd.f32 %v4232_v17, %v4144_v63  ;;  %v4558_v14 = vand.u32 2147483647, %v13506_v8 }
 0x32b   : > { %v10538_v23 = vpop.eup %10537  ;;  %v13522_v20 = vadd.f32 1.0, %v10536_v4  ;;  %4271 = vmatmul.bf16.gmra.mxu0 %v8791_v52 }
 0x32c   : > { %v4542_v62 = vsel %vm4541_vm11, %v10534_v7, %v4538_v10  ;;  %v4550_v15 = vmul.f32 %v10538_v23, %v13506_v8  ;;  %10539 = vpow2.f32 %v8951_v45  ;;  %v4306_v7 = vadd.f32 %v4233_v40, %v13287_v49  ;;  %v10683_v8 = vld [vmem:[%s11104_s23 + $0xb8] sm:$0xff] }
 0x32d   : > { %v4547_v24 = vsel %vm4544_vm13, %v4546_v27, %v4542_v62  ;;  %10541 = vrcp.f32 %v13522_v20  ;;  %v13531_v63 = vpop.f32.mrf.mxu1  ;;  %vm13540_vm11 = vcmp.eq.f32.partialorder %v4558_v14, 8.507059e+37  ;;  %vm16256_vm13 = vweird.f32 %v10538_v23 }
 0x32e   : > { %v13529_v17 = vmul.f32 %v4547_v24, %v13477_v18  ;;  %v4551_v1 = vsub.f32 1.0, %v4550_v15  ;;  %16249 = vst [vmem:[#allocation40_spill] sm:$0xff] %v13531_v63  ;;  %v4561_v18 = vor.u32 1.1754944e-38, %v4560_v54  ;;  %v4342_v49 = vmul.f32 %v13464_v57, %v4306_v7 }
 0x32f   : > { %v4145_v30 = vpop.f32.mrf.mxu3 }
 0x330   : > { %v4146_v10 = vadd.f32 %v4145_v30, %v13395_v61  ;;  %v5046_v55 = vrot.slane %v13529_v17, 7  ;;  %v5144_v52 = vrot.slane %v13529_v17, 1  ;;  %v5311_v56 = vpack.c.bf16 %v13529_v17, %v13529_v17  ;;  %v4234_v4 = vpop.f32.mrf.mxu0  ;;  %v8802_v61 = vld [vmem:[#allocation2 + $0x140] sm:$0xf]  ;;  %v10016_v30 = vld [vmem:[#allocation2 + $0x148] sm:$0xf0] }
 0x331   : > { %v4552_v60 = vmul.f32 %v10538_v23, %v4551_v1  ;;  %v10684_v1 = vld [vmem:[%s11104_s23 + $0xb0] sm:$0xff]  ;;  %v8803_v31 = vor.u32 %v10016_v30, %v8802_v61 }
 0x332   : > { %v10540_v45 = vpop.eup %10539  ;;  %v5110_v40 = vsel %vm16252_vm4, 0.0, %v5046_v55  ;;  %v5208_v27 = vsel %vm16253_vm5, 0.0, %v5144_v52  ;;  %5345 = vst [vmem:[#allocation3 + $0x1c] sm:$0xf] %v5311_v56  ;;  %v4235_v15 = vadd.f32 %v4234_v4, %v4146_v10  ;;  %vm4556_vm4 = vmor %vm16257_vm9, %vm16256_vm13  ;;  %v13559_v56 = vadd.f32 %v13470_v48, %v4342_v49  ;;  %v13561_v10 = vpop.f32.mrf.mxu2 }
 0x333   : > { %v4553_v62 = vadd.f32 %v10538_v23, %v4552_v60  ;;  %v10542_v14 = vpop.eup %10541  ;;  %v5111_v17 = vsel %vm11311_vm12, %v5110_v40, 0.0  ;;  %v13556_v7 = vadd.f32 1.0, %v10540_v45  ;;  %v5459_v45 = vpack.c.bf16 %v10683_v8, %v10684_v1 }
 0x334   : > { %4187 = vmatmul.bf16.gmra.mxu3 %v8799_v43  ;;  %v5209_v43 = vsel %vm13096_vm8, %v5208_v27, 0.0  ;;  %v5242_v60 = vpack.c.bf16 %v5111_v17, %v5111_v17  ;;  %v4565_v54 = vmul.f32 %v10542_v14, %v13522_v20  ;;  %v4573_v17 = vand.u32 2147483647, %v13522_v20 }
 0x335   : > { %v5379_v4 = vpack.c.bf16 %v5209_v43, %v5209_v43  ;;  %v4557_v63 = vsel %vm4556_vm4, %v10538_v23, %v4553_v62  ;;  %10543 = vrcp.f32 %v13556_v7  ;;  %v4575_v23 = vand.u32 2147483648, %v13522_v20  ;;  %v13574_v62 = vpop.f32.mrf.mxu1 }
 0x336   : > { %v4562_v27 = vsel %vm13540_vm11, %v4561_v18, %v4557_v63  ;;  %5277 = vst [vmem:[#allocation3 + $0x18] sm:$0xf] %v5242_v60  ;;  %v4566_v38 = vsub.f32 1.0, %v4565_v54  ;;  %vm4570_vm12 = vweird.f32 %v10542_v14  ;;  %v8952_v63 = vmul.f32 -1.442695, %v13559_v56 }
 0x337   : > { %v4148_v40 = vpop.f32.mrf.mxu3  ;;  %v13570_v49 = vmul.f32 %v4562_v27, %v13490_v19  ;;  %5413 = vst [vmem:[#allocation3 + $0x14] sm:$0xf] %v5379_v4  ;;  %v4307_v24 = vadd.f32 %v4235_v15, %v13290_v11  ;;  %vm4569_vm9 = vweird.f32 %v13522_v20  ;;  %vm16258_vm8 = vcmp.lt.s32.totalorder %v16234_v2, 1  ;;  %v8808_v27 = vld [vmem:[#allocation2 + $0x15c] sm:$0xf0] }
 0x338   : > { %v4149_v18 = vadd.f32 %v4148_v40, %v13402_v22  ;;  %v4567_v43 = vmul.f32 %v10542_v14, %v4566_v38  ;;  %10545 = vpow2.f32 %v8952_v63  ;;  %5595 = vmatmul.bf16.gmra.mxu1 %v5459_v45  ;;  %v4237_v4 = vpop.f32.mrf.mxu0  ;;  %v10017_v40 = vld [vmem:[#allocation2 + $0x154] sm:$0xf]  ;;  %vm4571_vm13 = vmor %vm4569_vm9, %vm4570_vm12  ;;  %v4576_v45 = vor.u32 1.1754944e-38, %v4575_v23 }
 0x339   : > { %v5047_v61 = vrot.slane %v13570_v49, 7  ;;  %v5145_v19 = vrot.slane %v13570_v49, 1  ;;  %v5312_v30 = vpack.c.bf16 %v13570_v49, %v13570_v49  ;;  %v4343_v60 = vmul.f32 %v13464_v57, %v4307_v24  ;;  %vm16260_vm9 = vmmov %vm16258_vm8 }
 0x33a   : > { %v4568_v15 = vadd.f32 %v10542_v14, %v4567_v43  ;;  %v4238_v54 = vadd.f32 %v4237_v4, %v4149_v18  ;;  %vm4574_vm11 = vcmp.eq.f32.partialorder %v4573_v17, 8.507059e+37  ;;  %v8811_v43 = vor.u32 %v10017_v40, %v8808_v27  ;;  %v13598_v4 = vpop.f32.mrf.mxu2 }
 0x33b   : > { %v5109_v11 = vsel %vm16258_vm8, %v5046_v55, %v5047_v61  ;;  %v5207_v22 = vsel %vm16253_vm5, %v5144_v52, %v5145_v19  ;;  %5346 = vst [vmem:[#allocation3 + $0x28] sm:$0xf] %v5312_v30  ;;  %v10544_v8 = vpop.eup %10543  ;;  %v13593_v49 = vadd.f32 %v13470_v48, %v4343_v60  ;;  %4276 = vmatmul.bf16.gmra.mxu0 %v8803_v31  ;;  %v4588_v60 = vand.u32 2147483647, %v13556_v7  ;;  %vm16261_vm8 = vmmov %vm16253_vm5 }
 0x33c   : > { %v5243_v38 = vpack.c.bf16 %v5109_v11, %v5109_v11  ;;  %v5380_v1 = vpack.c.bf16 %v5207_v22, %v5207_v22  ;;  %v4572_v55 = vsel %vm4571_vm13, %v10542_v14, %v4568_v15  ;;  %v4580_v52 = vmul.f32 %v10544_v8, %v13556_v7 }
 0x33d   : > { %v4308_v63 = vadd.f32 %v4238_v54, %v13298_v42  ;;  %v4577_v18 = vsel %vm4574_vm11, %v4576_v45, %v4572_v55  ;;  %v8953_v30 = vmul.f32 -1.442695, %v13593_v49  ;;  %v13603_v14 = vpop.f32.mrf.mxu1  ;;  %vm4585_vm4 = vweird.f32 %v10544_v8 }
 0x33e   : > { %5278 = vst [vmem:[#allocation3 + $0x24] sm:$0xf] %v5243_v38  ;;  %v13601_v20 = vmul.f32 %v4577_v18, %v13501_v6  ;;  %v4581_v23 = vsub.f32 1.0, %v4580_v52  ;;  %v10546_v42 = vpop.eup %10545  ;;  %v4590_v11 = vand.u32 2147483648, %v13556_v7  ;;  %vm4584_vm12 = vweird.f32 %v13556_v7 }
 0x33f   : > { %v4150_v24 = vpop.f32.mrf.mxu3  ;;  %5414 = vst [vmem:[#allocation3 + $0x20] sm:$0xf] %v5380_v1  ;;  %v4344_v17 = vmul.f32 %v13464_v57, %v4308_v63  ;;  %10547 = vpow2.f32 %v8953_v30  ;;  %v13614_v40 = vadd.f32 1.0, %v10546_v42  ;;  %vm4586_vm5 = vmor %vm4584_vm12, %vm4585_vm4  ;;  %vm4589_vm13 = vcmp.eq.f32.partialorder %v4588_v60, 8.507059e+37  ;;  %v9026_v60 = vld [vmem:[#allocation3 + $0x18] sm:$0xf] }
 0x340   : > { %16259 = vst [vmem:[#allocation19_spill] sm:$0xff] %v13603_v14  ;;  %v4151_v31 = vadd.f32 %v4150_v24, %v13407_v50  ;;  %v5048_v22 = vrot.slane %v13601_v20, 7  ;;  %v5146_v15 = vrot.slane %v13601_v20, 1  ;;  %v5313_v6 = vpack.c.bf16 %v13601_v20, %v13601_v20  ;;  %v10124_v50 = vld [vmem:[#allocation10 + $0x78] sm:$0xff]  ;;  %v4239_v38 = vpop.f32.mrf.mxu0 }
 0x341   : > { %v4582_v54 = vmul.f32 %v10544_v8, %v4581_v23  ;;  %v13617_v27 = vadd.f32 %v13470_v48, %v4344_v17  ;;  %v4591_v30 = vor.u32 1.1754944e-38, %v4590_v11  ;;  %10549 = vrcp.f32 %v13614_v40  ;;  %6222 = vmatpush.bf16.msrb.mxu3 %v10124_v50  ;;  %v10019_v11 = vld [vmem:[#allocation2 + $0x160] sm:$0xf0] }
 0x342   : > { %v5108_v1 = vsel %vm16260_vm9, %v5047_v61, %v5048_v22  ;;  %v5206_v45 = vsel %vm16261_vm8, %v5145_v19, %v5146_v15  ;;  %5347 = vst [vmem:[#allocation3 + $0x34] sm:$0xf] %v5313_v6  ;;  %v4240_v52 = vadd.f32 %v4239_v38, %v4151_v31  ;;  %v10686_v38 = vld [vmem:[%s11104_s23 + $0xc8] sm:$0xff]  ;;  %vm4599_vm4 = vweird.f32 %v13614_v40 }
 0x343   : > { %v4583_v55 = vadd.f32 %v10544_v8, %v4582_v54  ;;  %v5113_v7 = vsel %vm11499_vm14, %v5108_v1, 0.0  ;;  %v5211_v18 = vsel %vm11486_vm0, %v5206_v45, 0.0  ;;  %v8954_v42 = vmul.f32 -1.442695, %v13617_v27  ;;  %v10685_v54 = vld [vmem:[%s11104_s23 + $0xc0] sm:$0xff]  ;;  %vm16265_vm0 = vmmov %vm16260_vm9 }
 0x344   : > { %4192 = vmatmul.bf16.gmra.mxu3 %v8811_v43  ;;  %v5244_v61 = vpack.c.bf16 %v5113_v7, %v5113_v7  ;;  %v5381_v43 = vpack.c.bf16 %v5211_v18, %v5211_v18  ;;  %v4309_v6 = vadd.f32 %v4240_v52, %v13301_v25  ;;  %v5460_v1 = vpack.c.bf16 %v10686_v38, %v10685_v54  ;;  %v8814_v45 = vld [vmem:[#allocation2 + $0x158] sm:$0xf]  ;;  %v13642_v7 = vpop.f32.mrf.mxu2  ;;  %vm16266_vm14 = vmmov %vm16261_vm8 }
 0x345   : > { %v4587_v19 = vsel %vm4586_vm5, %v10544_v8, %v4583_v55  ;;  %v10065_v23 = vld [vmem:[#allocation3 + $0x20] sm:$0xf0]  ;;  %v10548_v17 = vpop.eup %10547  ;;  %v13638_v8 = vpop.f32.mrf.mxu1  ;;  %10551 = vpow2.f32 %v8954_v42  ;;  %v10196_v42 = vld [vmem:[#allocation10 + $0x138] sm:$0xff] }
 0x346   : > { %v4592_v31 = vsel %vm4589_vm13, %v4591_v30, %v4587_v19  ;;  %5279 = vst [vmem:[#allocation3 + $0x30] sm:$0xf] %v5244_v61  ;;  %v13636_v63 = vadd.f32 1.0, %v10548_v17  ;;  %v4345_v55 = vmul.f32 %v13464_v57, %v4309_v6  ;;  %v9027_v52 = vor.u32 %v10065_v23, %v9026_v60  ;;  %v10020_v19 = vld [vmem:[#allocation2 + $0x16c] sm:$0xf]  ;;  %v10132_v6 = vld [vmem:[#allocation10 + $0xb8] sm:$0xff]  ;;  %7034 = vmatpush.bf16.msrb.mxu2 %v10196_v42 }
 0x347   : > { %v4153_v20 = vpop.f32.mrf.mxu3  ;;  %v13634_v50 = vmul.f32 %v4592_v31, %v13517_v16  ;;  %16264 = vst [vmem:[#allocation68_spill] sm:$0xff] %v13638_v8  ;;  %v13649_v30 = vpop.eup %10549  ;;  %v10188_v54 = vld [vmem:[#allocation10 + $0xf8] sm:$0xff]  ;;  %6311 = vmatpush.bf16.msrb.mxu0 %v10132_v6 }
 0x348   : > { %5415 = vst [vmem:[#allocation3 + $0x2c] sm:$0xf] %v5381_v43  ;;  %v4154_v25 = vadd.f32 %v4153_v20, %v13414_v36  ;;  %10553 = vrcp.f32 %v13636_v63  ;;  %v13652_v61 = vadd.f32 %v13470_v48, %v4345_v55  ;;  %5600 = vmatmul.bf16.gmra.mxu1 %v5460_v1  ;;  %v4242_v43 = vpop.f32.mrf.mxu0  ;;  %v8815_v36 = vor.u32 %v10019_v11, %v8814_v45  ;;  %v8820_v20 = vld [vmem:[#allocation2 + $0x174] sm:$0xf0] }
 0x349   : > { %v5049_v24 = vrot.slane %v13634_v50, 7  ;;  %v15810_v18 = vrot.slane %v13634_v50, 1  ;;  %v5314_v16 = vpack.c.bf16 %v13634_v50, %v13634_v50  ;;  %6146 = vmatmul.bf16.gmra.mxu2 %v9027_v52  ;;  %v4595_v31 = vmul.f32 %v13649_v30, %v13614_v40  ;;  %6945 = vmatpush.bf16.msrb.mxu1 %v10188_v54 }
 0x34a   : > { %v8955_v11 = vmul.f32 -1.442695, %v13652_v61  ;;  %v8823_v55 = vor.u32 %v10020_v19, %v8820_v20  ;;  %vm4600_vm11 = vweird.f32 %v13649_v30  ;;  %v4620_v42 = vand.u32 2147483648, %v13636_v63 }
 0x34b   : > { %v5107_v23 = vsel %vm16265_vm0, %v5048_v22, %v5049_v24  ;;  %v5205_v17 = vsel %vm16266_vm14, %v5146_v15, %v15810_v18  ;;  %5348 = vst [vmem:[#allocation3 + $0x40] sm:$0xf] %v5314_v16  ;;  %v4596_v45 = vsub.f32 1.0, %v4595_v31  ;;  %v4243_v22 = vadd.f32 %v4242_v43, %v4154_v25  ;;  %v10552_v52 = vpop.eup %10551  ;;  %4281 = vmatmul.bf16.gmra.mxu0 %v8815_v36  ;;  %vm13686_vm12 = vmor %vm4599_vm4, %vm4600_vm11 }
 0x34c   : > { %v5245_v38 = vpack.c.bf16 %v5107_v23, %v5107_v23  ;;  %v5382_v1 = vpack.c.bf16 %v5205_v17, %v5205_v17  ;;  %v4603_v15 = vand.u32 2147483647, %v13614_v40  ;;  %v4605_v16 = vand.u32 2147483648, %v13614_v40  ;;  %v13693_v40 = vpop.f32.mrf.mxu2 }
 0x34d   : > { %v4597_v31 = vmul.f32 %v13649_v30, %v4596_v45  ;;  %v13672_v25 = vadd.f32 1.0, %v10552_v52  ;;  %10555 = vpow2.f32 %v8955_v11  ;;  %v13674_v43 = vpop.f32.mrf.mxu1  ;;  %v4310_v19 = vadd.f32 %v4243_v22, %v13309_v0  ;;  %v10687_v45 = vld [vmem:[%s11104_s23 + $0xd0] sm:$0xff]  ;;  %v10688_v11 = vld [vmem:[%s11104_s23 + $0xd8] sm:$0xff] }
 0x34e   : > { %5280 = vst [vmem:[#allocation3 + $0x3c] sm:$0xf] %v5245_v38  ;;  %v13669_v17 = vpop.eup %10553  ;;  %v4618_v36 = vand.u32 2147483647, %v13636_v63  ;;  %v4606_v0 = vor.u32 1.1754944e-38, %v4605_v16  ;;  %v5461_v22 = vpack.c.bf16 %v10688_v11, %v10687_v45  ;;  %vm4604_vm9 = vcmp.eq.f32.partialorder %v4603_v15, 8.507059e+37 }
 0x34f   : > { %v4155_v60 = vpop.f32.mrf.mxu3  ;;  %5416 = vst [vmem:[#allocation3 + $0x38] sm:$0xf] %v5382_v1  ;;  %v4610_v20 = vmul.f32 %v13669_v17, %v13636_v63  ;;  %10557 = vrcp.f32 %v13672_v25  ;;  %v4346_v38 = vmul.f32 %v13464_v57, %v4310_v19  ;;  %vm4614_vm8 = vweird.f32 %v13636_v63  ;;  %v13699_v16 = vld [vmem:[#allocation2 + $0x170] sm:$0xf] }
 0x350   : > { %v4156_v23 = vadd.f32 %v4155_v60, %v13419_v35  ;;  %16267 = vst [vmem:[#allocation81_spill] sm:$0xff] %v13674_v43  ;;  %v4598_v35 = vadd.f32 %v13649_v30, %v4597_v31  ;;  %v4244_v1 = vpop.f32.mrf.mxu0  ;;  %v10187_v60 = vld [vmem:[#allocation10 + $0xf0] sm:$0xff]  ;;  %vm4615_vm5 = vweird.f32 %v13669_v17  ;;  %vm13705_vm13 = vcmp.eq.f32.partialorder %v4618_v36, 8.507059e+37 }
 0x351   : > { %v4611_v54 = vsub.f32 1.0, %v4610_v20  ;;  %v13701_v20 = vld [vmem:[#allocation2 + $0x178] sm:$0xf0]  ;;  %6946 = vmatpush.bf16.msrb.mxu1 %v10187_v60  ;;  %v4621_v15 = vor.u32 1.1754944e-38, %v4620_v42  ;;  %v10123_v11 = vld [vmem:[#allocation10 + $0x70] sm:$0xff]  ;;  %vm4616_vm0 = vmor %vm4614_vm8, %vm4615_vm5  ;;  %vm16273_vm14 = vcmp.lt.s32.totalorder %v16234_v2, 1 }
 0x352   : > { %v4602_v52 = vsel %vm13686_vm12, %v13649_v30, %v4598_v35  ;;  %v4245_v31 = vadd.f32 %v4244_v1, %v4156_v23  ;;  %v13713_v23 = vadd.f32 %v13470_v48, %v4346_v38  ;;  %v4633_v1 = vand.u32 2147483647, %v13672_v25  ;;  %v10131_v60 = vld [vmem:[#allocation10 + $0xb0] sm:$0xff]  ;;  %6223 = vmatpush.bf16.msrb.mxu3 %v10123_v11 }
 0x353   : > { %v4607_v19 = vsel %vm4604_vm9, %v4606_v0, %v4602_v52  ;;  %v4612_v18 = vmul.f32 %v13669_v17, %v4611_v54  ;;  %v10556_v6 = vpop.eup %10555  ;;  %v8827_v45 = vor.u32 %v13701_v20, %v13699_v16  ;;  %6312 = vmatpush.bf16.msrb.mxu0 %v10131_v60  ;;  %vm16275_vm11 = vcmp.lt.s32.totalorder %v16234_v2, 7  ;;  %v13753_v11 = vld [vmem:[#allocation2 + $0x18c] sm:$0xf0] }
 0x354   : > { %4197 = vmatmul.bf16.gmra.mxu3 %v8823_v55  ;;  %v13710_v30 = vmul.f32 %v4607_v19, %v13559_v56  ;;  %v4311_v35 = vadd.f32 %v4245_v31, %v13312_v33  ;;  %v13718_v36 = vadd.f32 1.0, %v10556_v6  ;;  %v10186_v56 = vld [vmem:[#allocation10 + $0xe8] sm:$0xff]  ;;  %v13740_v6 = vld [vmem:[#allocation2 + $0x184] sm:$0xf]  ;;  %vm16279_vm12 = vmmov %vm16275_vm11  ;;  %vm13788_vm9 = vcmp.eq.f32.partialorder %v4633_v1, 8.507059e+37 }
 0x355   : > { %v4613_v54 = vadd.f32 %v13669_v17, %v4612_v18  ;;  %v13722_v52 = vpop.eup %10557  ;;  %v4635_v18 = vand.u32 2147483648, %v13672_v25  ;;  %v13733_v31 = vpop.f32.mrf.mxu1  ;;  %6947 = vmatpush.bf16.msrb.mxu1 %v10186_v56  ;;  %v10130_v55 = vld [vmem:[#allocation10 + $0xa8] sm:$0xff] }
 0x356   : > { %v5050_v42 = vrot.slane %v13710_v30, 7  ;;  %v5148_v38 = vrot.slane %v13710_v30, 1  ;;  %v5315_v33 = vpack.c.bf16 %v13710_v30, %v13710_v30  ;;  %16272 = vst [vmem:[#allocation79_spill] sm:$0xff] %v13733_v31  ;;  %v4625_v20 = vmul.f32 %v13722_v52, %v13672_v25 }
 0x357   : > { %v4158_v0 = vpop.f32.mrf.mxu3  ;;  %v4617_v16 = vsel %vm4616_vm0, %v13669_v17, %v4613_v54  ;;  %10559 = vrcp.f32 %v13718_v36  ;;  %v4347_v19 = vmul.f32 %v13464_v57, %v4311_v35  ;;  %v16274_v30 = vrot.slane %v13634_v50, 1  ;;  %6313 = vmatpush.bf16.msrb.mxu0 %v10130_v55 }
 0x358   : > { %v5106_v63 = vsel %vm16273_vm14, %v5049_v24, %v5050_v42  ;;  %5349 = vst [vmem:[#allocation3 + $0x4c] sm:$0xf] %v5315_v33  ;;  %v4622_v54 = vsel %vm13705_vm13, %v4621_v15, %v4617_v16  ;;  %v8956_v35 = vmul.f32 -1.442695, %v13713_v23  ;;  %v4626_v8 = vsub.f32 1.0, %v4625_v20  ;;  %5605 = vmatmul.bf16.gmra.mxu1 %v5461_v22  ;;  %v4247_v33 = vpop.f32.mrf.mxu0  ;;  %v10185_v15 = vld [vmem:[#allocation10 + $0xe0] sm:$0xff]  ;;  %v13769_v22 = vpop.f32.mrf.mxu2 }
 0x359   : > { %v5204_v17 = vsel %vm16275_vm11, %v16274_v30, %v5148_v38  ;;  %v5115_v31 = vsel %vm11705_vm2, %v5106_v63, 0.0  ;;  %v13760_v50 = vmul.f32 %v4622_v54, %v13593_v49  ;;  %v10122_v30 = vld [vmem:[#allocation10 + $0x68] sm:$0xff]  ;;  %vm4630_vm4 = vweird.f32 %v13722_v52  ;;  %6948 = vmatpush.bf16.msrb.mxu1 %v10185_v15  ;;  %vm16278_vm2 = vmmov %vm16273_vm14 }
 0x35a   : > { %v5213_v24 = vsel %vm11698_vm6, %v5204_v17, 0.0  ;;  %v5246_v16 = vpack.c.bf16 %v5115_v31, %v5115_v31  ;;  %v4159_v56 = vadd.f32 %v4158_v0, %v13427_v47  ;;  %v4627_v20 = vmul.f32 %v13722_v52, %v4626_v8  ;;  %6224 = vmatpush.bf16.msrb.mxu3 %v10122_v30  ;;  %v10068_v47 = vld [vmem:[#allocation3 + $0x38] sm:$0xf0]  ;;  %vm16284_vm14 = vmmov %vm16278_vm2 }
 0x35b   : > { %v5383_v14 = vpack.c.bf16 %v5213_v24, %v5213_v24  ;;  %v5051_v63 = vrot.slane %v13760_v50, 7  ;;  %v5149_v43 = vrot.slane %v13760_v50, 1  ;;  %v5316_v49 = vpack.c.bf16 %v13760_v50, %v13760_v50  ;;  %4286 = vmatmul.bf16.gmra.mxu0 %v8827_v45 }
 0x35c   : > { %5281 = vst [vmem:[#allocation3 + $0x48] sm:$0xf] %v5246_v16  ;;  %vm4629_vm6 = vweird.f32 %v13672_v25  ;;  %10561 = vpow2.f32 %v8956_v35  ;;  %v13773_v31 = vadd.f32 %v13470_v48, %v4347_v19  ;;  %v8835_v17 = vor.u32 %v13740_v6, %v13753_v11  ;;  %v10121_v6 = vld [vmem:[#allocation10 + $0x60] sm:$0xff] }
 0x35d   : > { %v13777_v54 = vpop.eup %10559  ;;  %5417 = vst [vmem:[#allocation3 + $0x44] sm:$0xf] %v5383_v14  ;;  %v5105_v8 = vsel %vm16278_vm2, %v5050_v42, %v5051_v63  ;;  %v5203_v19 = vsel %vm16279_vm12, %v5148_v38, %v5149_v43  ;;  %v4628_v35 = vadd.f32 %v13722_v52, %v4627_v20  ;;  %v10129_v11 = vld [vmem:[#allocation10 + $0xa0] sm:$0xff]  ;;  %v10184_v14 = vld [vmem:[#allocation10 + $0xd8] sm:$0xff]  ;;  %vm4631_vm8 = vmor %vm4629_vm6, %vm4630_vm4  ;;  %v4636_v42 = vor.u32 1.1754944e-38, %v4635_v18  ;;  %v13798_v1 = vpop.f32.mrf.mxu1 }
 0x35e   : > { %v5247_v24 = vpack.c.bf16 %v5105_v8, %v5105_v8  ;;  %5350 = vst [vmem:[#allocation3 + $0x58] sm:$0xf] %v5316_v49  ;;  %v5384_v30 = vpack.c.bf16 %v5203_v19, %v5203_v19  ;;  %v4640_v38 = vmul.f32 %v13777_v54, %v13718_v36  ;;  %v4650_v45 = vand.u32 2147483648, %v13718_v36  ;;  %v9038_v49 = vld [vmem:[#allocation3 + $0x30] sm:$0xf]  ;;  %6225 = vmatpush.bf16.msrb.mxu3 %v10121_v6 }
 0x35f   : > { %v4160_v0 = vpop.f32.mrf.mxu3  ;;  %v4632_v55 = vsel %vm4631_vm8, %v13722_v52, %v4628_v35  ;;  %v8957_v15 = vmul.f32 -1.442695, %v13773_v31  ;;  %v4248_v16 = vadd.f32 %v4247_v33, %v4159_v56  ;;  %6314 = vmatpush.bf16.msrb.mxu0 %v10129_v11  ;;  %v9039_v20 = vor.u32 %v10068_v47, %v9038_v49  ;;  %6949 = vmatpush.bf16.msrb.mxu1 %v10184_v14  ;;  %v10120_v19 = vld [vmem:[#allocation10 + $0x58] sm:$0xff]  ;;  %v10183_v47 = vld [vmem:[#allocation10 + $0xd0] sm:$0xff] }
 0x360   : > { %5282 = vst [vmem:[#allocation3 + $0x54] sm:$0xf] %v5247_v24  ;;  %v4637_v25 = vsel %vm13788_vm9, %v4636_v42, %v4632_v55  ;;  %v4641_v18 = vsub.f32 1.0, %v4640_v38  ;;  %v4161_v8 = vadd.f32 %v4160_v0, %v13434_v46  ;;  %vm4645_vm5 = vweird.f32 %v13777_v54  ;;  %v4249_v56 = vpop.f32.mrf.mxu0  ;;  %v10128_v35 = vld [vmem:[#allocation10 + $0x98] sm:$0xff]  ;;  %v10690_v38 = vld [vmem:[%s11104_s23 + $0xe8] sm:$0xff] }
 0x361   : > { %5418 = vst [vmem:[#allocation3 + $0x50] sm:$0xf] %v5384_v30  ;;  %v13807_v52 = vmul.f32 %v4637_v25, %v13617_v27  ;;  %10563 = vpow2.f32 %v8957_v15  ;;  %v4312_v33 = vadd.f32 %v4248_v16, %v13320_v44  ;;  %vm4644_vm13 = vweird.f32 %v13718_v36  ;;  %6151 = vmatmul.bf16.gmra.mxu2 %v9039_v20  ;;  %v10689_v42 = vld [vmem:[%s11104_s23 + $0xe0] sm:$0xff]  ;;  %v8838_v15 = vld [vmem:[#allocation2 + $0x188] sm:$0xf]  ;;  %v10119_v20 = vld [vmem:[#allocation10 + $0x50] sm:$0xff] }
 0x362   : > { %v10562_v60 = vpop.eup %10561  ;;  %v4642_v6 = vmul.f32 %v13777_v54, %v4641_v18  ;;  %v4648_v46 = vand.u32 2147483647, %v13718_v36  ;;  %v4250_v27 = vadd.f32 %v4249_v56, %v4161_v8  ;;  %6226 = vmatpush.bf16.msrb.mxu3 %v10120_v19  ;;  %vm13823_vm0 = vmor %vm4644_vm13, %vm4645_vm5  ;;  %v4651_v24 = vor.u32 1.1754944e-38, %v4650_v45  ;;  %v13844_v18 = vpop.f32.mrf.mxu2  ;;  %v10127_v8 = vld [vmem:[#allocation10 + $0x90] sm:$0xff]  ;;  %v16286_v19 = vld [vmem:[#allocation21_spill] sm:$0xff] }
 0x363   : > { %v5052_v0 = vrot.slane %v13807_v52, 7  ;;  %v5150_v44 = vrot.slane %v13807_v52, 1  ;;  %v13818_v11 = vadd.f32 1.0, %v10562_v60  ;;  %6315 = vmatpush.bf16.msrb.mxu0 %v10128_v35  ;;  %v4348_v30 = vmul.f32 %v13464_v57, %v4312_v33  ;;  %6950 = vmatpush.bf16.msrb.mxu1 %v10183_v47  ;;  %v10182_v33 = vld [vmem:[#allocation10 + $0xc8] sm:$0xff]  ;;  %v10025_v60 = vld [vmem:[#allocation2 + $0x190] sm:$0xf0] }
 0x364   : > { %4202 = vmatmul.bf16.gmra.mxu3 %v8835_v17  ;;  %v5317_v17 = vpack.c.bf16 %v13807_v52, %v13807_v52  ;;  %v4643_v14 = vadd.f32 %v13777_v54, %v4642_v6  ;;  %v5462_v55 = vpack.c.bf16 %v10690_v38, %v10689_v42  ;;  %v4313_v25 = vadd.f32 %v4250_v27, %v13323_v41  ;;  %v10026_v36 = vld [vmem:[#allocation2 + $0x19c] sm:$0xf] }
 0x365   : > { %v5104_v49 = vsel %vm16284_vm14, %v5051_v63, %v5052_v0  ;;  %v5202_v45 = vsel %vm16275_vm11, %v5149_v43, %v5150_v44  ;;  %10565 = vrcp.f32 %v13818_v11  ;;  %vm16287_vm4 = vnez %v16286_v19  ;;  %v13853_v43 = vpop.f32.mrf.mxu1 }
 0x366   : > { %5351 = vst [vmem:[#allocation3 + $0x64] sm:$0xf] %v5317_v17  ;;  %v5117_v63 = vsel %vm11953_vm3, %v5104_v49, 0.0  ;;  %v5215_v35 = vsel %vm16287_vm4, %v5202_v45, 0.0  ;;  %v4647_v50 = vsel %vm13823_vm0, %v13777_v54, %v4643_v14  ;;  %vm4649_vm6 = vcmp.eq.f32.partialorder %v4648_v46, 8.507059e+37  ;;  %6227 = vmatpush.bf16.msrb.mxu3 %v10119_v20  ;;  %v10118_v45 = vld [vmem:[#allocation10 + $0x48] sm:$0xff]  ;;  %vm16288_vm3 = vmmov %vm16278_vm2 }
 0x367   : > { %v4163_v16 = vpop.f32.mrf.mxu3  ;;  %v10564_v41 = vpop.eup %10563  ;;  %v5248_v6 = vpack.c.bf16 %v5117_v63, %v5117_v63  ;;  %v5385_v27 = vpack.c.bf16 %v5215_v35, %v5215_v35  ;;  %v4652_v47 = vsel %vm4649_vm6, %v4651_v24, %v4647_v50  ;;  %6316 = vmatpush.bf16.msrb.mxu0 %v10127_v8  ;;  %v13861_v38 = vadd.f32 %v13470_v48, %v4348_v30  ;;  %v8844_v54 = vld [vmem:[#allocation2 + $0x1a4] sm:$0xf0]  ;;  %vm16289_vm2 = vmmov %vm16275_vm11 }
 0x368   : > { %v13856_v17 = vmul.f32 %v4652_v47, %v13652_v61  ;;  %v13858_v42 = vadd.f32 1.0, %v10564_v41  ;;  %6951 = vmatpush.bf16.msrb.mxu1 %v10182_v33  ;;  %v4349_v46 = vmul.f32 %v13464_v57, %v4313_v25  ;;  %v4252_v14 = vpop.f32.mrf.mxu0  ;;  %v8839_v49 = vor.u32 %v10025_v60, %v8838_v15  ;;  %v10126_v20 = vld [vmem:[#allocation10 + $0x88] sm:$0xff]  ;;  %v10181_v61 = vld [vmem:[#allocation10 + $0xc0] sm:$0xff]  ;;  %v9050_v25 = vld [vmem:[#allocation3 + $0x48] sm:$0xf] }
 0x369   : > { %5283 = vst [vmem:[#allocation3 + $0x60] sm:$0xf] %v5248_v6  ;;  %5610 = vmatmul.bf16.gmra.mxu1 %v5462_v55  ;;  %v4164_v24 = vadd.f32 %v4163_v16, %v13440_v12  ;;  %v10071_v33 = vld [vmem:[#allocation3 + $0x50] sm:$0xf0]  ;;  %v8958_v55 = vmul.f32 -1.442695, %v13861_v38  ;;  %v8847_v60 = vor.u32 %v10026_v36, %v8844_v54  ;;  %vm4659_vm9 = vweird.f32 %v13818_v11  ;;  %vm16293_vm4 = vmmov %vm16288_vm3 }
 0x36a   : > { %5419 = vst [vmem:[#allocation3 + $0x5c] sm:$0xf] %v5385_v27  ;;  %v5053_v8 = vrot.slane %v13856_v17, 7  ;;  %v5151_v30 = vrot.slane %v13856_v17, 1  ;;  %v5318_v56 = vpack.c.bf16 %v13856_v17, %v13856_v17  ;;  %10567 = vrcp.f32 %v13858_v42  ;;  %6228 = vmatpush.bf16.msrb.mxu3 %v10118_v45  ;;  %v10125_v41 = vld [vmem:[#allocation10 + $0x80] sm:$0xff]  ;;  %v13895_v36 = vpop.f32.mrf.mxu2  ;;  %vm16294_vm6 = vmmov %vm16289_vm2 }
 0x36b   : > { %v13870_v57 = vpop.eup %10565  ;;  %6317 = vmatpush.bf16.msrb.mxu0 %v10126_v20  ;;  %v9051_v50 = vor.u32 %v10071_v33, %v9050_v25  ;;  %10569 = vpow2.f32 %v8958_v55  ;;  %v13888_v52 = vadd.f32 %v13470_v48, %v4349_v46  ;;  %v4253_v27 = vadd.f32 %v4252_v14, %v4164_v24  ;;  %v10195_v24 = vld [vmem:[#allocation10 + $0x130] sm:$0xff] }
 0x36c   : > { %v5103_v12 = vsel %vm16288_vm3, %v5052_v0, %v5053_v8  ;;  %v5201_v15 = vsel %vm16289_vm2, %v5150_v44, %v5151_v30  ;;  %5352 = vst [vmem:[#allocation3 + $0x70] sm:$0xf] %v5318_v56  ;;  %v4655_v16 = vmul.f32 %v13870_v57, %v13818_v11  ;;  %6952 = vmatpush.bf16.msrb.mxu1 %v10181_v61  ;;  %v10117_v0 = vld [vmem:[#allocation10 + $0x40] sm:$0xff]  ;;  %v4663_v47 = vand.u32 2147483647, %v13818_v11  ;;  %v10691_v61 = vld [vmem:[%s11104_s23 + $0xf0] sm:$0xff] }
 0x36d   : > { %v5249_v19 = vpack.c.bf16 %v5103_v12, %v5103_v12  ;;  %v5386_v35 = vpack.c.bf16 %v5201_v15, %v5201_v15  ;;  %4291 = vmatmul.bf16.gmra.mxu0 %v8839_v49  ;;  %v13890_v44 = vpop.f32.mrf.mxu1  ;;  %v4665_v45 = vand.u32 2147483648, %v13818_v11  ;;  %vm4660_vm12 = vweird.f32 %v13870_v57  ;;  %v10692_v56 = vld [vmem:[%s11104_s23 + $0xf8] sm:$0xff]  ;;  %v13912_v12 = vld [vmem:[%s15705_s4] ss:$0 sm:$0xff]  ;;  %7035 = vmatpush.bf16.msrb.mxu2 %v10195_v24  ;;  %s8103_s23 = sshll.u32 %s8100_s29, 4  ;;  %s8104_s23 = int_to_ptr.hbm [resolvable:$true] %s8103_s23 }
 0x36e   : > { %v4656_v6 = vsub.f32 1.0, %v4655_v16  ;;  %6229 = vmatpush.bf16.msrb.mxu3 %v10117_v0  ;;  %v8959_v46 = vmul.f32 -1.442695, %v13888_v52  ;;  %v4314_v14 = vadd.f32 %v4253_v27, %v13331_v34  ;;  %v5463_v33 = vpack.c.bf16 %v10692_v56, %v10691_v61  ;;  %vm13917_vm8 = vmor %vm4659_vm9, %vm4660_vm12  ;;  %v10028_v27 = vld [vmem:[#allocation2 + $0x1a8] sm:$0xf0]  ;;  %s10861_s1 = sshra.s32 %s8104_s23, 4  ;;  %s10862_s1 = int_to_ptr.hbm [resolvable:$true] %s10861_s1 }
 0x36f   : > { %v4165_v63 = vpop.f32.mrf.mxu3  ;;  %5284 = vst [vmem:[#allocation3 + $0x6c] sm:$0xf] %v5249_v19  ;;  %6318 = vmatpush.bf16.msrb.mxu0 %v10125_v41  ;;  %vm4664_vm5 = vcmp.eq.f32.partialorder %v4663_v47, 8.507059e+37  ;;  %v4666_v16 = vor.u32 1.1754944e-38, %v4665_v45  ;;  %vm4674_vm0 = vweird.f32 %v13858_v42  ;;  %vm16300_vm12 = vmmov %vm16293_vm4  ;;  %s10863_s15 = scalar_lea.hbm %s10862_s1, 256  ;;  %p10868_p9 = scmp.lt.s32.totalorder %s10862_s1, %s15710_s9 }
 0x370   : > { %v4166_v49 = vadd.f32 %v4165_v63, %v13459_v32  ;;  %v13897_v54 = vpop.eup %10567  ;;  %5420 = vst [vmem:[#allocation3 + $0x68] sm:$0xf] %v5386_v35  ;;  %v4657_v48 = vmul.f32 %v13870_v57, %v4656_v6  ;;  %v4254_v20 = vpop.f32.mrf.mxu0  ;;  %10571 = vpow2.f32 %v8959_v46  ;;  %v4350_v34 = vmul.f32 %v13912_v12, %v4314_v14  ;;  %v8850_v6 = vld [vmem:[#allocation2 + $0x1a0] sm:$0xf]  ;;  %vm16301_vm9 = vmmov %vm16294_vm6  ;;  %p10864_p1 = scmp.ne.s32.totalorder %s10862_s1, %s10863_s15  ;;  %p10869_p2 = scmp.lt.s32.totalorder %s10867_s24, %s10863_s15 }
 0x371   : > { %v4670_v32 = vmul.f32 %v13897_v54, %v13858_v42  ;;  %6156 = vmatmul.bf16.gmra.mxu2 %v9051_v50  ;;  %v4678_v63 = vand.u32 2147483647, %v13858_v42  ;;  %v10570_v19 = vpop.eup %10569  ;;  %v4680_v50 = vand.u32 2147483648, %v13858_v42  ;;  %vm4675_vm13 = vweird.f32 %v13897_v54  ;;  %v10061_v42 = vld [vmem:[#allocation3 + $0x4] sm:$0xf] }
 0x372   : > { %v4658_v55 = vadd.f32 %v13870_v57, %v4657_v48  ;;  %v4255_v11 = vadd.f32 %v4254_v20, %v4166_v49  ;;  %vm4676_vm14 = vmor %vm4674_vm0, %vm4675_vm13  ;;  %v13949_v15 = vpop.f32.mrf.mxu2  ;;  %p10865_p4 = pnand %p10864_p1, %p11068_p3  ;;  %p10870_p10 = por %p10869_p2, %p10868_p9 }
 0x373   : > { %v4671_v25 = vsub.f32 1.0, %v4670_v32  ;;  %vm4679_vm11 = vcmp.eq.f32.partialorder %v4678_v63, 8.507059e+37 }
 0x374   : > { %4207 = vmatmul.bf16.gmra.mxu3 %v8847_v60  ;;  %v4662_v35 = vsel %vm13917_vm8, %v13870_v57, %v4658_v55  ;;  %v13929_v60 = vld [vmem:[%s15706_s5] ss:$0 sm:$0xff]  ;;  %v4315_v41 = vadd.f32 %v4255_v11, %v13334_v29  ;;  %v13937_v57 = vadd.f32 1.0, %v10570_v19  ;;  %v8851_v29 = vor.u32 %v10028_v27, %v8850_v6  ;;  %p10866_p8 = pneg %p10865_p4 }
 0x375   : > { %v13932_v0 = vadd.f32 %v13929_v60, %v4350_v34  ;;  %v4667_v45 = vsel %vm4664_vm5, %v4666_v16, %v4662_v35  ;;  %v4672_v49 = vmul.f32 %v13897_v54, %v4671_v25  ;;  %v13941_v14 = vpop.f32.mrf.mxu1  ;;  %v4681_v55 = vor.u32 1.1754944e-38, %v4680_v50  ;;  %v9016_v16 = vld [vmem:[#allocation3 + $0xc] sm:$0xf0]  ;;  %v16297_v50 = vld [vmem:[#allocation36_spill] sm:$0xff] }
 0x376   : > { %v5022_v48 = vmul.f32 %v4667_v45, %v13713_v23  ;;  %16292 = vst [vmem:[#allocation44_spill] sm:$0xff] %v13941_v14  ;;  %10573 = vrcp.f32 %v13937_v57  ;;  %v10572_v24 = vpop.eup %10571  ;;  %v4351_v19 = vmul.f32 %v13912_v12, %v4315_v41  ;;  %vm16298_vm2 = vnez %v16297_v50  ;;  %p10871_p11 = pnand %p10870_p10, %p10866_p8 }
 0x377   : > { %v4168_v47 = vpop.f32.mrf.mxu3  ;;  %v8960_v46 = vmul.f32 -1.442695, %v13932_v0  ;;  %v4673_v32 = vadd.f32 %v13897_v54, %v4672_v49  ;;  %v13947_v23 = vadd.f32 1.0, %v10572_v24  ;;  %v9019_v49 = vor.u32 %v10061_v42, %v9016_v16  ;;  %v10074_v24 = vld [vmem:[#allocation3 + $0x68] sm:$0xf0] }
 0x378   : > { %v5054_v20 = vrot.slane %v5022_v48, 7  ;;  %v5152_v61 = vrot.slane %v5022_v48, 1  ;;  %v5319_v56 = vpack.c.bf16 %v5022_v48, %v5022_v48  ;;  %v4257_v11 = vpop.f32.mrf.mxu0  ;;  %v4695_v42 = vand.u32 2147483648, %v13937_v57 }
 0x379   : > { %v4677_v34 = vsel %vm4676_vm14, %v13897_v54, %v4673_v32  ;;  %10575 = vpow2.f32 %v8960_v46  ;;  %5615 = vmatmul.bf16.gmra.mxu1 %v5463_v33  ;;  %v16295_v33 = vld [vmem:[#allocation37_spill] sm:$0xff]  ;;  %vm4689_vm5 = vweird.f32 %v13937_v57  ;;  %vm4704_vm14 = vweird.f32 %v13947_v23 }
 0x37a   : > { %v5102_v25 = vsel %vm16293_vm4, %v5053_v8, %v5054_v20  ;;  %v5200_v54 = vsel %vm16294_vm6, %v5151_v30, %v5152_v61  ;;  %5353 = vst [vmem:[#allocation3 + $0x7c] sm:$0xf] %v5319_v56  ;;  %v4682_v63 = vsel %vm4679_vm11, %v4681_v55, %v4677_v34  ;;  %vm16296_vm3 = vnez %v16295_v33  ;;  %v13968_v8 = vld [vmem:[#allocation3 + $0x20] sm:$0xf0]  ;;  %v13977_v56 = vld [vmem:[#allocation3 + $0x18] sm:$0xf] }
 0x37b   : > { %v5119_v35 = vsel %vm16296_vm3, %v5102_v25, 0.0  ;;  %v5217_v6 = vsel %vm16298_vm2, %v5200_v54, 0.0  ;;  %v13965_v27 = vmul.f32 %v4682_v63, %v13773_v31  ;;  %10577 = vrcp.f32 %v13947_v23  ;;  %v13987_v54 = vld [vmem:[#allocation3 + $0x8] sm:$0xf]  ;;  %v9062_v25 = vld [vmem:[#allocation3 + $0x60] sm:$0xf]  ;;  %vm16306_vm2 = vmmov %vm16300_vm12 }
 0x37c   : > { %v5250_v17 = vpack.c.bf16 %v5119_v35, %v5119_v35  ;;  %v5387_v45 = vpack.c.bf16 %v5217_v6, %v5217_v6  ;;  %v13970_v48 = vpop.eup %10573  ;;  %v4169_v31 = vadd.f32 %v4168_v47, %v13479_v5  ;;  %v4693_v34 = vand.u32 2147483647, %v13937_v57  ;;  %v14001_v35 = vld [vmem:[#allocation3 + $0x10] sm:$0xf0] }
 0x37d   : > { %v15811_v41 = vrot.slane %v13965_v27, 7  ;;  %v15812_v46 = vrot.slane %v13965_v27, 1  ;;  %v5320_v32 = vpack.c.bf16 %v13965_v27, %v13965_v27  ;;  %4296 = vmatmul.bf16.gmra.mxu0 %v8851_v29  ;;  %v4685_v55 = vmul.f32 %v13970_v48, %v13937_v57  ;;  %v13983_v16 = vpop.f32.mrf.mxu1 }
 0x37e   : > { %5285 = vst [vmem:[#allocation3 + $0x78] sm:$0xf] %v5250_v17  ;;  %v4708_v63 = vand.u32 2147483647, %v13947_v23  ;;  %v13999_v33 = vadd.f32 %v13929_v60, %v4351_v19  ;;  %v9063_v14 = vor.u32 %v10074_v24, %v9062_v25  ;;  %vm4690_vm8 = vweird.f32 %v13970_v48 }
 0x37f   : > { %v4170_v30 = vpop.f32.mrf.mxu3  ;;  %16299 = vst [vmem:[#allocation31_spill] sm:$0xff] %v13983_v16  ;;  %v10576_v29 = vpop.eup %10575  ;;  %v5101_v5 = vsel %vm16300_vm12, %v5054_v20, %v15811_v41  ;;  %v5199_v47 = vsel %vm16301_vm9, %v5152_v61, %v15812_v46  ;;  %v4686_v17 = vsub.f32 1.0, %v4685_v55  ;;  %v4258_v16 = vadd.f32 %v4257_v11, %v4169_v31  ;;  %vm4691_vm13 = vmor %vm4689_vm5, %vm4690_vm8 }
 0x380   : > { %5421 = vst [vmem:[#allocation3 + $0x74] sm:$0xf] %v5387_v45  ;;  %v5251_v50 = vpack.c.bf16 %v5101_v5, %v5101_v5  ;;  %v5388_v6 = vpack.c.bf16 %v5199_v47, %v5199_v47  ;;  %v14003_v45 = vadd.f32 1.0, %v10576_v29  ;;  %v8961_v41 = vmul.f32 -1.442695, %v13999_v33  ;;  %v4259_v61 = vpop.f32.mrf.mxu0  ;;  %v14013_v11 = vpop.f32.mrf.mxu2  ;;  %vm16308_vm12 = vmmov %vm16301_vm9 }
 0x381   : > { %5354 = vst [vmem:[#allocation3 + $0x88] sm:$0xf] %v5320_v32  ;;  %v10578_v20 = vpop.eup %10577  ;;  %v4171_v46 = vadd.f32 %v4170_v30, %v13492_v53  ;;  %v4687_v19 = vmul.f32 %v13970_v48, %v4686_v17  ;;  %v4710_v55 = vand.u32 2147483648, %v13947_v23  ;;  %6161 = vmatmul.bf16.gmra.mxu2 %v9063_v14  ;;  %v9023_v53 = vor.u32 %v14001_v35, %v13987_v54  ;;  %v9028_v14 = vld [vmem:[#allocation3 + $0x24] sm:$0xf0] }
 0x382   : > { %5286 = vst [vmem:[#allocation3 + $0x84] sm:$0xf] %v5251_v50  ;;  %v4700_v32 = vmul.f32 %v10578_v20, %v13947_v23  ;;  %10579 = vrcp.f32 %v14003_v45  ;;  %v4316_v31 = vadd.f32 %v4258_v16, %v13342_v3  ;;  %vm4694_vm0 = vcmp.eq.f32.partialorder %v4693_v34, 8.507059e+37 }
 0x383   : > { %5422 = vst [vmem:[#allocation3 + $0x80] sm:$0xf] %v5388_v6  ;;  %10581 = vpow2.f32 %v8961_v41  ;;  %v4688_v30 = vadd.f32 %v13970_v48, %v4687_v19  ;;  %v4260_v24 = vadd.f32 %v4259_v61, %v4171_v46  ;;  %v4696_v57 = vor.u32 1.1754944e-38, %v4695_v42 }
 0x384   : > { %6230 = vmatmul.bf16.vlgmr.msrb.gmra.mxu3 %v9019_v49  ;;  %v4701_v49 = vsub.f32 1.0, %v4700_v32  ;;  %vm14022_vm11 = vcmp.eq.f32.partialorder %v4708_v63, 8.507059e+37  ;;  %vm4705_vm4 = vweird.f32 %v10578_v20  ;;  %v4352_v29 = vmul.f32 %v13912_v12, %v4316_v31 }
 0x385   : > { %v4692_v41 = vsel %vm4691_vm13, %v13970_v48, %v4688_v30  ;;  %v14028_v3 = vpop.f32.mrf.mxu1  ;;  %v4711_v16 = vor.u32 1.1754944e-38, %v4710_v55  ;;  %v4723_v5 = vand.u32 2147483647, %v14003_v45  ;;  %v4317_v34 = vadd.f32 %v4260_v24, %v13344_v51  ;;  %vm4706_vm6 = vmor %vm4704_vm14, %vm4705_vm4 }
 0x386   : > { %v4702_v54 = vmul.f32 %v10578_v20, %v4701_v49  ;;  %v4697_v46 = vsel %vm4694_vm0, %v4696_v57, %v4692_v41  ;;  %v4725_v35 = vand.u32 2147483648, %v14003_v45  ;;  %v14037_v48 = vadd.f32 %v13929_v60, %v4352_v29  ;;  %v16309_v41 = vld [vmem:[#allocation39_spill] sm:$0xff]  ;;  %v16311_v29 = vld [vmem:[#allocation38_spill] sm:$0xff]  ;;  %vm16313_vm13 = vmmov %vm16306_vm2 }
 0x387   : > { %v4173_v25 = vpop.f32.mrf.mxu3  ;;  %v5024_v47 = vmul.f32 %v4697_v46, %v13861_v38  ;;  %v4353_v51 = vmul.f32 %v13912_v12, %v4317_v34  ;;  %v16304_v38 = vor.u32 %v13968_v8, %v13977_v56  ;;  %v16305_v57 = vrot.slane %v13965_v27, 7  ;;  %vm16314_vm0 = vmmov %vm16308_vm12 }
 0x388   : > { %v14032_v42 = vpop.eup %10579  ;;  %v4703_v63 = vadd.f32 %v10578_v20, %v4702_v54  ;;  %v4262_v17 = vpop.f32.mrf.mxu0  ;;  %v4174_v61 = vadd.f32 %v4173_v25, %v13503_v39  ;;  %v8962_v24 = vmul.f32 -1.442695, %v14037_v48  ;;  %v16307_v56 = vrot.slane %v13965_v27, 1 }
 0x389   : > { %v10582_v50 = vpop.eup %10581  ;;  %v4715_v6 = vmul.f32 %v14032_v42, %v14003_v45  ;;  %vm4720_vm3 = vweird.f32 %v14032_v42  ;;  %6953 = vmatmul.bf16.vlgmr.msrb.gmra.mxu1 %v16304_v38  ;;  %v5056_v19 = vrot.slane %v5024_v47, 7  ;;  %v5154_v32 = vrot.slane %v5024_v47, 1  ;;  %v14074_v27 = vpop.f32.mrf.mxu2 }
 0x38a   : > { %v5321_v55 = vpack.c.bf16 %v5024_v47, %v5024_v47  ;;  %v4707_v30 = vsel %vm4706_vm6, %v10578_v20, %v4703_v63  ;;  %v14051_v31 = vadd.f32 1.0, %v10582_v50  ;;  %v14066_v25 = vadd.f32 %v13929_v60, %v4353_v51  ;;  %v10064_v51 = vld [vmem:[#allocation3 + $0x1c] sm:$0xf]  ;;  %vm16315_vm6 = vmmov %vm16306_vm2 }
 0x38b   : > { %v4712_v23 = vsel %vm14022_vm11, %v4711_v16, %v4707_v30  ;;  %v4716_v49 = vsub.f32 1.0, %v4715_v6  ;;  %v5100_v8 = vsel %vm16306_vm2, %v16305_v57, %v5056_v19  ;;  %v5198_v39 = vsel %vm16308_vm12, %v16307_v56, %v5154_v32 }
 0x38c   : > { %5355 = vst [vmem:[#allocation3 + $0x94] sm:$0xf] %v5321_v55  ;;  %v14063_v20 = vmul.f32 %v4712_v23, %v13888_v52  ;;  %vm16310_vm9 = vnez %v16309_v41  ;;  %vm16312_vm8 = vnez %v16311_v29  ;;  %10583 = vrcp.f32 %v14051_v31 }
 0x38d   : > { %v5121_v54 = vsel %vm16310_vm9, %v5100_v8, 0.0  ;;  %v5219_v46 = vsel %vm16312_vm8, %v5198_v39, 0.0  ;;  %v4717_v16 = vmul.f32 %v14032_v42, %v4716_v49  ;;  %6319 = vmatmul.bf16.vlgmr.msrb.gmra.mxu0 %v9023_v53  ;;  %v14078_v50 = vpop.f32.mrf.mxu1  ;;  %vm4719_vm5 = vweird.f32 %v14003_v45  ;;  %v10137_v53 = vld [vmem:[#allocation3 + $0x38] sm:$0xf0]  ;;  %v10077_v8 = vld [vmem:[#allocation3 + $0x80] sm:$0xf0] }
 0x38e   : > { %v5252_v34 = vpack.c.bf16 %v5121_v54, %v5121_v54  ;;  %v5389_v52 = vpack.c.bf16 %v5219_v46, %v5219_v46  ;;  %v5057_v47 = vrot.slane %v14063_v20, 7  ;;  %v5155_v63 = vrot.slane %v14063_v20, 1  ;;  %vm4721_vm14 = vmor %vm4719_vm5, %vm4720_vm3  ;;  %v9074_v54 = vld [vmem:[#allocation3 + $0x78] sm:$0xf] }
 0x38f   : > { %v4175_v6 = vpop.f32.mrf.mxu3  ;;  %v5322_v38 = vpack.c.bf16 %v14063_v20, %v14063_v20  ;;  %v4718_v55 = vadd.f32 %v14032_v42, %v4717_v16  ;;  %v9031_v30 = vor.u32 %v10064_v51, %v9028_v14  ;;  %v4726_v57 = vor.u32 1.1754944e-38, %v4725_v35  ;;  %v9314_v14 = vld [vmem:[#allocation3 + $0x30] sm:$0xf]  ;;  %vm16316_vm3 = vmmov %vm16314_vm0 }
 0x390   : > { %5287 = vst [vmem:[#allocation3 + $0x90] sm:$0xf] %v5252_v34  ;;  %v5099_v23 = vsel %vm16313_vm13, %v5056_v19, %v5057_v47  ;;  %v5197_v49 = vsel %vm16314_vm0, %v5154_v32, %v5155_v63  ;;  %10585 = vpow2.f32 %v8962_v24  ;;  %vm4724_vm11 = vcmp.eq.f32.partialorder %v4723_v5, 8.507059e+37  ;;  %v4264_v20 = vpop.f32.mrf.mxu0  ;;  %v10194_v24 = vld [vmem:[#allocation10 + $0x128] sm:$0xff]  ;;  %vm16322_vm13 = vmmov %vm16315_vm6 }
 0x391   : > { %5423 = vst [vmem:[#allocation3 + $0x8c] sm:$0xf] %v5389_v52  ;;  %v5253_v56 = vpack.c.bf16 %v5099_v23, %v5099_v23  ;;  %v5390_v39 = vpack.c.bf16 %v5197_v49, %v5197_v49  ;;  %v4722_v45 = vsel %vm4721_vm14, %v14032_v42, %v4718_v55  ;;  %v8963_v41 = vmul.f32 -1.442695, %v14066_v25  ;;  %7036 = vmatpush.bf16.msrb.mxu2 %v10194_v24 }
 0x392   : > { %5356 = vst [vmem:[#allocation3 + $0xa0] sm:$0xf] %v5322_v38  ;;  %v4727_v19 = vsel %vm4724_vm11, %v4726_v57, %v4722_v45  ;;  %v4263_v32 = vadd.f32 %v4262_v17, %v4174_v61  ;;  %v10584_v29 = vpop.eup %10583  ;;  %v9075_v46 = vor.u32 %v10077_v8, %v9074_v54  ;;  %v4176_v16 = vadd.f32 %v4175_v6, %v13519_v59  ;;  %v14118_v57 = vpop.f32.mrf.mxu2  ;;  %v10066_v8 = vld [vmem:[#allocation3 + $0x28] sm:$0xf0] }
 0x393   : > { %5288 = vst [vmem:[#allocation3 + $0x9c] sm:$0xf] %v5253_v56  ;;  %v14093_v35 = vmul.f32 %v4727_v19, %v13932_v0  ;;  %v9315_v42 = vor.u32 %v10137_v53, %v9314_v14  ;;  %v4730_v5 = vmul.f32 %v10584_v29, %v14051_v31  ;;  %v4738_v34 = vand.u32 2147483647, %v14051_v31  ;;  %v16317_v56 = vld [vmem:[#allocation42_spill] sm:$0xff]  ;;  %v16319_v45 = vld [vmem:[#allocation41_spill] sm:$0xff] }
 0x394   : > { %6235 = vmatmul.bf16.gmra.mxu3 %v9031_v30  ;;  %5424 = vst [vmem:[#allocation3 + $0x98] sm:$0xf] %v5390_v39  ;;  %10587 = vpow2.f32 %v8963_v41  ;;  %v4318_v52 = vadd.f32 %v4263_v32, %v13352_v58  ;;  %v4265_v51 = vadd.f32 %v4264_v20, %v4176_v16  ;;  %vm4735_vm4 = vweird.f32 %v10584_v29  ;;  %6166 = vmatmul.bf16.gmra.mxu2 %v9075_v46  ;;  %v9034_v32 = vld [vmem:[#allocation3 + $0x20] sm:$0xf] }
 0x395   : > { %v5058_v17 = vrot.slane %v14093_v35, 7  ;;  %v5156_v61 = vrot.slane %v14093_v35, 1  ;;  %v5323_v0 = vpack.c.bf16 %v14093_v35, %v14093_v35  ;;  %v4731_v59 = vsub.f32 1.0, %v4730_v5  ;;  %v14105_v53 = vpop.f32.mrf.mxu1  ;;  %v9040_v5 = vld [vmem:[#allocation3 + $0x3c] sm:$0xf0] }
 0x396   : > { %v10586_v38 = vpop.eup %10585  ;;  %v4740_v6 = vand.u32 2147483648, %v14051_v31  ;;  %v4354_v55 = vmul.f32 %v13912_v12, %v4318_v52  ;;  %v4319_v49 = vadd.f32 %v4265_v51, %v13356_v13  ;;  %vm16318_vm2 = vnez %v16317_v56 }
 0x397   : > { %v5098_v58 = vsel %vm16315_vm6, %v5057_v47, %v5058_v17  ;;  %v5196_v30 = vsel %vm16316_vm3, %v5155_v63, %v5156_v61  ;;  %5357 = vst [vmem:[#allocation3 + $0xac] sm:$0xf] %v5323_v0  ;;  %v14115_v23 = vadd.f32 1.0, %v10586_v38  ;;  %vm16320_vm12 = vnez %v16319_v45  ;;  %v4178_v19 = vpop.f32.mrf.mxu3  ;;  %v14135_v38 = vld [vmem:[#allocation3 + $0x40] sm:$0xf0] }
 0x398   : > { %v5123_v39 = vsel %vm16318_vm2, %v5098_v58, 0.0  ;;  %v5221_v20 = vsel %vm16320_vm12, %v5196_v30, 0.0  ;;  %v4732_v47 = vmul.f32 %v10584_v29, %v4731_v59  ;;  %v14125_v14 = vadd.f32 %v13929_v60, %v4354_v55  ;;  %v4267_v13 = vpop.f32.mrf.mxu0  ;;  %v10067_v58 = vld [vmem:[#allocation3 + $0x34] sm:$0xf] }
 0x399   : > { %v5254_v63 = vpack.c.bf16 %v5123_v39, %v5123_v39  ;;  %v5391_v41 = vpack.c.bf16 %v5221_v20, %v5221_v20  ;;  %10589 = vrcp.f32 %v14115_v23  ;;  %6958 = vmatmul.bf16.gmra.mxu1 %v9315_v42  ;;  %vm4734_vm9 = vweird.f32 %v14051_v31  ;;  %v14137_v31 = vld [vmem:[#allocation3 + $0x50] sm:$0xf0] }
 0x39a   : > { %v10588_v54 = vpop.eup %10587  ;;  %v4733_v24 = vadd.f32 %v10584_v29, %v4732_v47  ;;  %v8964_v46 = vmul.f32 -1.442695, %v14125_v14  ;;  %v9035_v16 = vor.u32 %v10066_v8, %v9034_v32  ;;  %vm4736_vm8 = vmor %vm4734_vm9, %vm4735_vm4  ;;  %v4741_v52 = vor.u32 1.1754944e-38, %v4740_v6  ;;  %v10080_v8 = vld [vmem:[#allocation3 + $0x98] sm:$0xf0] }
 0x39b   : > { %5289 = vst [vmem:[#allocation3 + $0xa8] sm:$0xf] %v5254_v63  ;;  %v14131_v0 = vadd.f32 1.0, %v10588_v54  ;;  %v4355_v51 = vmul.f32 %v13912_v12, %v4319_v49  ;;  %v4179_v42 = vadd.f32 %v4178_v19, %v13561_v10  ;;  %vm4739_vm5 = vcmp.eq.f32.partialorder %v4738_v34, 8.507059e+37  ;;  %v14150_v34 = vld [vmem:[#allocation3 + $0x38] sm:$0xf] }
 0x39c   : > { %5425 = vst [vmem:[#allocation3 + $0xa4] sm:$0xf] %v5391_v41  ;;  %v4737_v59 = vsel %vm4736_vm8, %v10584_v29, %v4733_v24  ;;  %10591 = vpow2.f32 %v8964_v46  ;;  %v14148_v29 = vld [vmem:[#allocation3 + $0x48] sm:$0xf]  ;;  %v9043_v45 = vor.u32 %v10067_v58, %v9040_v5  ;;  %v9086_v41 = vld [vmem:[#allocation3 + $0x90] sm:$0xf]  ;;  %vm4749_vm11 = vweird.f32 %v14115_v23 }
 0x39d   : > { %v4742_v55 = vsel %vm4739_vm5, %v4741_v52, %v4737_v59  ;;  %10593 = vrcp.f32 %v14131_v0  ;;  %6324 = vmatmul.bf16.gmra.mxu0 %v9035_v16  ;;  %v14144_v30 = vadd.f32 %v13929_v60, %v4355_v51  ;;  %v14146_v10 = vpop.f32.mrf.mxu1  ;;  %v4268_v49 = vadd.f32 %v4267_v13, %v4179_v42  ;;  %v14164_v32 = vld [vmem:[#allocation3 + $0x54] sm:$0xf0]  ;;  %v14169_v52 = vpop.f32.mrf.mxu2  ;;  %v14184_v58 = vld [vmem:[#allocation3 + $0x58] sm:$0xf0]  ;;  %vm16327_vm5 = vmmov %vm16322_vm13 }
 0x39e   : > { %v14141_v6 = vmul.f32 %v4742_v55, %v13999_v33  ;;  %16321 = vst [vmem:[#allocation74_spill] sm:$0xff] %v14146_v10  ;;  %v9327_v39 = vor.u32 %v14137_v31, %v14148_v29  ;;  %v9047_v33 = vor.u32 %v14135_v38, %v14150_v34  ;;  %v4753_v54 = vand.u32 2147483647, %v14115_v23  ;;  %v10193_v38 = vld [vmem:[#allocation10 + $0x120] sm:$0xff] }
 0x39f   : > { %v14152_v56 = vpop.eup %10589  ;;  %v4180_v13 = vpop.f32.mrf.mxu3  ;;  %v4755_v24 = vand.u32 2147483648, %v14115_v23  ;;  %v8965_v46 = vmul.f32 -1.442695, %v14144_v30  ;;  %v9087_v16 = vor.u32 %v10080_v8, %v9086_v41  ;;  %v4320_v55 = vadd.f32 %v4268_v49, %v13363_v21  ;;  %7037 = vmatpush.bf16.msrb.mxu2 %v10193_v38 }
 0x3a0   : > { %v15814_v20 = vrot.slane %v14141_v6, 7  ;;  %v15813_v47 = vrot.slane %v14141_v6, 1  ;;  %v5324_v19 = vpack.c.bf16 %v14141_v6, %v14141_v6  ;;  %v4745_v63 = vmul.f32 %v14152_v56, %v14115_v23  ;;  %v4269_v5 = vpop.f32.mrf.mxu0 }
 0x3a1   : > { %10595 = vpow2.f32 %v8965_v46  ;;  %vm4750_vm14 = vweird.f32 %v14152_v56  ;;  %v4768_v21 = vand.u32 2147483647, %v14131_v0  ;;  %vm4754_vm6 = vcmp.eq.f32.partialorder %v4753_v54, 8.507059e+37  ;;  %v14217_v46 = vld [vmem:[#allocation3 + $0x60] sm:$0xf] }
 0x3a2   : > { %v10592_v51 = vpop.eup %10591  ;;  %v5097_v42 = vsel %vm16322_vm13, %v5058_v17, %v15814_v20  ;;  %v5195_v59 = vsel %vm16314_vm0, %v5156_v61, %v15813_v47  ;;  %5358 = vst [vmem:[#allocation3 + $0xb8] sm:$0xf] %v5324_v19  ;;  %v4746_v31 = vsub.f32 1.0, %v4745_v63  ;;  %v4356_v61 = vmul.f32 %v13912_v12, %v4320_v55  ;;  %v14192_v19 = vld [vmem:[#allocation3 + $0x4c] sm:$0xf]  ;;  %vm4751_vm4 = vmor %vm4749_vm11, %vm4750_vm14 }
 0x3a3   : > { %v10594_v8 = vpop.eup %10593  ;;  %v5255_v29 = vpack.c.bf16 %v5097_v42, %v5097_v42  ;;  %v14186_v41 = vadd.f32 1.0, %v10592_v51  ;;  %v14194_v63 = vld [vmem:[#allocation3 + $0x50] sm:$0xf]  ;;  %v14209_v55 = vld [vmem:[#allocation3 + $0x68] sm:$0xf0]  ;;  %vm4764_vm2 = vweird.f32 %v14131_v0  ;;  %vm14220_vm12 = vcmp.eq.f32.partialorder %v4768_v21, 8.507059e+37  ;;  %vm16329_vm13 = vmmov %vm16314_vm0 }
 0x3a4   : > { %6240 = vmatmul.bf16.gmra.mxu3 %v9043_v45  ;;  %v5392_v45 = vpack.c.bf16 %v5195_v59, %v5195_v59  ;;  %v4747_v17 = vmul.f32 %v14152_v56, %v4746_v31  ;;  %v4760_v35 = vmul.f32 %v10594_v8, %v14131_v0  ;;  %v14205_v59 = vadd.f32 %v13929_v60, %v4356_v61 }
 0x3a5   : > { %5290 = vst [vmem:[#allocation3 + $0xb4] sm:$0xf] %v5255_v29  ;;  %10597 = vrcp.f32 %v14186_v41  ;;  %6171 = vmatmul.bf16.gmra.mxu2 %v9087_v16  ;;  %v14207_v31 = vpop.f32.mrf.mxu1  ;;  %v4756_v29 = vor.u32 1.1754944e-38, %v4755_v24  ;;  %vm4765_vm3 = vweird.f32 %v10594_v8  ;;  %vm4779_vm8 = vweird.f32 %v14186_v41 }
 0x3a6   : > { %5426 = vst [vmem:[#allocation3 + $0xb0] sm:$0xf] %v5392_v45  ;;  %v4748_v51 = vadd.f32 %v14152_v56, %v4747_v17  ;;  %v4761_v42 = vsub.f32 1.0, %v4760_v35  ;;  %v4770_v45 = vand.u32 2147483648, %v14131_v0  ;;  %v4181_v17 = vadd.f32 %v4180_v13, %v13598_v4  ;;  %vm4766_vm9 = vmor %vm4764_vm2, %vm4765_vm3 }
 0x3a7   : > { %16323 = vst [vmem:[#allocation82_spill] sm:$0xff] %v14207_v31  ;;  %v8966_v61 = vmul.f32 -1.442695, %v14205_v59  ;;  %v4183_v16 = vpop.f32.mrf.mxu3  ;;  %v10596_v49 = vpop.eup %10595  ;;  %v4783_v21 = vand.u32 2147483647, %v14186_v41  ;;  %v4785_v54 = vand.u32 2147483648, %v14186_v41 }
 0x3a8   : > { %v4752_v23 = vsel %vm4751_vm4, %v14152_v56, %v4748_v51  ;;  %v4762_v35 = vmul.f32 %v10594_v8, %v4761_v42  ;;  %v4272_v24 = vpop.f32.mrf.mxu0  ;;  %v14227_v51 = vadd.f32 1.0, %v10596_v49  ;;  %v4771_v0 = vor.u32 1.1754944e-38, %v4770_v45  ;;  %vm16336_vm4 = vmmov %vm16327_vm5 }
 0x3a9   : > { %v4757_v47 = vsel %vm4754_vm6, %v4756_v29, %v4752_v23  ;;  %6963 = vmatmul.bf16.gmra.mxu1 %v9327_v39  ;;  %10599 = vpow2.f32 %v8966_v61  ;;  %v4270_v39 = vadd.f32 %v4269_v5, %v4181_v17  ;;  %v14234_v29 = vpop.f32.mrf.mxu2  ;;  %v4184_v5 = vadd.f32 %v4183_v16, %v13642_v7  ;;  %v16331_v7 = vld [vmem:[#allocation48_spill] sm:$0xff]  ;;  %v16333_v16 = vld [vmem:[#allocation47_spill] sm:$0xff]  ;;  %vm16337_vm6 = vmmov %vm16329_vm13 }
 0x3aa   : > { %v5028_v56 = vmul.f32 %v4757_v47, %v14037_v48  ;;  %v4763_v13 = vadd.f32 %v10594_v8, %v4762_v35  ;;  %10601 = vrcp.f32 %v14227_v51  ;;  %v16326_v45 = vrot.slane %v14141_v6, 7 }
 0x3ab   : > { %v14229_v42 = vpop.eup %10597  ;;  %vm16332_vm0 = vnez %v16331_v7  ;;  %vm16334_vm14 = vnez %v16333_v16  ;;  %v14275_v7 = vld [vmem:[#allocation3 + $0x6c] sm:$0xf0]  ;;  %vm4784_vm2 = vcmp.eq.f32.partialorder %v4783_v21, 8.507059e+37 }
 0x3ac   : > { %v5060_v23 = vrot.slane %v5028_v56, 7  ;;  %v5158_v4 = vrot.slane %v5028_v56, 1  ;;  %v5325_v20 = vpack.c.bf16 %v5028_v56, %v5028_v56  ;;  %v4767_v48 = vsel %vm4766_vm9, %v10594_v8, %v4763_v13 }
 0x3ad   : > { %v4772_v47 = vsel %vm14220_vm12, %v4771_v0, %v4767_v48  ;;  %v4775_v49 = vmul.f32 %v14229_v42, %v14186_v41  ;;  %6329 = vmatmul.bf16.gmra.mxu0 %v9047_v33  ;;  %v16328_v8 = vrot.slane %v14141_v6, 1  ;;  %v14257_v34 = vpop.f32.mrf.mxu1  ;;  %v4321_v6 = vadd.f32 %v4270_v39, %v13367_v26  ;;  %v14273_v39 = vld [vmem:[#allocation3 + $0x64] sm:$0xf] }
 0x3ae   : > { %v5096_v17 = vsel %vm16327_vm5, %v16326_v45, %v5060_v23  ;;  %5359 = vst [vmem:[#allocation3 + $0xc4] sm:$0xf] %v5325_v20  ;;  %v14254_v61 = vmul.f32 %v4772_v47, %v14066_v25  ;;  %vm4780_vm11 = vweird.f32 %v14229_v42  ;;  %v16335_v26 = vor.u32 %v14192_v19, %v14164_v32  ;;  %vm16342_vm5 = vmmov %vm16336_vm4 }
 0x3af   : > { %v5194_v35 = vsel %vm16329_vm13, %v16328_v8, %v5158_v4  ;;  %16330 = vst [vmem:[#allocation46_spill] sm:$0xff] %v14257_v34  ;;  %v5125_v33 = vsel %vm16332_vm0, %v5096_v17, 0.0  ;;  %v4776_v13 = vsub.f32 1.0, %v4775_v49  ;;  %v10600_v0 = vpop.eup %10599  ;;  %v4185_v45 = vpop.f32.mrf.mxu3  ;;  %vm4781_vm3 = vmor %vm4779_vm8, %vm4780_vm11  ;;  %vm4794_vm12 = vweird.f32 %v14227_v51 }
 0x3b0   : > { %v5223_v56 = vsel %vm16334_vm14, %v5194_v35, 0.0  ;;  %v5256_v48 = vpack.c.bf16 %v5125_v33, %v5125_v33  ;;  %v5061_v25 = vrot.slane %v14254_v61, 7  ;;  %v15815_v47 = vrot.slane %v14254_v61, 1  ;;  %v4274_v49 = vpop.f32.mrf.mxu0  ;;  %v10602_v32 = vpop.eup %10601  ;;  %vm16344_vm13 = vmmov %vm16337_vm6 }
 0x3b1   : > { %v5393_v20 = vpack.c.bf16 %v5223_v56, %v5223_v56  ;;  %v5326_v8 = vpack.c.bf16 %v14254_v61, %v14254_v61  ;;  %v4777_v17 = vmul.f32 %v14229_v42, %v4776_v13  ;;  %v4273_v35 = vadd.f32 %v4272_v24, %v4184_v5 }
 0x3b2   : > { %5291 = vst [vmem:[#allocation3 + $0xc0] sm:$0xf] %v5256_v48  ;;  %v5095_v38 = vsel %vm16336_vm4, %v5060_v23, %v5061_v25  ;;  %v5193_v24 = vsel %vm16337_vm6, %v5158_v4, %v15815_v47  ;;  %v4798_v5 = vand.u32 2147483647, %v14227_v51  ;;  %v14286_v33 = vadd.f32 1.0, %v10600_v0 }
 0x3b3   : > { %5427 = vst [vmem:[#allocation3 + $0xbc] sm:$0xf] %v5393_v20  ;;  %v5257_v19 = vpack.c.bf16 %v5095_v38, %v5095_v38  ;;  %v5394_v16 = vpack.c.bf16 %v5193_v24, %v5193_v24  ;;  %v4778_v56 = vadd.f32 %v14229_v42, %v4777_v17  ;;  %v4800_v13 = vand.u32 2147483648, %v14227_v51  ;;  %v10083_v48 = vld [vmem:[#allocation3 + $0xb0] sm:$0xf0] }
 0x3b4   : > { %6245 = vmatmul.bf16.gmra.mxu3 %v16335_v26  ;;  %5360 = vst [vmem:[#allocation3 + $0xd0] sm:$0xf] %v5326_v8  ;;  %v4786_v4 = vor.u32 1.1754944e-38, %v4785_v54  ;;  %v4790_v23 = vmul.f32 %v10602_v32, %v14227_v51  ;;  %10603 = vrcp.f32 %v14286_v33  ;;  %v9067_v0 = vor.u32 %v14273_v39, %v14275_v7  ;;  %v9098_v17 = vld [vmem:[#allocation3 + $0xa8] sm:$0xf]  ;;  %v14301_v26 = vpop.f32.mrf.mxu2 }
 0x3b5   : > { %5292 = vst [vmem:[#allocation3 + $0xcc] sm:$0xf] %v5257_v19  ;;  %v4782_v20 = vsel %vm4781_vm3, %v14229_v42, %v4778_v56  ;;  %v4357_v8 = vmul.f32 %v13912_v12, %v4321_v6  ;;  %v4322_v38 = vadd.f32 %v4273_v35, %v13376_v28  ;;  %v9099_v24 = vor.u32 %v10083_v48, %v9098_v17  ;;  %v14304_v47 = vpop.f32.mrf.mxu1 }
 0x3b6   : > { %5428 = vst [vmem:[#allocation3 + $0xc8] sm:$0xf] %v5394_v16  ;;  %v4787_v41 = vsel %vm4784_vm2, %v4786_v4, %v4782_v20  ;;  %v4791_v54 = vsub.f32 1.0, %v4790_v23  ;;  %vm14309_vm9 = vcmp.eq.f32.partialorder %v4798_v5, 8.507059e+37  ;;  %v4801_v21 = vor.u32 1.1754944e-38, %v4800_v13  ;;  %vm16353_vm2 = vmmov %vm16342_vm5 }
 0x3b7   : > { %16338 = vst [vmem:[#allocation34_spill] sm:$0xff] %v14304_v47  ;;  %v14307_v19 = vmul.f32 %v4787_v41, %v14125_v14  ;;  %v14314_v6 = vadd.f32 %v13929_v60, %v4357_v8  ;;  %vm4795_vm8 = vweird.f32 %v10602_v32  ;;  %v4358_v16 = vmul.f32 %v13912_v12, %v4322_v38  ;;  %6176 = vmatmul.bf16.gmra.mxu2 %v9099_v24  ;;  %v4188_v35 = vpop.f32.mrf.mxu3 }
 0x3b8   : > { %v4792_v56 = vmul.f32 %v10602_v32, %v4791_v54  ;;  %v4186_v28 = vadd.f32 %v4185_v45, %v13693_v40  ;;  %v16341_v4 = vor.u32 %v14209_v55, %v14217_v46  ;;  %v4277_v23 = vpop.f32.mrf.mxu0  ;;  %v4813_v17 = vand.u32 2147483647, %v14286_v33  ;;  %vm4796_vm0 = vmor %vm4794_vm12, %vm4795_vm8 }
 0x3b9   : > { %v5062_v48 = vrot.slane %v14307_v19, 7  ;;  %v5160_v14 = vrot.slane %v14307_v19, 1  ;;  %v5327_v5 = vpack.c.bf16 %v14307_v19, %v14307_v19  ;;  %v8967_v13 = vmul.f32 -1.442695, %v14314_v6  ;;  %v16347_v19 = vld [vmem:[#allocation51_spill] sm:$0xff]  ;;  %vm16354_vm12 = vmmov %vm16344_vm13 }
 0x3ba   : > { %6968 = vmatmul.bf16.gmra.mxu1 %v16341_v4  ;;  %v10604_v20 = vpop.eup %10603  ;;  %v4793_v8 = vadd.f32 %v10602_v32, %v4792_v56  ;;  %v14328_v40 = vadd.f32 %v13929_v60, %v4358_v16  ;;  %v4275_v45 = vadd.f32 %v4274_v49, %v4186_v28  ;;  %v16343_v54 = vrot.slane %v14254_v61, 1  ;;  %v16345_v49 = vld [vmem:[#allocation52_spill] sm:$0xff]  ;;  %vm16356_vm8 = vmmov %vm16353_vm2 }
 0x3bb   : > { %v5094_v41 = vsel %vm16342_vm5, %v5061_v25, %v5062_v48  ;;  %5361 = vst [vmem:[#allocation3 + $0xdc] sm:$0xf] %v5327_v5  ;;  %v4805_v55 = vmul.f32 %v10604_v20, %v14286_v33  ;;  %v4189_v38 = vadd.f32 %v4188_v35, %v13769_v22  ;;  %vm16346_vm14 = vnez %v16345_v49  ;;  %v9110_v7 = vld [vmem:[#allocation3 + $0xc0] sm:$0xf]  ;;  %vm16357_vm5 = vmmov %vm16354_vm12 }
 0x3bc   : > { %v5192_v46 = vsel %vm16344_vm13, %v16343_v54, %v5160_v14  ;;  %v5127_v24 = vsel %vm16346_vm14, %v5094_v41, 0.0  ;;  %vm16348_vm11 = vnez %v16347_v19  ;;  %v4797_v56 = vsel %vm4796_vm0, %v10602_v32, %v4793_v8  ;;  %v14361_v42 = vpop.f32.mrf.mxu2  ;;  %v16358_v41 = vld [vmem:[#allocation49_spill] sm:$0xff] }
 0x3bd   : > { %v5225_v25 = vsel %vm16348_vm11, %v5192_v46, 0.0  ;;  %10605 = vpow2.f32 %v8967_v13  ;;  %v5258_v61 = vpack.c.bf16 %v5127_v24, %v5127_v24  ;;  %v4802_v28 = vsel %vm14309_vm9, %v4801_v21, %v4797_v56  ;;  %v14358_v13 = vpop.f32.mrf.mxu1 }
 0x3be   : > { %v5395_v16 = vpack.c.bf16 %v5225_v25, %v5225_v25  ;;  %v4806_v5 = vsub.f32 1.0, %v4805_v55  ;;  %v16349_v51 = vor.u32 %v14184_v58, %v14194_v63  ;;  %v14353_v22 = vmul.f32 %v4802_v28, %v14144_v30  ;;  %16350 = vst [vmem:[#allocation33_spill] sm:$0xff] %v14358_v13 }
 0x3bf   : > { %v4815_v35 = vand.u32 2147483648, %v14286_v33  ;;  %v8968_v4 = vmul.f32 -1.442695, %v14328_v40  ;;  %v4323_v32 = vadd.f32 %v4275_v45, %v13380_v9  ;;  %5293 = vst [vmem:[#allocation3 + $0xd8] sm:$0xf] %v5258_v61  ;;  %vm4809_vm4 = vweird.f32 %v14286_v33  ;;  %v4190_v9 = vpop.f32.mrf.mxu3 }
 0x3c0   : > { %6334 = vmatmul.bf16.gmra.mxu0 %v16349_v51  ;;  %v4807_v8 = vmul.f32 %v10604_v20, %v4806_v5  ;;  %vm4810_vm6 = vweird.f32 %v10604_v20  ;;  %v4278_v58 = vadd.f32 %v4277_v23, %v4189_v38  ;;  %5429 = vst [vmem:[#allocation3 + $0xd4] sm:$0xf] %v5395_v16  ;;  %v5063_v30 = vrot.slane %v14353_v22, 7  ;;  %v10086_v23 = vld [vmem:[#allocation3 + $0xc8] sm:$0xf0]  ;;  %v4279_v55 = vpop.f32.mrf.mxu0 }
 0x3c1   : > { %v5161_v63 = vrot.slane %v14353_v22, 1  ;;  %v5328_v21 = vpack.c.bf16 %v14353_v22, %v14353_v22  ;;  %10607 = vpow2.f32 %v8968_v4  ;;  %vm14367_vm3 = vcmp.eq.f32.partialorder %v4813_v17, 8.507059e+37  ;;  %vm4811_vm9 = vmor %vm4809_vm4, %vm4810_vm6  ;;  %v10146_v33 = vld [vmem:[#allocation3 + $0x80] sm:$0xf0]  ;;  %v9350_v22 = vld [vmem:[#allocation3 + $0x78] sm:$0xf] }
 0x3c2   : > { %v4808_v45 = vadd.f32 %v10604_v20, %v4807_v8  ;;  %v4359_v54 = vmul.f32 %v13912_v12, %v4323_v32  ;;  %v4324_v46 = vadd.f32 %v4278_v58, %v13389_v37  ;;  %v5093_v49 = vsel %vm16353_vm2, %v5062_v48, %v5063_v30 }
 0x3c3   : > { %v10606_v38 = vpop.eup %10605  ;;  %v5191_v17 = vsel %vm16354_vm12, %v5160_v14, %v5161_v63  ;;  %5362 = vst [vmem:[#allocation3 + $0xe8] sm:$0xf] %v5328_v21  ;;  %v4816_v24 = vor.u32 1.1754944e-38, %v4815_v35  ;;  %v4191_v37 = vadd.f32 %v4190_v9, %v13844_v18  ;;  %v5259_v19 = vpack.c.bf16 %v5093_v49, %v5093_v49 }
 0x3c4   : > { %6250 = vmatmul.bf16.gmra.mxu3 %v9067_v0  ;;  %v5396_v25 = vpack.c.bf16 %v5191_v17, %v5191_v17  ;;  %v4812_v56 = vsel %vm4811_vm9, %v10604_v20, %v4808_v45  ;;  %v14384_v39 = vadd.f32 1.0, %v10606_v38  ;;  %v14389_v48 = vadd.f32 %v13929_v60, %v4359_v54  ;;  %v14417_v45 = vpop.f32.mrf.mxu2  ;;  %v16361_v38 = vld [vmem:[#allocation56_spill] sm:$0xff] }
 0x3c5   : > { %v4817_v0 = vsel %vm14367_vm3, %v4816_v24, %v4812_v56  ;;  %v4360_v14 = vmul.f32 %v13912_v12, %v4324_v46  ;;  %v9111_v61 = vor.u32 %v10086_v23, %v9110_v7  ;;  %5294 = vst [vmem:[#allocation3 + $0xe4] sm:$0xf] %v5259_v19  ;;  %v14400_v5 = vpop.f32.mrf.mxu1  ;;  %v4280_v51 = vadd.f32 %v4279_v55, %v4191_v37  ;;  %v9076_v46 = vld [vmem:[#allocation3 + $0x84] sm:$0xf0]  ;;  %v16359_v23 = vld [vmem:[#allocation58_spill] sm:$0xff] }
 0x3c6   : > { %v14393_v16 = vmul.f32 %v4817_v0, %v14205_v59  ;;  %10609 = vrcp.f32 %v14384_v39  ;;  %5430 = vst [vmem:[#allocation3 + $0xe0] sm:$0xf] %v5396_v25  ;;  %v8969_v20 = vmul.f32 -1.442695, %v14389_v48  ;;  %v9351_v4 = vor.u32 %v10146_v33, %v9350_v22  ;;  %v9070_v17 = vld [vmem:[#allocation3 + $0x68] sm:$0xf] }
 0x3c7   : > { %v10608_v18 = vpop.eup %10607  ;;  %v14398_v28 = vadd.f32 %v13929_v60, %v4360_v14  ;;  %16355 = vst [vmem:[#allocation83_spill] sm:$0xff] %v14400_v5  ;;  %6181 = vmatmul.bf16.gmra.mxu2 %v9111_v61  ;;  %v10075_v60 = vld [vmem:[#allocation3 + $0x70] sm:$0xf0]  ;;  %v4193_v58 = vpop.f32.mrf.mxu3  ;;  %v4325_v54 = vadd.f32 %v4280_v51, %v16358_v41  ;;  %vm16360_vm13 = vnez %v16359_v23  ;;  %vm16362_vm0 = vnez %v16361_v38  ;;  %v10076_v24 = vld [vmem:[#allocation3 + $0x7c] sm:$0xf] }
 0x3c8   : > { %v15817_v12 = vrot.slane %v14393_v16, 7  ;;  %v15816_v35 = vrot.slane %v14393_v16, 1  ;;  %v5329_v59 = vpack.c.bf16 %v14393_v16, %v14393_v16  ;;  %v14406_v32 = vadd.f32 1.0, %v10608_v18  ;;  %v14427_v56 = vld [vmem:[#allocation3 + $0x98] sm:$0xf0] }
 0x3c9   : > { %10611 = vpow2.f32 %v8969_v20  ;;  %v8970_v8 = vmul.f32 -1.442695, %v14398_v28  ;;  %v9071_v25 = vor.u32 %v10075_v60, %v9070_v17  ;;  %v14429_v7 = vld [vmem:[#allocation3 + $0x80] sm:$0xf]  ;;  %v14431_v0 = vld [vmem:[#allocation3 + $0x88] sm:$0xf0]  ;;  %v9079_v20 = vor.u32 %v10076_v24, %v9076_v46 }
 0x3ca   : > { %v5092_v21 = vsel %vm16356_vm8, %v5063_v30, %v15817_v12  ;;  %v5190_v9 = vsel %vm16357_vm5, %v5161_v63, %v15816_v35  ;;  %5363 = vst [vmem:[#allocation3 + $0xf4] sm:$0xf] %v5329_v59  ;;  %6973 = vmatmul.bf16.gmra.mxu1 %v9351_v4  ;;  %10613 = vrcp.f32 %v14406_v32  ;;  %v4282_v30 = vpop.f32.mrf.mxu0  ;;  %v14433_v14 = vld [vmem:[#allocation3 + $0x94] sm:$0xf]  ;;  %v14435_v61 = vld [vmem:[#allocation3 + $0x9c] sm:$0xf0]  ;;  %vm4824_vm14 = vweird.f32 %v14384_v39 }
 0x3cb   : > { %v5129_v55 = vsel %vm16360_vm13, %v5092_v21, 0.0  ;;  %v5227_v49 = vsel %vm16362_vm0, %v5190_v9, 0.0  ;;  %10615 = vpow2.f32 %v8970_v8  ;;  %v14439_v18 = vld [vmem:[#allocation3 + $0x90] sm:$0xf]  ;;  %v14441_v51 = vld [vmem:[#allocation3 + $0xb0] sm:$0xf0]  ;;  %v4194_v8 = vadd.f32 %v4193_v58, %v13895_v36 }
 0x3cc   : > { %v14425_v37 = vpop.eup %10609  ;;  %v5260_v63 = vpack.c.bf16 %v5129_v55, %v5129_v55  ;;  %v5397_v19 = vpack.c.bf16 %v5227_v49, %v5227_v49  ;;  %v14443_v22 = vld [vmem:[#allocation3 + $0xa0] sm:$0xf0]  ;;  %v4828_v59 = vand.u32 2147483647, %v14384_v39  ;;  %v4830_v4 = vand.u32 2147483648, %v14384_v39  ;;  %v10192_v17 = vld [vmem:[#allocation10 + $0x118] sm:$0xff] }
 0x3cd   : > { %v4820_v33 = vmul.f32 %v14425_v37, %v14384_v39  ;;  %v14450_v60 = vld [vmem:[%s15705_s4] ss:$0 sm:$0xff]  ;;  %v14454_v46 = vpop.f32.mrf.mxu1  ;;  %v14462_v49 = vld [vmem:[#allocation3 + $0x98] sm:$0xf]  ;;  %v4283_v24 = vadd.f32 %v4282_v30, %v4194_v8  ;;  %vm4825_vm11 = vweird.f32 %v14425_v37  ;;  %7038 = vmatpush.bf16.msrb.mxu2 %v10192_v17  ;;  %v4843_v23 = vand.u32 2147483647, %v14406_v32 }
 0x3ce   : > { %5295 = vst [vmem:[#allocation3 + $0xf0] sm:$0xf] %v5260_v63  ;;  %v4361_v21 = vmul.f32 %v14450_v60, %v4325_v54  ;;  %v14469_v36 = vld [vmem:[%s15706_s5] ss:$0 sm:$0xff]  ;;  %v14474_v63 = vld [vmem:[#allocation3 + $0xa8] sm:$0xf]  ;;  %vm4826_vm6 = vmor %vm4824_vm14, %vm4825_vm11  ;;  %vm4839_vm2 = vweird.f32 %v14406_v32 }
 0x3cf   : > { %v10612_v9 = vpop.eup %10611  ;;  %5431 = vst [vmem:[#allocation3 + $0xec] sm:$0xf] %v5397_v19  ;;  %v4821_v41 = vsub.f32 1.0, %v4820_v33  ;;  %v4195_v38 = vpop.f32.mrf.mxu3  ;;  %vm14483_vm4 = vcmp.eq.f32.partialorder %v4828_v59, 8.507059e+37  ;;  %v4831_v30 = vor.u32 1.1754944e-38, %v4830_v4  ;;  %v4845_v59 = vand.u32 2147483648, %v14406_v32 }
 0x3d0   : > { %6339 = vmatmul.bf16.gmra.mxu0 %v9071_v25  ;;  %16363 = vst [vmem:[#allocation45_spill] sm:$0xff] %v14454_v46  ;;  %v14464_v54 = vadd.f32 1.0, %v10612_v9  ;;  %v14472_v58 = vadd.f32 %v14469_v36, %v4361_v21  ;;  %v10614_v25 = vpop.eup %10613  ;;  %v10089_v9 = vld [vmem:[#allocation3 + $0xe0] sm:$0xf0]  ;;  %v14489_v19 = vpop.f32.mrf.mxu2  ;;  %vm14512_vm12 = vcmp.eq.f32.partialorder %v4843_v23, 8.507059e+37  ;;  %v4196_v21 = vadd.f32 %v4195_v38, %v13949_v15 }
 0x3d1   : > { %v4822_v33 = vmul.f32 %v14425_v37, %v4821_v41  ;;  %v4835_v8 = vmul.f32 %v10614_v25, %v14406_v32  ;;  %v9122_v41 = vld [vmem:[#allocation3 + $0xd8] sm:$0xf]  ;;  %v10616_v35 = vpop.eup %10615  ;;  %vm4840_vm3 = vweird.f32 %v10614_v25  ;;  %v16372_v15 = vor.u32 %v14427_v56, %v14439_v18 }
 0x3d2   : > { %10617 = vrcp.f32 %v14464_v54  ;;  %v8971_v55 = vmul.f32 -1.442695, %v14472_v58  ;;  %v14495_v46 = vpop.f32.mrf.mxu0  ;;  %v14501_v17 = vadd.f32 1.0, %v10616_v35  ;;  %v9123_v13 = vor.u32 %v10089_v9, %v9122_v41  ;;  %vm4841_vm8 = vmor %vm4839_vm2, %vm4840_vm3 }
 0x3d3   : > { %v4823_v12 = vadd.f32 %v14425_v37, %v4822_v33  ;;  %v4836_v4 = vsub.f32 1.0, %v4835_v8  ;;  %v4858_v47 = vand.u32 2147483647, %v14464_v54  ;;  %v4860_v10 = vand.u32 2147483648, %v14464_v54 }
 0x3d4   : > { %6255 = vmatmul.bf16.gmra.mxu3 %v9079_v20  ;;  %v16366_v20 = vld [vmem:[#allocation59_spill] sm:$0xff]  ;;  %10619 = vpow2.f32 %v8971_v55  ;;  %vm4854_vm9 = vweird.f32 %v14464_v54  ;;  %vm16374_vm13 = vcmp.lt.s32.totalorder %v16234_v2, 1  ;;  %vm16376_vm0 = vcmp.lt.s32.totalorder %v16234_v2, 7  ;;  %v10203_v2 = vld [vmem:[#allocation10 + $0x170] sm:$0xff] }
 0x3d5   : > { %v4326_v5 = vadd.f32 %v4283_v24, %v16366_v20  ;;  %v4827_v33 = vsel %vm4826_vm6, %v14425_v37, %v4823_v12  ;;  %v4837_v31 = vmul.f32 %v10614_v25, %v4836_v4  ;;  %10621 = vrcp.f32 %v14501_v17  ;;  %v14516_v37 = vpop.f32.mrf.mxu1  ;;  %vm16380_vm6 = vmmov %vm16376_vm0 }
 0x3d6   : > { %v4832_v34 = vsel %vm14483_vm4, %v4831_v30, %v4827_v33  ;;  %v4846_v12 = vor.u32 1.1754944e-38, %v4845_v59  ;;  %16369 = vst [vmem:[#allocation43_spill] sm:$0xff] %v14516_v37  ;;  %vm14525_vm5 = vcmp.eq.f32.partialorder %v4858_v47, 8.507059e+37  ;;  %v16373_v59 = vrot.slane %v14393_v16, 7  ;;  %vm16379_vm4 = vmmov %vm16374_vm13 }
 0x3d7   : > { %v5033_v39 = vmul.f32 %v4832_v34, %v14314_v6  ;;  %v4838_v24 = vadd.f32 %v10614_v25, %v4837_v31  ;;  %v4362_v9 = vmul.f32 %v14450_v60, %v4326_v5  ;;  %6186 = vmatmul.bf16.gmra.mxu2 %v9123_v13  ;;  %v14523_v32 = vpop.f32.mrf.mxu3  ;;  %v4861_v31 = vor.u32 1.1754944e-38, %v4860_v10 }
 0x3d8   : > { %v10618_v55 = vpop.eup %10617  ;;  %v4873_v5 = vand.u32 2147483647, %v14501_v17  ;;  %v16375_v4 = vrot.slane %v14393_v16, 1  ;;  %vm4869_vm14 = vweird.f32 %v14501_v17  ;;  %v14549_v16 = vpop.f32.mrf.mxu2 }
 0x3d9   : > { %v5065_v30 = vrot.slane %v5033_v39, 7  ;;  %v5163_v8 = vrot.slane %v5033_v39, 1  ;;  %v5330_v34 = vpack.c.bf16 %v5033_v39, %v5033_v39  ;;  %v4850_v6 = vmul.f32 %v10618_v55, %v14464_v54 }
 0x3da   : > { %v4842_v23 = vsel %vm4841_vm8, %v10614_v25, %v4838_v24  ;;  %6978 = vmatmul.bf16.gmra.mxu1 %v16372_v15  ;;  %v10620_v38 = vpop.eup %10619  ;;  %v14544_v56 = vpop.f32.mrf.mxu0  ;;  %vm4855_vm11 = vweird.f32 %v10618_v55  ;;  %v14553_v35 = vadd.f32 %v14469_v36, %v4362_v9  ;;  %vm16387_vm8 = vmmov %vm16379_vm4 }
 0x3db   : > { %v5091_v13 = vsel %vm16374_vm13, %v16373_v59, %v5065_v30  ;;  %v5189_v47 = vsel %vm16376_vm0, %v16375_v4, %v5163_v8  ;;  %5364 = vst [vmem:[#allocation3 + $0x100] sm:$0xf] %v5330_v34  ;;  %v4847_v10 = vsel %vm14512_vm12, %v4846_v12, %v4842_v23  ;;  %v4851_v25 = vsub.f32 1.0, %v4850_v6  ;;  %v10622_v18 = vpop.eup %10621  ;;  %vm4856_vm3 = vmor %vm4854_vm9, %vm4855_vm11 }
 0x3dc   : > { %v5261_v20 = vpack.c.bf16 %v5091_v13, %v5091_v13  ;;  %v5398_v33 = vpack.c.bf16 %v5189_v47, %v5189_v47  ;;  %v5034_v39 = vmul.f32 %v4847_v10, %v14328_v40  ;;  %v14547_v24 = vadd.f32 1.0, %v10620_v38  ;;  %vm16392_vm13 = vmmov %vm16379_vm4 }
 0x3dd   : > { %v4852_v15 = vmul.f32 %v10618_v55, %v4851_v25  ;;  %v4865_v34 = vmul.f32 %v10622_v18, %v14501_v17  ;;  %v16377_v40 = vor.u32 %v14431_v0, %v14429_v7  ;;  %v4875_v13 = vand.u32 2147483648, %v14501_v17  ;;  %v14561_v47 = vpop.f32.mrf.mxu1  ;;  %vm16400_vm11 = vmmov %vm16376_vm0 }
 0x3de   : > { %5296 = vst [vmem:[#allocation3 + $0xfc] sm:$0xf] %v5261_v20  ;;  %v5066_v12 = vrot.slane %v5034_v39, 7  ;;  %v5164_v6 = vrot.slane %v5034_v39, 1  ;;  %v5331_v23 = vpack.c.bf16 %v5034_v39, %v5034_v39  ;;  %10623 = vrcp.f32 %v14547_v24 }
 0x3df   : > { %5432 = vst [vmem:[#allocation3 + $0xf8] sm:$0xf] %v5398_v33  ;;  %v4853_v38 = vadd.f32 %v10618_v55, %v4852_v15  ;;  %v4866_v59 = vsub.f32 1.0, %v4865_v34  ;;  %v4285_v4 = vadd.f32 %v14495_v46, %v4196_v21  ;;  %vm4870_vm2 = vweird.f32 %v10622_v18 }
 0x3e0   : > { %6344 = vmatmul.bf16.gmra.mxu0 %v16377_v40  ;;  %16378 = vst [vmem:[#allocation18_spill] sm:$0xff] %v14561_v47  ;;  %v5090_v9 = vsel %vm16379_vm4, %v5065_v30, %v5066_v12  ;;  %v5188_v10 = vsel %vm16380_vm6, %v5163_v8, %v5164_v6  ;;  %v8972_v7 = vmul.f32 -1.442695, %v14553_v35  ;;  %v4200_v30 = vpop.f32.mrf.mxu3  ;;  %vm14577_vm12 = vcmp.eq.f32.partialorder %v4873_v5, 8.507059e+37 }
 0x3e1   : > { %5365 = vst [vmem:[#allocation3 + $0x10c] sm:$0xf] %v5331_v23  ;;  %v5131_v25 = vsel %vm12901_vm7, %v5090_v9, 0.0  ;;  %v5229_v21 = vsel %vm12897_vm10, %v5188_v10, 0.0  ;;  %v4857_v20 = vsel %vm4856_vm3, %v10618_v55, %v4853_v38  ;;  %v4867_v33 = vmul.f32 %v10622_v18, %v4866_v59  ;;  %vm4871_vm10 = vmor %vm4869_vm14, %vm4870_vm2 }
 0x3e2   : > { %v5262_v39 = vpack.c.bf16 %v5131_v25, %v5131_v25  ;;  %v5399_v15 = vpack.c.bf16 %v5229_v21, %v5229_v21  ;;  %v4862_v8 = vsel %vm14525_vm5, %v4861_v31, %v4857_v20  ;;  %v16385_v34 = vor.u32 %v14433_v14, %v14435_v61  ;;  %v4289_v55 = vpop.f32.mrf.mxu0  ;;  %v16386_v61 = vld [vmem:[#allocation57_spill] sm:$0xff]  ;;  %vm16388_vm5 = vmmov %vm16376_vm0 }
 0x3e3   : > { %v5035_v23 = vmul.f32 %v4862_v8, %v14389_v48  ;;  %v4868_v40 = vadd.f32 %v10622_v18, %v4867_v33  ;;  %v4876_v9 = vor.u32 1.1754944e-38, %v4875_v13  ;;  %10625 = vpow2.f32 %v8972_v7  ;;  %v9134_v8 = vld [vmem:[#allocation3 + $0xf0] sm:$0xf] }
 0x3e4   : > { %6260 = vmatmul.bf16.gmra.mxu3 %v16385_v34  ;;  %v14585_v38 = vpop.eup %10623  ;;  %5297 = vst [vmem:[#allocation3 + $0x108] sm:$0xf] %v5262_v39  ;;  %vm4884_vm7 = vweird.f32 %v14547_v24  ;;  %v4888_v41 = vand.u32 2147483647, %v14547_v24  ;;  %v4890_v14 = vand.u32 2147483648, %v14547_v24  ;;  %v4327_v31 = vadd.f32 %v4285_v4, %v16386_v61  ;;  %v14601_v0 = vpop.f32.mrf.mxu2 }
 0x3e5   : > { %v4199_v48 = vadd.f32 %v14523_v32, %v14013_v11  ;;  %5433 = vst [vmem:[#allocation3 + $0x104] sm:$0xf] %v5399_v15  ;;  %v5067_v5 = vrot.slane %v5035_v23, 7  ;;  %v5165_v59 = vrot.slane %v5035_v23, 1  ;;  %v5332_v13 = vpack.c.bf16 %v5035_v23, %v5035_v23  ;;  %v10092_v46 = vld [vmem:[#allocation3 + $0xf8] sm:$0xf0] }
 0x3e6   : > { %v4872_v10 = vsel %vm4871_vm10, %v10622_v18, %v4868_v40  ;;  %v4880_v7 = vmul.f32 %v14585_v38, %v14547_v24  ;;  %vm4885_vm9 = vweird.f32 %v14585_v38  ;;  %v4201_v4 = vadd.f32 %v4200_v30, %v14074_v27  ;;  %v14612_v21 = vpop.f32.mrf.mxu1  ;;  %v16390_v40 = vld [vmem:[#allocation55_spill] sm:$0xff]  ;;  %vm16404_vm10 = vmmov %vm16387_vm8 }
 0x3e7   : > { %v4877_v17 = vsel %vm14577_vm12, %v4876_v9, %v4872_v10  ;;  %v5089_v11 = vsel %vm16387_vm8, %v5066_v12, %v5067_v5  ;;  %v5187_v32 = vsel %vm16388_vm5, %v5164_v6, %v5165_v59  ;;  %5366 = vst [vmem:[#allocation3 + $0x118] sm:$0xf] %v5332_v13  ;;  %v4363_v25 = vmul.f32 %v14450_v60, %v4327_v31  ;;  %vm4886_vm14 = vmor %vm4884_vm7, %vm4885_vm9 }
 0x3e8   : > { %v14609_v18 = vmul.f32 %v4877_v17, %v14398_v28  ;;  %16389 = vst [vmem:[#allocation50_spill] sm:$0xff] %v14612_v21  ;;  %v5263_v20 = vpack.c.bf16 %v5089_v11, %v5089_v11  ;;  %v5400_v33 = vpack.c.bf16 %v5187_v32, %v5187_v32  ;;  %v4881_v39 = vsub.f32 1.0, %v4880_v7  ;;  %v4203_v54 = vpop.f32.mrf.mxu3  ;;  %v14683_v7 = vld [vmem:[#allocation3 + $0xb8] sm:$0xf0]  ;;  %vm16405_vm7 = vmmov %vm16376_vm0 }
 0x3e9   : > { %v4288_v27 = vadd.f32 %v14544_v56, %v4199_v48  ;;  %v10626_v30 = vpop.eup %10625  ;;  %v14620_v28 = vadd.f32 %v14469_v36, %v4363_v25  ;;  %v9135_v9 = vor.u32 %v10092_v46, %v9134_v8  ;;  %v16391_v61 = vor.u32 %v14441_v51, %v14474_v63 }
 0x3ea   : > { %v5068_v12 = vrot.slane %v14609_v18, 7  ;;  %v5166_v15 = vrot.slane %v14609_v18, 1  ;;  %v5333_v6 = vpack.c.bf16 %v14609_v18, %v14609_v18  ;;  %5298 = vst [vmem:[#allocation3 + $0x114] sm:$0xf] %v5263_v20  ;;  %v4882_v34 = vmul.f32 %v14585_v38, %v4881_v39  ;;  %v4292_v17 = vpop.f32.mrf.mxu0  ;;  %v16396_v39 = vld [vmem:[#allocation62_spill] sm:$0xff] }
 0x3eb   : > { %v14623_v23 = vadd.f32 1.0, %v10626_v30  ;;  %v4328_v56 = vadd.f32 %v4288_v27, %v16390_v40  ;;  %6983 = vmatmul.bf16.gmra.mxu1 %v16391_v61  ;;  %5434 = vst [vmem:[#allocation3 + $0x110] sm:$0xf] %v5400_v33  ;;  %v8973_v13 = vmul.f32 -1.442695, %v14620_v28  ;;  %v4290_v10 = vadd.f32 %v4289_v55, %v4201_v4  ;;  %6191 = vmatmul.bf16.gmra.mxu2 %v9135_v9  ;;  %v16398_v61 = vld [vmem:[#allocation53_spill] sm:$0xff] }
 0x3ec   : > { %v5088_v31 = vsel %vm16392_vm13, %v5067_v5, %v5068_v12  ;;  %v5186_v48 = vsel %vm16376_vm0, %v5165_v59, %v5166_v15  ;;  %5367 = vst [vmem:[#allocation3 + $0x124] sm:$0xf] %v5333_v6  ;;  %v4883_v51 = vadd.f32 %v14585_v38, %v4882_v34  ;;  %v4891_v55 = vor.u32 1.1754944e-38, %v4890_v14  ;;  %v9100_v59 = vld [vmem:[#allocation3 + $0xb4] sm:$0xf0]  ;;  %v14646_v46 = vpop.f32.mrf.mxu2 }
 0x3ed   : > { %v5133_v11 = vsel %vm13011_vm1, %v5088_v31, 0.0  ;;  %v5231_v18 = vsel %vm12990_vm15, %v5186_v48, 0.0  ;;  %10627 = vrcp.f32 %v14623_v23  ;;  %vm4889_vm1 = vcmp.eq.f32.partialorder %v4888_v41, 8.507059e+37  ;;  %v10082_v30 = vld [vmem:[#allocation3 + $0xac] sm:$0xf]  ;;  %vm16399_vm15 = vmmov %vm16379_vm4 }
 0x3ee   : > { %v5264_v63 = vpack.c.bf16 %v5133_v11, %v5133_v11  ;;  %v5401_v5 = vpack.c.bf16 %v5231_v18, %v5231_v18  ;;  %v4887_v4 = vsel %vm4886_vm14, %v14585_v38, %v4883_v51  ;;  %10629 = vpow2.f32 %v8973_v13  ;;  %v14652_v24 = vpop.f32.mrf.mxu1 }
 0x3ef   : > { %v4364_v25 = vmul.f32 %v14450_v60, %v4328_v56  ;;  %v16395_v20 = vor.u32 %v14443_v22, %v14462_v49  ;;  %v4892_v33 = vsel %vm4889_vm1, %v4891_v55, %v4887_v4  ;;  %v4329_v27 = vadd.f32 %v4290_v10, %v16396_v39  ;;  %16397 = vst [vmem:[#allocation35_spill] sm:$0xff] %v14652_v24  ;;  %v10155_v55 = vld [vmem:[#allocation3 + $0xc8] sm:$0xf0] }
 0x3f0   : > { %5299 = vst [vmem:[#allocation3 + $0x120] sm:$0xf] %v5264_v63  ;;  %v4204_v14 = vadd.f32 %v4203_v54, %v14118_v57  ;;  %v14656_v38 = vmul.f32 %v4892_v33, %v14472_v58  ;;  %v9103_v6 = vor.u32 %v10082_v30, %v9100_v59  ;;  %v4205_v8 = vpop.f32.mrf.mxu3  ;;  %v14687_v59 = vld [vmem:[#allocation3 + $0xcc] sm:$0xf0]  ;;  %vm4899_vm6 = vweird.f32 %v14623_v23 }
 0x3f1   : > { %6349 = vmatmul.bf16.gmra.mxu0 %v16395_v20  ;;  %5435 = vst [vmem:[#allocation3 + $0x11c] sm:$0xf] %v5401_v5  ;;  %v14659_v41 = vadd.f32 %v14469_v36, %v4364_v25  ;;  %v4365_v22 = vmul.f32 %v14450_v60, %v4329_v27  ;;  %v10095_v63 = vld [vmem:[#allocation3 + $0x110] sm:$0xf0]  ;;  %v9386_v5 = vld [vmem:[#allocation3 + $0xc0] sm:$0xf]  ;;  %v4206_v33 = vadd.f32 %v4205_v8, %v14169_v52 }
 0x3f2   : > { %v4293_v49 = vadd.f32 %v4292_v17, %v4204_v14  ;;  %v5069_v40 = vrot.slane %v14656_v38, 7  ;;  %v5167_v56 = vrot.slane %v14656_v38, 1  ;;  %v5334_v57 = vpack.c.bf16 %v14656_v38, %v14656_v38  ;;  %v4294_v48 = vpop.f32.mrf.mxu0  ;;  %v9146_v25 = vld [vmem:[#allocation3 + $0x108] sm:$0xf]  ;;  %v9106_v52 = vld [vmem:[#allocation3 + $0xb0] sm:$0xf] }
 0x3f3   : > { %v14662_v34 = vpop.eup %10627  ;;  %v8974_v58 = vmul.f32 -1.442695, %v14659_v41  ;;  %v14672_v9 = vadd.f32 %v14469_v36, %v4365_v22  ;;  %v4903_v27 = vand.u32 2147483647, %v14623_v23  ;;  %v10191_v14 = vld [vmem:[#allocation10 + $0x110] sm:$0xff]  ;;  %v9147_v22 = vor.u32 %v10095_v63, %v9146_v25 }
 0x3f4   : > { %6265 = vmatmul.bf16.gmra.mxu3 %v9103_v6  ;;  %v4895_v54 = vmul.f32 %v14662_v34, %v14623_v23  ;;  %v4330_v31 = vadd.f32 %v4293_v49, %v16398_v61  ;;  %v10630_v13 = vpop.eup %10629  ;;  %v5087_v10 = vsel %vm16399_vm15, %v5068_v12, %v5069_v40  ;;  %v5185_v17 = vsel %vm16400_vm11, %v5166_v15, %v5167_v56  ;;  %v14692_v20 = vpop.f32.mrf.mxu2  ;;  %v14704_v8 = vld [vmem:[#allocation3 + $0xc4] sm:$0xf] }
 0x3f5   : > { %5368 = vst [vmem:[#allocation3 + $0x130] sm:$0xf] %v5334_v57  ;;  %10631 = vpow2.f32 %v8974_v58  ;;  %v5265_v11 = vpack.c.bf16 %v5087_v10, %v5087_v10  ;;  %v5402_v32 = vpack.c.bf16 %v5185_v17, %v5185_v17  ;;  %v14685_v51 = vadd.f32 1.0, %v10630_v13  ;;  %7039 = vmatpush.bf16.msrb.mxu2 %v10191_v14  ;;  %v14711_v13 = vld [vmem:[#allocation3 + $0xc8] sm:$0xf] }
 0x3f6   : > { %v4896_v18 = vsub.f32 1.0, %v4895_v54  ;;  %v4905_v12 = vand.u32 2147483648, %v14623_v23  ;;  %v8975_v4 = vmul.f32 -1.442695, %v14672_v9  ;;  %v4366_v15 = vmul.f32 %v14450_v60, %v4330_v31  ;;  %v14699_v30 = vpop.f32.mrf.mxu1  ;;  %v14709_v31 = vld [vmem:[#allocation3 + $0xe0] sm:$0xf0] }
 0x3f7   : > { %5300 = vst [vmem:[#allocation3 + $0x12c] sm:$0xf] %v5265_v11  ;;  %vm4900_vm4 = vweird.f32 %v14662_v34  ;;  %10633 = vrcp.f32 %v14685_v51  ;;  %v9387_v49 = vor.u32 %v10155_v55, %v9386_v5  ;;  %v4295_v58 = vadd.f32 %v4294_v48, %v4206_v33  ;;  %v14713_v10 = vld [vmem:[#allocation3 + $0xd0] sm:$0xf0]  ;;  %v16402_v5 = vld [vmem:[#allocation64_spill] sm:$0xff] }
 0x3f8   : > { %v4897_v39 = vmul.f32 %v14662_v34, %v4896_v18  ;;  %16401 = vst [vmem:[#allocation22_spill] sm:$0xff] %v14699_v30  ;;  %10635 = vpow2.f32 %v8975_v4  ;;  %v14702_v6 = vadd.f32 %v14469_v36, %v4366_v15  ;;  %v9107_v54 = vor.u32 %v14683_v7, %v9106_v52  ;;  %v4208_v61 = vpop.f32.mrf.mxu3  ;;  %vm4901_vm3 = vmor %vm4899_vm6, %vm4900_vm4  ;;  %v14721_v7 = vld [vmem:[#allocation3 + $0xe4] sm:$0xf0]  ;;  %v14727_v15 = vld [vmem:[#allocation3 + $0xd8] sm:$0xf] }
 0x3f9   : > { %5436 = vst [vmem:[#allocation3 + $0x128] sm:$0xf] %v5402_v32  ;;  %v4906_v11 = vor.u32 1.1754944e-38, %v4905_v12  ;;  %v4209_v23 = vadd.f32 %v4208_v61, %v14234_v29  ;;  %v9115_v48 = vor.u32 %v14704_v8, %v14687_v59  ;;  %vm4904_vm2 = vcmp.eq.f32.partialorder %v4903_v27, 8.507059e+37  ;;  %v14729_v12 = vld [vmem:[#allocation3 + $0xf8] sm:$0xf0] }
 0x3fa   : > { %v4898_v57 = vadd.f32 %v14662_v34, %v4897_v39  ;;  %v8976_v32 = vmul.f32 -1.442695, %v14702_v6  ;;  %v4331_v55 = vadd.f32 %v4295_v58, %v16402_v5  ;;  %v4297_v4 = vpop.f32.mrf.mxu0  ;;  %v14741_v14 = vld [vmem:[#allocation3 + $0xf0] sm:$0xf]  ;;  %v4918_v8 = vand.u32 2147483647, %v14685_v51 }
 0x3fb   : > { %v10632_v17 = vpop.eup %10631  ;;  %6988 = vmatmul.bf16.gmra.mxu1 %v9387_v49  ;;  %6196 = vmatmul.bf16.gmra.mxu2 %v9147_v22  ;;  %v4298_v27 = vadd.f32 %v4297_v4, %v4209_v23  ;;  %v16407_v59 = vld [vmem:[#allocation23_spill] sm:$0xff]  ;;  %vm4914_vm5 = vweird.f32 %v14685_v51  ;;  %v16415_v37 = vor.u32 %v14709_v31, %v14727_v15 }
 0x3fc   : > { %v4902_v18 = vsel %vm4901_vm3, %v14662_v34, %v4898_v57  ;;  %v14724_v63 = vadd.f32 1.0, %v10632_v17  ;;  %10637 = vpow2.f32 %v8976_v32  ;;  %v14735_v34 = vld [vmem:[#allocation3 + $0xdc] sm:$0xf]  ;;  %v4367_v57 = vmul.f32 %v14450_v60, %v4331_v55  ;;  %v14748_v58 = vpop.f32.mrf.mxu2  ;;  %vm16421_vm3 = vmmov %vm16404_vm10 }
 0x3fd   : > { %v4907_v25 = vsel %vm4904_vm2, %v4906_v11, %v4902_v18  ;;  %v10634_v33 = vpop.eup %10633  ;;  %v4920_v32 = vand.u32 2147483648, %v14685_v51  ;;  %vm16408_vm9 = vnez %v16407_v59  ;;  %vm14786_vm13 = vcmp.eq.f32.partialorder %v4918_v8, 8.507059e+37  ;;  %vm16423_vm2 = vmmov %vm16405_vm7 }
 0x3fe   : > { %v14738_v39 = vmul.f32 %v4907_v25, %v14553_v35  ;;  %10639 = vrcp.f32 %v14724_v63  ;;  %v10636_v49 = vpop.eup %10635  ;;  %v4910_v52 = vmul.f32 %v10634_v33, %v14685_v51  ;;  %v14757_v23 = vpop.f32.mrf.mxu1  ;;  %vm4915_vm12 = vweird.f32 %v10634_v33 }
 0x3ff   : > { %16403 = vst [vmem:[#allocation77_spill] sm:$0xff] %v14757_v23  ;;  %v4933_v5 = vand.u32 2147483647, %v14724_v63  ;;  %v14760_v55 = vadd.f32 1.0, %v10636_v49  ;;  %v14775_v25 = vadd.f32 %v14469_v36, %v4367_v57  ;;  %v16406_v49 = vld [vmem:[#allocation67_spill] sm:$0xff]  ;;  %vm4929_vm0 = vweird.f32 %v14724_v63  ;;  %vm4916_vm14 = vmor %vm4914_vm5, %vm4915_vm12 }
 0x400   : > { %v15818_v61 = vrot.slane %v14738_v39, 7  ;;  %v15819_v17 = vrot.slane %v14738_v39, 1  ;;  %v5335_v11 = vpack.c.bf16 %v14738_v39, %v14738_v39  ;;  %v4911_v18 = vsub.f32 1.0, %v4910_v52  ;;  %v14778_v35 = vpop.f32.mrf.mxu3 }
 0x401   : > { %6354 = vmatmul.bf16.gmra.mxu0 %v9107_v54  ;;  %v4332_v52 = vadd.f32 %v4298_v27, %v16406_v49  ;;  %10641 = vrcp.f32 %v14760_v55  ;;  %v8977_v51 = vmul.f32 -1.442695, %v14775_v25  ;;  %vm14800_vm1 = vcmp.eq.f32.partialorder %v4933_v5, 8.507059e+37 }
 0x402   : > { %v5086_v54 = vsel %vm16404_vm10, %v5069_v40, %v15818_v61  ;;  %v5184_v4 = vsel %vm16405_vm7, %v5167_v56, %v15819_v17  ;;  %5369 = vst [vmem:[#allocation3 + $0x13c] sm:$0xf] %v5335_v11  ;;  %v10638_v22 = vpop.eup %10637  ;;  %v16409_v40 = vld [vmem:[#allocation75_spill] sm:$0xff]  ;;  %v4912_v23 = vmul.f32 %v10634_v33, %v4911_v18  ;;  %v14790_v57 = vpop.f32.mrf.mxu0  ;;  %v10098_v18 = vld [vmem:[#allocation3 + $0x128] sm:$0xf0]  ;;  %vm4944_vm11 = vweird.f32 %v14760_v55 }
 0x403   : > { %v5135_v29 = vsel %vm16408_vm9, %v5086_v54, 0.0  ;;  %vm16410_vm8 = vnez %v16409_v40  ;;  %v4921_v54 = vor.u32 1.1754944e-38, %v4920_v32  ;;  %v4368_v8 = vmul.f32 %v14450_v60, %v4332_v52  ;;  %vm16425_vm9 = vmmov %vm16421_vm3 }
 0x404   : > { %v5233_v61 = vsel %vm16410_vm8, %v5184_v4, 0.0  ;;  %6270 = vmatmul.bf16.gmra.mxu3 %v9115_v48  ;;  %v10640_v38 = vpop.eup %10639  ;;  %v5266_v56 = vpack.c.bf16 %v5135_v29, %v5135_v29  ;;  %v4913_v59 = vadd.f32 %v10634_v33, %v4912_v23  ;;  %v4935_v48 = vand.u32 2147483648, %v14724_v63  ;;  %v14809_v17 = vpop.f32.mrf.mxu2  ;;  %vm16426_vm8 = vmmov %vm16423_vm2 }
 0x405   : > { %v5403_v11 = vpack.c.bf16 %v5233_v61, %v5233_v61  ;;  %v4925_v49 = vmul.f32 %v10640_v38, %v14724_v63  ;;  %v14796_v29 = vadd.f32 1.0, %v10638_v22  ;;  %v4948_v4 = vand.u32 2147483647, %v14760_v55 }
 0x406   : > { %5301 = vst [vmem:[#allocation3 + $0x138] sm:$0xf] %v5266_v56  ;;  %v4917_v61 = vsel %vm4916_vm14, %v10634_v33, %v4913_v59  ;;  %vm4930_vm15 = vweird.f32 %v10640_v38  ;;  %v4950_v22 = vand.u32 2147483648, %v14760_v55  ;;  %v9158_v56 = vld [vmem:[#allocation3 + $0x120] sm:$0xf]  ;;  %v14811_v52 = vpop.f32.mrf.mxu1  ;;  %v16420_v31 = vrot.slane %v14738_v39, 7 }
 0x407   : > { %5437 = vst [vmem:[#allocation3 + $0x134] sm:$0xf] %v5403_v11  ;;  %v4926_v23 = vsub.f32 1.0, %v4925_v49  ;;  %v4922_v40 = vsel %vm14786_vm13, %v4921_v54, %v4917_v61  ;;  %10643 = vrcp.f32 %v14796_v29  ;;  %v10642_v33 = vpop.eup %10641  ;;  %v9159_v59 = vor.u32 %v10098_v18, %v9158_v56  ;;  %vm14825_vm4 = vmor %vm4929_vm0, %vm4930_vm15 }
 0x408   : > { %v5039_v5 = vmul.f32 %v4922_v40, %v14620_v28  ;;  %10645 = vpow2.f32 %v8977_v51  ;;  %v4936_v49 = vor.u32 1.1754944e-38, %v4935_v48  ;;  %v4940_v27 = vmul.f32 %v10642_v33, %v14760_v55  ;;  %v6231_v61 = vpop.f32.mrf.mxu3  ;;  %vm16432_vm15 = vmmov %vm16421_vm3 }
 0x409   : > { %v4927_v11 = vmul.f32 %v10640_v38, %v4926_v23  ;;  %v14817_v54 = vadd.f32 %v14469_v36, %v4368_v8  ;;  %vm14829_vm6 = vcmp.eq.f32.partialorder %v4948_v4, 8.507059e+37  ;;  %v4951_v51 = vor.u32 1.1754944e-38, %v4950_v22 }
 0x40a   : > { %v5071_v30 = vrot.slane %v5039_v5, 7  ;;  %v5169_v24 = vrot.slane %v5039_v5, 1  ;;  %v5336_v21 = vpack.c.bf16 %v5039_v5, %v5039_v5  ;;  %v4941_v18 = vsub.f32 1.0, %v4940_v27  ;;  %v14834_v23 = vpop.f32.mrf.mxu0 }
 0x40b   : > { %v4928_v47 = vadd.f32 %v10640_v38, %v4927_v11  ;;  %6993 = vmatmul.bf16.gmra.mxu1 %v16415_v37  ;;  %v8978_v8 = vmul.f32 -1.442695, %v14817_v54  ;;  %v16422_v63 = vrot.slane %v14738_v39, 1  ;;  %vm4945_vm12 = vweird.f32 %v10642_v33  ;;  %6201 = vmatmul.bf16.gmra.mxu2 %v9159_v59 }
 0x40c   : > { %v5085_v37 = vsel %vm16421_vm3, %v16420_v31, %v5071_v30  ;;  %5370 = vst [vmem:[#allocation3 + $0x148] sm:$0xf] %v5336_v21  ;;  %v4942_v11 = vmul.f32 %v10642_v33, %v4941_v18  ;;  %v4963_v21 = vand.u32 2147483647, %v14796_v29  ;;  %v4965_v32 = vand.u32 2147483648, %v14796_v29  ;;  %vm4946_vm7 = vmor %vm4944_vm11, %vm4945_vm12 }
 0x40d   : > { %v5183_v15 = vsel %vm16423_vm2, %v16422_v63, %v5169_v24  ;;  %v4932_v4 = vsel %vm14825_vm4, %v10640_v38, %v4928_v47  ;;  %v14846_v40 = vpop.eup %10643  ;;  %v5267_v22 = vpack.c.bf16 %v5085_v37, %v5085_v37  ;;  %10647 = vpow2.f32 %v8978_v8  ;;  %v10190_v37 = vld [vmem:[#allocation10 + $0x108] sm:$0xff]  ;;  %vm16433_vm11 = vmmov %vm16423_vm2 }
 0x40e   : > { %v5404_v56 = vpack.c.bf16 %v5183_v15, %v5183_v15  ;;  %v4937_v5 = vsel %vm14800_vm1, %v4936_v49, %v4932_v4  ;;  %v10646_v27 = vpop.eup %10645  ;;  %v4955_v31 = vmul.f32 %v14846_v40, %v14796_v29  ;;  %v16424_v47 = vor.u32 %v14713_v10, %v14711_v13  ;;  %v14861_v49 = vpop.f32.mrf.mxu1  ;;  %7040 = vmatpush.bf16.msrb.mxu2 %v10190_v37 }
 0x40f   : > { %v5040_v39 = vmul.f32 %v4937_v5, %v14659_v41  ;;  %5302 = vst [vmem:[#allocation3 + $0x144] sm:$0xf] %v5267_v22  ;;  %v4943_v38 = vadd.f32 %v10642_v33, %v4942_v11  ;;  %vm4960_vm10 = vweird.f32 %v14846_v40  ;;  %v14859_v59 = vadd.f32 1.0, %v10646_v27  ;;  %v14866_v10 = vpop.f32.mrf.mxu2  ;;  %v16427_v5 = vld [vmem:[#allocation27_spill] sm:$0xff] }
 0x410   : > { %5438 = vst [vmem:[#allocation3 + $0x140] sm:$0xf] %v5404_v56  ;;  %v4956_v13 = vsub.f32 1.0, %v4955_v31  ;;  %v4211_v63 = vadd.f32 %v14778_v35, %v14301_v26  ;;  %v6232_v15 = vadd.f32 %v6231_v61, %v14361_v42  ;;  %v14872_v4 = vpop.f32.mrf.mxu3  ;;  %vm16428_vm5 = vnez %v16427_v5  ;;  %v16429_v26 = vld [vmem:[#allocation54_spill] sm:$0xff] }
 0x411   : > { %6359 = vmatmul.bf16.gmra.mxu0 %v16424_v47  ;;  %v5072_v41 = vrot.slane %v5040_v39, 7  ;;  %v5170_v28 = vrot.slane %v5040_v39, 1  ;;  %v5337_v18 = vpack.c.bf16 %v5040_v39, %v5040_v39  ;;  %v4947_v8 = vsel %vm4946_vm7, %v10642_v33, %v4943_v38 }
 0x412   : > { %10649 = vrcp.f32 %v14859_v59  ;;  %v4952_v33 = vsel %vm14829_vm6, %v4951_v51, %v4947_v8  ;;  %v4957_v56 = vmul.f32 %v14846_v40, %v4956_v13  ;;  %vm16430_vm13 = vnez %v16429_v26 }
 0x413   : > { %v5084_v22 = vsel %vm16425_vm9, %v5071_v30, %v5072_v41  ;;  %v5182_v55 = vsel %vm16426_vm8, %v5169_v24, %v5170_v28  ;;  %5371 = vst [vmem:[#allocation3 + $0x154] sm:$0xf] %v5337_v18  ;;  %v5041_v35 = vmul.f32 %v4952_v33, %v14672_v9  ;;  %vm4959_vm0 = vweird.f32 %v14796_v29  ;;  %v14887_v30 = vpop.f32.mrf.mxu0  ;;  %v10648_v61 = vpop.eup %10647  ;;  %v10090_v18 = vld [vmem:[#allocation3 + $0xe8] sm:$0xf0] }
 0x414   : > { %v5137_v11 = vsel %vm16428_vm5, %v5084_v22, 0.0  ;;  %v5235_v42 = vsel %vm16430_vm13, %v5182_v55, 0.0  ;;  %v16431_v24 = vor.u32 %v14735_v34, %v14721_v7  ;;  %v4958_v27 = vadd.f32 %v14846_v40, %v4957_v56  ;;  %vm4961_vm14 = vmor %vm4959_vm0, %vm4960_vm10  ;;  %v9130_v22 = vld [vmem:[#allocation3 + $0xe0] sm:$0xf] }
 0x415   : > { %v5268_v48 = vpack.c.bf16 %v5137_v11, %v5137_v11  ;;  %v5405_v51 = vpack.c.bf16 %v5235_v42, %v5235_v42  ;;  %v4966_v39 = vor.u32 1.1754944e-38, %v4965_v32  ;;  %v5073_v31 = vrot.slane %v5041_v35, 7  ;;  %vm16440_vm0 = vmmov %vm16421_vm3 }
 0x416   : > { %6275 = vmatmul.bf16.gmra.mxu3 %v16431_v24  ;;  %v5171_v47 = vrot.slane %v5041_v35, 1  ;;  %v5338_v38 = vpack.c.bf16 %v5041_v35, %v5041_v35  ;;  %v14895_v9 = vadd.f32 1.0, %v10648_v61  ;;  %v4962_v29 = vsel %vm4961_vm14, %v14846_v40, %v4958_v27  ;;  %v14909_v40 = vpop.f32.mrf.mxu1  ;;  %v16435_v24 = vld [vmem:[#allocation65_spill] sm:$0xff]  ;;  %vm16441_vm14 = vmmov %vm16423_vm2 }
 0x417   : > { %5303 = vst [vmem:[#allocation3 + $0x150] sm:$0xf] %v5268_v48  ;;  %vm4964_vm1 = vcmp.eq.f32.partialorder %v4963_v21, 8.507059e+37  ;;  %v4300_v7 = vadd.f32 %v14790_v57, %v4211_v63  ;;  %v14900_v34 = vadd.f32 %v14834_v23, %v6232_v15  ;;  %v5083_v32 = vsel %vm16432_vm15, %v5072_v41, %v5073_v31  ;;  %v10101_v15 = vld [vmem:[#allocation3 + $0x140] sm:$0xf0]  ;;  %v14922_v26 = vpop.f32.mrf.mxu2  ;;  %vm16442_vm15 = vmmov %vm16440_vm0 }
 0x418   : > { %v14902_v13 = vpop.eup %10649  ;;  %5439 = vst [vmem:[#allocation3 + $0x14c] sm:$0xf] %v5405_v51  ;;  %v5181_v8 = vsel %vm16433_vm11, %v5170_v28, %v5171_v47  ;;  %v4967_v37 = vsel %vm4964_vm1, %v4966_v39, %v4962_v29  ;;  %10651 = vrcp.f32 %v14895_v9  ;;  %v5269_v21 = vpack.c.bf16 %v5083_v32, %v5083_v32  ;;  %v9170_v28 = vld [vmem:[#allocation3 + $0x138] sm:$0xf]  ;;  %v6236_v33 = vpop.f32.mrf.mxu3  ;;  %v16436_v29 = vld [vmem:[#allocation20_spill] sm:$0xff]  ;;  %vm16443_vm11 = vmmov %vm16423_vm2 }
 0x419   : > { %5372 = vst [vmem:[#allocation3 + $0x160] sm:$0xf] %v5338_v38  ;;  %v5406_v57 = vpack.c.bf16 %v5181_v8, %v5181_v8  ;;  %v14912_v23 = vmul.f32 %v4967_v37, %v14702_v6  ;;  %v4970_v63 = vmul.f32 %v14902_v13, %v14859_v59  ;;  %vm4974_vm4 = vweird.f32 %v14859_v59 }
 0x41a   : > { %v4978_v41 = vand.u32 2147483647, %v14859_v59  ;;  %v9131_v55 = vor.u32 %v10090_v18, %v9130_v22  ;;  %5304 = vst [vmem:[#allocation3 + $0x15c] sm:$0xf] %v5269_v21  ;;  %v16434_v42 = vor.u32 %v14729_v12, %v14741_v14  ;;  %vm4975_vm6 = vweird.f32 %v14902_v13  ;;  %v16438_v18 = vld [vmem:[#allocation61_spill] sm:$0xff] }
 0x41b   : > { %v5074_v56 = vrot.slane %v14912_v23, 7  ;;  %v5172_v5 = vrot.slane %v14912_v23, 1  ;;  %v5339_v6 = vpack.c.bf16 %v14912_v23, %v14912_v23  ;;  %v4971_v11 = vsub.f32 1.0, %v4970_v63  ;;  %5440 = vst [vmem:[#allocation3 + $0x158] sm:$0xf] %v5406_v57  ;;  %v6325_v51 = vpop.f32.mrf.mxu0  ;;  %vm4976_vm7 = vmor %vm4974_vm4, %vm4975_vm6 }
 0x41c   : > { %6998 = vmatmul.bf16.gmra.mxu1 %v16434_v42  ;;  %v4980_v35 = vand.u32 2147483648, %v14859_v59  ;;  %v4333_v61 = vadd.f32 %v4300_v7, %v16435_v24  ;;  %v9171_v48 = vor.u32 %v10101_v15, %v9170_v28  ;;  %v6234_v39 = vadd.f32 %v14872_v4, %v14417_v45  ;;  %v9136_v45 = vld [vmem:[#allocation3 + $0xfc] sm:$0xf0]  ;;  %v10091_v22 = vld [vmem:[#allocation3 + $0xf4] sm:$0xf] }
 0x41d   : > { %v5082_v27 = vsel %vm16421_vm3, %v5073_v31, %v5074_v56  ;;  %v5180_v12 = vsel %vm16423_vm2, %v5171_v47, %v5172_v5  ;;  %5373 = vst [vmem:[#allocation3 + $0x16c] sm:$0xf] %v5339_v6  ;;  %v4972_v14 = vmul.f32 %v14902_v13, %v4971_v11  ;;  %vm16437_vm12 = vnez %v16436_v29 }
 0x41e   : > { %v10652_v38 = vpop.eup %10651  ;;  %v5139_v7 = vsel %vm16437_vm12, %v5082_v27, 0.0  ;;  %vm16439_vm10 = vnez %v16438_v18  ;;  %v4369_v31 = vmul.f32 %v14450_v60, %v4333_v61  ;;  %6206 = vmatmul.bf16.gmra.mxu2 %v9171_v48  ;;  %v6237_v8 = vadd.f32 %v6236_v33, %v14489_v19  ;;  %v14959_v19 = vpop.f32.mrf.mxu1 }
 0x41f   : > { %v5237_v32 = vsel %vm16439_vm10, %v5180_v12, 0.0  ;;  %v5270_v37 = vpack.c.bf16 %v5139_v7, %v5139_v7  ;;  %v4973_v21 = vadd.f32 %v14902_v13, %v4972_v14  ;;  %v4985_v57 = vmul.f32 %v10652_v38, %v14895_v9  ;;  %v14968_v24 = vpop.f32.mrf.mxu2 }
 0x420   : > { %v5407_v47 = vpack.c.bf16 %v5237_v32, %v5237_v32  ;;  %v4981_v4 = vor.u32 1.1754944e-38, %v4980_v35  ;;  %v14954_v63 = vadd.f32 %v14469_v36, %v4369_v31  ;;  %v14957_v60 = vadd.f32 %v14887_v30, %v6234_v39  ;;  %v6238_v30 = vpop.f32.mrf.mxu3  ;;  %v10189_v31 = vld [vmem:[#allocation10 + $0x100] sm:$0xff] }
 0x421   : > { %6364 = vmatmul.bf16.gmra.mxu0 %v9131_v55  ;;  %v14961_v15 = vadd.f32 %v6325_v51, %v6237_v8  ;;  %5305 = vst [vmem:[#allocation3 + $0x168] sm:$0xf] %v5270_v37  ;;  %v4977_v28 = vsel %vm4976_vm7, %v14902_v13, %v4973_v21  ;;  %vm4979_vm9 = vcmp.eq.f32.partialorder %v4978_v41, 8.507059e+37  ;;  %v4986_v55 = vsub.f32 1.0, %v4985_v57  ;;  %v10104_v29 = vld [vmem:[#allocation3 + $0x158] sm:$0xf0]  ;;  %7041 = vmatpush.bf16.msrb.mxu2 %v10189_v31  ;;  %vm16448_vm7 = vmmov %vm16440_vm0 }
 0x422   : > { %v4993_v59 = vand.u32 2147483647, %v14895_v9  ;;  %5441 = vst [vmem:[#allocation3 + $0x164] sm:$0xf] %v5407_v47  ;;  %v4982_v33 = vsel %vm4979_vm9, %v4981_v4, %v4977_v28  ;;  %v4995_v36 = vand.u32 2147483648, %v14895_v9  ;;  %v9139_v11 = vor.u32 %v10091_v22, %v9136_v45  ;;  %v10204_v47 = vld [vmem:[#allocation10 + $0x178] sm:$0xff]  ;;  %vm16449_vm9 = vmmov %vm16440_vm0 }
 0x423   : > { %v8979_v6 = vmul.f32 -1.442695, %v14954_v63  ;;  %v5043_v42 = vmul.f32 %v4982_v33, %v14775_v25  ;;  %v4987_v35 = vmul.f32 %v10652_v38, %v4986_v55  ;;  %vm4990_vm8 = vweird.f32 %v10652_v38  ;;  %v6327_v41 = vpop.f32.mrf.mxu0  ;;  %v10164_v25 = vld [vmem:[#allocation3 + $0x110] sm:$0xf0]  ;;  %v9422_v37 = vld [vmem:[#allocation3 + $0x108] sm:$0xf]  ;;  %7123 = vmatpush.bf16.msra.mxu3 %v10204_v47 }
 0x424   : > { %v6239_v13 = vadd.f32 %v6238_v30, %v14549_v16  ;;  %vm4989_vm5 = vweird.f32 %v14895_v9  ;;  %v4996_v12 = vor.u32 1.1754944e-38, %v4995_v36  ;;  %vm4994_vm1 = vcmp.eq.f32.partialorder %v4993_v59, 8.507059e+37  ;;  %v9142_v33 = vld [vmem:[#allocation3 + $0xf8] sm:$0xf] }
 0x425   : > { %10653 = vpow2.f32 %v8979_v6  ;;  %v5075_v61 = vrot.slane %v5043_v42, 7  ;;  %v5173_v48 = vrot.slane %v5043_v42, 1  ;;  %v5340_v51 = vpack.c.bf16 %v5043_v42, %v5043_v42  ;;  %vm4991_vm13 = vmor %vm4989_vm5, %vm4990_vm8  ;;  %v16444_v42 = vld [vmem:[#allocation32_spill] sm:$0xff] }
 0x426   : > { %6280 = vmatmul.bf16.gmra.mxu3 %v9139_v11  ;;  %v4988_v27 = vadd.f32 %v10652_v38, %v4987_v35  ;;  %v14972_v14 = vadd.f32 %v6327_v41, %v6239_v13  ;;  %v14982_v8 = vpop.f32.mrf.mxu1  ;;  %v9423_v23 = vor.u32 %v10164_v25, %v9422_v37  ;;  %vm16445_vm4 = vnez %v16444_v42  ;;  %v16446_v13 = vld [vmem:[#allocation69_spill] sm:$0xff]  ;;  %vm16450_vm8 = vmmov %vm16443_vm11 }
 0x427   : > { %v5081_v39 = vsel %vm16440_vm0, %v5074_v56, %v5075_v61  ;;  %v5179_v16 = vsel %vm16441_vm14, %v5172_v5, %v5173_v48  ;;  %5374 = vst [vmem:[#allocation3 + $0x178] sm:$0xf] %v5340_v51  ;;  %v9182_v56 = vld [vmem:[#allocation3 + $0x150] sm:$0xf]  ;;  %vm16447_vm6 = vnez %v16446_v13  ;;  %vm16451_vm5 = vmmov %vm16450_vm8  ;;  %7124 = vmatpush.bf16.msra.mxu3 %v10203_v2 }
 0x428   : > { %v4992_v9 = vsel %vm4991_vm13, %v10652_v38, %v4988_v27  ;;  %v5271_v7 = vpack.c.bf16 %v5081_v39, %v5081_v39  ;;  %v5408_v18 = vpack.c.bf16 %v5179_v16, %v5179_v16  ;;  %v9183_v5 = vor.u32 %v10104_v29, %v9182_v56  ;;  %v10093_v38 = vld [vmem:[#allocation3 + $0x100] sm:$0xf0]  ;;  %v6241_v45 = vpop.f32.mrf.mxu3  ;;  %v10260_v25 = vld [vmem:[#allocation10 + $0x1b8] sm:$0xff] }
 0x429   : > { %v4997_v32 = vsel %vm4994_vm1, %v4996_v12, %v4992_v9  ;;  %v6242_v36 = vadd.f32 %v6241_v45, %v14601_v0  ;;  %v9143_v11 = vor.u32 %v10093_v38, %v9142_v33  ;;  %v10276_v0 = vld [vmem:[#allocation10 + $0x238] sm:$0xff]  ;;  %v9148_v12 = vld [vmem:[#allocation3 + $0x114] sm:$0xf0]  ;;  %7757 = vmatpush.bf16.msra.mxu0 %v10260_v25 }
 0x42a   : > { %v14985_v21 = vmul.f32 %v4997_v32, %v14817_v54  ;;  %5306 = vst [vmem:[#allocation3 + $0x174] sm:$0xf] %v5271_v7  ;;  %v14991_v54 = vpop.f32.mrf.mxu2  ;;  %v10268_v39 = vld [vmem:[#allocation10 + $0x1f8] sm:$0xff]  ;;  %7935 = vmatpush.bf16.msra.mxu2 %v10276_v0 }
 0x42b   : > { %v10654_v57 = vpop.eup %10653  ;;  %5442 = vst [vmem:[#allocation3 + $0x170] sm:$0xf] %v5408_v18  ;;  %v6330_v59 = vpop.f32.mrf.mxu0  ;;  %v10094_v16 = vld [vmem:[#allocation3 + $0x10c] sm:$0xf]  ;;  %7846 = vmatpush.bf16.msra.mxu1 %v10268_v39  ;;  %v9194_v33 = vld [vmem:[#allocation3 + $0x168] sm:$0xf] }
 0x42c   : > { %v5076_v4 = vrot.slane %v14985_v21, 7  ;;  %v5174_v22 = vrot.slane %v14985_v21, 1  ;;  %v5341_v28 = vpack.c.bf16 %v14985_v21, %v14985_v21  ;;  %v4533_v55 = vadd.f32 1.0, %v10654_v57  ;;  %7003 = vmatmul.bf16.gmra.mxu1 %v9423_v23  ;;  %v10167_v23 = vld [vmem:[#allocation3 + $0x128] sm:$0xf0] }
 0x42d   : > { %v9151_v29 = vor.u32 %v10094_v16, %v9148_v12  ;;  %v9154_v0 = vld [vmem:[#allocation3 + $0x110] sm:$0xf] }
 0x42e   : > { %v5080_v6 = vsel %vm16442_vm15, %v5075_v61, %v5076_v4  ;;  %v5178_v30 = vsel %vm16443_vm11, %v5173_v48, %v5174_v22  ;;  %5375 = vst [vmem:[#allocation3 + $0x184] sm:$0xf] %v5341_v28  ;;  %10655 = vrcp.f32 %v4533_v55  ;;  %6211 = vmatmul.bf16.gmra.mxu2 %v9183_v5  ;;  %v15006_v61 = vadd.f32 %v6330_v59, %v6242_v36  ;;  %v15008_v48 = vpop.f32.mrf.mxu1  ;;  %v9434_v59 = vld [vmem:[#allocation3 + $0x120] sm:$0xf]  ;;  %v9160_v39 = vld [vmem:[#allocation3 + $0x12c] sm:$0xf0] }
 0x42f   : > { %v5141_v35 = vsel %vm16445_vm4, %v5080_v6, 0.0  ;;  %v5239_v41 = vsel %vm16447_vm6, %v5178_v30, 0.0  ;;  %v5010_v57 = vand.u32 2147483648, %v4533_v55  ;;  %v5008_v45 = vand.u32 2147483647, %v4533_v55 }
 0x430   : > { %v5272_v51 = vpack.c.bf16 %v5141_v35, %v5141_v35  ;;  %v5409_v27 = vpack.c.bf16 %v5239_v41, %v5239_v41  ;;  %v6243_v9 = vpop.f32.mrf.mxu3  ;;  %v9435_v36 = vor.u32 %v10167_v23, %v9434_v59  ;;  %vm5004_vm2 = vweird.f32 %v4533_v55  ;;  %v10096_v30 = vld [vmem:[#allocation3 + $0x118] sm:$0xf0] }
 0x431   : > { %6369 = vmatmul.bf16.gmra.mxu0 %v9143_v11  ;;  %v6244_v32 = vadd.f32 %v6243_v9, %v14646_v46  ;;  %v10107_v5 = vld [vmem:[#allocation3 + $0x170] sm:$0xf0]  ;;  %v5011_v42 = vor.u32 1.1754944e-38, %v5010_v57  ;;  %vm5009_vm10 = vcmp.eq.f32.partialorder %v5008_v45, 8.507059e+37  ;;  %v9155_v12 = vor.u32 %v10096_v30, %v9154_v0  ;;  %v10170_v30 = vld [vmem:[#allocation3 + $0x140] sm:$0xf0] }
 0x432   : > { %5307 = vst [vmem:[#allocation3 + $0x180] sm:$0xf] %v5272_v51  ;;  %v15010_v18 = vpop.f32.mrf.mxu2  ;;  %v9195_v46 = vor.u32 %v10107_v5, %v9194_v33  ;;  %v16452_v57 = vld [vmem:[#allocation66_spill] sm:$0xff] }
 0x433   : > { %5443 = vst [vmem:[#allocation3 + $0x17c] sm:$0xf] %v5409_v27  ;;  %v6332_v37 = vpop.f32.mrf.mxu0  ;;  %vm16453_vm13 = vnez %v16452_v57 }
 0x434   : > { %v10656_v7 = vpop.eup %10655  ;;  %v15013_v47 = vadd.f32 %v6332_v37, %v6244_v32 }
 0x435   : > { %v5000_v31 = vmul.f32 %v10656_v7, %v4533_v55  ;;  %vm5005_vm3 = vweird.f32 %v10656_v7 }
 0x436   : > { %6285 = vmatmul.bf16.gmra.mxu3 %v9151_v29  ;;  %vm5006_vm12 = vmor %vm5004_vm2, %vm5005_vm3 }
 0x437   : > { %v5001_v56 = vsub.f32 1.0, %v5000_v31  ;;  %v15015_v28 = vpop.f32.mrf.mxu1 }
 0x438   : > { %v6246_v11 = vpop.f32.mrf.mxu3 }
 0x439   : > { %v5002_v38 = vmul.f32 %v10656_v7, %v5001_v56  ;;  %v6247_v35 = vadd.f32 %v6246_v11, %v14692_v20  ;;  %v10097_v20 = vld [vmem:[#allocation3 + $0x124] sm:$0xf] }
 0x43a   : > { %v15018_v27 = vpop.f32.mrf.mxu2 }
 0x43b   : > { %v5003_v6 = vadd.f32 %v10656_v7, %v5002_v38  ;;  %v16454_v38 = vld [vmem:[#allocation76_spill] sm:$0xff] }
 0x43c   : > { %7008 = vmatmul.bf16.gmra.mxu1 %v9435_v36  ;;  %vm16455_vm0 = vnez %v16454_v38 }
 0x43d   : > { %v5007_v13 = vsel %vm5006_vm12, %v10656_v7, %v5003_v6  ;;  %v6335_v41 = vpop.f32.mrf.mxu0  ;;  %v9163_v7 = vor.u32 %v10097_v20, %v9160_v39  ;;  %v9166_v39 = vld [vmem:[#allocation3 + $0x128] sm:$0xf] }
 0x43e   : > { %v5012_v51 = vsel %vm5009_vm10, %v5011_v42, %v5007_v13  ;;  %v15020_v25 = vadd.f32 %v6335_v41, %v6247_v35  ;;  %6216 = vmatmul.bf16.gmra.mxu2 %v9195_v46  ;;  %v9446_v42 = vld [vmem:[#allocation3 + $0x138] sm:$0xf]  ;;  %v9304_v35 = vld [vmem:[#allocation3 + $0x24] sm:$0xf0]  ;;  %v10099_v41 = vld [vmem:[#allocation3 + $0x130] sm:$0xf0] }
 0x43f   : > { %v5045_v55 = vmul.f32 %v5012_v51, %v14954_v63  ;;  %v15023_v32 = vpop.f32.mrf.mxu1  ;;  %v9447_v13 = vor.u32 %v10170_v30, %v9446_v42  ;;  %v10275_v20 = vld [vmem:[#allocation10 + $0x230] sm:$0xff]  ;;  %v10136_v30 = vld [vmem:[#allocation3 + $0x34] sm:$0xf] }
 0x440   : > { %v6248_v23 = vpop.f32.mrf.mxu3  ;;  %7936 = vmatpush.bf16.msra.mxu2 %v10275_v20  ;;  %v10265_v20 = vld [vmem:[#allocation10 + $0x1e0] sm:$0xff] }
 0x441   : > { %6374 = vmatmul.bf16.gmra.mxu0 %v9155_v12  ;;  %v5077_v16 = vrot.slane %v5045_v55, 7  ;;  %v5175_v9 = vrot.slane %v5045_v55, 1  ;;  %v5342_v29 = vpack.c.bf16 %v5045_v55, %v5045_v55  ;;  %v6249_v46 = vadd.f32 %v6248_v23, %v14748_v58  ;;  %v10133_v58 = vld [vmem:[#allocation3 + $0x1c] sm:$0xf] }
 0x442   : > { %v15042_v21 = vpop.f32.mrf.mxu2  ;;  %v9307_v12 = vor.u32 %v10133_v58, %v9304_v35 }
 0x443   : > { %v5078_v31 = vsel %vm16448_vm7, %v5077_v16, 0.0  ;;  %v5079_v37 = vsel %vm16449_vm9, %v5076_v4, %v5077_v16  ;;  %v5176_v63 = vsel %vm16450_vm8, %v5175_v9, 0.0  ;;  %v5177_v56 = vsel %vm16451_vm5, %v5174_v22, %v5175_v9  ;;  %5376 = vst [vmem:[#allocation3 + $0x190] sm:$0xf] %v5342_v29 }
 0x444   : > { %v5143_v5 = vsel %vm16453_vm13, %v5078_v31, 0.0  ;;  %v5241_v45 = vsel %vm16455_vm0, %v5176_v63, 0.0  ;;  %v5273_v59 = vpack.c.bf16 %v5079_v37, %v5079_v37  ;;  %v5410_v33 = vpack.c.bf16 %v5177_v56, %v5177_v56  ;;  %v10259_v37 = vld [vmem:[#allocation10 + $0x1b0] sm:$0xff]  ;;  %v10100_v56 = vld [vmem:[#allocation3 + $0x13c] sm:$0xf] }
 0x445   : > { %v5274_v36 = vpack.c.bf16 %v5143_v5, %v5143_v5  ;;  %v5411_v4 = vpack.c.bf16 %v5241_v45, %v5241_v45  ;;  %v6337_v6 = vpop.f32.mrf.mxu0  ;;  %v9167_v9 = vor.u32 %v10099_v41, %v9166_v39  ;;  %v10267_v63 = vld [vmem:[#allocation10 + $0x1f0] sm:$0xff]  ;;  %7758 = vmatpush.bf16.msra.mxu0 %v10259_v37  ;;  %v10202_v39 = vld [vmem:[#allocation10 + $0x168] sm:$0xff] }
 0x446   : > { %6290 = vmatmul.bf16.gmra.mxu3 %v9163_v7  ;;  %5308 = vst [vmem:[#allocation3 + $0x18c] sm:$0xf] %v5273_v59  ;;  %v15044_v22 = vadd.f32 %v6337_v6, %v6249_v46  ;;  %v9172_v7 = vld [vmem:[#allocation3 + $0x144] sm:$0xf0]  ;;  %7847 = vmatpush.bf16.msra.mxu1 %v10267_v63  ;;  %v10173_v59 = vld [vmem:[#allocation3 + $0x158] sm:$0xf0] }
 0x447   : > { %5309 = vst [vmem:[#allocation3 + $0x198] sm:$0xf] %v5274_v36  ;;  %v15046_v11 = vpop.f32.mrf.mxu1  ;;  %v9458_v36 = vld [vmem:[#allocation3 + $0x150] sm:$0xf]  ;;  %v10102_v46 = vld [vmem:[#allocation3 + $0x148] sm:$0xf0]  ;;  %7125 = vmatpush.bf16.msra.mxu3 %v10202_v39 }
 0x448   : > { %5444 = vst [vmem:[#allocation3 + $0x188] sm:$0xf] %v5410_v33  ;;  %v6251_v0 = vpop.f32.mrf.mxu3  ;;  %v9459_v6 = vor.u32 %v10173_v59, %v9458_v36  ;;  %v10201_v63 = vld [vmem:[#allocation10 + $0x160] sm:$0xff] }
 0x449   : > { %5445 = vst [vmem:[#allocation3 + $0x194] sm:$0xf] %v5411_v4  ;;  %v6252_v51 = vadd.f32 %v6251_v0, %v14809_v17  ;;  %v9175_v17 = vor.u32 %v10100_v56, %v9172_v7  ;;  %v9316_v4 = vld [vmem:[#allocation3 + $0x3c] sm:$0xf0]  ;;  %v10103_v7 = vld [vmem:[#allocation3 + $0x154] sm:$0xf] }
 0x44a   : > { %v15049_v16 = vpop.f32.mrf.mxu2  ;;  %v9319_v35 = vor.u32 %v10136_v30, %v9316_v4  ;;  %v10257_v56 = vld [vmem:[#allocation10 + $0x1a0] sm:$0xff]  ;;  %v9470_v4 = vld [vmem:[#allocation3 + $0x168] sm:$0xf] }
 0x44b   : > { %v10176_v36 = vld [vmem:[#allocation3 + $0x170] sm:$0xf0]  ;;  %7126 = vmatpush.bf16.msra.mxu3 %v10201_v63  ;;  %v10263_v30 = vld [vmem:[#allocation10 + $0x1d0] sm:$0xff]  ;;  %v9190_v39 = vld [vmem:[#allocation3 + $0x158] sm:$0xf] }
 0x44c   : > { %7013 = vmatmul.bf16.gmra.mxu1 %v9447_v13  ;;  %v9178_v13 = vld [vmem:[#allocation3 + $0x140] sm:$0xf]  ;;  %v9196_v63 = vld [vmem:[#allocation3 + $0x174] sm:$0xf0] }
 0x44d   : > { %v6340_v55 = vpop.f32.mrf.mxu0  ;;  %v9179_v0 = vor.u32 %v10102_v46, %v9178_v13  ;;  %v10200_v46 = vld [vmem:[#allocation10 + $0x158] sm:$0xff] }
 0x44e   : > { %v15051_v29 = vadd.f32 %v6340_v55, %v6252_v51  ;;  %7042 = vmatmul.bf16.vlgmr.msrb.gmra.mxu2 %v9307_v12  ;;  %v10266_v51 = vld [vmem:[#allocation10 + $0x1e8] sm:$0xff]  ;;  %v10139_v13 = vld [vmem:[#allocation3 + $0x4c] sm:$0xf] }
 0x44f   : > { %v15053_v31 = vpop.f32.mrf.mxu1  ;;  %v9184_v12 = vld [vmem:[#allocation3 + $0x15c] sm:$0xf0]  ;;  %7848 = vmatpush.bf16.msra.mxu1 %v10266_v51  ;;  %7127 = vmatpush.bf16.msra.mxu3 %v10200_v46 }
 0x450   : > { %v6253_v23 = vpop.f32.mrf.mxu3  ;;  %v9187_v37 = vor.u32 %v10103_v7, %v9184_v12  ;;  %v10274_v7 = vld [vmem:[#allocation10 + $0x228] sm:$0xff] }
 0x451   : > { %6379 = vmatmul.bf16.gmra.mxu0 %v9167_v9  ;;  %v6254_v57 = vadd.f32 %v6253_v23, %v14866_v10  ;;  %v10258_v9 = vld [vmem:[#allocation10 + $0x1a8] sm:$0xff]  ;;  %7937 = vmatpush.bf16.msra.mxu2 %v10274_v7 }
 0x452   : > { %v15056_v38 = vpop.f32.mrf.mxu2  ;;  %7759 = vmatpush.bf16.msra.mxu0 %v10258_v9 }
 0x453   : > { %7849 = vmatpush.bf16.msra.mxu1 %v10265_v20 }
 0x455   : > { %v6342_v5 = vpop.f32.mrf.mxu0 }
 0x456   : > { %6295 = vmatmul.bf16.gmra.mxu3 %v9175_v17  ;;  %v15058_v45 = vadd.f32 %v6342_v5, %v6254_v57  ;;  %v10264_v57 = vld [vmem:[#allocation10 + $0x1d8] sm:$0xff]  ;;  %7760 = vmatpush.bf16.msra.mxu0 %v10257_v56  ;;  %v10262_v56 = vld [vmem:[#allocation10 + $0x1c8] sm:$0xff] }
 0x457   : > { %v15060_v33 = vpop.f32.mrf.mxu1  ;;  %7850 = vmatpush.bf16.msra.mxu1 %v10264_v57  ;;  %v10198_v57 = vld [vmem:[#allocation10 + $0x148] sm:$0xff] }
 0x458   : > { %v6256_v2 = vpop.f32.mrf.mxu3 }
 0x459   : > { %v6257_v42 = vadd.f32 %v6256_v2, %v14922_v26  ;;  %v10256_v2 = vld [vmem:[#allocation10 + $0x198] sm:$0xff] }
 0x45a   : > { %v15063_v41 = vpop.f32.mrf.mxu2  ;;  %7761 = vmatpush.bf16.msra.mxu0 %v10256_v2  ;;  %v10261_v2 = vld [vmem:[#allocation10 + $0x1c0] sm:$0xff] }
 0x45b   : > { %7851 = vmatpush.bf16.msra.mxu1 %v10263_v30 }
 0x45c   : > { %7018 = vmatmul.bf16.gmra.mxu1 %v9459_v6 }
 0x45d   : > { %v6345_v10 = vpop.f32.mrf.mxu0 }
 0x45e   : > { %v15065_v58 = vadd.f32 %v6345_v10, %v6257_v42  ;;  %7047 = vmatmul.bf16.gmra.mxu2 %v9319_v35  ;;  %v9328_v42 = vld [vmem:[#allocation3 + $0x54] sm:$0xf0]  ;;  %v10105_v35 = vld [vmem:[#allocation3 + $0x160] sm:$0xf0] }
 0x45f   : > { %v15067_v55 = vpop.f32.mrf.mxu1  ;;  %v9331_v51 = vor.u32 %v10139_v13, %v9328_v42  ;;  %v9191_v9 = vor.u32 %v10105_v35, %v9190_v39  ;;  %7852 = vmatpush.bf16.msra.mxu1 %v10262_v56  ;;  %v10197_v35 = vld [vmem:[#allocation10 + $0x140] sm:$0xff]  ;;  %v10179_v13 = vld [vmem:[#allocation3 + $0x188] sm:$0xf0] }
 0x460   : > { %16456 = vst [vmem:[#allocation25_spill] sm:$0xff] %v15067_v55  ;;  %v6258_v26 = vpop.f32.mrf.mxu3  ;;  %v9340_v39 = vld [vmem:[#allocation3 + $0x6c] sm:$0xf0] }
 0x461   : > { %6384 = vmatmul.bf16.gmra.mxu0 %v9179_v0  ;;  %v6259_v23 = vadd.f32 %v6258_v26, %v14968_v24  ;;  %v9471_v24 = vor.u32 %v10176_v36, %v9470_v4  ;;  %v10199_v26 = vld [vmem:[#allocation10 + $0x150] sm:$0xff]  ;;  %v10254_v36 = vld [vmem:[#allocation10 + $0x188] sm:$0xff] }
 0x462   : > { %v15072_v59 = vpop.f32.mrf.mxu2  ;;  %7128 = vmatpush.bf16.msra.mxu3 %v10199_v26  ;;  %v10142_v26 = vld [vmem:[#allocation3 + $0x64] sm:$0xf] }
 0x463   : > { %7853 = vmatpush.bf16.msra.mxu1 %v10261_v2 }
 0x465   : > { %v6347_v17 = vpop.f32.mrf.mxu0 }
 0x466   : > { %6300 = vmatmul.bf16.gmra.mxu3 %v9187_v37  ;;  %v15070_v5 = vadd.f32 %v6347_v17, %v6259_v23  ;;  %v10255_v37 = vld [vmem:[#allocation10 + $0x190] sm:$0xff] }
 0x467   : > { %7762 = vmatpush.bf16.msra.mxu0 %v10255_v37  ;;  %7129 = vmatpush.bf16.msra.mxu3 %v10198_v57 }
 0x468   : > { %v15074_v6 = vpop.f32.mrf.mxu1  ;;  %v6261_v10 = vpop.f32.mrf.mxu3 }
 0x469   : > { %16457 = vst [vmem:[#allocation24_spill] sm:$0xff] %v15074_v6  ;;  %v6262_v0 = vadd.f32 %v6261_v10, %v14991_v54  ;;  %v10106_v54 = vld [vmem:[#allocation3 + $0x16c] sm:$0xf]  ;;  %v10253_v10 = vld [vmem:[#allocation10 + $0x180] sm:$0xff] }
 0x46a   : > { %v9199_v46 = vor.u32 %v10106_v54, %v9196_v63  ;;  %v9343_v63 = vor.u32 %v10142_v26, %v9340_v39  ;;  %v9202_v54 = vld [vmem:[#allocation3 + $0x170] sm:$0xf] }
 0x46b   : > { %7763 = vmatpush.bf16.msra.mxu0 %v10254_v36  ;;  %7130 = vmatpush.bf16.msra.mxu3 %v10197_v35 }
 0x46c   : > { %7023 = vmatmul.bf16.gmra.mxu1 %v9471_v24 }
 0x46e   : > { %v6350_v12 = vpop.f32.mrf.mxu0  ;;  %7052 = vmatmul.bf16.gmra.mxu2 %v9331_v51  ;;  %v15079_v23 = vpop.f32.mrf.mxu2 }
 0x46f   : > { %v15077_v20 = vadd.f32 %v6350_v12, %v6262_v0  ;;  %v9482_v12 = vld [vmem:[#allocation3 + $0x180] sm:$0xf]  ;;  %7764 = vmatpush.bf16.msra.mxu0 %v10253_v10 }
 0x470   : > { %v15081_v17 = vpop.f32.mrf.mxu1  ;;  %v6263_v4 = vpop.f32.mrf.mxu3 }
 0x471   : > { %6389 = vmatmul.bf16.gmra.mxu0 %v9191_v9  ;;  %16458 = vst [vmem:[#allocation29_spill] sm:$0xff] %v15081_v17  ;;  %v6264_v30 = vadd.f32 %v6263_v4, %v15010_v18  ;;  %v9483_v9 = vor.u32 %v10179_v13, %v9482_v12  ;;  %v10108_v18 = vld [vmem:[#allocation3 + $0x178] sm:$0xf0]  ;;  %v10135_v4 = vld [vmem:[#allocation3 + $0x28] sm:$0xf0] }
 0x472   : > { %v9203_v57 = vor.u32 %v10108_v18, %v9202_v54  ;;  %v9592_v12 = vld [vmem:[#allocation3 + $0x3c] sm:$0xf0]  ;;  %v10205_v18 = vld [vmem:[#allocation3 + $0x34] sm:$0xf] }
 0x473   : > { %v9595_v26 = vor.u32 %v10205_v18, %v9592_v12  ;;  %v9322_v12 = vld [vmem:[#allocation3 + $0x38] sm:$0xf] }
 0x476   : > { %v6352_v42 = vpop.f32.mrf.mxu0  ;;  %6305 = vmatmul.bf16.gmra.mxu3 %v9199_v46  ;;  %v15086_v0 = vpop.f32.mrf.mxu2 }
 0x477   : > { %v15084_v24 = vadd.f32 %v6352_v42, %v6264_v30  ;;  %v9310_v30 = vld [vmem:[#allocation3 + $0x20] sm:$0xf] }
 0x478   : > { %v15088_v51 = vpop.f32.mrf.mxu1  ;;  %v6266_v7 = vpop.f32.mrf.mxu3  ;;  %v9311_v35 = vor.u32 %v10135_v4, %v9310_v30  ;;  %v9590_v4 = vld [vmem:[#allocation3 + $0x30] sm:$0xf] }
 0x479   : > { %16459 = vst [vmem:[#allocation28_spill] sm:$0xff] %v15088_v51  ;;  %v6267_v37 = vadd.f32 %v6266_v7, %v15018_v27  ;;  %v9352_v7 = vld [vmem:[#allocation3 + $0x84] sm:$0xf0] }
 0x47c   : > { %7028 = vmatmul.bf16.gmra.mxu1 %v9483_v9 }
 0x47e   : > { %v6355_v56 = vpop.f32.mrf.mxu0  ;;  %7057 = vmatmul.bf16.gmra.mxu2 %v9343_v63  ;;  %v15093_v46 = vpop.f32.mrf.mxu2 }
 0x47f   : > { %v15091_v36 = vadd.f32 %v6355_v56, %v6267_v37  ;;  %v10206_v37 = vld [vmem:[#allocation3 + $0x38] sm:$0xf0] }
 0x480   : > { %v15095_v2 = vpop.f32.mrf.mxu1  ;;  %v6268_v42 = vpop.f32.mrf.mxu3  ;;  %v10145_v56 = vld [vmem:[#allocation3 + $0x7c] sm:$0xf]  ;;  %v9591_v30 = vor.u32 %v10206_v37, %v9590_v4  ;;  %v9604_v37 = vld [vmem:[#allocation3 + $0x54] sm:$0xf0] }
 0x481   : > { %6394 = vmatmul.bf16.gmra.mxu0 %v9203_v57  ;;  %16460 = vst [vmem:[#allocation30_spill] sm:$0xff] %v15095_v2  ;;  %v6269_v10 = vadd.f32 %v6268_v42, %v15042_v21  ;;  %v9355_v57 = vor.u32 %v10145_v56, %v9352_v7 }
 0x486   : > { %v6357_v13 = vpop.f32.mrf.mxu0  ;;  %7131 = vmatmul.bf16.vlgmr.msra.gmra.mxu3 %v9311_v35  ;;  %v15100_v39 = vpop.f32.mrf.mxu2  ;;  %v10273_v35 = vld [vmem:[#allocation10 + $0x220] sm:$0xff] }
 0x487   : > { %v15098_v27 = vadd.f32 %v6357_v13, %v6269_v10  ;;  %v10138_v10 = vld [vmem:[#allocation3 + $0x40] sm:$0xf0]  ;;  %7938 = vmatpush.bf16.msra.mxu2 %v10273_v35  ;;  %v10148_v35 = vld [vmem:[#allocation3 + $0x94] sm:$0xf] }
 0x488   : > { %v15102_v9 = vpop.f32.mrf.mxu1  ;;  %v6271_v63 = vpop.f32.mrf.mxu3 }
 0x489   : > { %16461 = vst [vmem:[#allocation21_spill] sm:$0xff] %v15102_v9  ;;  %v6272_v54 = vadd.f32 %v6271_v63, %v15049_v16 }
 0x48c   : > { %7854 = vmatmul.bf16.vlgmr.msra.gmra.mxu1 %v9595_v26  ;;  %v9323_v26 = vor.u32 %v10138_v10, %v9322_v12 }
 0x48e   : > { %v6360_v21 = vpop.f32.mrf.mxu0  ;;  %7062 = vmatmul.bf16.gmra.mxu2 %v9355_v57  ;;  %v15107_v13 = vpop.f32.mrf.mxu2  ;;  %v10208_v57 = vld [vmem:[#allocation3 + $0x4c] sm:$0xf] }
 0x48f   : > { %v15105_v42 = vadd.f32 %v6360_v21, %v6272_v54  ;;  %v9364_v21 = vld [vmem:[#allocation3 + $0x9c] sm:$0xf0]  ;;  %v9607_v4 = vor.u32 %v10208_v57, %v9604_v37  ;;  %v9334_v37 = vld [vmem:[#allocation3 + $0x50] sm:$0xf] }
 0x490   : > { %v15109_v9 = vpop.f32.mrf.mxu1  ;;  %v6273_v18 = vpop.f32.mrf.mxu3  ;;  %v9367_v12 = vor.u32 %v10148_v35, %v9364_v21 }
 0x491   : > { %7765 = vmatmul.bf16.vlgmr.msra.gmra.mxu0 %v9591_v30  ;;  %16462 = vst [vmem:[#allocation37_spill] sm:$0xff] %v15109_v9  ;;  %v6274_v16 = vadd.f32 %v6273_v18, %v15056_v38  ;;  %v10209_v30 = vld [vmem:[#allocation3 + $0x50] sm:$0xf0]  ;;  %v9602_v18 = vld [vmem:[#allocation3 + $0x48] sm:$0xf] }
 0x496   : > { %v6362_v7 = vpop.f32.mrf.mxu0  ;;  %7136 = vmatmul.bf16.gmra.mxu3 %v9323_v26  ;;  %v15114_v56 = vpop.f32.mrf.mxu2  ;;  %v9603_v26 = vor.u32 %v10209_v30, %v9602_v18  ;;  %v10211_v30 = vld [vmem:[#allocation3 + $0x64] sm:$0xf] }
 0x497   : > { %v15112_v63 = vadd.f32 %v6362_v7, %v6274_v16  ;;  %v10141_v7 = vld [vmem:[#allocation3 + $0x58] sm:$0xf0] }
 0x498   : > { %v9335_v51 = vor.u32 %v10141_v7, %v9334_v37 }
 0x499   : > { %v15116_v54 = vpop.f32.mrf.mxu1  ;;  %v6276_v9 = vpop.f32.mrf.mxu3 }
 0x49a   : > { %16463 = vst [vmem:[#allocation36_spill] sm:$0xff] %v15116_v54  ;;  %v6277_v10 = vadd.f32 %v6276_v9, %v15063_v41  ;;  %v9616_v9 = vld [vmem:[#allocation3 + $0x6c] sm:$0xf0] }
 0x49c   : > { %7859 = vmatmul.bf16.gmra.mxu1 %v9607_v4 }
 0x49e   : > { %v6365_v38 = vpop.f32.mrf.mxu0  ;;  %7067 = vmatmul.bf16.gmra.mxu2 %v9367_v12  ;;  %v9619_v12 = vor.u32 %v10211_v30, %v9616_v9  ;;  %v9346_v30 = vld [vmem:[#allocation3 + $0x68] sm:$0xf] }
 0x49f   : > { %v15119_v16 = vadd.f32 %v6365_v38, %v6277_v10  ;;  %v9376_v10 = vld [vmem:[#allocation3 + $0xb4] sm:$0xf0]  ;;  %v10212_v38 = vld [vmem:[#allocation3 + $0x68] sm:$0xf0] }
 0x4a1   : > { %7770 = vmatmul.bf16.gmra.mxu0 %v9603_v26  ;;  %v15121_v2 = vpop.f32.mrf.mxu1  ;;  %v15123_v54 = vpop.f32.mrf.mxu2  ;;  %v10151_v26 = vld [vmem:[#allocation3 + $0xac] sm:$0xf] }
 0x4a2   : > { %16464 = vst [vmem:[#allocation39_spill] sm:$0xff] %v15121_v2  ;;  %v6278_v57 = vpop.f32.mrf.mxu3  ;;  %v9379_v37 = vor.u32 %v10151_v26, %v9376_v10  ;;  %v9628_v26 = vld [vmem:[#allocation3 + $0x84] sm:$0xf0] }
 0x4a3   : > { %v6279_v4 = vadd.f32 %v6278_v57, %v15072_v59  ;;  %v9614_v57 = vld [vmem:[#allocation3 + $0x60] sm:$0xf] }
 0x4a6   : > { %v6367_v17 = vpop.f32.mrf.mxu0  ;;  %7141 = vmatmul.bf16.gmra.mxu3 %v9335_v51  ;;  %v9615_v51 = vor.u32 %v10212_v38, %v9614_v57  ;;  %v10214_v57 = vld [vmem:[#allocation3 + $0x7c] sm:$0xf] }
 0x4a7   : > { %v15126_v41 = vadd.f32 %v6367_v17, %v6279_v4  ;;  %v10272_v4 = vld [vmem:[#allocation10 + $0x218] sm:$0xff] }
 0x4a8   : > { %7939 = vmatpush.bf16.msra.mxu2 %v10272_v4  ;;  %v9631_v4 = vor.u32 %v10214_v57, %v9628_v26  ;;  %v10147_v26 = vld [vmem:[#allocation3 + $0x88] sm:$0xf0]  ;;  %v9358_v57 = vld [vmem:[#allocation3 + $0x80] sm:$0xf] }
 0x4a9   : > { %v15128_v21 = vpop.f32.mrf.mxu1  ;;  %v15130_v35 = vpop.f32.mrf.mxu2 }
 0x4aa   : > { %16465 = vst [vmem:[#allocation38_spill] sm:$0xff] %v15128_v21  ;;  %v6281_v18 = vpop.f32.mrf.mxu3  ;;  %v10144_v21 = vld [vmem:[#allocation3 + $0x70] sm:$0xf0] }
 0x4ab   : > { %v6282_v7 = vadd.f32 %v6281_v18, %v15079_v23  ;;  %v15142_v23 = vld [vmem:[%s15709_s8] ss:$0 sm:$0xff] }
 0x4ac   : > { %7864 = vmatmul.bf16.gmra.mxu1 %v9619_v12  ;;  %v9347_v12 = vor.u32 %v10144_v21, %v9346_v30  ;;  %v9388_v21 = vld [vmem:[#allocation3 + $0xcc] sm:$0xf0] }
 0x4ae   : > { %v6370_v59 = vpop.f32.mrf.mxu0  ;;  %7072 = vmatmul.bf16.gmra.mxu2 %v9379_v37 }
 0x4af   : > { %v15133_v17 = vadd.f32 %v6370_v59, %v6282_v7  ;;  %v16469_v7 = vld [vmem:[#allocation60_spill] sm:$0xff] }
 0x4b0   : > { %v5542_v37 = vadd.f32 %v15142_v23, %v16469_v7 }
 0x4b1   : > { %16466 = vst [vmem:[#allocation42_spill] sm:$0xff] %v15133_v17  ;;  %7775 = vmatmul.bf16.gmra.mxu0 %v9615_v51  ;;  %v15135_v2 = vpop.f32.mrf.mxu1  ;;  %v15137_v9 = vpop.f32.mrf.mxu2 }
 0x4b2   : > { %16467 = vst [vmem:[#allocation41_spill] sm:$0xff] %v15135_v2  ;;  %v6283_v6 = vpop.f32.mrf.mxu3  ;;  %v15154_v30 = vadd.f32 %v14900_v34, %v5542_v37  ;;  %v10215_v2 = vld [vmem:[#allocation3 + $0x80] sm:$0xf0] }
 0x4b3   : > { %v6284_v10 = vadd.f32 %v6283_v6, %v15086_v0  ;;  %v10154_v0 = vld [vmem:[#allocation3 + $0xc4] sm:$0xf] }
 0x4b6   : > { %v6372_v38 = vpop.f32.mrf.mxu0  ;;  %7146 = vmatmul.bf16.gmra.mxu3 %v9347_v12 }
 0x4b7   : > { %v15145_v18 = vadd.f32 %v6372_v38, %v6284_v10  ;;  %v9391_v10 = vor.u32 %v10154_v0, %v9388_v21  ;;  %v9359_v21 = vor.u32 %v10147_v26, %v9358_v57  ;;  %v9640_v0 = vld [vmem:[#allocation3 + $0x9c] sm:$0xf0]  ;;  %v10218_v26 = vld [vmem:[#allocation3 + $0x98] sm:$0xf0] }
 0x4b8   : > { %v10157_v57 = vld [vmem:[#allocation3 + $0xdc] sm:$0xf] }
 0x4b9   : > { %16468 = vst [vmem:[#allocation48_spill] sm:$0xff] %v15145_v18  ;;  %v15149_v59 = vpop.f32.mrf.mxu1  ;;  %v15151_v51 = vpop.f32.mrf.mxu2  ;;  %v9626_v18 = vld [vmem:[#allocation3 + $0x78] sm:$0xf] }
 0x4ba   : > { %16470 = vst [vmem:[#allocation47_spill] sm:$0xff] %v15149_v59  ;;  %v6286_v6 = vpop.f32.mrf.mxu3  ;;  %v9627_v7 = vor.u32 %v10215_v2, %v9626_v18  ;;  %v16472_v59 = vld [vmem:[#allocation26_spill] sm:$0xff] }
 0x4bb   : > { %v6287_v12 = vadd.f32 %v6286_v6, %v15093_v46  ;;  %v5544_v17 = vadd.f32 %v15142_v23, %v16472_v59  ;;  %v16475_v59 = vld [vmem:[#allocation63_spill] sm:$0xff] }
 0x4bc   : > { %7869 = vmatmul.bf16.gmra.mxu1 %v9631_v4 }
 0x4bd   : > { %v15166_v4 = vadd.f32 %v14957_v60, %v5544_v17 }
 0x4be   : > { %v6375_v38 = vpop.f32.mrf.mxu0  ;;  %7077 = vmatmul.bf16.gmra.mxu2 %v9391_v10 }
 0x4bf   : > { %v15157_v55 = vadd.f32 %v6375_v38, %v6287_v12  ;;  %v5547_v12 = vadd.f32 %v15142_v23, %v16475_v59  ;;  %v10217_v38 = vld [vmem:[#allocation3 + $0x94] sm:$0xf] }
 0x4c0   : > { %v9643_v60 = vor.u32 %v10217_v38, %v9640_v0 }
 0x4c1   : > { %16471 = vst [vmem:[#allocation52_spill] sm:$0xff] %v15157_v55  ;;  %7780 = vmatmul.bf16.gmra.mxu0 %v9627_v7  ;;  %v15161_v34 = vpop.f32.mrf.mxu1  ;;  %v15163_v37 = vpop.f32.mrf.mxu2  ;;  %v15178_v17 = vadd.f32 %v14961_v15, %v5547_v12  ;;  %v16478_v55 = vld [vmem:[#allocation78_spill] sm:$0xff]  ;;  %v10150_v15 = vld [vmem:[#allocation3 + $0xa0] sm:$0xf0] }
 0x4c2   : > { %16473 = vst [vmem:[#allocation51_spill] sm:$0xff] %v15161_v34  ;;  %v6288_v46 = vpop.f32.mrf.mxu3  ;;  %v9400_v34 = vld [vmem:[#allocation3 + $0xe4] sm:$0xf0]  ;;  %v5549_v0 = vadd.f32 %v15142_v23, %v16478_v55  ;;  %v9652_v55 = vld [vmem:[#allocation3 + $0xb4] sm:$0xf0] }
 0x4c3   : > { %v6289_v2 = vadd.f32 %v6288_v46, %v15100_v39 }
 0x4c6   : > { %v6377_v18 = vpop.f32.mrf.mxu0  ;;  %7151 = vmatmul.bf16.gmra.mxu3 %v9359_v21  ;;  %v9403_v21 = vor.u32 %v10157_v57, %v9400_v34 }
 0x4c7   : > { %v15169_v6 = vadd.f32 %v6377_v18, %v6289_v2  ;;  %v9638_v18 = vld [vmem:[#allocation3 + $0x90] sm:$0xf] }
 0x4c8   : > { %v9639_v59 = vor.u32 %v10218_v26, %v9638_v18 }
 0x4c9   : > { %16474 = vst [vmem:[#allocation49_spill] sm:$0xff] %v15169_v6  ;;  %v15173_v10 = vpop.f32.mrf.mxu1  ;;  %v15175_v7 = vpop.f32.mrf.mxu2 }
 0x4ca   : > { %16476 = vst [vmem:[#allocation58_spill] sm:$0xff] %v15173_v10  ;;  %v6291_v39 = vpop.f32.mrf.mxu3  ;;  %v10271_v10 = vld [vmem:[#allocation10 + $0x210] sm:$0xff] }
 0x4cb   : > { %v6292_v46 = vadd.f32 %v6291_v39, %v15107_v13  ;;  %7940 = vmatpush.bf16.msra.mxu2 %v10271_v10  ;;  %v15190_v13 = vadd.f32 %v14972_v14, %v5549_v0  ;;  %v10220_v10 = vld [vmem:[#allocation3 + $0xac] sm:$0xf] }
 0x4cc   : > { %7874 = vmatmul.bf16.gmra.mxu1 %v9643_v60  ;;  %v9370_v60 = vld [vmem:[#allocation3 + $0x98] sm:$0xf]  ;;  %v9655_v14 = vor.u32 %v10220_v10, %v9652_v55  ;;  %v10153_v55 = vld [vmem:[#allocation3 + $0xb8] sm:$0xf0]  ;;  %v9382_v10 = vld [vmem:[#allocation3 + $0xb0] sm:$0xf] }
 0x4cd   : > { %v9371_v26 = vor.u32 %v10150_v15, %v9370_v60  ;;  %v10221_v15 = vld [vmem:[#allocation3 + $0xb0] sm:$0xf0] }
 0x4ce   : > { %v6380_v2 = vpop.f32.mrf.mxu0  ;;  %7082 = vmatmul.bf16.gmra.mxu2 %v9403_v21  ;;  %v16481_v21 = vld [vmem:[#allocation80_spill] sm:$0xff]  ;;  %v10160_v60 = vld [vmem:[#allocation3 + $0xf4] sm:$0xf] }
 0x4cf   : > { %v15181_v6 = vadd.f32 %v6380_v2, %v6292_v46  ;;  %v5552_v2 = vadd.f32 %v15142_v23, %v16481_v21 }
 0x4d1   : > { %16477 = vst [vmem:[#allocation56_spill] sm:$0xff] %v15181_v6  ;;  %7785 = vmatmul.bf16.gmra.mxu0 %v9639_v59  ;;  %v15185_v12 = vpop.f32.mrf.mxu1  ;;  %v15187_v38 = vpop.f32.mrf.mxu2  ;;  %v15202_v0 = vadd.f32 %v15006_v61, %v5552_v2 }
 0x4d2   : > { %16479 = vst [vmem:[#allocation59_spill] sm:$0xff] %v15185_v12  ;;  %v6293_v34 = vpop.f32.mrf.mxu3  ;;  %v9412_v12 = vld [vmem:[#allocation3 + $0xfc] sm:$0xf0] }
 0x4d3   : > { %v6294_v39 = vadd.f32 %v6293_v34, %v15114_v56 }
 0x4d6   : > { %v6382_v57 = vpop.f32.mrf.mxu0  ;;  %7156 = vmatmul.bf16.gmra.mxu3 %v9371_v26  ;;  %v9415_v26 = vor.u32 %v10160_v60, %v9412_v12  ;;  %v9383_v12 = vor.u32 %v10153_v55, %v9382_v10  ;;  %v10224_v55 = vld [vmem:[#allocation3 + $0xc8] sm:$0xf0] }
 0x4d7   : > { %v15193_v46 = vadd.f32 %v6382_v57, %v6294_v39  ;;  %v9650_v57 = vld [vmem:[#allocation3 + $0xa8] sm:$0xf]  ;;  %v10163_v10 = vld [vmem:[#allocation3 + $0x10c] sm:$0xf] }
 0x4d8   : > { %v9651_v21 = vor.u32 %v10221_v15, %v9650_v57 }
 0x4d9   : > { %16480 = vst [vmem:[#allocation71_spill] sm:$0xff] %v15193_v46  ;;  %v15197_v18 = vpop.f32.mrf.mxu1  ;;  %v15199_v59 = vpop.f32.mrf.mxu2 }
 0x4da   : > { %16482 = vst [vmem:[#allocation70_spill] sm:$0xff] %v15197_v18  ;;  %v6296_v56 = vpop.f32.mrf.mxu3  ;;  %v16483_v18 = vld [vmem:[#allocation40_spill] sm:$0xff] }
 0x4db   : > { %v6297_v34 = vadd.f32 %v6296_v56, %v15123_v54  ;;  %v5554_v6 = vadd.f32 %v15142_v23, %v16483_v18  ;;  %v5557_v18 = vadd.f32 %v15142_v23, %v13574_v62 }
 0x4dc   : > { %7879 = vmatmul.bf16.gmra.mxu1 %v9655_v14 }
 0x4dd   : > { %v15214_v14 = vadd.f32 %v15013_v47, %v5554_v6  ;;  %v15226_v6 = vadd.f32 %v15020_v25, %v5557_v18  ;;  %v10156_v25 = vld [vmem:[#allocation3 + $0xd0] sm:$0xf0] }
 0x4de   : > { %v6385_v39 = vpop.f32.mrf.mxu0  ;;  %7087 = vmatmul.bf16.gmra.mxu2 %v9415_v26 }
 0x4df   : > { %v15205_v46 = vadd.f32 %v6385_v39, %v6297_v34  ;;  %v9664_v34 = vld [vmem:[#allocation3 + $0xcc] sm:$0xf0]  ;;  %v10223_v39 = vld [vmem:[#allocation3 + $0xc4] sm:$0xf] }
 0x4e0   : > { %v9667_v47 = vor.u32 %v10223_v39, %v9664_v34 }
 0x4e1   : > { %7790 = vmatmul.bf16.gmra.mxu0 %v9651_v21  ;;  %v15209_v61 = vpop.f32.mrf.mxu1  ;;  %v15211_v2 = vpop.f32.mrf.mxu2  ;;  %v9424_v21 = vld [vmem:[#allocation3 + $0x114] sm:$0xf0] }
 0x4e2   : > { %16484 = vst [vmem:[#allocation57_spill] sm:$0xff] %v15209_v61  ;;  %v6298_v54 = vpop.f32.mrf.mxu3 }
 0x4e3   : > { %v6299_v15 = vadd.f32 %v6298_v54, %v15130_v35 }
 0x4e6   : > { %v6387_v56 = vpop.f32.mrf.mxu0  ;;  %7161 = vmatmul.bf16.gmra.mxu3 %v9383_v12  ;;  %v9427_v12 = vor.u32 %v10163_v10, %v9424_v21 }
 0x4e7   : > { %v15217_v60 = vadd.f32 %v6387_v56, %v6299_v15  ;;  %v9662_v56 = vld [vmem:[#allocation3 + $0xc0] sm:$0xf] }
 0x4e8   : > { %v9663_v62 = vor.u32 %v10224_v55, %v9662_v56 }
 0x4e9   : > { %16485 = vst [vmem:[#allocation55_spill] sm:$0xff] %v15217_v60  ;;  %v15221_v26 = vpop.f32.mrf.mxu1  ;;  %v15223_v57 = vpop.f32.mrf.mxu2  ;;  %v16488_v60 = vld [vmem:[#allocation19_spill] sm:$0xff] }
 0x4ea   : > { %16486 = vst [vmem:[#allocation73_spill] sm:$0xff] %v15221_v26  ;;  %v6301_v35 = vpop.f32.mrf.mxu3  ;;  %v10270_v26 = vld [vmem:[#allocation10 + $0x208] sm:$0xff]  ;;  %v5559_v34 = vadd.f32 %v15142_v23, %v16488_v60  ;;  %v9676_v60 = vld [vmem:[#allocation3 + $0xe4] sm:$0xf0] }
 0x4eb   : > { %v6302_v54 = vadd.f32 %v6301_v35, %v15137_v9  ;;  %7941 = vmatpush.bf16.msra.mxu2 %v10270_v26  ;;  %v10226_v26 = vld [vmem:[#allocation3 + $0xdc] sm:$0xf] }
 0x4ec   : > { %7884 = vmatmul.bf16.gmra.mxu1 %v9667_v47  ;;  %v9394_v47 = vld [vmem:[#allocation3 + $0xc8] sm:$0xf]  ;;  %v15238_v9 = vadd.f32 %v15044_v22, %v5559_v34  ;;  %v9679_v22 = vor.u32 %v10226_v26, %v9676_v60  ;;  %v10159_v60 = vld [vmem:[#allocation3 + $0xe8] sm:$0xf0]  ;;  %v9406_v26 = vld [vmem:[#allocation3 + $0xe0] sm:$0xf] }
 0x4ed   : > { %v9395_v55 = vor.u32 %v10156_v25, %v9394_v47  ;;  %v10227_v25 = vld [vmem:[#allocation3 + $0xe0] sm:$0xf0] }
 0x4ee   : > { %v6390_v15 = vpop.f32.mrf.mxu0  ;;  %7092 = vmatmul.bf16.gmra.mxu2 %v9427_v12  ;;  %v16491_v12 = vld [vmem:[#allocation68_spill] sm:$0xff] }
 0x4ef   : > { %v15229_v61 = vadd.f32 %v6390_v15, %v6302_v54  ;;  %v5562_v15 = vadd.f32 %v15142_v23, %v16491_v12  ;;  %v10166_v47 = vld [vmem:[#allocation3 + $0x124] sm:$0xf] }
 0x4f1   : > { %16487 = vst [vmem:[#allocation72_spill] sm:$0xff] %v15229_v61  ;;  %7795 = vmatmul.bf16.gmra.mxu0 %v9663_v62  ;;  %v15233_v18 = vpop.f32.mrf.mxu1  ;;  %v15235_v39 = vpop.f32.mrf.mxu2  ;;  %v15250_v34 = vadd.f32 %v15051_v29, %v5562_v15 }
 0x4f2   : > { %16489 = vst [vmem:[#allocation62_spill] sm:$0xff] %v15233_v18  ;;  %v6303_v21 = vpop.f32.mrf.mxu3  ;;  %v9436_v18 = vld [vmem:[#allocation3 + $0x12c] sm:$0xf0] }
 0x4f3   : > { %v6304_v35 = vadd.f32 %v6303_v21, %v15151_v51 }
 0x4f6   : > { %v6392_v10 = vpop.f32.mrf.mxu0  ;;  %7166 = vmatmul.bf16.gmra.mxu3 %v9395_v55  ;;  %v9439_v55 = vor.u32 %v10166_v47, %v9436_v18  ;;  %v9407_v18 = vor.u32 %v10159_v60, %v9406_v26 }
 0x4f7   : > { %v15241_v54 = vadd.f32 %v6392_v10, %v6304_v35  ;;  %v9674_v10 = vld [vmem:[#allocation3 + $0xd8] sm:$0xf] }
 0x4f8   : > { %v9675_v12 = vor.u32 %v10227_v25, %v9674_v10  ;;  %v10229_v10 = vld [vmem:[#allocation3 + $0xf4] sm:$0xf] }
 0x4f9   : > { %16490 = vst [vmem:[#allocation53_spill] sm:$0xff] %v15241_v54  ;;  %v15245_v56 = vpop.f32.mrf.mxu1  ;;  %v15247_v62 = vpop.f32.mrf.mxu2 }
 0x4fa   : > { %16492 = vst [vmem:[#allocation64_spill] sm:$0xff] %v15245_v56  ;;  %v6306_v51 = vpop.f32.mrf.mxu3  ;;  %v16494_v56 = vld [vmem:[#allocation81_spill] sm:$0xff] }
 0x4fb   : > { %v6307_v21 = vadd.f32 %v6306_v51, %v15163_v37  ;;  %v5564_v61 = vadd.f32 %v15142_v23, %v16494_v56  ;;  %v16497_v56 = vld [vmem:[#allocation79_spill] sm:$0xff] }
 0x4fc   : > { %7889 = vmatmul.bf16.gmra.mxu1 %v9679_v22 }
 0x4fd   : > { %v15262_v22 = vadd.f32 %v15058_v45, %v5564_v61  ;;  %v9448_v45 = vld [vmem:[#allocation3 + $0x144] sm:$0xf0] }
 0x4fe   : > { %v6395_v35 = vpop.f32.mrf.mxu0  ;;  %7097 = vmatmul.bf16.gmra.mxu2 %v9439_v55  ;;  %v5567_v55 = vadd.f32 %v15142_v23, %v16497_v56  ;;  %v9686_v56 = vld [vmem:[#allocation3 + $0xf0] sm:$0xf] }
 0x4ff   : > { %v15253_v54 = vadd.f32 %v6395_v35, %v6307_v21  ;;  %v9688_v21 = vld [vmem:[#allocation3 + $0xfc] sm:$0xf0] }
 0x500   : > { %v9691_v61 = vor.u32 %v10229_v10, %v9688_v21  ;;  %v15274_v60 = vadd.f32 %v15065_v58, %v5567_v55  ;;  %v5569_v58 = vadd.f32 %v15142_v23, %v13798_v1  ;;  %v10162_v21 = vld [vmem:[#allocation3 + $0x100] sm:$0xf0]  ;;  %v7046_v10 = vadd.f32 %v15199_v59, %v14861_v49 }
 0x501   : > { %16493 = vst [vmem:[#allocation67_spill] sm:$0xff] %v15253_v54  ;;  %7800 = vmatmul.bf16.gmra.mxu0 %v9675_v12  ;;  %v15257_v29 = vpop.f32.mrf.mxu1  ;;  %v15259_v15 = vpop.f32.mrf.mxu2  ;;  %v7044_v12 = vadd.f32 %v15187_v38, %v14811_v52  ;;  %v10269_v38 = vld [vmem:[#allocation10 + $0x200] sm:$0xff]  ;;  %v5572_v49 = vadd.f32 %v15142_v23, %v13853_v43  ;;  %v9698_v43 = vld [vmem:[#allocation3 + $0x108] sm:$0xf] }
 0x502   : > { %16495 = vst [vmem:[#allocation23_spill] sm:$0xff] %v15257_v29  ;;  %v6308_v37 = vpop.f32.mrf.mxu3  ;;  %7942 = vmatpush.bf16.msra.mxu2 %v10269_v38 }
 0x503   : > { %v6309_v25 = vadd.f32 %v6308_v37, %v15175_v7  ;;  %v10230_v7 = vld [vmem:[#allocation3 + $0xf8] sm:$0xf0]  ;;  %v15302_v38 = vadd.f32 %v15077_v20, %v5572_v49  ;;  %v9430_v49 = vld [vmem:[#allocation3 + $0x110] sm:$0xf] }
 0x504   : > { %v10169_v37 = vld [vmem:[#allocation3 + $0x13c] sm:$0xf]  ;;  %v9687_v54 = vor.u32 %v10230_v7, %v9686_v56 }
 0x505   : > { %v10165_v20 = vld [vmem:[#allocation3 + $0x118] sm:$0xf0] }
 0x506   : > { %v6397_v51 = vpop.f32.mrf.mxu0  ;;  %7171 = vmatmul.bf16.gmra.mxu3 %v9407_v18 }
 0x507   : > { %v15265_v47 = vadd.f32 %v6397_v51, %v6309_v25  ;;  %v9451_v25 = vor.u32 %v10169_v37, %v9448_v45  ;;  %v15288_v45 = vadd.f32 %v15070_v5, %v5569_v58  ;;  %v7049_v5 = vadd.f32 %v15211_v2, %v14909_v40  ;;  %v10233_v58 = vld [vmem:[#allocation3 + $0x110] sm:$0xf0] }
 0x508   : > { %v5574_v2 = vadd.f32 %v15142_v23, %v13890_v44 }
 0x509   : > { %16496 = vst [vmem:[#allocation75_spill] sm:$0xff] %v15265_v47  ;;  %v7855_v35 = vpop.f32.mrf.mxu1  ;;  %v15271_v29 = vpop.f32.mrf.mxu2 }
 0x50a   : > { %v7132_v26 = vpop.f32.mrf.mxu3 }
 0x50b   : > { %v7133_v18 = vadd.f32 %v7132_v26, %v7044_v12 }
 0x50c   : > { %7894 = vmatmul.bf16.gmra.mxu1 %v9691_v61 }
 0x50d   : > { %v15279_v52 = vadd.f32 %v7133_v18, %v15154_v30  ;;  %v10232_v18 = vld [vmem:[#allocation3 + $0x10c] sm:$0xf] }
 0x50e   : > { %v7766_v51 = vpop.f32.mrf.mxu0  ;;  %7102 = vmatmul.bf16.gmra.mxu2 %v9451_v25 }
 0x50f   : > { %v15276_v47 = vadd.f32 %v7855_v35, %v7766_v51  ;;  %v9418_v35 = vld [vmem:[#allocation3 + $0xf8] sm:$0xf]  ;;  %v9460_v51 = vld [vmem:[#allocation3 + $0x15c] sm:$0xf0] }
 0x510   : > { %v9419_v61 = vor.u32 %v10162_v21, %v9418_v35 }
 0x511   : > { %7805 = vmatmul.bf16.gmra.mxu0 %v9687_v54  ;;  %v7857_v55 = vpop.f32.mrf.mxu1  ;;  %v15285_v12 = vpop.f32.mrf.mxu2  ;;  %v9700_v54 = vld [vmem:[#allocation3 + $0x114] sm:$0xf0] }
 0x512   : > { %v7134_v30 = vpop.f32.mrf.mxu3  ;;  %v9703_v56 = vor.u32 %v10232_v18, %v9700_v54 }
 0x513   : > { %v7135_v7 = vadd.f32 %v7134_v30, %v7046_v10 }
 0x515   : > { %v15293_v1 = vadd.f32 %v7135_v7, %v15166_v4  ;;  %v10172_v4 = vld [vmem:[#allocation3 + $0x154] sm:$0xf] }
 0x516   : > { %v7768_v26 = vpop.f32.mrf.mxu0  ;;  %7176 = vmatmul.bf16.gmra.mxu3 %v9419_v61  ;;  %v9463_v10 = vor.u32 %v10172_v4, %v9460_v51  ;;  %v9699_v61 = vor.u32 %v10233_v58, %v9698_v43  ;;  %v9712_v58 = vld [vmem:[#allocation3 + $0x12c] sm:$0xf0]  ;;  %v10235_v4 = vld [vmem:[#allocation3 + $0x124] sm:$0xf] }
 0x517   : > { %v15290_v37 = vadd.f32 %v7857_v55, %v7768_v26  ;;  %v7051_v26 = vadd.f32 %v15223_v57, %v14959_v19 }
 0x519   : > { %v7860_v59 = vpop.f32.mrf.mxu1  ;;  %v15299_v25 = vpop.f32.mrf.mxu2 }
 0x51a   : > { %v7137_v21 = vpop.f32.mrf.mxu3 }
 0x51b   : > { %v7138_v55 = vadd.f32 %v7137_v21, %v7049_v5  ;;  %v9431_v5 = vor.u32 %v10165_v20, %v9430_v49  ;;  %v16498_v21 = vld [vmem:[#allocation44_spill] sm:$0xff] }
 0x51c   : > { %7899 = vmatmul.bf16.gmra.mxu1 %v9703_v56  ;;  %v5577_v19 = vadd.f32 %v15142_v23, %v16498_v21  ;;  %v9710_v49 = vld [vmem:[#allocation3 + $0x120] sm:$0xf] }
 0x51d   : > { %v15307_v40 = vadd.f32 %v7138_v55, %v15178_v17 }
 0x51e   : > { %v7771_v35 = vpop.f32.mrf.mxu0  ;;  %7107 = vmatmul.bf16.gmra.mxu2 %v9463_v10  ;;  %v9472_v10 = vld [vmem:[#allocation3 + $0x174] sm:$0xf0]  ;;  %v15330_v43 = vadd.f32 %v15091_v36, %v5577_v19  ;;  %v10168_v36 = vld [vmem:[#allocation3 + $0x130] sm:$0xf0]  ;;  %v9442_v19 = vld [vmem:[#allocation3 + $0x128] sm:$0xf] }
 0x51f   : > { %v15304_v30 = vadd.f32 %v7860_v59, %v7771_v35  ;;  %v15316_v59 = vadd.f32 %v15084_v24, %v5574_v2  ;;  %v7054_v24 = vadd.f32 %v15235_v39, %v14982_v8  ;;  %v9715_v35 = vor.u32 %v10235_v4, %v9712_v58  ;;  %v16499_v39 = vld [vmem:[#allocation31_spill] sm:$0xff] }
 0x520   : > { %v7056_v58 = vadd.f32 %v15247_v62, %v15008_v48  ;;  %v5582_v48 = vadd.f32 %v15142_v23, %v14028_v3  ;;  %v10238_v62 = vld [vmem:[#allocation3 + $0x13c] sm:$0xf]  ;;  %v9722_v3 = vld [vmem:[#allocation3 + $0x138] sm:$0xf] }
 0x521   : > { %7810 = vmatmul.bf16.gmra.mxu0 %v9699_v61  ;;  %v7862_v7 = vpop.f32.mrf.mxu1  ;;  %v15313_v54 = vpop.f32.mrf.mxu2  ;;  %v10236_v61 = vld [vmem:[#allocation3 + $0x128] sm:$0xf0] }
 0x522   : > { %v7139_v18 = vpop.f32.mrf.mxu3 }
 0x523   : > { %v7140_v17 = vadd.f32 %v7139_v18, %v7051_v26 }
 0x525   : > { %v15321_v44 = vadd.f32 %v7140_v17, %v15190_v13  ;;  %v10175_v13 = vld [vmem:[#allocation3 + $0x16c] sm:$0xf]  ;;  %v5579_v17 = vadd.f32 %v15142_v23, %v16499_v39 }
 0x526   : > { %v7773_v51 = vpop.f32.mrf.mxu0  ;;  %7181 = vmatmul.bf16.gmra.mxu3 %v9431_v5  ;;  %v9711_v5 = vor.u32 %v10236_v61, %v9710_v49 }
 0x527   : > { %v15318_v56 = vadd.f32 %v7862_v7, %v7773_v51  ;;  %v9475_v7 = vor.u32 %v10175_v13, %v9472_v10  ;;  %v7059_v13 = vadd.f32 %v15259_v15, %v15015_v28  ;;  %v10171_v15 = vld [vmem:[#allocation3 + $0x148] sm:$0xf0] }
 0x529   : > { %v7865_v57 = vpop.f32.mrf.mxu1  ;;  %v15327_v55 = vpop.f32.mrf.mxu2 }
 0x52a   : > { %v7142_v2 = vpop.f32.mrf.mxu3 }
 0x52b   : > { %v7143_v20 = vadd.f32 %v7142_v2, %v7054_v24  ;;  %v9443_v24 = vor.u32 %v10168_v36, %v9442_v19  ;;  %v9724_v2 = vld [vmem:[#allocation3 + $0x144] sm:$0xf0] }
 0x52c   : > { %7904 = vmatmul.bf16.gmra.mxu1 %v9715_v35 }
 0x52d   : > { %v15335_v8 = vadd.f32 %v7143_v20, %v15202_v0  ;;  %v9484_v20 = vld [vmem:[#allocation3 + $0x18c] sm:$0xf0] }
 0x52e   : > { %v7776_v26 = vpop.f32.mrf.mxu0  ;;  %7112 = vmatmul.bf16.gmra.mxu2 %v9475_v7  ;;  %v9727_v7 = vor.u32 %v10238_v62, %v9724_v2 }
 0x52f   : > { %v15332_v18 = vadd.f32 %v7865_v57, %v7776_v26  ;;  %v15344_v57 = vadd.f32 %v15098_v27, %v5579_v17  ;;  %v15358_v26 = vadd.f32 %v15105_v42, %v5582_v48  ;;  %v5584_v42 = vadd.f32 %v15142_v23, %v14078_v50 }
 0x531   : > { %7815 = vmatmul.bf16.gmra.mxu0 %v9711_v5  ;;  %v7867_v51 = vpop.f32.mrf.mxu1  ;;  %v15341_v21 = vpop.f32.mrf.mxu2  ;;  %v10239_v5 = vld [vmem:[#allocation3 + $0x140] sm:$0xf0] }
 0x532   : > { %v7144_v4 = vpop.f32.mrf.mxu3  ;;  %v9723_v19 = vor.u32 %v10239_v5, %v9722_v3  ;;  %v10207_v5 = vld [vmem:[#allocation3 + $0x40] sm:$0xf0] }
 0x533   : > { %v7145_v0 = vadd.f32 %v7144_v4, %v7056_v58  ;;  %v7061_v4 = vadd.f32 %v15271_v29, %v15023_v32  ;;  %v5587_v32 = vadd.f32 %v15142_v23, %v14105_v53  ;;  %v10241_v29 = vld [vmem:[#allocation3 + $0x154] sm:$0xf] }
 0x535   : > { %v15349_v61 = vadd.f32 %v7145_v0, %v15214_v14  ;;  %v10178_v14 = vld [vmem:[#allocation3 + $0x184] sm:$0xf]  ;;  %v9454_v0 = vld [vmem:[#allocation3 + $0x140] sm:$0xf] }
 0x536   : > { %v7778_v10 = vpop.f32.mrf.mxu0  ;;  %7186 = vmatmul.bf16.gmra.mxu3 %v9443_v24  ;;  %v9487_v36 = vor.u32 %v10178_v14, %v9484_v20  ;;  %v9455_v48 = vor.u32 %v10171_v15, %v9454_v0  ;;  %v15386_v14 = vadd.f32 %v15119_v16, %v5587_v32  ;;  %v10174_v15 = vld [vmem:[#allocation3 + $0x160] sm:$0xf0]  ;;  %v7066_v16 = vadd.f32 %v15299_v25, %v15053_v31  ;;  %v9466_v0 = vld [vmem:[#allocation3 + $0x158] sm:$0xf] }
 0x537   : > { %v15346_v35 = vadd.f32 %v7867_v51, %v7778_v10  ;;  %v15372_v10 = vadd.f32 %v15112_v63, %v5584_v42  ;;  %v7064_v63 = vadd.f32 %v15285_v12, %v15046_v11  ;;  %v16500_v11 = vld [vmem:[#allocation74_spill] sm:$0xff]  ;;  %v7069_v31 = vadd.f32 %v15313_v54, %v15060_v33 }
 0x538   : > { %v5589_v12 = vadd.f32 %v15142_v23, %v16500_v11  ;;  %v16503_v33 = vld [vmem:[#allocation46_spill] sm:$0xff]  ;;  %v10177_v11 = vld [vmem:[#allocation3 + $0x178] sm:$0xf0] }
 0x539   : > { %v15355_v27 = vpop.f32.mrf.mxu2  ;;  %v7870_v49 = vpop.f32.mrf.mxu1  ;;  %v5594_v54 = vadd.f32 %v15142_v23, %v16503_v33 }
 0x53a   : > { %v7147_v39 = vpop.f32.mrf.mxu3 }
 0x53b   : > { %v7148_v17 = vadd.f32 %v7147_v39, %v7059_v13 }
 0x53c   : > { %7909 = vmatmul.bf16.gmra.mxu1 %v9727_v7  ;;  %v9736_v7 = vld [vmem:[#allocation3 + $0x15c] sm:$0xf0] }
 0x53d   : > { %v15363_v28 = vadd.f32 %v7148_v17, %v15226_v6  ;;  %v9739_v39 = vor.u32 %v10241_v29, %v9736_v7  ;;  %v10242_v17 = vld [vmem:[#allocation3 + $0x158] sm:$0xf0]  ;;  %v16501_v7 = vld [vmem:[#allocation82_spill] sm:$0xff]  ;;  %v10244_v29 = vld [vmem:[#allocation3 + $0x16c] sm:$0xf] }
 0x53e   : > { %v7781_v51 = vpop.f32.mrf.mxu0  ;;  %7117 = vmatmul.bf16.gmra.mxu2 %v9487_v36  ;;  %v5592_v32 = vadd.f32 %v15142_v23, %v16501_v7 }
 0x53f   : > { %v15360_v58 = vadd.f32 %v7870_v49, %v7781_v51  ;;  %v9598_v51 = vld [vmem:[#allocation3 + $0x38] sm:$0xf] }
 0x540   : > { %v9599_v3 = vor.u32 %v10207_v5, %v9598_v51  ;;  %v16502_v5 = vld [vmem:[#allocation42_spill] sm:$0xff] }
 0x541   : > { %7820 = vmatmul.bf16.gmra.mxu0 %v9723_v19  ;;  %v15369_v24 = vpop.f32.mrf.mxu2  ;;  %v7872_v6 = vpop.f32.mrf.mxu1  ;;  %v9734_v19 = vld [vmem:[#allocation3 + $0x150] sm:$0xf] }
 0x542   : > { %v7149_v2 = vpop.f32.mrf.mxu3  ;;  %v9735_v42 = vor.u32 %v10242_v17, %v9734_v19  ;;  %v10245_v17 = vld [vmem:[#allocation3 + $0x170] sm:$0xf0]  ;;  %v9610_v51 = vld [vmem:[#allocation3 + $0x50] sm:$0xf] }
 0x543   : > { %v7150_v62 = vadd.f32 %v7149_v2, %v7061_v4  ;;  %v15398_v2 = vadd.f32 %v15126_v41, %v5589_v12  ;;  %v16504_v12 = vld [vmem:[#allocation25_spill] sm:$0xff] }
 0x545   : > { %v15377_v50 = vadd.f32 %v7150_v62, %v15238_v9  ;;  %v9467_v62 = vor.u32 %v10174_v15, %v9466_v0  ;;  %v7071_v15 = vadd.f32 %v15327_v55, %v16504_v12  ;;  %v9478_v0 = vld [vmem:[#allocation3 + $0x170] sm:$0xf] }
 0x546   : > { %v7783_v13 = vpop.f32.mrf.mxu0  ;;  %7191 = vmatmul.bf16.gmra.mxu3 %v9455_v48 }
 0x547   : > { %v15374_v20 = vadd.f32 %v7872_v6, %v7783_v13  ;;  %v9748_v13 = vld [vmem:[#allocation3 + $0x174] sm:$0xf0] }
 0x548   : > { %v9751_v41 = vor.u32 %v10244_v29, %v9748_v13  ;;  %v9479_v13 = vor.u32 %v10177_v11, %v9478_v0  ;;  %v16506_v29 = vld [vmem:[#allocation34_spill] sm:$0xff]  ;;  %v9490_v0 = vld [vmem:[#allocation3 + $0x188] sm:$0xf] }
 0x549   : > { %v15383_v49 = vpop.f32.mrf.mxu2 }
 0x54a   : > { %v7152_v36 = vpop.f32.mrf.mxu3 }
 0x54b   : > { %v7153_v9 = vadd.f32 %v7152_v36, %v7064_v63  ;;  %v10210_v63 = vld [vmem:[#allocation3 + $0x58] sm:$0xf0] }
 0x54c   : > { %7914 = vmatmul.bf16.gmra.mxu1 %v9739_v39  ;;  %v15410_v39 = vadd.f32 %v16502_v5, %v5592_v32  ;;  %v9760_v32 = vld [vmem:[#allocation3 + $0x18c] sm:$0xf0] }
 0x54d   : > { %v15389_v53 = vadd.f32 %v7153_v9, %v15250_v34  ;;  %v9611_v9 = vor.u32 %v10210_v63, %v9610_v51  ;;  %v10247_v63 = vld [vmem:[#allocation3 + $0x184] sm:$0xf] }
 0x54e   : > { %7943 = vmatmul.bf16.vlgmr.msra.gmra.mxu2 %v9599_v3  ;;  %v9746_v3 = vld [vmem:[#allocation3 + $0x168] sm:$0xf] }
 0x54f   : > { %v9747_v19 = vor.u32 %v10245_v17, %v9746_v3  ;;  %v10213_v17 = vld [vmem:[#allocation3 + $0x70] sm:$0xf0]  ;;  %v16508_v51 = vld [vmem:[#allocation52_spill] sm:$0xff] }
 0x551   : > { %7825 = vmatmul.bf16.gmra.mxu0 %v9735_v42  ;;  %v15395_v4 = vpop.f32.mrf.mxu2 }
 0x552   : > { %v7154_v48 = vpop.f32.mrf.mxu3 }
 0x553   : > { %v7155_v6 = vadd.f32 %v7154_v48, %v7066_v16  ;;  %v16505_v48 = vld [vmem:[#allocation48_spill] sm:$0xff] }
 0x555   : > { %v15401_v34 = vadd.f32 %v7155_v6, %v15262_v22 }
 0x556   : > { %7196 = vmatmul.bf16.gmra.mxu3 %v9467_v62  ;;  %v15422_v62 = vadd.f32 %v16505_v48, %v5594_v54  ;;  %v9758_v54 = vld [vmem:[#allocation3 + $0x180] sm:$0xf]  ;;  %v10180_v48 = vld [vmem:[#allocation3 + $0x190] sm:$0xf0] }
 0x559   : > { %v15407_v25 = vpop.f32.mrf.mxu2 }
 0x55a   : > { %v7157_v36 = vpop.f32.mrf.mxu3 }
 0x55b   : > { %v7158_v22 = vadd.f32 %v7157_v36, %v7069_v31  ;;  %v5597_v31 = vadd.f32 %v15142_v23, %v16506_v29  ;;  %v9763_v36 = vor.u32 %v10247_v63, %v9760_v32  ;;  %v16511_v32 = vld [vmem:[#allocation49_spill] sm:$0xff]  ;;  %v9491_v63 = vor.u32 %v10180_v48, %v9490_v0  ;;  %v9634_v0 = vld [vmem:[#allocation3 + $0x80] sm:$0xf] }
 0x55c   : > { %7919 = vmatmul.bf16.gmra.mxu1 %v9751_v41  ;;  %v16507_v41 = vld [vmem:[#allocation24_spill] sm:$0xff] }
 0x55d   : > { %v15413_v42 = vadd.f32 %v7158_v22, %v15274_v60  ;;  %v7074_v55 = vadd.f32 %v15341_v21, %v16507_v41  ;;  %v15434_v22 = vadd.f32 %v16508_v51, %v5597_v31  ;;  %v16509_v21 = vld [vmem:[#allocation33_spill] sm:$0xff] }
 0x55e   : > { %7948 = vmatmul.bf16.gmra.mxu2 %v9611_v9  ;;  %v10248_v9 = vld [vmem:[#allocation3 + $0x188] sm:$0xf0] }
 0x55f   : > { %v9759_v11 = vor.u32 %v10248_v9, %v9758_v54 }
 0x561   : > { %7830 = vmatmul.bf16.gmra.mxu0 %v9747_v19  ;;  %v15419_v16 = vpop.f32.mrf.mxu2  ;;  %v9622_v19 = vld [vmem:[#allocation3 + $0x68] sm:$0xf] }
 0x562   : > { %v7159_v6 = vpop.f32.mrf.mxu3  ;;  %v9623_v33 = vor.u32 %v10213_v17, %v9622_v19 }
 0x563   : > { %v7160_v7 = vadd.f32 %v7159_v6, %v7071_v15  ;;  %v5599_v15 = vadd.f32 %v15142_v23, %v16509_v21  ;;  %v16510_v6 = vld [vmem:[#allocation29_spill] sm:$0xff]  ;;  %v10251_v21 = vld [vmem:[#allocation3 + $0x1a0] sm:$0xf0] }
 0x565   : > { %v15425_v60 = vadd.f32 %v7160_v7, %v15288_v45  ;;  %v15446_v29 = vadd.f32 %v16511_v32, %v5599_v15  ;;  %v16515_v32 = vld [vmem:[#allocation45_spill] sm:$0xff] }
 0x566   : > { %7201 = vmatmul.bf16.gmra.mxu3 %v9479_v13  ;;  %v7076_v13 = vadd.f32 %v15355_v27, %v16510_v6 }
 0x569   : > { %v15431_v5 = vpop.f32.mrf.mxu2 }
 0x56a   : > { %v7162_v3 = vpop.f32.mrf.mxu3 }
 0x56b   : > { %v7163_v45 = vadd.f32 %v7162_v3, %v7074_v55  ;;  %v9772_v55 = vld [vmem:[#allocation3 + $0x1a4] sm:$0xf0] }
 0x56c   : > { %7924 = vmatmul.bf16.gmra.mxu1 %v9763_v36  ;;  %v16512_v36 = vld [vmem:[#allocation83_spill] sm:$0xff]  ;;  %v16513_v3 = vld [vmem:[#allocation28_spill] sm:$0xff] }
 0x56d   : > { %v15437_v12 = vadd.f32 %v7163_v45, %v15302_v38  ;;  %v10250_v38 = vld [vmem:[#allocation3 + $0x19c] sm:$0xf]  ;;  %v5602_v51 = vadd.f32 %v15142_v23, %v16512_v36  ;;  %v7079_v27 = vadd.f32 %v15369_v24, %v16513_v3  ;;  %v10216_v45 = vld [vmem:[#allocation3 + $0x88] sm:$0xf0]  ;;  %v5604_v24 = vadd.f32 %v15142_v23, %v16515_v32 }
 0x56e   : > { %7953 = vmatmul.bf16.gmra.mxu2 %v9623_v33  ;;  %v9775_v9 = vor.u32 %v10250_v38, %v9772_v55  ;;  %v16514_v33 = vld [vmem:[#allocation56_spill] sm:$0xff]  ;;  %v9635_v48 = vor.u32 %v10216_v45, %v9634_v0  ;;  %v16517_v38 = vld [vmem:[#allocation71_spill] sm:$0xff]  ;;  %v16521_v32 = vld [vmem:[#allocation37_spill] sm:$0xff] }
 0x56f   : > { %v15458_v54 = vadd.f32 %v16514_v33, %v5602_v51  ;;  %v15468_v55 = vadd.f32 %v16517_v38, %v5604_v24  ;;  %v16518_v3 = vld [vmem:[#allocation43_spill] sm:$0xff]  ;;  %v7086_v24 = vadd.f32 %v15407_v25, %v16521_v32 }
 0x570   : > { %v16527_v32 = vld [vmem:[#allocation39_spill] sm:$0xff] }
 0x571   : > { %7835 = vmatmul.bf16.gmra.mxu0 %v9759_v11  ;;  %v15443_v7 = vpop.f32.mrf.mxu2  ;;  %v9770_v11 = vld [vmem:[#allocation3 + $0x198] sm:$0xf] }
 0x572   : > { %v7164_v31 = vpop.f32.mrf.mxu3  ;;  %v9771_v6 = vor.u32 %v10251_v21, %v9770_v11  ;;  %v10219_v11 = vld [vmem:[#allocation3 + $0xa0] sm:$0xf0] }
 0x573   : > { %v7165_v41 = vadd.f32 %v7164_v31, %v7076_v13  ;;  %v16516_v31 = vld [vmem:[#allocation30_spill] sm:$0xff] }
 0x575   : > { %v15449_v17 = vadd.f32 %v7165_v41, %v15316_v59 }
 0x576   : > { %7206 = vmatmul.bf16.gmra.mxu3 %v9491_v63  ;;  %v7081_v63 = vadd.f32 %v15383_v49, %v16516_v31  ;;  %v16522_v31 = vld [vmem:[#allocation55_spill] sm:$0xff] }
 0x579   : > { %v15455_v19 = vpop.f32.mrf.mxu2 }
 0x57a   : > { %v7167_v15 = vpop.f32.mrf.mxu3 }
 0x57b   : > { %v7168_v59 = vadd.f32 %v7167_v15, %v7079_v27  ;;  %v16519_v27 = vld [vmem:[#allocation21_spill] sm:$0xff]  ;;  %v9646_v15 = vld [vmem:[#allocation3 + $0x98] sm:$0xf] }
 0x57c   : > { %7929 = vmatmul.bf16.gmra.mxu1 %v9775_v9  ;;  %v7084_v45 = vadd.f32 %v15395_v4, %v16519_v27 }
 0x57d   : > { %v15461_v13 = vadd.f32 %v7168_v59, %v15330_v43  ;;  %v5607_v43 = vadd.f32 %v15142_v23, %v16518_v3  ;;  %v9647_v59 = vor.u32 %v10219_v11, %v9646_v15  ;;  %v16524_v3 = vld [vmem:[#allocation36_spill] sm:$0xff]  ;;  %v9658_v15 = vld [vmem:[#allocation3 + $0xb0] sm:$0xf] }
 0x57e   : > { %7958 = vmatmul.bf16.gmra.mxu2 %v9635_v48  ;;  %v16525_v11 = vld [vmem:[#allocation72_spill] sm:$0xff] }
 0x57f   : > { %v15478_v21 = vadd.f32 %v15205_v46, %v5607_v43  ;;  %v7089_v43 = vadd.f32 %v15419_v16, %v16524_v3  ;;  %v16529_v3 = vld [vmem:[#allocation22_spill] sm:$0xff] }
 0x581   : > { %7840 = vmatmul.bf16.gmra.mxu0 %v9771_v6  ;;  %v7098_v41 = vpop.f32.mrf.mxu2 }
 0x582   : > { %v7169_v36 = vpop.f32.mrf.mxu3 }
 0x583   : > { %v7170_v51 = vadd.f32 %v7169_v36, %v7081_v63 }
 0x585   : > { %v15471_v9 = vadd.f32 %v7170_v51, %v15344_v57  ;;  %v16520_v57 = vld [vmem:[#allocation18_spill] sm:$0xff] }
 0x586   : > { %v5609_v6 = vadd.f32 %v15142_v23, %v16520_v57  ;;  %v16523_v51 = vld [vmem:[#allocation50_spill] sm:$0xff] }
 0x588   : > { %v15488_v63 = vadd.f32 %v16522_v31, %v5609_v6  ;;  %v16528_v31 = vld [vmem:[#allocation53_spill] sm:$0xff] }
 0x589   : > { %v7100_v33 = vpop.f32.mrf.mxu2 }
 0x58a   : > { %v7172_v49 = vpop.f32.mrf.mxu3 }
 0x58b   : > { %v7173_v0 = vadd.f32 %v7172_v49, %v7084_v45  ;;  %v10222_v45 = vld [vmem:[#allocation3 + $0xb8] sm:$0xf0] }
 0x58d   : > { %v15481_v48 = vadd.f32 %v7173_v0, %v15358_v26  ;;  %v5612_v26 = vadd.f32 %v15142_v23, %v16523_v51 }
 0x58e   : > { %7963 = vmatmul.bf16.gmra.mxu2 %v9647_v59  ;;  %v9659_v59 = vor.u32 %v10222_v45, %v9658_v15  ;;  %v16531_v15 = vld [vmem:[#allocation67_spill] sm:$0xff] }
 0x58f   : > { %v15498_v49 = vadd.f32 %v16525_v11, %v5612_v26 }
 0x591   : > { %v7103_v4 = vpop.f32.mrf.mxu2 }
 0x592   : > { %v7174_v46 = vpop.f32.mrf.mxu3 }
 0x593   : > { %v7175_v38 = vadd.f32 %v7174_v46, %v7086_v24  ;;  %v7091_v24 = vadd.f32 %v15431_v5, %v16527_v32 }
 0x595   : > { %v15491_v36 = vadd.f32 %v7175_v38, %v15372_v10  ;;  %v16526_v10 = vld [vmem:[#allocation35_spill] sm:$0xff] }
 0x596   : > { %v5614_v6 = vadd.f32 %v15142_v23, %v16526_v10 }
 0x598   : > { %v15508_v46 = vadd.f32 %v16528_v31, %v5614_v6  ;;  %v16533_v31 = vld [vmem:[#allocation41_spill] sm:$0xff] }
 0x599   : > { %v7105_v27 = vpop.f32.mrf.mxu2 }
 0x59a   : > { %v7177_v25 = vpop.f32.mrf.mxu3 }
 0x59b   : > { %v7178_v0 = vadd.f32 %v7177_v25, %v7089_v43  ;;  %v16530_v43 = vld [vmem:[#allocation38_spill] sm:$0xff] }
 0x59c   : > { %v7094_v45 = vadd.f32 %v15443_v7, %v16530_v43  ;;  %v10225_v25 = vld [vmem:[#allocation3 + $0xd0] sm:$0xf0] }
 0x59d   : > { %v15501_v57 = vadd.f32 %v7178_v0, %v15386_v14  ;;  %v5617_v14 = vadd.f32 %v15142_v23, %v16529_v3 }
 0x59e   : > { %7968 = vmatmul.bf16.gmra.mxu2 %v9659_v59  ;;  %v9670_v59 = vld [vmem:[#allocation3 + $0xc8] sm:$0xf] }
 0x59f   : > { %v15518_v0 = vadd.f32 %v16531_v15, %v5617_v14  ;;  %v9671_v6 = vor.u32 %v10225_v25, %v9670_v59 }
 0x5a1   : > { %v7108_v16 = vpop.f32.mrf.mxu2 }
 0x5a2   : > { %v7179_v38 = vpop.f32.mrf.mxu3 }
 0x5a3   : > { %v7180_v51 = vadd.f32 %v7179_v38, %v7091_v24  ;;  %v7096_v38 = vadd.f32 %v15455_v19, %v16533_v31 }
 0x5a5   : > { %v15511_v26 = vadd.f32 %v7180_v51, %v15398_v2  ;;  %v16532_v2 = vld [vmem:[#allocation77_spill] sm:$0xff]  ;;  %v16534_v51 = vld [vmem:[#allocation75_spill] sm:$0xff] }
 0x5a6   : > { %v5619_v24 = vadd.f32 %v15142_v23, %v16532_v2  ;;  %v16536_v2 = vld [vmem:[#allocation51_spill] sm:$0xff] }
 0x5a8   : > { %v15528_v3 = vadd.f32 %v16534_v51, %v5619_v24  ;;  %v7101_v24 = vadd.f32 %v7100_v33, %v16536_v2  ;;  %v16538_v33 = vld [vmem:[#allocation59_spill] sm:$0xff] }
 0x5a9   : > { %v7110_v11 = vpop.f32.mrf.mxu2 }
 0x5aa   : > { %v7182_v5 = vpop.f32.mrf.mxu3 }
 0x5ab   : > { %v7183_v10 = vadd.f32 %v7182_v5, %v7094_v45  ;;  %v16535_v45 = vld [vmem:[#allocation47_spill] sm:$0xff]  ;;  %v10228_v5 = vld [vmem:[#allocation3 + $0xe8] sm:$0xf0] }
 0x5ac   : > { %v7099_v25 = vadd.f32 %v7098_v41, %v16535_v45  ;;  %v16537_v41 = vld [vmem:[#allocation58_spill] sm:$0xff]  ;;  %v10231_v45 = vld [vmem:[#allocation3 + $0x100] sm:$0xf0] }
 0x5ad   : > { %v15521_v32 = vadd.f32 %v7183_v10, %v15410_v39  ;;  %v9682_v10 = vld [vmem:[#allocation3 + $0xe0] sm:$0xf] }
 0x5ae   : > { %7973 = vmatmul.bf16.gmra.mxu2 %v9671_v6  ;;  %v9683_v6 = vor.u32 %v10228_v5, %v9682_v10  ;;  %v9694_v5 = vld [vmem:[#allocation3 + $0xf8] sm:$0xf] }
 0x5b1   : > { %v7113_v7 = vpop.f32.mrf.mxu2 }
 0x5b2   : > { %v7184_v14 = vpop.f32.mrf.mxu3 }
 0x5b3   : > { %v7185_v43 = vadd.f32 %v7184_v14, %v7096_v38  ;;  %v7104_v14 = vadd.f32 %v7103_v4, %v16537_v41 }
 0x5b5   : > { %v15531_v15 = vadd.f32 %v7185_v43, %v15422_v62 }
 0x5b9   : > { %v15534_v39 = vpop.f32.mrf.mxu2 }
 0x5ba   : > { %v7187_v59 = vpop.f32.mrf.mxu3 }
 0x5bb   : > { %v7188_v23 = vadd.f32 %v7187_v59, %v7099_v25  ;;  %v9695_v59 = vor.u32 %v10231_v45, %v9694_v5  ;;  %v9706_v45 = vld [vmem:[#allocation3 + $0x110] sm:$0xf] }
 0x5bd   : > { %v15537_v19 = vadd.f32 %v7188_v23, %v15434_v22  ;;  %v7106_v23 = vadd.f32 %v7105_v27, %v16538_v33  ;;  %v10234_v27 = vld [vmem:[#allocation3 + $0x118] sm:$0xf0] }
 0x5be   : > { %7978 = vmatmul.bf16.gmra.mxu2 %v9683_v6 }
 0x5c1   : > { %v15540_v31 = vpop.f32.mrf.mxu2 }
 0x5c2   : > { %v7189_v38 = vpop.f32.mrf.mxu3 }
 0x5c3   : > { %v7190_v62 = vadd.f32 %v7189_v38, %v7101_v24 }
 0x5c5   : > { %v15543_v51 = vadd.f32 %v7190_v62, %v15446_v29 }
 0x5c9   : > { %v15546_v43 = vpop.f32.mrf.mxu2 }
 0x5ca   : > { %v7192_v25 = vpop.f32.mrf.mxu3 }
 0x5cb   : > { %v7193_v22 = vadd.f32 %v7192_v25, %v7104_v14 }
 0x5cd   : > { %v15549_v10 = vadd.f32 %v7193_v22, %v15458_v54  ;;  %v16539_v54 = vld [vmem:[#allocation70_spill] sm:$0xff]  ;;  %v15569_v22 = vpop.f32.mrf.mxu0 }
 0x5ce   : > { %7983 = vmatmul.bf16.gmra.mxu2 %v9695_v59  ;;  %v7109_v62 = vadd.f32 %v7108_v16, %v16539_v54  ;;  %v15571_v59 = vpop.f32.mrf.mxu1  ;;  %v16540_v16 = vld [vmem:[#allocation57_spill] sm:$0xff] }
 0x5cf   : > { %v7111_v33 = vadd.f32 %v7110_v11, %v16540_v16 }
 0x5d1   : > { %v7944_v6 = vpop.f32.mrf.mxu2 }
 0x5d2   : > { %v7945_v29 = vadd.f32 %v7944_v6, %v15276_v47  ;;  %v7194_v2 = vpop.f32.mrf.mxu3 }
 0x5d3   : > { %v7195_v24 = vadd.f32 %v7194_v2, %v7106_v23 }
 0x5d4   : > { %v8024_v4 = vadd.f32 %v7945_v29, %v15279_v52 }
 0x5d5   : > { %v15555_v38 = vadd.f32 %v7195_v24, %v15468_v55  ;;  %v9707_v55 = vor.u32 %v10234_v27, %v9706_v45  ;;  %v16541_v24 = vld [vmem:[#allocation73_spill] sm:$0xff]  ;;  %v16542_v45 = vld [vmem:[#allocation62_spill] sm:$0xff] }
 0x5d6   : > { %8056 = vst [vmem:[%s15559_s22] sm:$0xff] %v8024_v4  ;;  %v7114_v4 = vadd.f32 %v7113_v7, %v16541_v24  ;;  %v7877_v27 = vpop.f32.mrf.mxu1  ;;  %v7116_v7 = vadd.f32 %v15534_v39, %v16542_v45 }
 0x5d9   : > { %v7946_v41 = vpop.f32.mrf.mxu2 }
 0x5da   : > { %v7947_v14 = vadd.f32 %v7946_v41, %v15290_v37  ;;  %v7197_v47 = vpop.f32.mrf.mxu3 }
 0x5db   : > { %v7198_v25 = vadd.f32 %v7197_v47, %v7109_v62  ;;  %v10237_v62 = vld [vmem:[#allocation3 + $0x130] sm:$0xf0] }
 0x5dc   : > { %v8025_v52 = vadd.f32 %v7947_v14, %v15293_v1 }
 0x5dd   : > { %v15566_v5 = vadd.f32 %v7198_v25, %v15478_v21  ;;  %v15580_v21 = vpop.f32.mrf.mxu0 }
 0x5de   : > { %8057 = vst [vmem:[%s15559_s22 + $0x8] sm:$0xff] %v8025_v52  ;;  %7988 = vmatmul.bf16.gmra.mxu2 %v9707_v55 }
 0x5e1   : > { %v7949_v23 = vpop.f32.mrf.mxu2 }
 0x5e2   : > { %v7950_v37 = vadd.f32 %v7949_v23, %v15304_v30  ;;  %v7199_v6 = vpop.f32.mrf.mxu3  ;;  %v9718_v30 = vld [vmem:[#allocation3 + $0x128] sm:$0xf]  ;;  %v7880_v23 = vpop.f32.mrf.mxu1 }
 0x5e3   : > { %v7200_v29 = vadd.f32 %v7199_v6, %v7111_v33 }
 0x5e4   : > { %v8026_v1 = vadd.f32 %v7950_v37, %v15307_v40  ;;  %v9719_v40 = vor.u32 %v10237_v62, %v9718_v30 }
 0x5e5   : > { %v15577_v2 = vadd.f32 %v7200_v29, %v15488_v63  ;;  %v7791_v55 = vpop.f32.mrf.mxu0  ;;  %v10240_v29 = vld [vmem:[#allocation3 + $0x148] sm:$0xf0] }
 0x5e6   : > { %8058 = vst [vmem:[%s15559_s22 + $0x10] sm:$0xff] %v8026_v1 }
 0x5e9   : > { %v7951_v54 = vpop.f32.mrf.mxu2 }
 0x5ea   : > { %v7952_v11 = vadd.f32 %v7951_v54, %v15318_v56  ;;  %v7202_v41 = vpop.f32.mrf.mxu3 }
 0x5eb   : > { %v7203_v14 = vadd.f32 %v7202_v41, %v7114_v4 }
 0x5ec   : > { %v8027_v47 = vadd.f32 %v7952_v11, %v15321_v44  ;;  %v16544_v11 = vld [vmem:[#allocation23_spill] sm:$0xff] }
 0x5ed   : > { %v15586_v63 = vadd.f32 %v7203_v14, %v15498_v49  ;;  %v16543_v49 = vld [vmem:[#allocation64_spill] sm:$0xff] }
 0x5ee   : > { %8059 = vst [vmem:[%s15559_s22 + $0x18] sm:$0xff] %v8027_v47  ;;  %7993 = vmatmul.bf16.gmra.mxu2 %v9719_v40  ;;  %v7119_v37 = vadd.f32 %v15540_v31, %v16543_v49  ;;  %v7121_v31 = vadd.f32 %v15546_v43, %v16544_v11  ;;  %v9742_v43 = vld [vmem:[#allocation3 + $0x158] sm:$0xf] }
 0x5f1   : > { %v7954_v25 = vpop.f32.mrf.mxu2 }
 0x5f2   : > { %v7955_v52 = vadd.f32 %v7954_v25, %v15332_v18  ;;  %v7204_v56 = vpop.f32.mrf.mxu3  ;;  %v9730_v18 = vld [vmem:[#allocation3 + $0x140] sm:$0xf] }
 0x5f3   : > { %v7205_v16 = vadd.f32 %v7204_v56, %v7116_v7  ;;  %v9731_v54 = vor.u32 %v10240_v29, %v9730_v18  ;;  %v10243_v7 = vld [vmem:[#allocation3 + $0x160] sm:$0xf0] }
 0x5f4   : > { %v8028_v33 = vadd.f32 %v7955_v52, %v15335_v8  ;;  %v7793_v8 = vpop.f32.mrf.mxu0  ;;  %v9743_v56 = vor.u32 %v10243_v7, %v9742_v43  ;;  %v9778_v7 = vld [vmem:[#allocation3 + $0x1a0] sm:$0xf] }
 0x5f5   : > { %v15594_v44 = vadd.f32 %v7205_v16, %v15508_v46  ;;  %v7882_v46 = vpop.f32.mrf.mxu1 }
 0x5f6   : > { %8060 = vst [vmem:[%s15559_s22 + $0x20] sm:$0xff] %v8028_v33 }
 0x5f9   : > { %v7956_v6 = vpop.f32.mrf.mxu2 }
 0x5fa   : > { %v7957_v39 = vadd.f32 %v7956_v6, %v15346_v35  ;;  %v7207_v1 = vpop.f32.mrf.mxu3  ;;  %v10246_v6 = vld [vmem:[#allocation3 + $0x178] sm:$0xf0] }
 0x5fb   : > { %v7208_v24 = vadd.f32 %v7207_v1, %v7119_v37  ;;  %v7878_v37 = vadd.f32 %v7877_v27, %v15580_v21  ;;  %v7883_v27 = vadd.f32 %v7882_v46, %v7793_v8  ;;  %v10252_v8 = vld [vmem:[#allocation3 + $0x1a8] sm:$0xf0] }
 0x5fc   : > { %v8029_v4 = vadd.f32 %v7957_v39, %v15349_v61  ;;  %v9754_v39 = vld [vmem:[#allocation3 + $0x170] sm:$0xf] }
 0x5fd   : > { %v15602_v62 = vadd.f32 %v7208_v24, %v15518_v0  ;;  %v7796_v0 = vpop.f32.mrf.mxu0  ;;  %v7885_v40 = vpop.f32.mrf.mxu1  ;;  %v9755_v18 = vor.u32 %v10246_v6, %v9754_v39 }
 0x5fe   : > { %8061 = vst [vmem:[%s15559_s22 + $0x28] sm:$0xff] %v8029_v4  ;;  %7998 = vmatmul.bf16.gmra.mxu2 %v9731_v54 }
 0x601   : > { %v7959_v41 = vpop.f32.mrf.mxu2 }
 0x602   : > { %v7960_v35 = vadd.f32 %v7959_v41, %v15360_v58  ;;  %v7209_v30 = vpop.f32.mrf.mxu3  ;;  %v7876_v58 = vadd.f32 %v15571_v59, %v15569_v22  ;;  %v7881_v59 = vadd.f32 %v7880_v23, %v7791_v55  ;;  %v10249_v41 = vld [vmem:[#allocation3 + $0x190] sm:$0xf0]  ;;  %v7886_v55 = vadd.f32 %v7885_v40, %v7796_v0 }
 0x603   : > { %v7210_v14 = vadd.f32 %v7209_v30, %v7121_v31  ;;  %v9766_v31 = vld [vmem:[#allocation3 + $0x188] sm:$0xf] }
 0x604   : > { %v8030_v47 = vadd.f32 %v7960_v35, %v15363_v28  ;;  %v9767_v30 = vor.u32 %v10249_v41, %v9766_v31 }
 0x605   : > { %v15610_v61 = vadd.f32 %v7210_v14, %v15528_v3  ;;  %v7798_v28 = vpop.f32.mrf.mxu0  ;;  %v7887_v33 = vpop.f32.mrf.mxu1 }
 0x606   : > { %8062 = vst [vmem:[%s15559_s22 + $0x30] sm:$0xff] %v8030_v47  ;;  %v7888_v46 = vadd.f32 %v7887_v33, %v7798_v28 }
 0x609   : > { %v7961_v45 = vpop.f32.mrf.mxu2 }
 0x60a   : > { %v7962_v25 = vadd.f32 %v7961_v45, %v15374_v20 }
 0x60c   : > { %v8031_v52 = vadd.f32 %v7962_v25, %v15377_v50 }
 0x60d   : > { %v7801_v29 = vpop.f32.mrf.mxu0  ;;  %v7890_v22 = vpop.f32.mrf.mxu1 }
 0x60e   : > { %8063 = vst [vmem:[%s15559_s22 + $0x38] sm:$0xff] %v8031_v52  ;;  %8003 = vmatmul.bf16.gmra.mxu2 %v9743_v56  ;;  %v7891_v0 = vadd.f32 %v7890_v22, %v7801_v29 }
 0x611   : > { %v7964_v3 = vpop.f32.mrf.mxu2 }
 0x612   : > { %v7965_v16 = vadd.f32 %v7964_v3, %v7876_v58 }
 0x614   : > { %v8032_v49 = vadd.f32 %v7965_v16, %v15389_v53 }
 0x615   : > { %v7803_v54 = vpop.f32.mrf.mxu0  ;;  %v7892_v21 = vpop.f32.mrf.mxu1 }
 0x616   : > { %8064 = vst [vmem:[%s15559_s22 + $0x40] sm:$0xff] %v8032_v49  ;;  %v7893_v28 = vadd.f32 %v7892_v21, %v7803_v54 }
 0x619   : > { %v7966_v20 = vpop.f32.mrf.mxu2 }
 0x61a   : > { %v7967_v50 = vadd.f32 %v7966_v20, %v7878_v37 }
 0x61c   : > { %v8033_v1 = vadd.f32 %v7967_v50, %v15401_v34 }
 0x61d   : > { %v7806_v14 = vpop.f32.mrf.mxu0  ;;  %v7895_v23 = vpop.f32.mrf.mxu1 }
 0x61e   : > { %8065 = vst [vmem:[%s15559_s22 + $0x48] sm:$0xff] %v8033_v1  ;;  %8008 = vmatmul.bf16.gmra.mxu2 %v9755_v18  ;;  %v7896_v50 = vadd.f32 %v7895_v23, %v7806_v14 }
 0x621   : > { %v7969_v24 = vpop.f32.mrf.mxu2 }
 0x622   : > { %v7970_v4 = vadd.f32 %v7969_v24, %v7881_v59 }
 0x624   : > { %v8034_v53 = vadd.f32 %v7970_v4, %v15413_v42 }
 0x625   : > { %v7808_v25 = vpop.f32.mrf.mxu0  ;;  %v7897_v56 = vpop.f32.mrf.mxu1 }
 0x626   : > { %8066 = vst [vmem:[%s15559_s22 + $0x50] sm:$0xff] %v8034_v53 }
 0x629   : > { %v7971_v11 = vpop.f32.mrf.mxu2 }
 0x62a   : > { %v7972_v35 = vadd.f32 %v7971_v11, %v7883_v27 }
 0x62c   : > { %v8035_v34 = vadd.f32 %v7972_v35, %v15425_v60  ;;  %v9779_v60 = vor.u32 %v10252_v8, %v9778_v7 }
 0x62d   : > { %v7900_v49 = vpop.f32.mrf.mxu1 }
 0x62e   : > { %8067 = vst [vmem:[%s15559_s22 + $0x58] sm:$0xff] %v8035_v34  ;;  %8013 = vmatmul.bf16.gmra.mxu2 %v9767_v30 }
 0x631   : > { %v7974_v47 = vpop.f32.mrf.mxu2 }
 0x632   : > { %v7975_v42 = vadd.f32 %v7974_v47, %v7886_v55 }
 0x634   : > { %v8036_v45 = vadd.f32 %v7975_v42, %v15437_v12  ;;  %v7811_v12 = vpop.f32.mrf.mxu0 }
 0x636   : > { %8068 = vst [vmem:[%s15559_s22 + $0x60] sm:$0xff] %v8036_v45 }
 0x639   : > { %v7976_v43 = vpop.f32.mrf.mxu2 }
 0x63a   : > { %v7977_v52 = vadd.f32 %v7976_v43, %v7888_v46 }
 0x63c   : > { %v8037_v58 = vadd.f32 %v7977_v52, %v15449_v17  ;;  %v7813_v6 = vpop.f32.mrf.mxu0  ;;  %v7902_v17 = vpop.f32.mrf.mxu1 }
 0x63e   : > { %8069 = vst [vmem:[%s15559_s22 + $0x68] sm:$0xff] %v8037_v58  ;;  %8018 = vmatmul.bf16.gmra.mxu2 %v9779_v60 }
 0x641   : > { %v7979_v40 = vpop.f32.mrf.mxu2 }
 0x642   : > { %v7980_v3 = vadd.f32 %v7979_v40, %v7891_v0 }
 0x644   : > { %v8038_v16 = vadd.f32 %v7980_v3, %v15461_v13  ;;  %v7816_v18 = vpop.f32.mrf.mxu0  ;;  %v7898_v13 = vadd.f32 %v7897_v56, %v7808_v25  ;;  %v7905_v22 = vpop.f32.mrf.mxu1 }
 0x646   : > { %8070 = vst [vmem:[%s15559_s22 + $0x70] sm:$0xff] %v8038_v16 }
 0x649   : > { %v7981_v33 = vpop.f32.mrf.mxu2 }
 0x64a   : > { %v7982_v37 = vadd.f32 %v7981_v33, %v7893_v28 }
 0x64c   : > { %v8039_v20 = vadd.f32 %v7982_v37, %v15471_v9  ;;  %v7901_v9 = vadd.f32 %v7900_v49, %v7811_v12  ;;  %v7818_v53 = vpop.f32.mrf.mxu0  ;;  %v7907_v27 = vpop.f32.mrf.mxu1 }
 0x64e   : > { %8071 = vst [vmem:[%s15559_s22 + $0x78] sm:$0xff] %v8039_v20 }
 0x651   : > { %v7984_v39 = vpop.f32.mrf.mxu2 }
 0x652   : > { %v7985_v29 = vadd.f32 %v7984_v39, %v7896_v50 }
 0x654   : > { %v8040_v1 = vadd.f32 %v7985_v29, %v15481_v48  ;;  %v7903_v48 = vadd.f32 %v7902_v17, %v7813_v6  ;;  %v7821_v35 = vpop.f32.mrf.mxu0  ;;  %v7910_v30 = vpop.f32.mrf.mxu1 }
 0x656   : > { %8072 = vst [vmem:[%s15559_s22 + $0x80] sm:$0xff] %v8040_v1 }
 0x659   : > { %v7986_v59 = vpop.f32.mrf.mxu2 }
 0x65a   : > { %v7987_v24 = vadd.f32 %v7986_v59, %v7898_v13 }
 0x65c   : > { %v8041_v4 = vadd.f32 %v7987_v24, %v15491_v36  ;;  %v7906_v36 = vadd.f32 %v7905_v22, %v7816_v18  ;;  %v7823_v47 = vpop.f32.mrf.mxu0  ;;  %v7912_v42 = vpop.f32.mrf.mxu1 }
 0x65e   : > { %8073 = vst [vmem:[%s15559_s22 + $0x88] sm:$0xff] %v8041_v4 }
 0x661   : > { %v7989_v54 = vpop.f32.mrf.mxu2 }
 0x662   : > { %v7990_v21 = vadd.f32 %v7989_v54, %v7901_v9 }
 0x664   : > { %v8042_v11 = vadd.f32 %v7990_v21, %v15501_v57  ;;  %v7908_v57 = vadd.f32 %v7907_v27, %v7818_v53  ;;  %v7826_v46 = vpop.f32.mrf.mxu0  ;;  %v7915_v25 = vpop.f32.mrf.mxu1 }
 0x666   : > { %8074 = vst [vmem:[%s15559_s22 + $0x90] sm:$0xff] %v8042_v11 }
 0x669   : > { %v7991_v31 = vpop.f32.mrf.mxu2 }
 0x66a   : > { %v7992_v41 = vadd.f32 %v7991_v31, %v7903_v48 }
 0x66c   : > { %v8043_v34 = vadd.f32 %v7992_v41, %v15511_v26  ;;  %v7911_v26 = vadd.f32 %v7910_v30, %v7821_v35  ;;  %v7828_v56 = vpop.f32.mrf.mxu0  ;;  %v7917_v40 = vpop.f32.mrf.mxu1 }
 0x66e   : > { %8075 = vst [vmem:[%s15559_s22 + $0x98] sm:$0xff] %v8043_v34 }
 0x671   : > { %v7994_v14 = vpop.f32.mrf.mxu2 }
 0x672   : > { %v7995_v55 = vadd.f32 %v7994_v14, %v7906_v36 }
 0x674   : > { %v8044_v23 = vadd.f32 %v7995_v55, %v15521_v32  ;;  %v7913_v32 = vadd.f32 %v7912_v42, %v7823_v47  ;;  %v7831_v49 = vpop.f32.mrf.mxu0  ;;  %v7920_v33 = vpop.f32.mrf.mxu1 }
 0x676   : > { %8076 = vst [vmem:[%s15559_s22 + $0xa0] sm:$0xff] %v8044_v23 }
 0x679   : > { %v7996_v45 = vpop.f32.mrf.mxu2 }
 0x67a   : > { %v7997_v7 = vadd.f32 %v7996_v45, %v7908_v57 }
 0x67c   : > { %v8045_v8 = vadd.f32 %v7997_v7, %v15531_v15  ;;  %v7916_v15 = vadd.f32 %v7915_v25, %v7826_v46  ;;  %v7833_v17 = vpop.f32.mrf.mxu0  ;;  %v7922_v50 = vpop.f32.mrf.mxu1 }
 0x67e   : > { %8077 = vst [vmem:[%s15559_s22 + $0xa8] sm:$0xff] %v8045_v8 }
 0x681   : > { %v7999_v43 = vpop.f32.mrf.mxu2 }
 0x682   : > { %v8000_v52 = vadd.f32 %v7999_v43, %v7911_v26 }
 0x684   : > { %v8046_v60 = vadd.f32 %v8000_v52, %v15537_v19  ;;  %v7918_v19 = vadd.f32 %v7917_v40, %v7828_v56  ;;  %v7836_v18 = vpop.f32.mrf.mxu0  ;;  %v7925_v13 = vpop.f32.mrf.mxu1 }
 0x686   : > { %8078 = vst [vmem:[%s15559_s22 + $0xb0] sm:$0xff] %v8046_v60 }
 0x689   : > { %v8001_v58 = vpop.f32.mrf.mxu2 }
 0x68a   : > { %v8002_v0 = vadd.f32 %v8001_v58, %v7913_v32 }
 0x68c   : > { %v8047_v3 = vadd.f32 %v8002_v0, %v15543_v51  ;;  %v7921_v51 = vadd.f32 %v7920_v33, %v7831_v49  ;;  %v7838_v4 = vpop.f32.mrf.mxu0  ;;  %v7927_v54 = vpop.f32.mrf.mxu1 }
 0x68e   : > { %8079 = vst [vmem:[%s15559_s22 + $0xb8] sm:$0xff] %v8047_v3 }
 0x691   : > { %v8004_v12 = vpop.f32.mrf.mxu2 }
 0x692   : > { %v8005_v16 = vadd.f32 %v8004_v12, %v7916_v15 }
 0x694   : > { %v8048_v28 = vadd.f32 %v8005_v16, %v15549_v10  ;;  %v7923_v10 = vadd.f32 %v7922_v50, %v7833_v17  ;;  %v7841_v48 = vpop.f32.mrf.mxu0  ;;  %v7930_v31 = vpop.f32.mrf.mxu1 }
 0x696   : > { %8080 = vst [vmem:[%s15559_s22 + $0xc0] sm:$0xff] %v8048_v28 }
 0x699   : > { %v8006_v37 = vpop.f32.mrf.mxu2 }
 0x69a   : > { %v8007_v20 = vadd.f32 %v8006_v37, %v7918_v19 }
 0x69c   : > { %v8049_v6 = vadd.f32 %v8007_v20, %v15555_v38  ;;  %v7926_v38 = vadd.f32 %v7925_v13, %v7836_v18  ;;  %v7932_v36 = vpop.f32.mrf.mxu1 }
 0x69e   : > { %8081 = vst [vmem:[%s15559_s22 + $0xc8] sm:$0xff] %v8049_v6 }
 0x6a1   : > { %v8009_v39 = vpop.f32.mrf.mxu2 }
 0x6a2   : > { %v8010_v29 = vadd.f32 %v8009_v39, %v7921_v51 }
 0x6a4   : > { %v8050_v1 = vadd.f32 %v8010_v29, %v15566_v5  ;;  %v7928_v5 = vadd.f32 %v7927_v54, %v7838_v4 }
 0x6a6   : > { %8082 = vst [vmem:[%s15559_s22 + $0xd0] sm:$0xff] %v8050_v1 }
 0x6a9   : > { %v8011_v22 = vpop.f32.mrf.mxu2 }
 0x6aa   : > { %v8012_v59 = vadd.f32 %v8011_v22, %v7923_v10 }
 0x6ac   : > { %v8051_v24 = vadd.f32 %v8012_v59, %v15577_v2  ;;  %v7931_v2 = vadd.f32 %v7930_v31, %v7841_v48 }
 0x6ae   : > { %8083 = vst [vmem:[%s15559_s22 + $0xd8] sm:$0xff] %v8051_v24 }
 0x6b1   : > { %v8014_v9 = vpop.f32.mrf.mxu2 }
 0x6b2   : > { %v8015_v53 = vadd.f32 %v8014_v9, %v7926_v38 }
 0x6b4   : > { %v8052_v21 = vadd.f32 %v8015_v53, %v15586_v63  ;;  %v7843_v63 = vpop.f32.mrf.mxu0 }
 0x6b5   : > { %v7933_v14 = vadd.f32 %v7932_v36, %v7843_v63 }
 0x6b6   : > { %8084 = vst [vmem:[%s15559_s22 + $0xe0] sm:$0xff] %v8052_v21 }
 0x6b9   : > { %v8016_v27 = vpop.f32.mrf.mxu2 }
 0x6ba   : > { %v8017_v11 = vadd.f32 %v8016_v27, %v7928_v5 }
 0x6bc   : > { %v8053_v41 = vadd.f32 %v8017_v11, %v15594_v44 }
 0x6be   : > { %8085 = vst [vmem:[%s15559_s22 + $0xe8] sm:$0xff] %v8053_v41 }
 0x6c1   : > { %v8019_v35 = vpop.f32.mrf.mxu2 }
 0x6c2   : > { %v8020_v34 = vadd.f32 %v8019_v35, %v7931_v2 }
 0x6c4   : > { %v8054_v30 = vadd.f32 %v8020_v34, %v15602_v62 }
 0x6c6   : > { %8086 = vst [vmem:[%s15559_s22 + $0xf0] sm:$0xff] %v8054_v30 }
 0x6c9   : > { %v8021_v44 = vpop.f32.mrf.mxu2 }
 0x6ca   : > { %v8022_v55 = vadd.f32 %v8021_v44, %v7933_v14 }
 0x6cc   : > { %v8055_v23 = vadd.f32 %v8022_v55, %v15610_v61 }
 0x6ce   : > { %8087 = vst [vmem:[%s15559_s22 + $0xf8] sm:$0xff] %v8055_v23 }
 0x6cf   : > { %10874 = shalt.err (!%p10871_p11)
}
 0x6d0   : > { %s10932_s18 = smov 128   ;;  %s10933_s22 = smov 8  }
 0x6d1   : > { %10320 = dma.vmem_to_hbm [thread:$0]  (%p11068_p3), %s8102_s6, 4096, %s8104_s23, %s8089_s13, %s10932_s18, %s10932_s18, %s10933_s22  }
 0x6d2 PF: > { %s8118_s3 = sand.u32 1, %s10909_s30   ;;  %p16545_p12 = scmp.ge.s32.totalorder %s10921_s12, 2 }
 0x6d3   : > { %s8119_s27 = scalar_lea.sflag [#allocation6], %s8118_s3 }
 0x6d4   : > { %p10340_p13 = pnand %p16545_p12, %p11019_p6 }
 0x6d6   : > { %p10341_p0 = pneg %p10340_p13 }
 0x6d8   : > { %10904 = dma.done.wait (%p10341_p0), %s8119_s27, 4096  }
 0x6d9   : > { %10906 = vsyncadd (%p10341_p0), %s8119_s27, 4294963200  ;;  %p24_p5 = scmp.ge.s32.totalorder %s11058_s26, 4   ;;  %s16546_s30 = smov %s10913_s10 }
 0x6da   : > { %s16547_s10 = smov %s10917_s11  ;;  %s16548_s11 = smov %s11074_s17 }
 0x6db   : > { %s16549_s12 = smov %s11058_s26  ;;  %26 = sbr.rel (!%p24_p5) target bundleno = 11 (0xb), region = 121 }
 0x6e0   :  { %8125 = vsyncpa [#allocation5], 1 }
 0x6e1   :  { %8127 = vsyncpa [#allocation5 + $0x1], 1 }
 0x6e2   :  { %8128 = vsyncpa [#allocation8], 1 }
 0x6e3   :  { %8129 = vsyncpa [#allocation11], 1 }
 0x6e4   :  { %8130 = vsyncpa [#allocation6], 1 }
 0x6e5   :  { %8132 = vsyncpa [#allocation6 + $0x1], 1 }

</bundles_post_ra>
